<compile_context>
chip_gen: v7x
topology: tpu7x:2x2x1
jax: 0.10.0
libtpu: 0.0.40
codegen_flags: <defaults>
</compile_context>

<pallas_src>
import functools

import jax
import jax.numpy as jnp
from jax import lax
from jax.experimental import pallas as pl
from jax.experimental.pallas import tpu as pltpu


def _basic_block_kernel(x_ref, w1_ref, w2_ref, s1_ref, b1_ref, b2_ref, b3_ref,
                        o_ref, zp1_ref, zp2_ref, *, stride, mm_dtype):
    B, H, W, cin = x_ref.shape
    cmid = zp2_ref.shape[-1]
    cout = o_ref.shape[-1]
    Ho, Wo = H // stride, W // stride
    M = B * Ho * Wo

    s1 = s1_ref[...]                       # (1, cin); broadcasts against (..., W, cin)
    b1 = b1_ref[...]

    # ---------------- bn1 -> zero-padded conv1 input (VMEM scratch) -------------------
    if stride == 1:
        x = x_ref[...]                                            # (B, H, W, cin) f32
        # Ring-only zeroing; the interior is fully overwritten below.
        zp1_ref[:, 0:1, :, :] = jnp.zeros((B, 1, W + 2, cin), jnp.float32)
        zp1_ref[:, H + 1:H + 2, :, :] = jnp.zeros((B, 1, W + 2, cin), jnp.float32)
        zp1_ref[:, :, 0:1, :] = jnp.zeros((B, H + 2, 1, cin), jnp.float32)
        zp1_ref[:, :, W + 1:W + 2, :] = jnp.zeros((B, H + 2, 1, cin), jnp.float32)
        zp1_ref[:, 1:H + 1, 1:W + 1, :] = x * s1 + b1

        zp1 = zp1_ref[...].astype(mm_dtype)           # matmul operand cast, once

        def tap1(ky, kx):                                         # (B, Ho, Wo, cin)
            return zp1[:, ky:ky + Ho, kx:kx + Wo, :]

        sc = x                                                    # identity shortcut
    else:
        # 2x2 polyphase split: phase (r, c) = x[:, r::2, c::2, :], read once with
        # all-slice (no int) strided indexing.  All 9 conv taps and the AvgPool2d
        # shortcut below then become contiguous reads.
        ph_x = [x_ref[:, pl.ds(r, Ho, stride=2), pl.ds(c, Wo, stride=2), :]
                for r in (0, 1) for c in (0, 1)]
        # Fused AvgPool2d((2, 2), stride=2) shortcut, in f32.
        sc = 0.25 * (ph_x[0] + ph_x[1] + ph_x[2] + ph_x[3])

        # Polyphase padded scratch: rows [p*B:(p+1)*B] hold phase p = (pr, pc); only the
        # top row / left column of a phase is ever read as conv zero padding, but the
        # trailing row/column bands are zeroed too so no uninitialized VMEM is read.
        zp1_ref[:, Ho:Ho + 1, :, :] = jnp.zeros((4 * B, 1, Wo + 1, cin), jnp.float32)
        zp1_ref[:, :, Wo:Wo + 1, :] = jnp.zeros((4 * B, Ho + 1, 1, cin), jnp.float32)
        for pr in (0, 1):
            for pc in (0, 1):
                p = pr * 2 + pc
                rows = slice(p * B, (p + 1) * B)
                zp1_ref[rows, 0:1, :, :] = jnp.zeros((B, 1, Wo + 1, cin), jnp.float32)
                zp1_ref[rows, :, 0:1, :] = jnp.zeros((B, Ho + 1, 1, cin), jnp.float32)
                r0, c0 = 1 - pr, 1 - pc
                src = ph_x[r0 * 2 + c0]                           # x[:, r0::2, c0::2, :]
                zp1_ref[rows, r0:r0 + Ho, c0:c0 + Wo, :] = src * s1 + b1

        zp1 = zp1_ref[...].astype(mm_dtype)

        def tap1(ky, kx):                                         # (B, Ho, Wo, cin)
            p = (ky % 2) * 2 + (kx % 2)
            return zp1[p * B:(p + 1) * B,
                       ky // 2:ky // 2 + Ho, kx // 2:kx // 2 + Wo, :]

    # ---------------- conv1 (bn2 scale folded into w1) + bias -> relu -----------------
    # 9 accumulated MXU matmuls (no concat im2col), f32 accumulation.
    acc = None
    for t in range(9):
        ky, kx = divmod(t, 3)
        patch = tap1(ky, kx).reshape(M, cin)
        part = jnp.dot(patch, w1_ref[t], preferred_element_type=jnp.float32)
        acc = part if acc is None else acc + part
    h = jnp.maximum(acc + b2_ref[...], 0.0)                       # (M, cmid), f32

    # ---------------- conv2 (bn3 scale folded into w2) + bias -------------------------
    zp2_ref[:, 0:1, :, :] = jnp.zeros((B, 1, Wo + 2, cmid), jnp.float32)
    zp2_ref[:, Ho + 1:Ho + 2, :, :] = jnp.zeros((B, 1, Wo + 2, cmid), jnp.float32)
    zp2_ref[:, :, 0:1, :] = jnp.zeros((B, Ho + 2, 1, cmid), jnp.float32)
    zp2_ref[:, :, Wo + 1:Wo + 2, :] = jnp.zeros((B, Ho + 2, 1, cmid), jnp.float32)
    zp2_ref[:, 1:Ho + 1, 1:Wo + 1, :] = h.reshape(B, Ho, Wo, cmid)

    zp2 = zp2_ref[...].astype(mm_dtype)
    acc = None
    for t in range(9):
        ky, kx = divmod(t, 3)
        patch = zp2[:, ky:ky + Ho, kx:kx + Wo, :].reshape(M, cmid)
        part = jnp.dot(patch, w2_ref[t], preferred_element_type=jnp.float32)
        acc = part if acc is None else acc + part
    res = (acc + b3_ref[...]).reshape(B, Ho, Wo, cout)            # f32

    # ---------------- residual add + NHWC store ---------------------------------------
    if cout == cin:
        o_ref[...] = (res + sc).astype(o_ref.dtype)
    else:
        # torch.cat((shortcut, zeros), dim=1): add the shortcut to the first cin output
        # channels only, store the rest untouched (no zeros materialization / concat).
        o_ref[:, :, :, 0:cin] = (res[:, :, :, 0:cin] + sc).astype(o_ref.dtype)
        o_ref[:, :, :, cin:cout] = res[:, :, :, cin:cout].astype(o_ref.dtype)


def _pick_batch_block(n, h, w, cin, cmid, cout, stride, budget_bytes=24 << 20):
    """Largest divisor of n whose per-step activation footprint fits the VMEM budget."""
    ho, wo = h // stride, w // stride
    per_img = 4 * (2 * h * w * cin                      # input block (double-buffered)
                   + (h + 2) * (w + 2) * cin            # padded conv1 input scratch
                   + (ho + 2) * (wo + 2) * cmid         # padded conv2 input scratch
                   + 2 * ho * wo * cout                 # output block (double-buffered)
                   + 2 * ho * wo * (cin + cmid + cout)) # live values headroom
    b = int(max(1, min(n, budget_bytes // max(per_img, 1))))
    while n % b:
        b -= 1
    return b


def basic_block_forward_nhwc(x_nhwc, params, stride=1, mm_dtype=jnp.bfloat16):
    """DS_pResNet BasicBlock forward (eval-mode BN), NHWC in / NHWC out.

    Use this entry point when stacking blocks so no per-block layout transposes are paid.
    """
    N, H, W, cin = x_nhwc.shape
    w1, w2 = params["w1"], params["w2"]                  # OIHW (PyTorch layout)
    cmid, cout = w1.shape[0], w2.shape[0]
    assert w1.shape[1] == cin and w2.shape[1] == cmid and cout >= cin
    assert stride in (1, 2)
    if stride == 2:
        assert H % 2 == 0 and W % 2 == 0                 # TODO(synk): ceil_mode pooling
    Ho, Wo = H // stride, W // stride

    # Fold bn2/bn3 scales into the conv output channels (one-time constant work);
    # only the bias adds stay in-kernel.
    w1f = w1.astype(jnp.float32) * params["bn2_s"].astype(jnp.float32)[:, None, None, None]
    w2f = w2.astype(jnp.float32) * params["bn3_s"].astype(jnp.float32)[:, None, None, None]
    # OIHW -> tap-major (ky*3+kx, cin, cout) for the 9 accumulated matmuls.
    w1p = jnp.transpose(w1f, (2, 3, 1, 0)).reshape(9, cin, cmid).astype(mm_dtype)
    w2p = jnp.transpose(w2f, (2, 3, 1, 0)).reshape(9, cmid, cout).astype(mm_dtype)

    def vec(p):                                          # per-channel param as (1, C)
        return p.reshape(1, -1).astype(jnp.float32)

    x = x_nhwc.astype(jnp.float32)
    B = _pick_batch_block(N, H, W, cin, cmid, cout, stride)

    if stride == 1:
        zp1_shape = (B, H + 2, W + 2, cin)               # padded bn1(x)
    else:
        zp1_shape = (4 * B, Ho + 1, Wo + 1, cin)         # 2x2 polyphase, phase-major

    kernel = functools.partial(_basic_block_kernel, stride=stride, mm_dtype=mm_dtype)
    out = pl.pallas_call(
        kernel,
        out_shape=jax.ShapeDtypeStruct((N, Ho, Wo, cout), jnp.float32),
        grid=(N // B,),
        in_specs=[
            pl.BlockSpec((B, H, W, cin), lambda b: (b, 0, 0, 0)),
            pl.BlockSpec((9, cin, cmid), lambda b: (0, 0, 0)),
            pl.BlockSpec((9, cmid, cout), lambda b: (0, 0, 0)),
            pl.BlockSpec((1, cin), lambda b: (0, 0)),
            pl.BlockSpec((1, cin), lambda b: (0, 0)),
            pl.BlockSpec((1, cmid), lambda b: (0, 0)),
            pl.BlockSpec((1, cout), lambda b: (0, 0)),
        ],
        out_specs=pl.BlockSpec((B, Ho, Wo, cout), lambda b: (b, 0, 0, 0)),
        scratch_shapes=[
            pltpu.VMEM(zp1_shape, jnp.float32),                   # padded conv1 input
            pltpu.VMEM((B, Ho + 2, Wo + 2, cmid), jnp.float32),   # padded conv2 input
        ],
        compiler_params=pltpu.CompilerParams(
            # Batch axis shards across TensorCores.  48 MiB scoped VMEM: above the
            # 16/32 MiB defaults so larger blocks fit on v5e/v6e, still under v7x's
            # 64 MiB physical budget.
            dimension_semantics=("parallel",),
            vmem_limit_bytes=48 * 1024 * 1024,
        ),
    )(x, w1p, w2p,
      vec(params["bn1_s"]), vec(params["bn1_b"]),
      vec(params["bn2_b"]), vec(params["bn3_b"]))
    return out


def basic_block_forward(x_nchw, params, stride=1, mm_dtype=jnp.bfloat16):
    """PyTorch-facing NCHW wrapper around the NHWC kernel (used by the test below)."""
    x = jnp.transpose(x_nchw, (0, 2, 3, 1))
    y = basic_block_forward_nhwc(x, params, stride=stride, mm_dtype=mm_dtype)
    return jnp.transpose(y, (0, 3, 1, 2))


# ------------------------------ test scaffolding ------------------------------------ #

def _fold_bn(kg, kb, km, kv, c, eps=1e-5):
    gamma = 1.0 + 0.1 * jax.random.normal(kg, (c,), jnp.float32)
    beta = 0.1 * jax.random.normal(kb, (c,), jnp.float32)
    mean = 0.1 * jax.random.normal(km, (c,), jnp.float32)
    var = 0.5 + jnp.abs(jax.random.normal(kv, (c,), jnp.float32))
    scale = gamma / jnp.sqrt(var + eps)
    shift = beta - mean * scale
    return scale, shift


def init_params(key, inplanes, planes):
    ks = jax.random.split(key, 14)
    # PyTorch Conv2d weights, OIHW, bias=False.
    w1 = 0.1 * jax.random.normal(ks[0], (planes, inplanes, 3, 3), jnp.float32)
    w2 = 0.1 * jax.random.normal(ks[1], (planes, planes, 3, 3), jnp.float32)
    bn1_s, bn1_b = _fold_bn(ks[2], ks[3], ks[4], ks[5], inplanes)
    bn2_s, bn2_b = _fold_bn(ks[6], ks[7], ks[8], ks[9], planes)
    bn3_s, bn3_b = _fold_bn(ks[10], ks[11], ks[12], ks[13], planes)
    return dict(w1=w1, w2=w2, bn1_s=bn1_s, bn1_b=bn1_b,
                bn2_s=bn2_s, bn2_b=bn2_b, bn3_s=bn3_s, bn3_b=bn3_b)


def reference_forward(x_nchw, params, stride=1):
    """Pure-JAX reference with identical semantics (for validation)."""
    x = x_nchw.astype(jnp.float32)
    dn = ("NCHW", "OIHW", "NCHW")

    def bn(t, s, b):
        return t * s.reshape(1, -1, 1, 1) + b.reshape(1, -1, 1, 1)

    y = bn(x, params["bn1_s"], params["bn1_b"])
    y = lax.conv_general_dilated(y, params["w1"], (stride, stride), ((1, 1), (1, 1)),
                                 dimension_numbers=dn, precision=lax.Precision.HIGHEST)
    y = jnp.maximum(bn(y, params["bn2_s"], params["bn2_b"]), 0.0)
    y = lax.conv_general_dilated(y, params["w2"], (1, 1), ((1, 1), (1, 1)),
                                 dimension_numbers=dn, precision=lax.Precision.HIGHEST)
    y = bn(y, params["bn3_s"], params["bn3_b"])
    if stride != 1:
        N, C, H, W = x.shape
        sc = x.reshape(N, C, H // 2, 2, W // 2, 2).mean(axis=(3, 5))
    else:
        sc = x
    if y.shape[1] != sc.shape[1]:
        sc = jnp.pad(sc, ((0, 0), (0, y.shape[1] - sc.shape[1]), (0, 0), (0, 0)))
    return y + sc


if __name__ == "__main__":
    key = jax.random.PRNGKey(0)
    kx_, kp = jax.random.split(key)

    N, inplanes, planes, H, W = 2, 4, 8, 16, 16
    x = jax.random.normal(kx_, (N, inplanes, H, W), jnp.float32)
    params = init_params(kp, inplanes, planes)

    for stride in (1, 2):
        ref = reference_forward(x, params, stride=stride)
        # f32 matmuls validate the structure tightly; bf16 is the fast MXU path.
        for mm_dtype, tol in ((jnp.float32, 5e-4), (jnp.bfloat16, 6e-2)):
            fwd = jax.jit(functools.partial(basic_block_forward, stride=stride,
                                            mm_dtype=mm_dtype))
            out = jax.block_until_ready(fwd(x, params))
            assert out.shape == ref.shape, (out.shape, ref.shape)
            err = float(jnp.max(jnp.abs(out - ref)))
            assert jnp.allclose(out, ref, atol=tol, rtol=tol), \
                f"stride={stride} mm_dtype={mm_dtype.__name__} max err={err}"

    print("KERNEL_OK")
</pallas_src>

<mosaic_0001>
module attributes {stable_mosaic.version = 11 : i64} {
  func.func @_basic_block_kernel(%arg0: i32, %arg1: memref<2x16x16x4xf32, #tpu.memory_space<vmem>>, %arg2: memref<9x4x8xf32, #tpu.memory_space<vmem>>, %arg3: memref<9x8x8xf32, #tpu.memory_space<vmem>>, %arg4: memref<1x4xf32, #tpu.memory_space<vmem>>, %arg5: memref<1x4xf32, #tpu.memory_space<vmem>>, %arg6: memref<1x8xf32, #tpu.memory_space<vmem>>, %arg7: memref<1x8xf32, #tpu.memory_space<vmem>>, %arg8: memref<2x16x16x8xf32, #tpu.memory_space<vmem>>, %arg9: memref<2x18x18x4xf32, #tpu.memory_space<vmem>>, %arg10: memref<2x18x18x8xf32, #tpu.memory_space<vmem>>) attributes {dimension_semantics = [#tpu.dimension_semantics<parallel>], iteration_bounds = array<i64: 1>, scalar_prefetch = 0 : i64, scratch_operands = 2 : i64, tpu.core_type = #tpu.core_type<tc>, window_params = [{transform_indices = @transform_0, window_bounds = array<i64: 2, 16, 16, 4>}, {pipeline_mode = #tpu.pipeline_mode<synchronous>, transform_indices = @transform_1, window_bounds = array<i64: 9, 4, 8>}, {pipeline_mode = #tpu.pipeline_mode<synchronous>, transform_indices = @transform_2, window_bounds = array<i64: 9, 8, 8>}, {pipeline_mode = #tpu.pipeline_mode<synchronous>, transform_indices = @transform_3, window_bounds = array<i64: 1, 4>}, {pipeline_mode = #tpu.pipeline_mode<synchronous>, transform_indices = @transform_4, window_bounds = array<i64: 1, 4>}, {pipeline_mode = #tpu.pipeline_mode<synchronous>, transform_indices = @transform_5, window_bounds = array<i64: 1, 8>}, {pipeline_mode = #tpu.pipeline_mode<synchronous>, transform_indices = @transform_6, window_bounds = array<i64: 1, 8>}, {transform_indices = @transform_7, window_bounds = array<i64: 2, 16, 16, 8>}]} {
    %c0 = arith.constant 0 : index
    %c0_0 = arith.constant 0 : index
    %0 = vector.load %arg4[%c0, %c0_0] : memref<1x4xf32, #tpu.memory_space<vmem>>, vector<1x4xf32>
    %c0_1 = arith.constant 0 : index
    %c0_2 = arith.constant 0 : index
    %1 = vector.load %arg5[%c0_1, %c0_2] : memref<1x4xf32, #tpu.memory_space<vmem>>, vector<1x4xf32>
    %c0_3 = arith.constant 0 : index
    %c0_4 = arith.constant 0 : index
    %c0_5 = arith.constant 0 : index
    %c0_6 = arith.constant 0 : index
    %2 = vector.load %arg1[%c0_3, %c0_4, %c0_5, %c0_6] : memref<2x16x16x4xf32, #tpu.memory_space<vmem>>, vector<2x16x16x4xf32>
    %cst = arith.constant 0.000000e+00 : f32
    %3 = vector.broadcast %cst : f32 to vector<2x1x18x4xf32>
    %c0_7 = arith.constant 0 : index
    %c0_8 = arith.constant 0 : index
    %c0_9 = arith.constant 0 : index
    %c0_10 = arith.constant 0 : index
    %4 = vector.load %arg9[%c0_7, %c0_8, %c0_9, %c0_10] : memref<2x18x18x4xf32, #tpu.memory_space<vmem>>, vector<2x1x18x4xf32>
    tpu.vector_store %arg9[%c0_7, %c0_8, %c0_9, %c0_10], %3 {strides = array<i32>} : memref<2x18x18x4xf32, #tpu.memory_space<vmem>>, vector<2x1x18x4xf32>,
    %cst_11 = arith.constant 0.000000e+00 : f32
    %5 = vector.broadcast %cst_11 : f32 to vector<2x1x18x4xf32>
    %c0_12 = arith.constant 0 : index
    %c17 = arith.constant 17 : index
    %c0_13 = arith.constant 0 : index
    %c0_14 = arith.constant 0 : index
    %6 = vector.load %arg9[%c0_12, %c17, %c0_13, %c0_14] : memref<2x18x18x4xf32, #tpu.memory_space<vmem>>, vector<2x1x18x4xf32>
    tpu.vector_store %arg9[%c0_12, %c17, %c0_13, %c0_14], %5 {strides = array<i32>} : memref<2x18x18x4xf32, #tpu.memory_space<vmem>>, vector<2x1x18x4xf32>,
    %cst_15 = arith.constant 0.000000e+00 : f32
    %7 = vector.broadcast %cst_15 : f32 to vector<2x18x1x4xf32>
    %c0_16 = arith.constant 0 : index
    %c0_17 = arith.constant 0 : index
    %c0_18 = arith.constant 0 : index
    %c0_19 = arith.constant 0 : index
    %8 = vector.load %arg9[%c0_16, %c0_17, %c0_18, %c0_19] : memref<2x18x18x4xf32, #tpu.memory_space<vmem>>, vector<2x18x1x4xf32>
    tpu.vector_store %arg9[%c0_16, %c0_17, %c0_18, %c0_19], %7 {strides = array<i32>} : memref<2x18x18x4xf32, #tpu.memory_space<vmem>>, vector<2x18x1x4xf32>,
    %cst_20 = arith.constant 0.000000e+00 : f32
    %9 = vector.broadcast %cst_20 : f32 to vector<2x18x1x4xf32>
    %c0_21 = arith.constant 0 : index
    %c0_22 = arith.constant 0 : index
    %c17_23 = arith.constant 17 : index
    %c0_24 = arith.constant 0 : index
    %10 = vector.load %arg9[%c0_21, %c0_22, %c17_23, %c0_24] : memref<2x18x18x4xf32, #tpu.memory_space<vmem>>, vector<2x18x1x4xf32>
    tpu.vector_store %arg9[%c0_21, %c0_22, %c17_23, %c0_24], %9 {strides = array<i32>} : memref<2x18x18x4xf32, #tpu.memory_space<vmem>>, vector<2x18x1x4xf32>,
    %11 = vector.shape_cast %0 : vector<1x4xf32> to vector<1x1x1x4xf32>
    %12 = vector.broadcast %11 : vector<1x1x1x4xf32> to vector<2x16x16x4xf32>
    %13 = arith.mulf %2, %12 : vector<2x16x16x4xf32>
    %14 = vector.shape_cast %1 : vector<1x4xf32> to vector<1x1x1x4xf32>
    %15 = vector.broadcast %14 : vector<1x1x1x4xf32> to vector<2x16x16x4xf32>
    %16 = arith.addf %13, %15 : vector<2x16x16x4xf32>
    %c0_25 = arith.constant 0 : index
    %c1 = arith.constant 1 : index
    %c1_26 = arith.constant 1 : index
    %c0_27 = arith.constant 0 : index
    %17 = vector.load %arg9[%c0_25, %c1, %c1_26, %c0_27] : memref<2x18x18x4xf32, #tpu.memory_space<vmem>>, vector<2x16x16x4xf32>
    tpu.vector_store %arg9[%c0_25, %c1, %c1_26, %c0_27], %16 {strides = array<i32>} : memref<2x18x18x4xf32, #tpu.memory_space<vmem>>, vector<2x16x16x4xf32>,
    %c0_28 = arith.constant 0 : index
    %c0_29 = arith.constant 0 : index
    %c0_30 = arith.constant 0 : index
    %c0_31 = arith.constant 0 : index
    %18 = vector.load %arg9[%c0_28, %c0_29, %c0_30, %c0_31] : memref<2x18x18x4xf32, #tpu.memory_space<vmem>>, vector<2x18x18x4xf32>
    %19 = vector.extract_strided_slice %18 {offsets = [0, 0, 0, 0], sizes = [2, 16, 16, 4], strides = [1, 1, 1, 1]} : vector<2x18x18x4xf32> to vector<2x16x16x4xf32>
    %20 = vector.shape_cast %19 : vector<2x16x16x4xf32> to vector<512x4xf32>
    %c0_32 = arith.constant 0 : index
    %c0_33 = arith.constant 0 : index
    %c0_34 = arith.constant 0 : index
    %21 = vector.load %arg2[%c0_32, %c0_33, %c0_34] : memref<9x4x8xf32, #tpu.memory_space<vmem>>, vector<1x4x8xf32>
    %22 = vector.shape_cast %21 : vector<1x4x8xf32> to vector<4x8xf32>
    %cst_35 = arith.constant dense<0.000000e+00> : vector<512x8xf32>
    %23 = tpu.matmul %20, %22, %cst_35 {dimension_numbers = #tpu.dot_dimension_numbers<[1], [0], [0], [1], [0, 0, 1, 1], [], []>} : vector<512x4xf32>, vector<4x8xf32>, vector<512x8xf32> -> vector<512x8xf32>
    %24 = vector.extract_strided_slice %18 {offsets = [0, 0, 1, 0], sizes = [2, 16, 16, 4], strides = [1, 1, 1, 1]} : vector<2x18x18x4xf32> to vector<2x16x16x4xf32>
    %25 = vector.shape_cast %24 : vector<2x16x16x4xf32> to vector<512x4xf32>
    %c1_36 = arith.constant 1 : index
    %c0_37 = arith.constant 0 : index
    %c0_38 = arith.constant 0 : index
    %26 = vector.load %arg2[%c1_36, %c0_37, %c0_38] : memref<9x4x8xf32, #tpu.memory_space<vmem>>, vector<1x4x8xf32>
    %27 = vector.shape_cast %26 : vector<1x4x8xf32> to vector<4x8xf32>
    %cst_39 = arith.constant dense<0.000000e+00> : vector<512x8xf32>
    %28 = tpu.matmul %25, %27, %cst_39 {dimension_numbers = #tpu.dot_dimension_numbers<[1], [0], [0], [1], [0, 0, 1, 1], [], []>} : vector<512x4xf32>, vector<4x8xf32>, vector<512x8xf32> -> vector<512x8xf32>
    %29 = arith.addf %23, %28 : vector<512x8xf32>
    %30 = vector.extract_strided_slice %18 {offsets = [0, 0, 2, 0], sizes = [2, 16, 16, 4], strides = [1, 1, 1, 1]} : vector<2x18x18x4xf32> to vector<2x16x16x4xf32>
    %31 = vector.shape_cast %30 : vector<2x16x16x4xf32> to vector<512x4xf32>
    %c2 = arith.constant 2 : index
    %c0_40 = arith.constant 0 : index
    %c0_41 = arith.constant 0 : index
    %32 = vector.load %arg2[%c2, %c0_40, %c0_41] : memref<9x4x8xf32, #tpu.memory_space<vmem>>, vector<1x4x8xf32>
    %33 = vector.shape_cast %32 : vector<1x4x8xf32> to vector<4x8xf32>
    %cst_42 = arith.constant dense<0.000000e+00> : vector<512x8xf32>
    %34 = tpu.matmul %31, %33, %cst_42 {dimension_numbers = #tpu.dot_dimension_numbers<[1], [0], [0], [1], [0, 0, 1, 1], [], []>} : vector<512x4xf32>, vector<4x8xf32>, vector<512x8xf32> -> vector<512x8xf32>
    %35 = arith.addf %29, %34 : vector<512x8xf32>
    %36 = vector.extract_strided_slice %18 {offsets = [0, 1, 0, 0], sizes = [2, 16, 16, 4], strides = [1, 1, 1, 1]} : vector<2x18x18x4xf32> to vector<2x16x16x4xf32>
    %37 = vector.shape_cast %36 : vector<2x16x16x4xf32> to vector<512x4xf32>
    %c3 = arith.constant 3 : index
    %c0_43 = arith.constant 0 : index
    %c0_44 = arith.constant 0 : index
    %38 = vector.load %arg2[%c3, %c0_43, %c0_44] : memref<9x4x8xf32, #tpu.memory_space<vmem>>, vector<1x4x8xf32>
    %39 = vector.shape_cast %38 : vector<1x4x8xf32> to vector<4x8xf32>
    %cst_45 = arith.constant dense<0.000000e+00> : vector<512x8xf32>
    %40 = tpu.matmul %37, %39, %cst_45 {dimension_numbers = #tpu.dot_dimension_numbers<[1], [0], [0], [1], [0, 0, 1, 1], [], []>} : vector<512x4xf32>, vector<4x8xf32>, vector<512x8xf32> -> vector<512x8xf32>
    %41 = arith.addf %35, %40 : vector<512x8xf32>
    %42 = vector.extract_strided_slice %18 {offsets = [0, 1, 1, 0], sizes = [2, 16, 16, 4], strides = [1, 1, 1, 1]} : vector<2x18x18x4xf32> to vector<2x16x16x4xf32>
    %43 = vector.shape_cast %42 : vector<2x16x16x4xf32> to vector<512x4xf32>
    %c4 = arith.constant 4 : index
    %c0_46 = arith.constant 0 : index
    %c0_47 = arith.constant 0 : index
    %44 = vector.load %arg2[%c4, %c0_46, %c0_47] : memref<9x4x8xf32, #tpu.memory_space<vmem>>, vector<1x4x8xf32>
    %45 = vector.shape_cast %44 : vector<1x4x8xf32> to vector<4x8xf32>
    %cst_48 = arith.constant dense<0.000000e+00> : vector<512x8xf32>
    %46 = tpu.matmul %43, %45, %cst_48 {dimension_numbers = #tpu.dot_dimension_numbers<[1], [0], [0], [1], [0, 0, 1, 1], [], []>} : vector<512x4xf32>, vector<4x8xf32>, vector<512x8xf32> -> vector<512x8xf32>
    %47 = arith.addf %41, %46 : vector<512x8xf32>
    %48 = vector.extract_strided_slice %18 {offsets = [0, 1, 2, 0], sizes = [2, 16, 16, 4], strides = [1, 1, 1, 1]} : vector<2x18x18x4xf32> to vector<2x16x16x4xf32>
    %49 = vector.shape_cast %48 : vector<2x16x16x4xf32> to vector<512x4xf32>
    %c5 = arith.constant 5 : index
    %c0_49 = arith.constant 0 : index
    %c0_50 = arith.constant 0 : index
    %50 = vector.load %arg2[%c5, %c0_49, %c0_50] : memref<9x4x8xf32, #tpu.memory_space<vmem>>, vector<1x4x8xf32>
    %51 = vector.shape_cast %50 : vector<1x4x8xf32> to vector<4x8xf32>
    %cst_51 = arith.constant dense<0.000000e+00> : vector<512x8xf32>
    %52 = tpu.matmul %49, %51, %cst_51 {dimension_numbers = #tpu.dot_dimension_numbers<[1], [0], [0], [1], [0, 0, 1, 1], [], []>} : vector<512x4xf32>, vector<4x8xf32>, vector<512x8xf32> -> vector<512x8xf32>
    %53 = arith.addf %47, %52 : vector<512x8xf32>
    %54 = vector.extract_strided_slice %18 {offsets = [0, 2, 0, 0], sizes = [2, 16, 16, 4], strides = [1, 1, 1, 1]} : vector<2x18x18x4xf32> to vector<2x16x16x4xf32>
    %55 = vector.shape_cast %54 : vector<2x16x16x4xf32> to vector<512x4xf32>
    %c6 = arith.constant 6 : index
    %c0_52 = arith.constant 0 : index
    %c0_53 = arith.constant 0 : index
    %56 = vector.load %arg2[%c6, %c0_52, %c0_53] : memref<9x4x8xf32, #tpu.memory_space<vmem>>, vector<1x4x8xf32>
    %57 = vector.shape_cast %56 : vector<1x4x8xf32> to vector<4x8xf32>
    %cst_54 = arith.constant dense<0.000000e+00> : vector<512x8xf32>
    %58 = tpu.matmul %55, %57, %cst_54 {dimension_numbers = #tpu.dot_dimension_numbers<[1], [0], [0], [1], [0, 0, 1, 1], [], []>} : vector<512x4xf32>, vector<4x8xf32>, vector<512x8xf32> -> vector<512x8xf32>
    %59 = arith.addf %53, %58 : vector<512x8xf32>
    %60 = vector.extract_strided_slice %18 {offsets = [0, 2, 1, 0], sizes = [2, 16, 16, 4], strides = [1, 1, 1, 1]} : vector<2x18x18x4xf32> to vector<2x16x16x4xf32>
    %61 = vector.shape_cast %60 : vector<2x16x16x4xf32> to vector<512x4xf32>
    %c7 = arith.constant 7 : index
    %c0_55 = arith.constant 0 : index
    %c0_56 = arith.constant 0 : index
    %62 = vector.load %arg2[%c7, %c0_55, %c0_56] : memref<9x4x8xf32, #tpu.memory_space<vmem>>, vector<1x4x8xf32>
    %63 = vector.shape_cast %62 : vector<1x4x8xf32> to vector<4x8xf32>
    %cst_57 = arith.constant dense<0.000000e+00> : vector<512x8xf32>
    %64 = tpu.matmul %61, %63, %cst_57 {dimension_numbers = #tpu.dot_dimension_numbers<[1], [0], [0], [1], [0, 0, 1, 1], [], []>} : vector<512x4xf32>, vector<4x8xf32>, vector<512x8xf32> -> vector<512x8xf32>
    %65 = arith.addf %59, %64 : vector<512x8xf32>
    %66 = vector.extract_strided_slice %18 {offsets = [0, 2, 2, 0], sizes = [2, 16, 16, 4], strides = [1, 1, 1, 1]} : vector<2x18x18x4xf32> to vector<2x16x16x4xf32>
    %67 = vector.shape_cast %66 : vector<2x16x16x4xf32> to vector<512x4xf32>
    %c8 = arith.constant 8 : index
    %c0_58 = arith.constant 0 : index
    %c0_59 = arith.constant 0 : index
    %68 = vector.load %arg2[%c8, %c0_58, %c0_59] : memref<9x4x8xf32, #tpu.memory_space<vmem>>, vector<1x4x8xf32>
    %69 = vector.shape_cast %68 : vector<1x4x8xf32> to vector<4x8xf32>
    %cst_60 = arith.constant dense<0.000000e+00> : vector<512x8xf32>
    %70 = tpu.matmul %67, %69, %cst_60 {dimension_numbers = #tpu.dot_dimension_numbers<[1], [0], [0], [1], [0, 0, 1, 1], [], []>} : vector<512x4xf32>, vector<4x8xf32>, vector<512x8xf32> -> vector<512x8xf32>
    %71 = arith.addf %65, %70 : vector<512x8xf32>
    %c0_61 = arith.constant 0 : index
    %c0_62 = arith.constant 0 : index
    %72 = vector.load %arg6[%c0_61, %c0_62] : memref<1x8xf32, #tpu.memory_space<vmem>>, vector<1x8xf32>
    %73 = vector.broadcast %72 : vector<1x8xf32> to vector<512x8xf32>
    %74 = arith.addf %71, %73 : vector<512x8xf32>
    %cst_63 = arith.constant 0.000000e+00 : f32
    %75 = vector.broadcast %cst_63 : f32 to vector<512x8xf32>
    %76 = arith.maximumf %74, %75 : vector<512x8xf32>
    %cst_64 = arith.constant 0.000000e+00 : f32
    %77 = vector.broadcast %cst_64 : f32 to vector<2x1x18x8xf32>
    %c0_65 = arith.constant 0 : index
    %c0_66 = arith.constant 0 : index
    %c0_67 = arith.constant 0 : index
    %c0_68 = arith.constant 0 : index
    %78 = vector.load %arg10[%c0_65, %c0_66, %c0_67, %c0_68] : memref<2x18x18x8xf32, #tpu.memory_space<vmem>>, vector<2x1x18x8xf32>
    tpu.vector_store %arg10[%c0_65, %c0_66, %c0_67, %c0_68], %77 {strides = array<i32>} : memref<2x18x18x8xf32, #tpu.memory_space<vmem>>, vector<2x1x18x8xf32>,
    %cst_69 = arith.constant 0.000000e+00 : f32
    %79 = vector.broadcast %cst_69 : f32 to vector<2x1x18x8xf32>
    %c0_70 = arith.constant 0 : index
    %c17_71 = arith.constant 17 : index
    %c0_72 = arith.constant 0 : index
    %c0_73 = arith.constant 0 : index
    %80 = vector.load %arg10[%c0_70, %c17_71, %c0_72, %c0_73] : memref<2x18x18x8xf32, #tpu.memory_space<vmem>>, vector<2x1x18x8xf32>
    tpu.vector_store %arg10[%c0_70, %c17_71, %c0_72, %c0_73], %79 {strides = array<i32>} : memref<2x18x18x8xf32, #tpu.memory_space<vmem>>, vector<2x1x18x8xf32>,
    %cst_74 = arith.constant 0.000000e+00 : f32
    %81 = vector.broadcast %cst_74 : f32 to vector<2x18x1x8xf32>
    %c0_75 = arith.constant 0 : index
    %c0_76 = arith.constant 0 : index
    %c0_77 = arith.constant 0 : index
    %c0_78 = arith.constant 0 : index
    %82 = vector.load %arg10[%c0_75, %c0_76, %c0_77, %c0_78] : memref<2x18x18x8xf32, #tpu.memory_space<vmem>>, vector<2x18x1x8xf32>
    tpu.vector_store %arg10[%c0_75, %c0_76, %c0_77, %c0_78], %81 {strides = array<i32>} : memref<2x18x18x8xf32, #tpu.memory_space<vmem>>, vector<2x18x1x8xf32>,
    %cst_79 = arith.constant 0.000000e+00 : f32
    %83 = vector.broadcast %cst_79 : f32 to vector<2x18x1x8xf32>
    %c0_80 = arith.constant 0 : index
    %c0_81 = arith.constant 0 : index
    %c17_82 = arith.constant 17 : index
    %c0_83 = arith.constant 0 : index
    %84 = vector.load %arg10[%c0_80, %c0_81, %c17_82, %c0_83] : memref<2x18x18x8xf32, #tpu.memory_space<vmem>>, vector<2x18x1x8xf32>
    tpu.vector_store %arg10[%c0_80, %c0_81, %c17_82, %c0_83], %83 {strides = array<i32>} : memref<2x18x18x8xf32, #tpu.memory_space<vmem>>, vector<2x18x1x8xf32>,
    %85 = vector.shape_cast %76 : vector<512x8xf32> to vector<2x16x16x8xf32>
    %c0_84 = arith.constant 0 : index
    %c1_85 = arith.constant 1 : index
    %c1_86 = arith.constant 1 : index
    %c0_87 = arith.constant 0 : index
    %86 = vector.load %arg10[%c0_84, %c1_85, %c1_86, %c0_87] : memref<2x18x18x8xf32, #tpu.memory_space<vmem>>, vector<2x16x16x8xf32>
    tpu.vector_store %arg10[%c0_84, %c1_85, %c1_86, %c0_87], %85 {strides = array<i32>} : memref<2x18x18x8xf32, #tpu.memory_space<vmem>>, vector<2x16x16x8xf32>,
    %c0_88 = arith.constant 0 : index
    %c0_89 = arith.constant 0 : index
    %c0_90 = arith.constant 0 : index
    %c0_91 = arith.constant 0 : index
    %87 = vector.load %arg10[%c0_88, %c0_89, %c0_90, %c0_91] : memref<2x18x18x8xf32, #tpu.memory_space<vmem>>, vector<2x18x18x8xf32>
    %88 = vector.extract_strided_slice %87 {offsets = [0, 0, 0, 0], sizes = [2, 16, 16, 8], strides = [1, 1, 1, 1]} : vector<2x18x18x8xf32> to vector<2x16x16x8xf32>
    %89 = vector.shape_cast %88 : vector<2x16x16x8xf32> to vector<512x8xf32>
    %c0_92 = arith.constant 0 : index
    %c0_93 = arith.constant 0 : index
    %c0_94 = arith.constant 0 : index
    %90 = vector.load %arg3[%c0_92, %c0_93, %c0_94] : memref<9x8x8xf32, #tpu.memory_space<vmem>>, vector<1x8x8xf32>
    %91 = vector.shape_cast %90 : vector<1x8x8xf32> to vector<8x8xf32>
    %cst_95 = arith.constant dense<0.000000e+00> : vector<512x8xf32>
    %92 = tpu.matmul %89, %91, %cst_95 {dimension_numbers = #tpu.dot_dimension_numbers<[1], [0], [0], [1], [0, 0, 1, 1], [], []>} : vector<512x8xf32>, vector<8x8xf32>, vector<512x8xf32> -> vector<512x8xf32>
    %93 = vector.extract_strided_slice %87 {offsets = [0, 0, 1, 0], sizes = [2, 16, 16, 8], strides = [1, 1, 1, 1]} : vector<2x18x18x8xf32> to vector<2x16x16x8xf32>
    %94 = vector.shape_cast %93 : vector<2x16x16x8xf32> to vector<512x8xf32>
    %c1_96 = arith.constant 1 : index
    %c0_97 = arith.constant 0 : index
    %c0_98 = arith.constant 0 : index
    %95 = vector.load %arg3[%c1_96, %c0_97, %c0_98] : memref<9x8x8xf32, #tpu.memory_space<vmem>>, vector<1x8x8xf32>
    %96 = vector.shape_cast %95 : vector<1x8x8xf32> to vector<8x8xf32>
    %cst_99 = arith.constant dense<0.000000e+00> : vector<512x8xf32>
    %97 = tpu.matmul %94, %96, %cst_99 {dimension_numbers = #tpu.dot_dimension_numbers<[1], [0], [0], [1], [0, 0, 1, 1], [], []>} : vector<512x8xf32>, vector<8x8xf32>, vector<512x8xf32> -> vector<512x8xf32>
    %98 = arith.addf %92, %97 : vector<512x8xf32>
    %99 = vector.extract_strided_slice %87 {offsets = [0, 0, 2, 0], sizes = [2, 16, 16, 8], strides = [1, 1, 1, 1]} : vector<2x18x18x8xf32> to vector<2x16x16x8xf32>
    %100 = vector.shape_cast %99 : vector<2x16x16x8xf32> to vector<512x8xf32>
    %c2_100 = arith.constant 2 : index
    %c0_101 = arith.constant 0 : index
    %c0_102 = arith.constant 0 : index
    %101 = vector.load %arg3[%c2_100, %c0_101, %c0_102] : memref<9x8x8xf32, #tpu.memory_space<vmem>>, vector<1x8x8xf32>
    %102 = vector.shape_cast %101 : vector<1x8x8xf32> to vector<8x8xf32>
    %cst_103 = arith.constant dense<0.000000e+00> : vector<512x8xf32>
    %103 = tpu.matmul %100, %102, %cst_103 {dimension_numbers = #tpu.dot_dimension_numbers<[1], [0], [0], [1], [0, 0, 1, 1], [], []>} : vector<512x8xf32>, vector<8x8xf32>, vector<512x8xf32> -> vector<512x8xf32>
    %104 = arith.addf %98, %103 : vector<512x8xf32>
    %105 = vector.extract_strided_slice %87 {offsets = [0, 1, 0, 0], sizes = [2, 16, 16, 8], strides = [1, 1, 1, 1]} : vector<2x18x18x8xf32> to vector<2x16x16x8xf32>
    %106 = vector.shape_cast %105 : vector<2x16x16x8xf32> to vector<512x8xf32>
    %c3_104 = arith.constant 3 : index
    %c0_105 = arith.constant 0 : index
    %c0_106 = arith.constant 0 : index
    %107 = vector.load %arg3[%c3_104, %c0_105, %c0_106] : memref<9x8x8xf32, #tpu.memory_space<vmem>>, vector<1x8x8xf32>
    %108 = vector.shape_cast %107 : vector<1x8x8xf32> to vector<8x8xf32>
    %cst_107 = arith.constant dense<0.000000e+00> : vector<512x8xf32>
    %109 = tpu.matmul %106, %108, %cst_107 {dimension_numbers = #tpu.dot_dimension_numbers<[1], [0], [0], [1], [0, 0, 1, 1], [], []>} : vector<512x8xf32>, vector<8x8xf32>, vector<512x8xf32> -> vector<512x8xf32>
    %110 = arith.addf %104, %109 : vector<512x8xf32>
    %111 = vector.extract_strided_slice %87 {offsets = [0, 1, 1, 0], sizes = [2, 16, 16, 8], strides = [1, 1, 1, 1]} : vector<2x18x18x8xf32> to vector<2x16x16x8xf32>
    %112 = vector.shape_cast %111 : vector<2x16x16x8xf32> to vector<512x8xf32>
    %c4_108 = arith.constant 4 : index
    %c0_109 = arith.constant 0 : index
    %c0_110 = arith.constant 0 : index
    %113 = vector.load %arg3[%c4_108, %c0_109, %c0_110] : memref<9x8x8xf32, #tpu.memory_space<vmem>>, vector<1x8x8xf32>
    %114 = vector.shape_cast %113 : vector<1x8x8xf32> to vector<8x8xf32>
    %cst_111 = arith.constant dense<0.000000e+00> : vector<512x8xf32>
    %115 = tpu.matmul %112, %114, %cst_111 {dimension_numbers = #tpu.dot_dimension_numbers<[1], [0], [0], [1], [0, 0, 1, 1], [], []>} : vector<512x8xf32>, vector<8x8xf32>, vector<512x8xf32> -> vector<512x8xf32>
    %116 = arith.addf %110, %115 : vector<512x8xf32>
    %117 = vector.extract_strided_slice %87 {offsets = [0, 1, 2, 0], sizes = [2, 16, 16, 8], strides = [1, 1, 1, 1]} : vector<2x18x18x8xf32> to vector<2x16x16x8xf32>
    %118 = vector.shape_cast %117 : vector<2x16x16x8xf32> to vector<512x8xf32>
    %c5_112 = arith.constant 5 : index
    %c0_113 = arith.constant 0 : index
    %c0_114 = arith.constant 0 : index
    %119 = vector.load %arg3[%c5_112, %c0_113, %c0_114] : memref<9x8x8xf32, #tpu.memory_space<vmem>>, vector<1x8x8xf32>
    %120 = vector.shape_cast %119 : vector<1x8x8xf32> to vector<8x8xf32>
    %cst_115 = arith.constant dense<0.000000e+00> : vector<512x8xf32>
    %121 = tpu.matmul %118, %120, %cst_115 {dimension_numbers = #tpu.dot_dimension_numbers<[1], [0], [0], [1], [0, 0, 1, 1], [], []>} : vector<512x8xf32>, vector<8x8xf32>, vector<512x8xf32> -> vector<512x8xf32>
    %122 = arith.addf %116, %121 : vector<512x8xf32>
    %123 = vector.extract_strided_slice %87 {offsets = [0, 2, 0, 0], sizes = [2, 16, 16, 8], strides = [1, 1, 1, 1]} : vector<2x18x18x8xf32> to vector<2x16x16x8xf32>
    %124 = vector.shape_cast %123 : vector<2x16x16x8xf32> to vector<512x8xf32>
    %c6_116 = arith.constant 6 : index
    %c0_117 = arith.constant 0 : index
    %c0_118 = arith.constant 0 : index
    %125 = vector.load %arg3[%c6_116, %c0_117, %c0_118] : memref<9x8x8xf32, #tpu.memory_space<vmem>>, vector<1x8x8xf32>
    %126 = vector.shape_cast %125 : vector<1x8x8xf32> to vector<8x8xf32>
    %cst_119 = arith.constant dense<0.000000e+00> : vector<512x8xf32>
    %127 = tpu.matmul %124, %126, %cst_119 {dimension_numbers = #tpu.dot_dimension_numbers<[1], [0], [0], [1], [0, 0, 1, 1], [], []>} : vector<512x8xf32>, vector<8x8xf32>, vector<512x8xf32> -> vector<512x8xf32>
    %128 = arith.addf %122, %127 : vector<512x8xf32>
    %129 = vector.extract_strided_slice %87 {offsets = [0, 2, 1, 0], sizes = [2, 16, 16, 8], strides = [1, 1, 1, 1]} : vector<2x18x18x8xf32> to vector<2x16x16x8xf32>
    %130 = vector.shape_cast %129 : vector<2x16x16x8xf32> to vector<512x8xf32>
    %c7_120 = arith.constant 7 : index
    %c0_121 = arith.constant 0 : index
    %c0_122 = arith.constant 0 : index
    %131 = vector.load %arg3[%c7_120, %c0_121, %c0_122] : memref<9x8x8xf32, #tpu.memory_space<vmem>>, vector<1x8x8xf32>
    %132 = vector.shape_cast %131 : vector<1x8x8xf32> to vector<8x8xf32>
    %cst_123 = arith.constant dense<0.000000e+00> : vector<512x8xf32>
    %133 = tpu.matmul %130, %132, %cst_123 {dimension_numbers = #tpu.dot_dimension_numbers<[1], [0], [0], [1], [0, 0, 1, 1], [], []>} : vector<512x8xf32>, vector<8x8xf32>, vector<512x8xf32> -> vector<512x8xf32>
    %134 = arith.addf %128, %133 : vector<512x8xf32>
    %135 = vector.extract_strided_slice %87 {offsets = [0, 2, 2, 0], sizes = [2, 16, 16, 8], strides = [1, 1, 1, 1]} : vector<2x18x18x8xf32> to vector<2x16x16x8xf32>
    %136 = vector.shape_cast %135 : vector<2x16x16x8xf32> to vector<512x8xf32>
    %c8_124 = arith.constant 8 : index
    %c0_125 = arith.constant 0 : index
    %c0_126 = arith.constant 0 : index
    %137 = vector.load %arg3[%c8_124, %c0_125, %c0_126] : memref<9x8x8xf32, #tpu.memory_space<vmem>>, vector<1x8x8xf32>
    %138 = vector.shape_cast %137 : vector<1x8x8xf32> to vector<8x8xf32>
    %cst_127 = arith.constant dense<0.000000e+00> : vector<512x8xf32>
    %139 = tpu.matmul %136, %138, %cst_127 {dimension_numbers = #tpu.dot_dimension_numbers<[1], [0], [0], [1], [0, 0, 1, 1], [], []>} : vector<512x8xf32>, vector<8x8xf32>, vector<512x8xf32> -> vector<512x8xf32>
    %140 = arith.addf %134, %139 : vector<512x8xf32>
    %c0_128 = arith.constant 0 : index
    %c0_129 = arith.constant 0 : index
    %141 = vector.load %arg7[%c0_128, %c0_129] : memref<1x8xf32, #tpu.memory_space<vmem>>, vector<1x8xf32>
    %142 = vector.broadcast %141 : vector<1x8xf32> to vector<512x8xf32>
    %143 = arith.addf %140, %142 : vector<512x8xf32>
    %144 = vector.shape_cast %143 : vector<512x8xf32> to vector<2x16x16x8xf32>
    %145 = vector.extract_strided_slice %144 {offsets = [0, 0, 0, 0], sizes = [2, 16, 16, 4], strides = [1, 1, 1, 1]} : vector<2x16x16x8xf32> to vector<2x16x16x4xf32>
    %146 = arith.addf %145, %2 : vector<2x16x16x4xf32>
    %c0_130 = arith.constant 0 : index
    %c0_131 = arith.constant 0 : index
    %c0_132 = arith.constant 0 : index
    %c0_133 = arith.constant 0 : index
    %147 = vector.load %arg8[%c0_130, %c0_131, %c0_132, %c0_133] : memref<2x16x16x8xf32, #tpu.memory_space<vmem>>, vector<2x16x16x4xf32>
    tpu.vector_store %arg8[%c0_130, %c0_131, %c0_132, %c0_133], %146 {strides = array<i32>} : memref<2x16x16x8xf32, #tpu.memory_space<vmem>>, vector<2x16x16x4xf32>,
    %148 = vector.extract_strided_slice %144 {offsets = [0, 0, 0, 4], sizes = [2, 16, 16, 4], strides = [1, 1, 1, 1]} : vector<2x16x16x8xf32> to vector<2x16x16x4xf32>
    %c0_134 = arith.constant 0 : index
    %c0_135 = arith.constant 0 : index
    %c0_136 = arith.constant 0 : index
    %c4_137 = arith.constant 4 : index
    %149 = vector.load %arg8[%c0_134, %c0_135, %c0_136, %c4_137] : memref<2x16x16x8xf32, #tpu.memory_space<vmem>>, vector<2x16x16x4xf32>
    tpu.vector_store %arg8[%c0_134, %c0_135, %c0_136, %c4_137], %148 {strides = array<i32>} : memref<2x16x16x8xf32, #tpu.memory_space<vmem>>, vector<2x16x16x4xf32>,
    return
  }
  func.func @transform_0(%arg0: i32) -> (i32, i32, i32, i32) {
    %c0_i32 = arith.constant 0 : i32
    %c0_i32_0 = arith.constant 0 : i32
    %c0_i32_1 = arith.constant 0 : i32
    %c0_i32_2 = arith.constant 0 : i32
    return %arg0, %c0_i32, %c0_i32_0, %c0_i32_1 : i32, i32, i32, i32
  }
  func.func @transform_1(%arg0: i32) -> (i32, i32, i32) {
    %c0_i32 = arith.constant 0 : i32
    %c0_i32_0 = arith.constant 0 : i32
    %c0_i32_1 = arith.constant 0 : i32
    %c0_i32_2 = arith.constant 0 : i32
    return %c0_i32, %c0_i32_0, %c0_i32_1 : i32, i32, i32
  }
  func.func @transform_2(%arg0: i32) -> (i32, i32, i32) {
    %c0_i32 = arith.constant 0 : i32
    %c0_i32_0 = arith.constant 0 : i32
    %c0_i32_1 = arith.constant 0 : i32
    %c0_i32_2 = arith.constant 0 : i32
    return %c0_i32, %c0_i32_0, %c0_i32_1 : i32, i32, i32
  }
  func.func @transform_3(%arg0: i32) -> (i32, i32) {
    %c0_i32 = arith.constant 0 : i32
    %c0_i32_0 = arith.constant 0 : i32
    %c0_i32_1 = arith.constant 0 : i32
    return %c0_i32, %c0_i32_0 : i32, i32
  }
  func.func @transform_4(%arg0: i32) -> (i32, i32) {
    %c0_i32 = arith.constant 0 : i32
    %c0_i32_0 = arith.constant 0 : i32
    %c0_i32_1 = arith.constant 0 : i32
    return %c0_i32, %c0_i32_0 : i32, i32
  }
  func.func @transform_5(%arg0: i32) -> (i32, i32) {
    %c0_i32 = arith.constant 0 : i32
    %c0_i32_0 = arith.constant 0 : i32
    %c0_i32_1 = arith.constant 0 : i32
    return %c0_i32, %c0_i32_0 : i32, i32
  }
  func.func @transform_6(%arg0: i32) -> (i32, i32) {
    %c0_i32 = arith.constant 0 : i32
    %c0_i32_0 = arith.constant 0 : i32
    %c0_i32_1 = arith.constant 0 : i32
    return %c0_i32, %c0_i32_0 : i32, i32
  }
  func.func @transform_7(%arg0: i32) -> (i32, i32, i32, i32) {
    %c0_i32 = arith.constant 0 : i32
    %c0_i32_0 = arith.constant 0 : i32
    %c0_i32_1 = arith.constant 0 : i32
    %c0_i32_2 = arith.constant 0 : i32
    return %arg0, %c0_i32, %c0_i32_0, %c0_i32_1 : i32, i32, i32, i32
  }
}

</mosaic_0001>

<bundles_post_ra>
// kernel: basic_block_forward.1
= control target key start
LH: loop header
LB: loop body
LE: loop exit
PB: predicated region body
PF: predicated region fallthrough
CT: control target
= control target key end

     0   :  { %vm881_vm0 = vcmask 1043456   ;;  %vm92_vm1 = vcmask 31744   ;;  %vm107_vm2 = vcmask 24576   ;;  %v21959_v1 = vmov 0.0   ;;  %s21951_s1 = inlined_call_operand.vmem [shape: f32[9,4,8], index: 1, kind: input, shape index: {}]   ;;  %s21952_s0 = inlined_call_operand.vmem [shape: f32[2,16,16,4], index: 0, kind: input, shape index: {}]   ;;  %s21953_s3 = inlined_call_operand.vmem [shape: f32[1,4], index: 3, kind: input, shape index: {}]   ;;  %s21954_s4 = inlined_call_operand.vmem [shape: f32[1,4], index: 4, kind: input, shape index: {}]   ;;  %s21955_s2 = inlined_call_operand.vmem [shape: f32[9,8,8], index: 2, kind: input, shape index: {}]   ;;  %s21956_s5 = inlined_call_operand.vmem [shape: f32[1,8], index: 5, kind: input, shape index: {}]   ;;  %s21957_s6 = inlined_call_operand.vmem [shape: f32[1,8], index: 6, kind: input, shape index: {}]   ;;  %s21958_s7 = inlined_call_operand.vmem [shape: f32[2,16,16,8], index: 7, kind: output, shape index: {}]  }
   0x1   :  { %v16245_v0 = vld [vmem:[%s21951_s1 + $0x4] sm:$0xf]  ;;  %93 = vst.msk [vmem:[#allocation2] sm:$0xff] %vm92_vm1, %v21959_v1  ;;  %94 = vst.msk [vmem:[#allocation2 + $0x8] sm:$0xff] %vm92_vm1, %v21959_v1  ;;  %v16394_v2 = vld [vmem:[%s21951_s1] sm:$0xf] }
   0x2   :  { %97 = vst.msk [vmem:[#allocation2 + $0x1b0] sm:$0xff] %vm92_vm1, %v21959_v1  ;;  %98 = vst.msk [vmem:[#allocation2 + $0x1b8] sm:$0xff] %vm92_vm1, %v21959_v1  ;;  %vm95_vm3 = vcmask 25600   ;;  %13198 = vmatprep.subr.msk.mxu0 %vm881_vm0, %v16245_v0  ;;  %v16413_v3 = vld [vmem:[%s21953_s3] ss:$0 sm:$0xff]  ;;  %v29_v6 = vld [vmem:[%s21952_s0 + $0x8] sm:$0xff] }
   0x3   :  { %101 = vst.msk [vmem:[#allocation2 + $0x198] sm:$0xff] %vm92_vm1, %v21959_v1  ;;  %102 = vst.msk [vmem:[#allocation2 + $0x1a0] sm:$0xff] %vm92_vm1, %v21959_v1  ;;  %v16418_v4 = vld [vmem:[%s21954_s4] ss:$0 sm:$0xff]  ;;  %13199 = vmatpush3.msk.msra.mxu0 %vm881_vm0, %v16245_v0  ;;  %v30_v8 = vld [vmem:[%s21952_s0 + $0x10] sm:$0xff]  ;;  %vm590_vm4 = vcmask 1046528   ;;  %v187_v10 = vmul.f32 %v16413_v3, %v29_v6 }
   0x4   :  { %104 = vst.msk [vmem:[#allocation2 + $0x348] sm:$0xff] %vm92_vm1, %v21959_v1  ;;  %105 = vst.msk [vmem:[#allocation2 + $0x350] sm:$0xff] %vm92_vm1, %v21959_v1  ;;  %v28_v5 = vld [vmem:[%s21952_s0] sm:$0xff]  ;;  %v31_v9 = vld [vmem:[%s21952_s0 + $0x18] sm:$0xff]  ;;  %13296 = vmatprep.subr.msk.mxu0 %vm881_vm0, %v16394_v2  ;;  %v188_v11 = vmul.f32 %v16413_v3, %v30_v8  ;;  %vm1786_vm5 = vcmask 1045504   ;;  %vm5488_vm6 = vcmask 64512  }
   0x5   :  { %109 = vst.msk [vmem:[#allocation2 + $0x18] sm:$0x1] %vm107_vm2, %v21959_v1  ;;  %110 = vst.msk [vmem:[#allocation2 + $0x30] sm:$0x1] %vm107_vm2, %v21959_v1  ;;  %v186_v7 = vmul.f32 %v16413_v3, %v28_v5  ;;  %v189_v12 = vmul.f32 %v16413_v3, %v31_v9  ;;  %v32_v13 = vld [vmem:[%s21952_s0 + $0x20] sm:$0xff]  ;;  %v33_v14 = vld [vmem:[%s21952_s0 + $0x28] sm:$0xff]  ;;  %v257_v23 = vadd.f32 %v16418_v4, %v187_v10 }
   0x6   :  { %111 = vst.msk [vmem:[#allocation2 + $0x48] sm:$0x1] %vm107_vm2, %v21959_v1  ;;  %112 = vst.msk [vmem:[#allocation2 + $0x60] sm:$0x1] %vm107_vm2, %v21959_v1  ;;  %v34_v15 = vld [vmem:[%s21952_s0 + $0x30] sm:$0xff]  ;;  %v190_v17 = vmul.f32 %v16413_v3, %v32_v13  ;;  %v191_v18 = vmul.f32 %v16413_v3, %v33_v14  ;;  %v35_v19 = vld [vmem:[%s21952_s0 + $0x38] sm:$0xff]  ;;  %v258_v24 = vadd.f32 %v16418_v4, %v188_v11 }
   0x7   :  { %113 = vst.msk [vmem:[#allocation2 + $0x78] sm:$0x1] %vm107_vm2, %v21959_v1  ;;  %114 = vst.msk [vmem:[#allocation2 + $0x90] sm:$0x1] %vm107_vm2, %v21959_v1  ;;  %v256_v16 = vadd.f32 %v16418_v4, %v186_v7  ;;  %v192_v20 = vmul.f32 %v16413_v3, %v34_v15  ;;  %v36_v21 = vld [vmem:[%s21952_s0 + $0x40] sm:$0xff]  ;;  %v37_v22 = vld [vmem:[%s21952_s0 + $0x48] sm:$0xff]  ;;  %v259_v25 = vadd.f32 %v16418_v4, %v189_v12 }
   0x8   :  { %115 = vst.msk [vmem:[#allocation2 + $0xa8] sm:$0x1] %vm107_vm2, %v21959_v1  ;;  %116 = vst.msk [vmem:[#allocation2 + $0xc0] sm:$0x1] %vm107_vm2, %v21959_v1  ;;  %v193_v26 = vmul.f32 %v16413_v3, %v35_v19  ;;  %v38_v27 = vld [vmem:[%s21952_s0 + $0x50] sm:$0xff]  ;;  %v39_v28 = vld [vmem:[%s21952_s0 + $0x58] sm:$0xff]  ;;  %v260_v30 = vadd.f32 %v16418_v4, %v190_v17  ;;  %v261_v31 = vadd.f32 %v16418_v4, %v191_v18 }
   0x9   :  { %117 = vst.msk [vmem:[#allocation2 + $0xd8] sm:$0x1] %vm107_vm2, %v21959_v1  ;;  %118 = vst.msk [vmem:[#allocation2 + $0xf0] sm:$0x1] %vm107_vm2, %v21959_v1  ;;  %v40_v29 = vld [vmem:[%s21952_s0 + $0x60] sm:$0xff]  ;;  %v262_v32 = vadd.f32 %v16418_v4, %v192_v20  ;;  %v194_v33 = vmul.f32 %v16413_v3, %v36_v21  ;;  %v41_v34 = vld [vmem:[%s21952_s0 + $0x68] sm:$0xff]  ;;  %v195_v37 = vmul.f32 %v16413_v3, %v37_v22 }
   0xa   :  { %119 = vst.msk [vmem:[#allocation2 + $0x108] sm:$0x1] %vm107_vm2, %v21959_v1  ;;  %120 = vst.msk [vmem:[#allocation2 + $0x120] sm:$0x1] %vm107_vm2, %v21959_v1  ;;  %v386_v35 = vld [vmem:[#allocation2 + $0x8] sm:$0xff]  ;;  %v263_v36 = vadd.f32 %v16418_v4, %v193_v26  ;;  %v196_v38 = vmul.f32 %v16413_v3, %v38_v27  ;;  %v197_v39 = vmul.f32 %v16413_v3, %v39_v28  ;;  %v42_v40 = vld [vmem:[%s21952_s0 + $0x70] sm:$0xff] }
   0xb   :  { %121 = vst.msk [vmem:[#allocation2 + $0x138] sm:$0x1] %vm107_vm2, %v21959_v1  ;;  %122 = vst.msk [vmem:[#allocation2 + $0x150] sm:$0x1] %vm107_vm2, %v21959_v1  ;;  %v43_v41 = vld [vmem:[%s21952_s0 + $0x78] sm:$0xff]  ;;  %v592_v43 = vrot.slane %v386_v35, 1  ;;  %v264_v44 = vadd.f32 %v16418_v4, %v194_v33  ;;  %v198_v45 = vmul.f32 %v16413_v3, %v40_v29  ;;  %v199_v46 = vmul.f32 %v16413_v3, %v41_v34 }
   0xc   :  { %123 = vst.msk [vmem:[#allocation2 + $0x168] sm:$0x1] %vm107_vm2, %v21959_v1  ;;  %124 = vst.msk [vmem:[#allocation2 + $0x180] sm:$0x1] %vm107_vm2, %v21959_v1  ;;  %v44_v47 = vld [vmem:[%s21952_s0 + $0x80] sm:$0xff]  ;;  %v45_v48 = vld [vmem:[%s21952_s0 + $0x88] sm:$0xff]  ;;  %v265_v51 = vadd.f32 %v16418_v4, %v195_v37  ;;  %v266_v52 = vadd.f32 %v16418_v4, %v196_v38  ;;  %v267_v53 = vadd.f32 %v16418_v4, %v197_v39 }
   0xd   :  { %127 = vst.msk [vmem:[#allocation2 + $0x1c8] sm:$0x1] %vm107_vm2, %v21959_v1  ;;  %128 = vst.msk [vmem:[#allocation2 + $0x1e0] sm:$0x1] %vm107_vm2, %v21959_v1  ;;  %v46_v54 = vld [vmem:[%s21952_s0 + $0x90] sm:$0xff]  ;;  %v47_v55 = vld [vmem:[%s21952_s0 + $0x98] sm:$0xff]  ;;  %v268_v57 = vadd.f32 %v16418_v4, %v198_v45  ;;  %v269_v58 = vadd.f32 %v16418_v4, %v199_v46  ;;  %v200_v61 = vmul.f32 %v16413_v3, %v42_v40 }
   0xe   :  { %129 = vst.msk [vmem:[#allocation2 + $0x1f8] sm:$0x1] %vm107_vm2, %v21959_v1  ;;  %130 = vst.msk [vmem:[#allocation2 + $0x210] sm:$0x1] %vm107_vm2, %v21959_v1  ;;  %v48_v59 = vld [vmem:[%s21952_s0 + $0xa0] sm:$0xff]  ;;  %v201_v62 = vmul.f32 %v16413_v3, %v43_v41  ;;  %v202_v63 = vmul.f32 %v16413_v3, %v44_v47  ;;  %v203_v5 = vmul.f32 %v16413_v3, %v45_v48  ;;  %v50_v47 = vld [vmem:[%s21952_s0 + $0xb0] sm:$0xff] }
   0xf   :  { %131 = vst.msk [vmem:[#allocation2 + $0x228] sm:$0x1] %vm107_vm2, %v21959_v1  ;;  %132 = vst.msk [vmem:[#allocation2 + $0x240] sm:$0x1] %vm107_vm2, %v21959_v1  ;;  %v204_v6 = vmul.f32 %v16413_v3, %v46_v54  ;;  %v205_v7 = vmul.f32 %v16413_v3, %v47_v55  ;;  %v270_v9 = vadd.f32 %v16418_v4, %v200_v61  ;;  %v52_v61 = vld [vmem:[%s21952_s0 + $0xc0] sm:$0xff]  ;;  %vm5503_vm7 = vcmask 57344  }
  0x10   :  { %133 = vst.msk [vmem:[#allocation2 + $0x258] sm:$0x1] %vm107_vm2, %v21959_v1  ;;  %134 = vst.msk [vmem:[#allocation2 + $0x270] sm:$0x1] %vm107_vm2, %v21959_v1  ;;  %v271_v10 = vadd.f32 %v16418_v4, %v201_v62  ;;  %v272_v11 = vadd.f32 %v16418_v4, %v202_v63  ;;  %v206_v12 = vmul.f32 %v16413_v3, %v48_v59  ;;  %vm5491_vm8 = vcmask 58368  }
  0x11   :  { %135 = vst.msk [vmem:[#allocation2 + $0x288] sm:$0x1] %vm107_vm2, %v21959_v1  ;;  %136 = vst.msk [vmem:[#allocation2 + $0x2a0] sm:$0x1] %vm107_vm2, %v21959_v1  ;;  %v273_v17 = vadd.f32 %v16418_v4, %v203_v5  ;;  %v274_v18 = vadd.f32 %v16418_v4, %v204_v6  ;;  %v275_v19 = vadd.f32 %v16418_v4, %v205_v7  ;;  %v54_v5 = vld [vmem:[%s21952_s0 + $0xd0] sm:$0xff]  ;;  %v55_v6 = vld [vmem:[%s21952_s0 + $0xd8] sm:$0xff] }
  0x12   :  { %137 = vst.msk [vmem:[#allocation2 + $0x2b8] sm:$0x1] %vm107_vm2, %v21959_v1  ;;  %138 = vst.msk [vmem:[#allocation2 + $0x2d0] sm:$0x1] %vm107_vm2, %v21959_v1  ;;  %v276_v28 = vadd.f32 %v16418_v4, %v206_v12  ;;  %vm10778_vm9 = vcmask 64544  }
  0x13   :  { %139 = vst.msk [vmem:[#allocation2 + $0x2e8] sm:$0x1] %vm107_vm2, %v21959_v1  ;;  %140 = vst.msk [vmem:[#allocation2 + $0x300] sm:$0x1] %vm107_vm2, %v21959_v1 }
  0x14   :  { %141 = vst.msk [vmem:[#allocation2 + $0x318] sm:$0x1] %vm107_vm2, %v21959_v1  ;;  %142 = vst.msk [vmem:[#allocation2 + $0x330] sm:$0x1] %vm107_vm2, %v21959_v1 }
  0x15   :  { %145 = vst.msk [vmem:[#allocation2 + $0x29] sm:$0x1] %vm107_vm2, %v21959_v1  ;;  %146 = vst.msk [vmem:[#allocation2 + $0x41] sm:$0x1] %vm107_vm2, %v21959_v1 }
  0x16   :  { %147 = vst.msk [vmem:[#allocation2 + $0x59] sm:$0x1] %vm107_vm2, %v21959_v1  ;;  %148 = vst.msk [vmem:[#allocation2 + $0x71] sm:$0x1] %vm107_vm2, %v21959_v1 }
  0x17   :  { %149 = vst.msk [vmem:[#allocation2 + $0x89] sm:$0x1] %vm107_vm2, %v21959_v1  ;;  %150 = vst.msk [vmem:[#allocation2 + $0xa1] sm:$0x1] %vm107_vm2, %v21959_v1 }
  0x18   :  { %151 = vst.msk [vmem:[#allocation2 + $0xb9] sm:$0x1] %vm107_vm2, %v21959_v1  ;;  %152 = vst.msk [vmem:[#allocation2 + $0xd1] sm:$0x1] %vm107_vm2, %v21959_v1 }
  0x19   :  { %153 = vst.msk [vmem:[#allocation2 + $0xe9] sm:$0x1] %vm107_vm2, %v21959_v1  ;;  %154 = vst.msk [vmem:[#allocation2 + $0x101] sm:$0x1] %vm107_vm2, %v21959_v1 }
  0x1a   :  { %155 = vst.msk [vmem:[#allocation2 + $0x119] sm:$0x1] %vm107_vm2, %v21959_v1  ;;  %156 = vst.msk [vmem:[#allocation2 + $0x131] sm:$0x1] %vm107_vm2, %v21959_v1 }
  0x1b   :  { %157 = vst.msk [vmem:[#allocation2 + $0x149] sm:$0x1] %vm107_vm2, %v21959_v1  ;;  %158 = vst.msk [vmem:[#allocation2 + $0x161] sm:$0x1] %vm107_vm2, %v21959_v1 }
  0x1c   :  { %159 = vst.msk [vmem:[#allocation2 + $0x179] sm:$0x1] %vm107_vm2, %v21959_v1  ;;  %160 = vst.msk [vmem:[#allocation2 + $0x191] sm:$0x1] %vm107_vm2, %v21959_v1 }
  0x1d   :  { %163 = vst.msk [vmem:[#allocation2 + $0x1d9] sm:$0x1] %vm107_vm2, %v21959_v1  ;;  %164 = vst.msk [vmem:[#allocation2 + $0x1f1] sm:$0x1] %vm107_vm2, %v21959_v1 }
  0x1e   :  { %165 = vst.msk [vmem:[#allocation2 + $0x209] sm:$0x1] %vm107_vm2, %v21959_v1  ;;  %166 = vst.msk [vmem:[#allocation2 + $0x221] sm:$0x1] %vm107_vm2, %v21959_v1 }
  0x1f   :  { %167 = vst.msk [vmem:[#allocation2 + $0x239] sm:$0x1] %vm107_vm2, %v21959_v1  ;;  %168 = vst.msk [vmem:[#allocation2 + $0x251] sm:$0x1] %vm107_vm2, %v21959_v1 }
  0x20   :  { %169 = vst.msk [vmem:[#allocation2 + $0x269] sm:$0x1] %vm107_vm2, %v21959_v1  ;;  %170 = vst.msk [vmem:[#allocation2 + $0x281] sm:$0x1] %vm107_vm2, %v21959_v1 }
  0x21   :  { %171 = vst.msk [vmem:[#allocation2 + $0x299] sm:$0x1] %vm107_vm2, %v21959_v1  ;;  %172 = vst.msk [vmem:[#allocation2 + $0x2b1] sm:$0x1] %vm107_vm2, %v21959_v1 }
  0x22   :  { %173 = vst.msk [vmem:[#allocation2 + $0x2c9] sm:$0x1] %vm107_vm2, %v21959_v1  ;;  %174 = vst.msk [vmem:[#allocation2 + $0x2e1] sm:$0x1] %vm107_vm2, %v21959_v1 }
  0x23   :  { %175 = vst.msk [vmem:[#allocation2 + $0x2f9] sm:$0x1] %vm107_vm2, %v21959_v1  ;;  %176 = vst.msk [vmem:[#allocation2 + $0x311] sm:$0x1] %vm107_vm2, %v21959_v1 }
  0x24   :  { %177 = vst.msk [vmem:[#allocation2 + $0x329] sm:$0x1] %vm107_vm2, %v21959_v1  ;;  %178 = vst.msk [vmem:[#allocation2 + $0x341] sm:$0x1] %vm107_vm2, %v21959_v1 }
  0x25   :  { %108 = vst.msk [vmem:[#allocation2] sm:$0x1] %vm107_vm2, %v21959_v1  ;;  %125 = vst.msk [vmem:[#allocation2 + $0x198] sm:$0x1] %vm107_vm2, %v21959_v1 }
  0x26   :  { %126 = vst.msk [vmem:[#allocation2 + $0x1b0] sm:$0x1] %vm107_vm2, %v21959_v1  ;;  %143 = vst.msk [vmem:[#allocation2 + $0x348] sm:$0x1] %vm107_vm2, %v21959_v1 }
  0x27   :  { %96 = vst.msk [vmem:[#allocation2 + $0x10] sm:$0x3] %vm95_vm3, %v21959_v1  ;;  %99 = vst.msk [vmem:[#allocation2 + $0x1c0] sm:$0x3] %vm95_vm3, %v21959_v1 }
  0x28   :  { %103 = vst.msk [vmem:[#allocation2 + $0x1a8] sm:$0x3] %vm95_vm3, %v21959_v1  ;;  %106 = vst.msk [vmem:[#allocation2 + $0x358] sm:$0x3] %vm95_vm3, %v21959_v1 }
  0x29   :  { %144 = vst.msk [vmem:[#allocation2 + $0x11] sm:$0x1] %vm107_vm2, %v21959_v1  ;;  %161 = vst.msk [vmem:[#allocation2 + $0x1a9] sm:$0x1] %vm107_vm2, %v21959_v1 }
  0x2a   :  { %162 = vst.msk [vmem:[#allocation2 + $0x1c1] sm:$0x1] %vm107_vm2, %v21959_v1  ;;  %179 = vst.msk [vmem:[#allocation2 + $0x359] sm:$0x1] %vm107_vm2, %v21959_v1 }
  0x2b   :  { %321 = vst.msk [vmem:[#allocation2 + $0x19] sm:$0xff] %vm92_vm1, %v256_v16  ;;  %322 = vst.msk [vmem:[#allocation2 + $0x21] sm:$0xff] %vm92_vm1, %v257_v23 }
  0x2c   :  { %323 = vst.msk [vmem:[#allocation2 + $0x31] sm:$0xff] %vm92_vm1, %v258_v24  ;;  %324 = vst.msk [vmem:[#allocation2 + $0x39] sm:$0xff] %vm92_vm1, %v259_v25  ;;  %v385_v42 = vld [vmem:[#allocation2] sm:$0xff] }
  0x2d   :  { %325 = vst.msk [vmem:[#allocation2 + $0x49] sm:$0xff] %vm92_vm1, %v260_v30  ;;  %326 = vst.msk [vmem:[#allocation2 + $0x51] sm:$0xff] %vm92_vm1, %v261_v31  ;;  %v591_v49 = vrot.slane %v385_v42, 1  ;;  %v49_v42 = vld [vmem:[%s21952_s0 + $0xa8] sm:$0xff] }
  0x2e   :  { %327 = vst.msk [vmem:[#allocation2 + $0x61] sm:$0xff] %vm92_vm1, %v262_v32  ;;  %328 = vst.msk [vmem:[#allocation2 + $0x69] sm:$0xff] %vm92_vm1, %v263_v36 }
  0x2f   :  { %329 = vst.msk [vmem:[#allocation2 + $0x79] sm:$0xff] %vm92_vm1, %v264_v44  ;;  %v593_v60 = vsel %vm590_vm4, %v591_v49, %v592_v43  ;;  %330 = vst.msk [vmem:[#allocation2 + $0x81] sm:$0xff] %vm92_vm1, %v265_v51 }
  0x30   :  { %v387_v50 = vld [vmem:[#allocation2 + $0x10] sm:$0x3]  ;;  %331 = vst.msk [vmem:[#allocation2 + $0x91] sm:$0xff] %vm92_vm1, %v266_v52  ;;  %332 = vst.msk [vmem:[#allocation2 + $0x99] sm:$0xff] %vm92_vm1, %v267_v53  ;;  %13200 = vmatprep.mubr.msk.f32.mxu0 %vm92_vm1, %v593_v60  ;;  %v207_v52 = vmul.f32 %v16413_v3, %v49_v42  ;;  %v51_v60 = vld [vmem:[%s21952_s0 + $0xb8] sm:$0xff] }
  0x31   :  { %v594_v56 = vrot.slane %v387_v50, 1  ;;  %333 = vst.msk [vmem:[#allocation2 + $0xa9] sm:$0xff] %vm92_vm1, %v268_v57  ;;  %334 = vst.msk [vmem:[#allocation2 + $0xb1] sm:$0xff] %vm92_vm1, %v269_v58  ;;  %v208_v57 = vmul.f32 %v16413_v3, %v50_v47  ;;  %v62_v42 = vld [vmem:[%s21952_s0 + $0x110] sm:$0xff] }
  0x32   :  { %v16547_v8 = vld [vmem:[#allocation2 + $0x18] sm:$0xff]  ;;  %v16555_v13 = vld [vmem:[#allocation2 + $0x20] sm:$0xff]  ;;  %v390_v15 = vld [vmem:[#allocation2 + $0x28] sm:$0x3]  ;;  %335 = vst.msk [vmem:[#allocation2 + $0xc1] sm:$0xff] %vm92_vm1, %v270_v9  ;;  %v277_v12 = vadd.f32 %v16418_v4, %v207_v52 }
  0x33   :  { %v595_v0 = vsel %vm590_vm4, %v592_v43, %v594_v56  ;;  %v596_v14 = vrot.slane %v16547_v8, 1  ;;  %v16558_v16 = vld [vmem:[#allocation2 + $0x30] sm:$0xff]  ;;  %v597_v20 = vrot.slane %v16555_v13, 1  ;;  %v599_v21 = vrot.slane %v390_v15, 1  ;;  %v16564_v22 = vld [vmem:[#allocation2 + $0x38] sm:$0xff]  ;;  %336 = vst.msk [vmem:[#allocation2 + $0xc9] sm:$0xff] %vm92_vm1, %v271_v10 }
  0x34   :  { %13201 = vmatmul.mubr.msk.f32.vlgmr.msra.gmra.mrb[0].mxu0 %vm92_vm1, %v595_v0  ;;  %v393_v23 = vld [vmem:[#allocation2 + $0x40] sm:$0x3]  ;;  %337 = vst.msk [vmem:[#allocation2 + $0xd9] sm:$0xff] %vm92_vm1, %v272_v11  ;;  %v602_v24 = vrot.slane %v16564_v22, 1  ;;  %v16571_v26 = vld [vmem:[#allocation2 + $0x48] sm:$0xff]  ;;  %v16573_v27 = vld [vmem:[#allocation2 + $0x50] sm:$0xff] }
  0x35   :  { %13297 = vmatpush3.msk.msra.mxu0 %vm881_vm0, %v16394_v2  ;;  %v601_v2 = vrot.slane %v16558_v16, 1  ;;  %v604_v25 = vrot.slane %v393_v23, 1  ;;  %338 = vst.msk [vmem:[#allocation2 + $0xe1] sm:$0xff] %vm92_vm1, %v273_v17  ;;  %339 = vst.msk [vmem:[#allocation2 + $0xf1] sm:$0xff] %vm92_vm1, %v274_v18  ;;  %v16580_v29 = vsel %vm590_vm4, %v596_v14, %v597_v20  ;;  %v16583_v30 = vsel %vm590_vm4, %v597_v20, %v599_v21  ;;  %v396_v33 = vld [vmem:[#allocation2 + $0x58] sm:$0x3] }
  0x36   :  { %340 = vst.msk [vmem:[#allocation2 + $0xf9] sm:$0xff] %vm92_vm1, %v275_v19  ;;  %22508 = vst [vmem:[#allocation4_spill] sm:$0xff] %v16580_v29  ;;  %v606_v31 = vrot.slane %v16571_v26, 1  ;;  %v607_v32 = vrot.slane %v16573_v27, 1  ;;  %13203 = vmatprep.mubr.msk.f32.mxu0 %vm92_vm1, %v16580_v29  ;;  %v16592_v35 = vld [vmem:[#allocation2 + $0x60] sm:$0xff]  ;;  %v16594_v36 = vld [vmem:[#allocation2 + $0x68] sm:$0xff]  ;;  %v209_v19 = vmul.f32 %v16413_v3, %v51_v60  ;;  %v278_v20 = vadd.f32 %v16418_v4, %v208_v57 }
  0x37   :  { %22509 = vst [vmem:[#allocation5_spill] sm:$0xff] %v16583_v30  ;;  %v16590_v34 = vsel %vm590_vm4, %v601_v2, %v602_v24  ;;  %341 = vst.msk [vmem:[#allocation2 + $0x109] sm:$0xff] %vm92_vm1, %v276_v28  ;;  %v399_v37 = vld [vmem:[#allocation2 + $0x70] sm:$0x3]  ;;  %v16602_v38 = vsel %vm590_vm4, %v602_v24, %v604_v25  ;;  %v609_v39 = vrot.slane %v396_v33, 1  ;;  %v16604_v40 = vld [vmem:[#allocation2 + $0x78] sm:$0xff]  ;;  %v210_v2 = vmul.f32 %v16413_v3, %v52_v61 }
  0x38   :  { %22510 = vst [vmem:[#allocation6_spill] sm:$0xff] %v16590_v34  ;;  %13204 = vmatmul.mubr.msk.f32.gmra.mrb[2].mxu0 %vm92_vm1, %v16583_v30  ;;  %22511 = vst [vmem:[#allocation7_spill] sm:$0xff] %v16602_v38  ;;  %v16606_v41 = vld [vmem:[#allocation2 + $0x80] sm:$0xff]  ;;  %v16612_v43 = vsel %vm590_vm4, %v606_v31, %v607_v32  ;;  %v611_v44 = vrot.slane %v16592_v35, 1  ;;  %v612_v45 = vrot.slane %v16594_v36, 1  ;;  %v614_v48 = vrot.slane %v399_v37, 1 }
  0x39   :  { %13206 = vmatprep.mubr.msk.f32.mxu0 %vm92_vm1, %v16590_v34  ;;  %22512 = vst [vmem:[#allocation8_spill] sm:$0xff] %v16612_v43  ;;  %v402_v46 = vld [vmem:[#allocation2 + $0x88] sm:$0x3]  ;;  %v616_v49 = vrot.slane %v16604_v40, 1  ;;  %v617_v50 = vrot.slane %v16606_v41, 1  ;;  %v16623_v51 = vld [vmem:[#allocation2 + $0x90] sm:$0xff]  ;;  %v16629_v53 = vsel %vm590_vm4, %v607_v32, %v609_v39  ;;  %v212_v24 = vmul.f32 %v16413_v3, %v54_v5 }
  0x3a   :  { %22513 = vst [vmem:[#allocation9_spill] sm:$0xff] %v16629_v53  ;;  %v619_v54 = vrot.slane %v402_v46, 1  ;;  %v16631_v55 = vld [vmem:[#allocation2 + $0x98] sm:$0xff]  ;;  %v405_v56 = vld [vmem:[#allocation2 + $0xa0] sm:$0x3]  ;;  %v16635_v58 = vsel %vm590_vm4, %v611_v44, %v612_v45  ;;  %v16637_v59 = vld [vmem:[#allocation2 + $0xa8] sm:$0xff]  ;;  %v16646_v62 = vsel %vm590_vm4, %v612_v45, %v614_v48  ;;  %v213_v25 = vmul.f32 %v16413_v3, %v55_v6 }
  0x3b   :  { %22514 = vst [vmem:[#allocation10_spill] sm:$0xff] %v16635_v58  ;;  %22515 = vst [vmem:[#allocation11_spill] sm:$0xff] %v16646_v62  ;;  %v621_v63 = vrot.slane %v16623_v51, 1  ;;  %v53_v0 = vld [vmem:[%s21952_s0 + $0xc8] sm:$0xff]  ;;  %v16661_v7 = vsel %vm590_vm4, %v616_v49, %v617_v50  ;;  %v622_v9 = vrot.slane %v16631_v55, 1  ;;  %v624_v10 = vrot.slane %v405_v56, 1 }
  0x3c   :  { %13207 = vmatmul.mubr.msk.f32.gmra.mrb[4].mxu0 %vm92_vm1, %v16602_v38  ;;  %22516 = vst [vmem:[#allocation12_spill] sm:$0xff] %v16661_v7  ;;  %v16664_v11 = vld [vmem:[#allocation2 + $0xb0] sm:$0xff]  ;;  %v56_v14 = vld [vmem:[%s21952_s0 + $0xe0] sm:$0xff]  ;;  %v57_v15 = vld [vmem:[%s21952_s0 + $0xe8] sm:$0xff]  ;;  %v16676_v17 = vsel %vm590_vm4, %v617_v50, %v619_v54  ;;  %v626_v18 = vrot.slane %v16637_v59, 1  ;;  %v211_v23 = vmul.f32 %v16413_v3, %v53_v0  ;;  %v279_v32 = vadd.f32 %v16418_v4, %v209_v19 }
  0x3d   :  { %13209 = vmatprep.mubr.msk.f32.mxu0 %vm92_vm1, %v16612_v43  ;;  %22517 = vst [vmem:[#allocation13_spill] sm:$0xff] %v16676_v17  ;;  %v16681_v21 = vld [vmem:[#allocation2 + $0xb8] sm:$0x3]  ;;  %342 = vst.msk [vmem:[#allocation2 + $0x111] sm:$0xff] %vm92_vm1, %v277_v12  ;;  %v60_v28 = vld [vmem:[%s21952_s0 + $0x100] sm:$0xff]  ;;  %v627_v31 = vrot.slane %v16664_v11, 1  ;;  %v214_v33 = vmul.f32 %v16413_v3, %v56_v14  ;;  %v215_v37 = vmul.f32 %v16413_v3, %v57_v15 }
  0x3e   :  { %343 = vst.msk [vmem:[#allocation2 + $0x121] sm:$0xff] %vm92_vm1, %v278_v20  ;;  %v61_v39 = vld [vmem:[%s21952_s0 + $0x108] sm:$0xff]  ;;  %v63_v44 = vld [vmem:[%s21952_s0 + $0x118] sm:$0xff]  ;;  %v16707_v45 = vld [vmem:[#allocation2 + $0xc0] sm:$0xff]  ;;  %v280_v46 = vadd.f32 %v16418_v4, %v210_v2  ;;  %v281_v47 = vadd.f32 %v16418_v4, %v211_v23  ;;  %v282_v48 = vadd.f32 %v16418_v4, %v212_v24  ;;  %v283_v49 = vadd.f32 %v16418_v4, %v213_v25 }
  0x3f   :  { %v64_v50 = vld [vmem:[%s21952_s0 + $0x120] sm:$0xff]  ;;  %v65_v52 = vld [vmem:[%s21952_s0 + $0x128] sm:$0xff]  ;;  %v16722_v54 = vsel %vm590_vm4, %v621_v63, %v622_v9  ;;  %v16725_v56 = vsel %vm590_vm4, %v622_v9, %v624_v10  ;;  %344 = vst.msk [vmem:[#allocation2 + $0x129] sm:$0xff] %vm92_vm1, %v279_v32  ;;  %v284_v57 = vadd.f32 %v16418_v4, %v214_v33  ;;  %v285_v60 = vadd.f32 %v16418_v4, %v215_v37  ;;  %v66_v6 = vld [vmem:[%s21952_s0 + $0x130] sm:$0xff] }
  0x40   :  { %13210 = vmatmul.mubr.msk.f32.gmra.mrb[6].mxu0 %vm92_vm1, %v16629_v53  ;;  %22518 = vst [vmem:[#allocation14_spill] sm:$0xff] %v16722_v54  ;;  %22519 = vst [vmem:[#allocation15_spill] sm:$0xff] %v16725_v56  ;;  %v218_v61 = vmul.f32 %v16413_v3, %v60_v28  ;;  %v219_v63 = vmul.f32 %v16413_v3, %v61_v39  ;;  %v220_v0 = vmul.f32 %v16413_v3, %v62_v42  ;;  %v67_v9 = vld [vmem:[%s21952_s0 + $0x138] sm:$0xff]  ;;  %v16745_v12 = vld [vmem:[#allocation2 + $0xc8] sm:$0xff] }
  0x41   :  { %13212 = vmatprep.mubr.msk.f32.mxu0 %vm92_vm1, %v16635_v58  ;;  %345 = vst.msk [vmem:[#allocation2 + $0x139] sm:$0xff] %vm92_vm1, %v280_v46  ;;  %346 = vst.msk [vmem:[#allocation2 + $0x141] sm:$0xff] %vm92_vm1, %v281_v47  ;;  %v221_v5 = vmul.f32 %v16413_v3, %v63_v44  ;;  %v629_v10 = vrot.slane %v16681_v21, 1  ;;  %v631_v14 = vrot.slane %v16707_v45, 1  ;;  %v222_v15 = vmul.f32 %v16413_v3, %v64_v50  ;;  %v68_v20 = vld [vmem:[%s21952_s0 + $0x140] sm:$0xff]  ;;  %v69_v21 = vld [vmem:[%s21952_s0 + $0x148] sm:$0xff] }
  0x42   :  { %347 = vst.msk [vmem:[#allocation2 + $0x151] sm:$0xff] %vm92_vm1, %v282_v48  ;;  %348 = vst.msk [vmem:[#allocation2 + $0x159] sm:$0xff] %vm92_vm1, %v283_v49  ;;  %v223_v19 = vmul.f32 %v16413_v3, %v65_v52  ;;  %v288_v2 = vadd.f32 %v16418_v4, %v218_v61  ;;  %v289_v23 = vadd.f32 %v16418_v4, %v219_v63  ;;  %v70_v28 = vld [vmem:[%s21952_s0 + $0x150] sm:$0xff]  ;;  %v16770_v32 = vld [vmem:[%s21951_s1 + $0x8] sm:$0xf]  ;;  %v632_v46 = vrot.slane %v16745_v12, 1 }
  0x43   :  { %349 = vst.msk [vmem:[#allocation2 + $0x169] sm:$0xff] %vm92_vm1, %v284_v57  ;;  %350 = vst.msk [vmem:[#allocation2 + $0x171] sm:$0xff] %vm92_vm1, %v285_v60  ;;  %v290_v24 = vadd.f32 %v16418_v4, %v220_v0  ;;  %v291_v25 = vadd.f32 %v16418_v4, %v221_v5  ;;  %v292_v33 = vadd.f32 %v16418_v4, %v222_v15  ;;  %v16786_v47 = vld [vmem:[#allocation2 + $0xd0] sm:$0x3]  ;;  %13394 = vmatprep.subr.msk.mxu0 %vm881_vm0, %v16770_v32  ;;  %v16799_v50 = vld [vmem:[#allocation2 + $0xd8] sm:$0xff] }
  0x44   :  { %13213 = vmatmul.mubr.msk.f32.gmra.mrb[8].mxu0 %vm92_vm1, %v16646_v62  ;;  %v293_v37 = vadd.f32 %v16418_v4, %v223_v19  ;;  %v224_v39 = vmul.f32 %v16413_v3, %v66_v6  ;;  %v225_v42 = vmul.f32 %v16413_v3, %v67_v9  ;;  %v16783_v44 = vsel %vm590_vm4, %v626_v18, %v627_v31  ;;  %v71_v18 = vld [vmem:[%s21952_s0 + $0x158] sm:$0xff]  ;;  %v16801_v52 = vld [vmem:[#allocation2 + $0xe0] sm:$0xff]  ;;  %v85_v53 = vld [vmem:[%s21952_s0 + $0x1c8] sm:$0xff] }
  0x45   :  { %13215 = vmatprep.mubr.msk.f32.mxu0 %vm92_vm1, %v16661_v7  ;;  %22520 = vst [vmem:[#allocation16_spill] sm:$0xff] %v16783_v44  ;;  %22521 = vst [vmem:[#allocation17_spill] sm:$0xff] %v16786_v47  ;;  %v226_v48 = vmul.f32 %v16413_v3, %v68_v20  ;;  %v227_v49 = vmul.f32 %v16413_v3, %v69_v21  ;;  %v228_v61 = vmul.f32 %v16413_v3, %v70_v28  ;;  %v16850_v28 = vld [vmem:[#allocation2 + $0x110] sm:$0xff] }
  0x46   :  { %353 = vst.msk [vmem:[#allocation2 + $0x1c9] sm:$0xff] %vm92_vm1, %v288_v2  ;;  %354 = vst.msk [vmem:[#allocation2 + $0x1d1] sm:$0xff] %vm92_vm1, %v289_v23  ;;  %v294_v57 = vadd.f32 %v16418_v4, %v224_v39  ;;  %v295_v60 = vadd.f32 %v16418_v4, %v225_v42  ;;  %v16817_v5 = vsel %vm590_vm4, %v627_v31, %v629_v10  ;;  %v634_v6 = vrot.slane %v16786_v47, 1  ;;  %v16829_v2 = vld [vmem:[#allocation2 + $0xe8] sm:$0x3]  ;;  %v16833_v31 = vld [vmem:[#allocation2 + $0xf0] sm:$0xff] }
  0x47   :  { %355 = vst.msk [vmem:[#allocation2 + $0x1e1] sm:$0xff] %vm92_vm1, %v290_v24  ;;  %356 = vst.msk [vmem:[#allocation2 + $0x1e9] sm:$0xff] %vm92_vm1, %v291_v25  ;;  %v296_v63 = vadd.f32 %v16418_v4, %v226_v48  ;;  %v297_v0 = vadd.f32 %v16418_v4, %v227_v49  ;;  %v229_v9 = vmul.f32 %v16413_v3, %v71_v18  ;;  %v636_v20 = vrot.slane %v16799_v50, 1  ;;  %v16835_v10 = vld [vmem:[#allocation2 + $0xf8] sm:$0xff]  ;;  %v16848_v25 = vld [vmem:[#allocation2 + $0x108] sm:$0xff] }
  0x48   :  { %13216 = vmatmul.mubr.msk.f32.gmra.mrb[10].mxu0 %vm92_vm1, %v16676_v17  ;;  %357 = vst.msk [vmem:[#allocation2 + $0x1f9] sm:$0xff] %vm92_vm1, %v292_v33  ;;  %358 = vst.msk [vmem:[#allocation2 + $0x201] sm:$0xff] %vm92_vm1, %v293_v37  ;;  %v298_v15 = vadd.f32 %v16418_v4, %v228_v61  ;;  %v16825_v19 = vsel %vm590_vm4, %v631_v14, %v632_v46  ;;  %v637_v21 = vrot.slane %v16801_v52, 1  ;;  %v16840_v14 = vld [vmem:[#allocation2 + $0x100] sm:$0x3]  ;;  %v639_v24 = vrot.slane %v16829_v2, 1 }
  0x49   :  { %13218 = vmatprep.mubr.msk.f32.mxu0 %vm92_vm1, %v16722_v54  ;;  %22522 = vst [vmem:[#allocation18_spill] sm:$0xff] %v16817_v5  ;;  %359 = vst.msk [vmem:[#allocation2 + $0x211] sm:$0xff] %vm92_vm1, %v294_v57  ;;  %v16845_v23 = vsel %vm590_vm4, %v632_v46, %v634_v6  ;;  %v16852_v33 = vld [vmem:[#allocation2 + $0x118] sm:$0x3]  ;;  %v299_v37 = vadd.f32 %v16418_v4, %v229_v9  ;;  %v641_v42 = vrot.slane %v16833_v31, 1  ;;  %v642_v48 = vrot.slane %v16835_v10, 1 }
  0x4a   :  { %360 = vst.msk [vmem:[#allocation2 + $0x219] sm:$0xff] %vm92_vm1, %v295_v60  ;;  %22523 = vst [vmem:[#allocation19_spill] sm:$0xff] %v16825_v19  ;;  %v16856_v39 = vsel %vm590_vm4, %v636_v20, %v637_v21  ;;  %v72_v46 = vld [vmem:[%s21952_s0 + $0x160] sm:$0xff]  ;;  %v644_v49 = vrot.slane %v16840_v14, 1  ;;  %v646_v18 = vrot.slane %v16848_v25, 1  ;;  %v647_v57 = vrot.slane %v16850_v28, 1 }
  0x4b   :  { %22524 = vst [vmem:[#allocation20_spill] sm:$0xff] %v16829_v2  ;;  %361 = vst.msk [vmem:[#allocation2 + $0x229] sm:$0xff] %vm92_vm1, %v296_v63  ;;  %v649_v60 = vrot.slane %v16852_v33, 1  ;;  %v16870_v61 = vld [vmem:[#allocation2 + $0x120] sm:$0xff]  ;;  %v16872_v63 = vld [vmem:[#allocation2 + $0x128] sm:$0xff]  ;;  %v16886_v20 = vsel %vm590_vm4, %v641_v42, %v642_v48 }
  0x4c   :  { %13219 = vmatmul.mubr.msk.f32.gmra.mrb[12].mxu0 %vm92_vm1, %v16725_v56  ;;  %362 = vst.msk [vmem:[#allocation2 + $0x231] sm:$0xff] %vm92_vm1, %v297_v0  ;;  %363 = vst.msk [vmem:[#allocation2 + $0x241] sm:$0xff] %vm92_vm1, %v298_v15  ;;  %v16877_v0 = vsel %vm590_vm4, %v637_v21, %v639_v24  ;;  %v16879_v6 = vld [vmem:[#allocation2 + $0x130] sm:$0x3]  ;;  %v73_v9 = vld [vmem:[%s21952_s0 + $0x168] sm:$0xff]  ;;  %v230_v15 = vmul.f32 %v16413_v3, %v72_v46  ;;  %v16896_v24 = vsel %vm590_vm4, %v642_v48, %v644_v49 }
  0x4d   :  { %13221 = vmatprep.mubr.msk.f32.mxu0 %vm92_vm1, %v16783_v44  ;;  %22525 = vst [vmem:[#allocation21_spill] sm:$0xff] %v16840_v14  ;;  %22526 = vst [vmem:[#allocation22_spill] sm:$0xff] %v16845_v23  ;;  %v16890_v1 = vld [vmem:[#allocation2 + $0x140] sm:$0xff]  ;;  %v74_v21 = vld [vmem:[%s21952_s0 + $0x170] sm:$0xff]  ;;  %v16912_v48 = vsel %vm590_vm4, %v646_v18, %v647_v57  ;;  %v16915_v49 = vsel %vm590_vm4, %v647_v57, %v649_v60  ;;  %v231_v56 = vmul.f32 %v16413_v3, %v73_v9 }
  0x4e   :  { %22527 = vst [vmem:[#allocation23_spill] sm:$0xff] %v16852_v33  ;;  %22528 = vst [vmem:[#allocation24_spill] sm:$0xff] %v16856_v39  ;;  %v75_v42 = vld [vmem:[%s21952_s0 + $0x178] sm:$0xff]  ;;  %v76_v46 = vld [vmem:[%s21952_s0 + $0x180] sm:$0xff]  ;;  %v300_v57 = vadd.f32 %v16418_v4, %v230_v15  ;;  %v232_v60 = vmul.f32 %v16413_v3, %v74_v21 }
  0x4f   :  { %364 = vst.msk [vmem:[#allocation2 + $0x249] sm:$0xff] %vm92_vm1, %v299_v37  ;;  %22529 = vst [vmem:[#allocation25_spill] sm:$0xff] %v16877_v0  ;;  %v16888_v37 = vld [vmem:[#allocation2 + $0x138] sm:$0xff]  ;;  %v16918_v44 = vld [vmem:[#allocation2 + $0x148] sm:$0x3]  ;;  %v301_v7 = vadd.f32 %v16418_v4, %v231_v56  ;;  %v233_v62 = vmul.f32 %v16413_v3, %v75_v42 }
  0x50   :  { %13222 = vmatmul.mubr.msk.f32.gmra.mrb[14].mxu0 %vm92_vm1, %v16817_v5  ;;  %22530 = vst [vmem:[#allocation26_spill] sm:$0xff] %v16879_v6  ;;  %22531 = vst [vmem:[#allocation27_spill] sm:$0xff] %v16886_v20  ;;  %v654_v5 = vrot.slane %v16879_v6, 1  ;;  %v78_v54 = vld [vmem:[%s21952_s0 + $0x190] sm:$0xff]  ;;  %v79_v17 = vld [vmem:[%s21952_s0 + $0x198] sm:$0xff]  ;;  %v302_v58 = vadd.f32 %v16418_v4, %v232_v60 }
  0x51   :  { %13224 = vmatprep.mubr.msk.f32.mxu0 %vm92_vm1, %v16825_v19  ;;  %22532 = vst [vmem:[#allocation28_spill] sm:$0xff] %v16896_v24  ;;  %v77_v19 = vld [vmem:[%s21952_s0 + $0x188] sm:$0xff]  ;;  %22533 = vst [vmem:[#allocation29_spill] sm:$0xff] %v16912_v48  ;;  %v16933_v9 = vld [vmem:[#allocation2 + $0x150] sm:$0xff]  ;;  %v236_v56 = vmul.f32 %v16413_v3, %v78_v54  ;;  %v237_v60 = vmul.f32 %v16413_v3, %v79_v17 }
  0x52   :  { %22534 = vst [vmem:[#allocation30_spill] sm:$0xff] %v16915_v49  ;;  %22535 = vst [vmem:[#allocation31_spill] sm:$0xff] %v16918_v44  ;;  %v80_v15 = vld [vmem:[%s21952_s0 + $0x1a0] sm:$0xff]  ;;  %v81_v42 = vld [vmem:[%s21952_s0 + $0x1a8] sm:$0xff]  ;;  %v661_v17 = vrot.slane %v16933_v9, 1 }
  0x53   :  { %365 = vst.msk [vmem:[#allocation2 + $0x259] sm:$0xff] %vm92_vm1, %v300_v57  ;;  %366 = vst.msk [vmem:[#allocation2 + $0x261] sm:$0xff] %vm92_vm1, %v301_v7  ;;  %v84_v18 = vld [vmem:[%s21952_s0 + $0x1c0] sm:$0xff]  ;;  %v86_v7 = vld [vmem:[%s21952_s0 + $0x1d0] sm:$0xff] }
  0x54   :  { %13225 = vmatmul.mubr.msk.f32.gmra.mrb[16].mxu0 %vm92_vm1, %v16845_v23  ;;  %v652_v23 = vrot.slane %v16872_v63, 1  ;;  %367 = vst.msk [vmem:[#allocation2 + $0x271] sm:$0xff] %vm92_vm1, %v302_v58  ;;  %v17118_v43 = vld [vmem:[#allocation2 + $0x1f8] sm:$0xff]  ;;  %v17120_v38 = vld [vmem:[#allocation2 + $0x200] sm:$0xff]  ;;  %v17134_v34 = vld [vmem:[#allocation2 + $0x208] sm:$0x3] }
  0x55   :  { %13227 = vmatprep.mubr.msk.f32.mxu0 %vm92_vm1, %v16856_v39  ;;  %v651_v39 = vrot.slane %v16870_v61, 1  ;;  %22556 = vst [vmem:[#allocation48_spill] sm:$0xff] %v17134_v34  ;;  %v17136_v30 = vld [vmem:[#allocation2 + $0x210] sm:$0xff] }
  0x57   :  { %v16943_v21 = vsel %vm590_vm4, %v651_v39, %v652_v23  ;;  %v83_v39 = vld [vmem:[%s21952_s0 + $0x1b8] sm:$0xff] }
  0x58   :  { %13228 = vmatmul.mubr.msk.f32.gmra.mrb[18].mxu0 %vm92_vm1, %v16877_v0  ;;  %v235_v0 = vmul.f32 %v16413_v3, %v77_v19  ;;  %22536 = vst [vmem:[#allocation32_spill] sm:$0xff] %v16943_v21  ;;  %v82_v19 = vld [vmem:[%s21952_s0 + $0x1b0] sm:$0xff] }
  0x59   :  { %13230 = vmatprep.mubr.msk.f32.mxu0 %vm92_vm1, %v16886_v20  ;;  %v234_v20 = vmul.f32 %v16413_v3, %v76_v46  ;;  %v303_v46 = vadd.f32 %v16418_v4, %v233_v62  ;;  %v16977_v62 = vsel %vm590_vm4, %v652_v23, %v654_v5  ;;  %v307_v5 = vadd.f32 %v16418_v4, %v237_v60 }
  0x5a   :  { %v305_v57 = vadd.f32 %v16418_v4, %v235_v0  ;;  %22537 = vst [vmem:[#allocation33_spill] sm:$0xff] %v16977_v62  ;;  %v306_v0 = vadd.f32 %v16418_v4, %v236_v56  ;;  %v239_v23 = vmul.f32 %v16413_v3, %v81_v42  ;;  %v240_v58 = vmul.f32 %v16413_v3, %v82_v19  ;;  %v89_v19 = vld [vmem:[%s21952_s0 + $0x1e8] sm:$0xff] }
  0x5b   :  { %v304_v54 = vadd.f32 %v16418_v4, %v234_v20  ;;  %v238_v20 = vmul.f32 %v16413_v3, %v80_v15  ;;  %368 = vst.msk [vmem:[#allocation2 + $0x279] sm:$0xff] %vm92_vm1, %v303_v46  ;;  %v241_v56 = vmul.f32 %v16413_v3, %v83_v39  ;;  %v88_v15 = vld [vmem:[%s21952_s0 + $0x1e0] sm:$0xff]  ;;  %v244_v42 = vmul.f32 %v16413_v3, %v86_v7  ;;  %v17210_v6 = vld [vmem:[#allocation2 + $0x268] sm:$0x3]  ;;  %v17212_v33 = vld [vmem:[#allocation2 + $0x270] sm:$0xff] }
  0x5c   :  { %13231 = vmatmul.mubr.msk.f32.gmra.mrb[20].mxu0 %vm92_vm1, %v16896_v24  ;;  %v87_v24 = vld [vmem:[%s21952_s0 + $0x1d8] sm:$0xff]  ;;  %370 = vst.msk [vmem:[#allocation2 + $0x291] sm:$0xff] %vm92_vm1, %v305_v57  ;;  %371 = vst.msk [vmem:[#allocation2 + $0x2a1] sm:$0xff] %vm92_vm1, %v306_v0  ;;  %v243_v57 = vmul.f32 %v16413_v3, %v85_v53  ;;  %v309_v39 = vadd.f32 %v16418_v4, %v239_v23  ;;  %v310_v60 = vadd.f32 %v16418_v4, %v240_v58 }
  0x5d   :  { %13233 = vmatprep.mubr.msk.f32.mxu0 %vm92_vm1, %v16912_v48  ;;  %369 = vst.msk [vmem:[#allocation2 + $0x289] sm:$0xff] %vm92_vm1, %v304_v54  ;;  %v16996_v48 = vld [vmem:[#allocation2 + $0x158] sm:$0xff]  ;;  %v308_v46 = vadd.f32 %v16418_v4, %v238_v20  ;;  %v242_v54 = vmul.f32 %v16413_v3, %v84_v18  ;;  %372 = vst.msk [vmem:[#allocation2 + $0x2a9] sm:$0xff] %vm92_vm1, %v307_v5  ;;  %v311_v0 = vadd.f32 %v16418_v4, %v241_v56 }
  0x5e   :  { %v245_v18 = vmul.f32 %v16413_v3, %v87_v24  ;;  %v313_v7 = vadd.f32 %v16418_v4, %v243_v57  ;;  %v314_v20 = vadd.f32 %v16418_v4, %v244_v42  ;;  %v246_v5 = vmul.f32 %v16413_v3, %v88_v15  ;;  %374 = vst.msk [vmem:[#allocation2 + $0x2c1] sm:$0xff] %vm92_vm1, %v309_v39  ;;  %v17037_v57 = vld [vmem:[#allocation2 + $0x170] sm:$0xff] }
  0x5f   :  { %373 = vst.msk [vmem:[#allocation2 + $0x2b9] sm:$0xff] %vm92_vm1, %v308_v46  ;;  %v312_v53 = vadd.f32 %v16418_v4, %v242_v54  ;;  %v22538_v23 = vrot.slane %v16890_v1, 1  ;;  %v22539_v58 = vrot.slane %v16888_v37, 1  ;;  %v662_v24 = vrot.slane %v16996_v48, 1  ;;  %375 = vst.msk [vmem:[#allocation2 + $0x2d1] sm:$0xff] %vm92_vm1, %v310_v60  ;;  %v17035_v54 = vld [vmem:[#allocation2 + $0x168] sm:$0xff] }
  0x60   :  { %13234 = vmatmul.mubr.msk.f32.gmra.mrb[22].mxu0 %vm92_vm1, %v16915_v49  ;;  %376 = vst.msk [vmem:[#allocation2 + $0x2d9] sm:$0xff] %vm92_vm1, %v311_v0  ;;  %v315_v46 = vadd.f32 %v16418_v4, %v245_v18  ;;  %v247_v15 = vmul.f32 %v16413_v3, %v89_v19  ;;  %378 = vst.msk [vmem:[#allocation2 + $0x2f1] sm:$0xff] %vm92_vm1, %v313_v7  ;;  %v316_v42 = vadd.f32 %v16418_v4, %v246_v5  ;;  %v17063_v7 = vld [vmem:[#allocation2 + $0x178] sm:$0x3]  ;;  %v17116_v49 = vld [vmem:[#allocation2 + $0x1f0] sm:$0x3] }
  0x61   :  { %13236 = vmatprep.mubr.msk.f32.mxu0 %vm92_vm1, %v16943_v21  ;;  %v17025_v56 = vsel %vm590_vm4, %v22539_v58, %v22538_v23  ;;  %v17028_v21 = vld [vmem:[#allocation2 + $0x160] sm:$0x3]  ;;  %377 = vst.msk [vmem:[#allocation2 + $0x2e9] sm:$0xff] %vm92_vm1, %v312_v53  ;;  %379 = vst.msk [vmem:[#allocation2 + $0x301] sm:$0xff] %vm92_vm1, %v314_v20  ;;  %v22542_v3 = vrot.slane %v16918_v44, 1  ;;  %v22543_v19 = vmov %v22538_v23  ;;  %v17059_v18 = vsel %vm590_vm4, %v661_v17, %v662_v24  ;;  %v17066_v20 = vld [vmem:[#allocation2 + $0x1b0] sm:$0xff] }
  0x62   :  { %22540 = vst [vmem:[#allocation34_spill] sm:$0xff] %v17025_v56  ;;  %22541 = vst [vmem:[#allocation35_spill] sm:$0xff] %v17028_v21  ;;  %v317_v39 = vadd.f32 %v16418_v4, %v247_v15  ;;  %v664_v0 = vrot.slane %v17028_v21, 1  ;;  %v666_v53 = vrot.slane %v17035_v54, 1  ;;  %v667_v4 = vrot.slane %v17037_v57, 1  ;;  %v17068_v5 = vld [vmem:[#allocation2 + $0x1b8] sm:$0xff] }
  0x63   :  { %380 = vst.msk [vmem:[#allocation2 + $0x309] sm:$0xff] %vm92_vm1, %v315_v46  ;;  %v17054_v60 = vsel %vm590_vm4, %v22543_v19, %v22542_v3  ;;  %381 = vst.msk [vmem:[#allocation2 + $0x319] sm:$0xff] %vm92_vm1, %v316_v42  ;;  %v669_v23 = vrot.slane %v17063_v7, 1  ;;  %v671_v46 = vrot.slane %v17066_v20, 1  ;;  %v672_v15 = vrot.slane %v17068_v5, 1  ;;  %v17087_v3 = vld [vmem:[#allocation2 + $0x1d0] sm:$0xff] }
  0x64   :  { %13237 = vmatmul.mubr.msk.f32.gmra.mrb[24].mxu0 %vm92_vm1, %v16977_v62  ;;  %22544 = vst [vmem:[#allocation36_spill] sm:$0xff] %v17054_v60  ;;  %22545 = vst [vmem:[#allocation37_spill] sm:$0xff] %v17059_v18  ;;  %v17075_v17 = vsel %vm590_vm4, %v662_v24, %v664_v0  ;;  %v17079_v58 = vsel %vm590_vm4, %v666_v53, %v667_v4  ;;  %v17083_v42 = vld [vmem:[#allocation2 + $0x1c0] sm:$0x3]  ;;  %v17104_v62 = vld [vmem:[#allocation2 + $0x1e8] sm:$0xff] }
  0x65   :  { %13239 = vmatprep.mubr.msk.f32.mxu0 %vm92_vm1, %v17025_v56  ;;  %22546 = vst [vmem:[#allocation38_spill] sm:$0xff] %v17063_v7  ;;  %382 = vst.msk [vmem:[#allocation2 + $0x321] sm:$0xff] %vm92_vm1, %v317_v39  ;;  %v17085_v39 = vld [vmem:[#allocation2 + $0x1c8] sm:$0xff]  ;;  %v17094_v24 = vsel %vm590_vm4, %v667_v4, %v669_v23  ;;  %v674_v19 = vrot.slane %v17083_v42, 1  ;;  %v673_v0 = vsel %vm590_vm4, %v671_v46, %v672_v15  ;;  %v17102_v56 = vld [vmem:[#allocation2 + $0x1e0] sm:$0xff] }
  0x66   :  { %22547 = vst [vmem:[#allocation39_spill] sm:$0xff] %v17075_v17  ;;  %22548 = vst [vmem:[#allocation40_spill] sm:$0xff] %v17079_v58  ;;  %v676_v53 = vrot.slane %v17085_v39, 1  ;;  %v17174_v7 = vld [vmem:[#allocation2 + $0x240] sm:$0xff]  ;;  %v17191_v21 = vld [vmem:[#allocation2 + $0x250] sm:$0x3] }
  0x67   :  { %22549 = vst [vmem:[#allocation41_spill] sm:$0xff] %v17083_v42  ;;  %22550 = vst [vmem:[#allocation42_spill] sm:$0xff] %v17094_v24  ;;  %v675_v4 = vsel %vm590_vm4, %v672_v15, %v674_v19  ;;  %v684_v19 = vrot.slane %v17116_v49, 1  ;;  %v17172_v42 = vld [vmem:[#allocation2 + $0x238] sm:$0x3]  ;;  %v17231_v2 = vld [vmem:[#allocation2 + $0x288] sm:$0xff] }
  0x68   :  { %13240 = vmatmul.mubr.msk.f32.gmra.mrb[26].mxu0 %vm92_vm1, %v17054_v60  ;;  %v17100_v60 = vld [vmem:[#allocation2 + $0x1d8] sm:$0x3]  ;;  %22553 = vst [vmem:[#allocation45_spill] sm:$0xff] %v17116_v49  ;;  %v17153_v49 = vld [vmem:[#allocation2 + $0x220] sm:$0x3]  ;;  %22562 = vst [vmem:[#allocation54_spill] sm:$0xff] %v17172_v42 }
  0x69   :  { %13242 = vmatprep.mubr.msk.f32.mxu0 %vm92_vm1, %v17059_v18  ;;  %v677_v18 = vrot.slane %v17087_v3, 1  ;;  %22551 = vst [vmem:[#allocation43_spill] sm:$0xff] %v17100_v60  ;;  %v679_v23 = vrot.slane %v17100_v60, 1  ;;  %22559 = vst [vmem:[#allocation51_spill] sm:$0xff] %v17153_v49  ;;  %v17155_v60 = vld [vmem:[#allocation2 + $0x228] sm:$0xff]  ;;  %v17193_v44 = vld [vmem:[#allocation2 + $0x258] sm:$0xff] }
  0x6a   :  { %22565 = vst [vmem:[#allocation57_spill] sm:$0xff] %v17191_v21  ;;  %22568 = vst [vmem:[#allocation60_spill] sm:$0xff] %v17210_v6  ;;  %v17229_v14 = vld [vmem:[#allocation2 + $0x280] sm:$0x3]  ;;  %v17248_v47 = vld [vmem:[#allocation2 + $0x298] sm:$0x3] }
  0x6b   :  { %v17112_v46 = vsel %vm590_vm4, %v676_v53, %v677_v18  ;;  %v17126_v15 = vsel %vm590_vm4, %v677_v18, %v679_v23  ;;  %v686_v53 = vrot.slane %v17118_v43, 1  ;;  %22572 = vst [vmem:[#allocation64_spill] sm:$0xff] %v17229_v14  ;;  %22573 = vst [vmem:[#allocation65_spill] sm:$0xff] %v17231_v2 }
  0x6c   :  { %13243 = vmatmul.mubr.msk.f32.gmra.mrb[28].mxu0 %vm92_vm1, %v17075_v17  ;;  %22552 = vst [vmem:[#allocation44_spill] sm:$0xff] %v17112_v46  ;;  %v682_v17 = vrot.slane %v17104_v62, 1  ;;  %22554 = vst [vmem:[#allocation46_spill] sm:$0xff] %v17126_v15 }
  0x6d   :  { %13245 = vmatprep.mubr.msk.f32.mxu0 %vm92_vm1, %v17079_v58  ;;  %v681_v58 = vrot.slane %v17102_v56, 1  ;;  %22577 = vst [vmem:[#allocation69_spill] sm:$0xff] %v17248_v47 }
  0x6e   :  { %v17145_v18 = vsel %vm590_vm4, %v682_v17, %v684_v19  ;;  %v694_v19 = vrot.slane %v17153_v49, 1 }
  0x6f   :  { %22557 = vst [vmem:[#allocation49_spill] sm:$0xff] %v17145_v18 }
  0x70   :  { %13246 = vmatmul.mubr.msk.f32.gmra.mrb[30].mxu0 %vm92_vm1, %v17094_v24  ;;  %v687_v24 = vrot.slane %v17120_v38, 1 }
  0x71   :  { %13248 = vmatprep.mubr.msk.f32.mxu0 %vm92_vm1, %v673_v0  ;;  %v17130_v0 = vsel %vm590_vm4, %v681_v58, %v682_v17  ;;  %v689_v58 = vrot.slane %v17134_v34, 1 }
  0x72   :  { %22555 = vst [vmem:[#allocation47_spill] sm:$0xff] %v17130_v0  ;;  %v17149_v23 = vsel %vm590_vm4, %v686_v53, %v687_v24 }
  0x73   :  { %22558 = vst [vmem:[#allocation50_spill] sm:$0xff] %v17149_v23  ;;  %v17164_v17 = vsel %vm590_vm4, %v687_v24, %v689_v58 }
  0x74   :  { %13249 = vmatmul.mubr.msk.f32.gmra.mrb[32].mxu0 %vm92_vm1, %v675_v4  ;;  %v17138_v4 = vld [vmem:[#allocation2 + $0x218] sm:$0xff]  ;;  %22560 = vst [vmem:[#allocation52_spill] sm:$0xff] %v17164_v17 }
  0x75   :  { %13251 = vmatprep.mubr.msk.f32.mxu0 %vm92_vm1, %v17112_v46  ;;  %v691_v46 = vrot.slane %v17136_v30, 1  ;;  %v692_v29 = vrot.slane %v17138_v4, 1 }
  0x77   :  { %v17168_v53 = vsel %vm590_vm4, %v691_v46, %v692_v29  ;;  %v17183_v24 = vsel %vm590_vm4, %v692_v29, %v694_v19  ;;  %v699_v46 = vrot.slane %v17172_v42, 1 }
  0x78   :  { %13252 = vmatmul.mubr.msk.f32.gmra.mrb[34].mxu0 %vm92_vm1, %v17126_v15  ;;  %v17157_v15 = vld [vmem:[#allocation2 + $0x230] sm:$0xff]  ;;  %22561 = vst [vmem:[#allocation53_spill] sm:$0xff] %v17168_v53  ;;  %22563 = vst [vmem:[#allocation55_spill] sm:$0xff] %v17183_v24 }
  0x79   :  { %13254 = vmatprep.mubr.msk.f32.mxu0 %vm92_vm1, %v17130_v0  ;;  %v696_v0 = vrot.slane %v17155_v60, 1  ;;  %v697_v34 = vrot.slane %v17157_v15, 1 }
  0x7b   :  { %v17187_v58 = vsel %vm590_vm4, %v696_v0, %v697_v34  ;;  %v17202_v29 = vsel %vm590_vm4, %v697_v34, %v699_v46  ;;  %v704_v0 = vrot.slane %v17191_v21, 1 }
  0x7c   :  { %13255 = vmatmul.mubr.msk.f32.gmra.mrb[36].mxu0 %vm92_vm1, %v17145_v18  ;;  %v17176_v18 = vld [vmem:[#allocation2 + $0x248] sm:$0xff]  ;;  %22564 = vst [vmem:[#allocation56_spill] sm:$0xff] %v17187_v58  ;;  %22566 = vst [vmem:[#allocation58_spill] sm:$0xff] %v17202_v29 }
  0x7d   :  { %13257 = vmatprep.mubr.msk.f32.mxu0 %vm92_vm1, %v17149_v23  ;;  %v701_v23 = vrot.slane %v17174_v7, 1  ;;  %v702_v49 = vrot.slane %v17176_v18, 1 }
  0x7f   :  { %v17206_v19 = vsel %vm590_vm4, %v701_v23, %v702_v49  ;;  %v17221_v34 = vsel %vm590_vm4, %v702_v49, %v704_v0  ;;  %v709_v23 = vrot.slane %v17210_v6, 1 }
  0x80   :  { %13258 = vmatmul.mubr.msk.f32.gmra.mrb[38].mxu0 %vm92_vm1, %v17164_v17  ;;  %v17195_v17 = vld [vmem:[#allocation2 + $0x260] sm:$0xff]  ;;  %22567 = vst [vmem:[#allocation59_spill] sm:$0xff] %v17206_v19  ;;  %22570 = vst [vmem:[#allocation62_spill] sm:$0xff] %v17221_v34 }
  0x81   :  { %13260 = vmatprep.mubr.msk.f32.mxu0 %vm92_vm1, %v17168_v53  ;;  %v706_v53 = vrot.slane %v17193_v44, 1  ;;  %v707_v42 = vrot.slane %v17195_v17, 1 }
  0x83   :  { %v17225_v46 = vsel %vm590_vm4, %v706_v53, %v707_v42  ;;  %v17240_v49 = vsel %vm590_vm4, %v707_v42, %v709_v23  ;;  %v714_v53 = vrot.slane %v17229_v14, 1 }
  0x84   :  { %13261 = vmatmul.mubr.msk.f32.gmra.mrb[40].mxu0 %vm92_vm1, %v17183_v24  ;;  %v17214_v24 = vld [vmem:[#allocation2 + $0x278] sm:$0xff]  ;;  %22571 = vst [vmem:[#allocation63_spill] sm:$0xff] %v17225_v46  ;;  %22575 = vst [vmem:[#allocation67_spill] sm:$0xff] %v17240_v49 }
  0x85   :  { %13263 = vmatprep.mubr.msk.f32.mxu0 %vm92_vm1, %v17187_v58  ;;  %22569 = vst [vmem:[#allocation61_spill] sm:$0xff] %v17214_v24  ;;  %v711_v58 = vrot.slane %v17212_v33, 1  ;;  %v712_v21 = vrot.slane %v17214_v24, 1  ;;  %v17250_v24 = vld [vmem:[#allocation2 + $0x2a0] sm:$0xff] }
  0x86   :  { %22578 = vst [vmem:[#allocation70_spill] sm:$0xff] %v17250_v24 }
  0x87   :  { %v17244_v0 = vsel %vm590_vm4, %v711_v58, %v712_v21  ;;  %v17259_v42 = vsel %vm590_vm4, %v712_v21, %v714_v53  ;;  %v719_v58 = vrot.slane %v17248_v47, 1 }
  0x88   :  { %13264 = vmatmul.mubr.msk.f32.gmra.mrb[42].mxu0 %vm92_vm1, %v17202_v29  ;;  %v17233_v29 = vld [vmem:[#allocation2 + $0x290] sm:$0xff]  ;;  %22576 = vst [vmem:[#allocation68_spill] sm:$0xff] %v17244_v0  ;;  %22580 = vst [vmem:[#allocation72_spill] sm:$0xff] %v17259_v42 }
  0x89   :  { %13266 = vmatprep.mubr.msk.f32.mxu0 %vm92_vm1, %v17206_v19  ;;  %22574 = vst [vmem:[#allocation66_spill] sm:$0xff] %v17233_v29  ;;  %v716_v19 = vrot.slane %v17231_v2, 1  ;;  %v717_v6 = vrot.slane %v17233_v29, 1  ;;  %v17267_v29 = vld [vmem:[#allocation2 + $0x2b0] sm:$0x3]  ;;  %v17269_v2 = vld [vmem:[#allocation2 + $0x2b8] sm:$0xff] }
  0x8a   :  { %22582 = vst [vmem:[#allocation74_spill] sm:$0xff] %v17267_v29  ;;  %22583 = vst [vmem:[#allocation75_spill] sm:$0xff] %v17269_v2 }
  0x8b   :  { %v17263_v23 = vsel %vm590_vm4, %v716_v19, %v717_v6  ;;  %v17278_v21 = vsel %vm590_vm4, %v717_v6, %v719_v58  ;;  %v724_v19 = vrot.slane %v17267_v29, 1 }
  0x8c   :  { %13267 = vmatmul.mubr.msk.f32.gmra.mrb[44].mxu0 %vm92_vm1, %v17221_v34  ;;  %v17252_v34 = vld [vmem:[#allocation2 + $0x2a8] sm:$0xff]  ;;  %22581 = vst [vmem:[#allocation73_spill] sm:$0xff] %v17263_v23  ;;  %22585 = vst [vmem:[#allocation77_spill] sm:$0xff] %v17278_v21 }
  0x8d   :  { %13269 = vmatprep.mubr.msk.f32.mxu0 %vm92_vm1, %v17225_v46  ;;  %22579 = vst [vmem:[#allocation71_spill] sm:$0xff] %v17252_v34  ;;  %v721_v46 = vrot.slane %v17250_v24, 1  ;;  %v722_v14 = vrot.slane %v17252_v34, 1  ;;  %v17286_v34 = vld [vmem:[#allocation2 + $0x2c8] sm:$0x3]  ;;  %v17288_v24 = vld [vmem:[#allocation2 + $0x2d0] sm:$0xff] }
  0x8e   :  { %22587 = vst [vmem:[#allocation79_spill] sm:$0xff] %v17286_v34  ;;  %22588 = vst [vmem:[#allocation80_spill] sm:$0xff] %v17288_v24 }
  0x8f   :  { %v17282_v53 = vsel %vm590_vm4, %v721_v46, %v722_v14  ;;  %v17297_v6 = vsel %vm590_vm4, %v722_v14, %v724_v19  ;;  %v729_v46 = vrot.slane %v17286_v34, 1 }
  0x90   :  { %13270 = vmatmul.mubr.msk.f32.gmra.mrb[46].mxu0 %vm92_vm1, %v17240_v49  ;;  %v17271_v49 = vld [vmem:[#allocation2 + $0x2c0] sm:$0xff]  ;;  %22586 = vst [vmem:[#allocation78_spill] sm:$0xff] %v17282_v53  ;;  %22590 = vst [vmem:[#allocation82_spill] sm:$0xff] %v17297_v6 }
  0x91   :  { %13272 = vmatprep.mubr.msk.f32.mxu0 %vm92_vm1, %v17244_v0  ;;  %22584 = vst [vmem:[#allocation76_spill] sm:$0xff] %v17271_v49  ;;  %v726_v0 = vrot.slane %v17269_v2, 1  ;;  %v727_v47 = vrot.slane %v17271_v49, 1  ;;  %v17305_v49 = vld [vmem:[#allocation2 + $0x2e0] sm:$0x3]  ;;  %v17307_v2 = vld [vmem:[#allocation2 + $0x2e8] sm:$0xff] }
  0x92   :  { %22592 = vst [vmem:[#allocation84_spill] sm:$0xff] %v17305_v49  ;;  %22593 = vst [vmem:[#allocation85_spill] sm:$0xff] %v17307_v2 }
  0x93   :  { %v17301_v58 = vsel %vm590_vm4, %v726_v0, %v727_v47  ;;  %v17316_v14 = vsel %vm590_vm4, %v727_v47, %v729_v46  ;;  %v734_v0 = vrot.slane %v17305_v49, 1 }
  0x94   :  { %13273 = vmatmul.mubr.msk.f32.gmra.mrb[48].mxu0 %vm92_vm1, %v17259_v42  ;;  %v17290_v42 = vld [vmem:[#allocation2 + $0x2d8] sm:$0xff]  ;;  %22591 = vst [vmem:[#allocation83_spill] sm:$0xff] %v17301_v58  ;;  %22595 = vst [vmem:[#allocation87_spill] sm:$0xff] %v17316_v14 }
  0x95   :  { %13275 = vmatprep.mubr.msk.f32.mxu0 %vm92_vm1, %v17263_v23  ;;  %22589 = vst [vmem:[#allocation81_spill] sm:$0xff] %v17290_v42  ;;  %v731_v23 = vrot.slane %v17288_v24, 1  ;;  %v732_v29 = vrot.slane %v17290_v42, 1  ;;  %v17324_v42 = vld [vmem:[#allocation2 + $0x2f8] sm:$0x3]  ;;  %v17326_v24 = vld [vmem:[#allocation2 + $0x300] sm:$0xff] }
  0x96   :  { %22597 = vst [vmem:[#allocation89_spill] sm:$0xff] %v17324_v42 }
  0x97   :  { %v17320_v19 = vsel %vm590_vm4, %v731_v23, %v732_v29  ;;  %v17335_v47 = vsel %vm590_vm4, %v732_v29, %v734_v0  ;;  %v739_v23 = vrot.slane %v17324_v42, 1 }
  0x98   :  { %13276 = vmatmul.mubr.msk.f32.gmra.mrb[50].mxu0 %vm92_vm1, %v17278_v21  ;;  %v17309_v21 = vld [vmem:[#allocation2 + $0x2f0] sm:$0xff]  ;;  %22596 = vst [vmem:[#allocation88_spill] sm:$0xff] %v17320_v19  ;;  %22599 = vst [vmem:[#allocation91_spill] sm:$0xff] %v17335_v47 }
  0x99   :  { %13278 = vmatprep.mubr.msk.f32.mxu0 %vm92_vm1, %v17282_v53  ;;  %22594 = vst [vmem:[#allocation86_spill] sm:$0xff] %v17309_v21  ;;  %v736_v53 = vrot.slane %v17307_v2, 1  ;;  %v737_v34 = vrot.slane %v17309_v21, 1  ;;  %v17343_v21 = vld [vmem:[#allocation2 + $0x310] sm:$0x3]  ;;  %v17345_v2 = vld [vmem:[#allocation2 + $0x318] sm:$0xff] }
  0x9b   :  { %v17339_v46 = vsel %vm590_vm4, %v736_v53, %v737_v34  ;;  %v17354_v29 = vsel %vm590_vm4, %v737_v34, %v739_v23  ;;  %v744_v53 = vrot.slane %v17343_v21, 1 }
  0x9c   :  { %13279 = vmatmul.mubr.msk.f32.gmra.mrb[52].mxu0 %vm92_vm1, %v17297_v6  ;;  %v17328_v6 = vld [vmem:[#allocation2 + $0x308] sm:$0xff]  ;;  %22600 = vst [vmem:[#allocation92_spill] sm:$0xff] %v17339_v46  ;;  %22601 = vst [vmem:[#allocation93_spill] sm:$0xff] %v17354_v29 }
  0x9d   :  { %13281 = vmatprep.mubr.msk.f32.mxu0 %vm92_vm1, %v17301_v58  ;;  %22598 = vst [vmem:[#allocation90_spill] sm:$0xff] %v17328_v6  ;;  %v741_v58 = vrot.slane %v17326_v24, 1  ;;  %v742_v49 = vrot.slane %v17328_v6, 1  ;;  %v17362_v6 = vld [vmem:[#allocation2 + $0x328] sm:$0x3] }
  0x9e   :  { %22603 = vst [vmem:[#allocation95_spill] sm:$0xff] %v17362_v6  ;;  %v749_v23 = vrot.slane %v17362_v6, 1  ;;  %v17548_v6 = vld [vmem:[%s21951_s1 + $0x10] sm:$0xf] }
  0x9f   :  { %v17358_v0 = vsel %vm590_vm4, %v741_v58, %v742_v49  ;;  %v17369_v34 = vsel %vm590_vm4, %v742_v49, %v744_v53  ;;  %v17391_v49 = vld [vmem:[%s21951_s1 + $0xc] sm:$0xf] }
  0xa0   :  { %13282 = vmatmul.mubr.msk.f32.gmra.mrb[54].mxu0 %vm92_vm1, %v17316_v14  ;;  %v17347_v14 = vld [vmem:[#allocation2 + $0x320] sm:$0xff]  ;;  %22602 = vst [vmem:[#allocation94_spill] sm:$0xff] %v17358_v0  ;;  %22604 = vst [vmem:[#allocation96_spill] sm:$0xff] %v17369_v34 }
  0xa1   :  { %13284 = vmatprep.mubr.msk.f32.mxu0 %vm92_vm1, %v17320_v19  ;;  %v746_v19 = vrot.slane %v17345_v2, 1  ;;  %v747_v42 = vrot.slane %v17347_v14, 1 }
  0xa3   :  { %v17373_v58 = vsel %vm590_vm4, %v746_v19, %v747_v42  ;;  %v17393_v19 = vld [vmem:[#allocation2 + $0x8] sm:$0xff] }
  0xa4   :  { %13285 = vmatmul.mubr.msk.f32.gmra.mrb[56].mxu0 %vm92_vm1, %v17335_v47  ;;  %22605 = vst [vmem:[#allocation97_spill] sm:$0xff] %v17373_v58 }
  0xa5   :  { %13287 = vmatprep.mubr.msk.f32.mxu0 %vm92_vm1, %v17339_v46  ;;  %v17380_v46 = vsel %vm590_vm4, %v747_v42, %v749_v23  ;;  %v17526_v23 = vld [vmem:[#allocation2 + $0x18] sm:$0xff] }
  0xa6   :  { %22606 = vst [vmem:[#allocation98_spill] sm:$0xff] %v17380_v46 }
  0xa8   :  { %13288 = vmatmul.mubr.msk.f32.gmra.mrb[58].mxu0 %vm92_vm1, %v17354_v29 }
  0xa9   :  { %13290 = vmatprep.mubr.msk.f32.mxu0 %vm92_vm1, %v17358_v0  ;;  %v17384_v0 = vld [vmem:[#allocation2] sm:$0xff] }
  0xac   :  { %13291 = vmatmul.mubr.msk.f32.gmra.mrb[60].mxu0 %vm92_vm1, %v17369_v34 }
  0xad   :  { %13293 = vmatprep.mubr.msk.f32.mxu0 %vm92_vm1, %v17373_v58  ;;  %v17529_v58 = vld [vmem:[#allocation2 + $0x20] sm:$0xff] }
  0xb0   :  { %13294 = vmatmul.mubr.msk.f32.gmra.mrb[62].mxu0 %vm92_vm1, %v17380_v46  ;;  %v1792_v46 = vrot.slane %v17526_v23, 2 }
  0xb1   :  { %13298 = vmatprep.mubr.msk.f32.mxu0 %vm92_vm1, %v17384_v0 }
  0xb4   :  { %13299 = vmatmul.mubr.msk.f32.vlgmr.msra.gmra.mrb[0].mxu0 %vm92_vm1, %v17393_v19 }
  0xb5   :  { %13395 = vmatpush3.msk.msra.mxu0 %vm881_vm0, %v16770_v32  ;;  %13301 = vmatprep.mubr.msk.f32.mxu0 %vm92_vm1, %v16547_v8  ;;  %v22607_v8 = vld [vmem:[#allocation61_spill] sm:$0xff]  ;;  %v15989_v32 = vld [vmem:[#allocation2 + $0x10] sm:$0x3] }
  0xb6   :  { %13492 = vmatprep.subr.msk.mxu0 %vm881_vm0, %v17391_v49  ;;  %v1790_v42 = vrot.slane %v15989_v32, 2  ;;  %22619 = vst [vmem:[#allocation61_spill] sm:$0xff] %v17526_v23  ;;  %v15992_v32 = vld [vmem:[#allocation2 + $0x28] sm:$0x3]  ;;  %v17542_v23 = vld [vmem:[#allocation2 + $0x38] sm:$0xff] }
  0xb7   :  { %v1795_v34 = vrot.slane %v15992_v32, 2  ;;  %v17561_v32 = vld [vmem:[#allocation2 + $0x48] sm:$0xff] }
  0xb8   :  { %13302 = vmatmul.mubr.msk.f32.gmra.mrb[2].mxu0 %vm92_vm1, %v16555_v13  ;;  %v22608_v13 = vld [vmem:[#allocation65_spill] sm:$0xff] }
  0xb9   :  { %13304 = vmatprep.mubr.msk.f32.mxu0 %vm92_vm1, %v16558_v16  ;;  %v22609_v16 = vld [vmem:[#allocation66_spill] sm:$0xff]  ;;  %22620 = vst [vmem:[#allocation65_spill] sm:$0xff] %v17529_v58 }
  0xbc   :  { %13305 = vmatmul.mubr.msk.f32.gmra.mrb[4].mxu0 %vm92_vm1, %v16564_v22  ;;  %v22610_v22 = vld [vmem:[#allocation70_spill] sm:$0xff] }
  0xbd   :  { %13307 = vmatprep.mubr.msk.f32.mxu0 %vm92_vm1, %v16571_v26  ;;  %v22611_v26 = vld [vmem:[#allocation71_spill] sm:$0xff] }
  0xbe   :  { %22623 = vst [vmem:[#allocation71_spill] sm:$0xff] %v17542_v23 }
  0xc0   :  { %13308 = vmatmul.mubr.msk.f32.gmra.mrb[6].mxu0 %vm92_vm1, %v16573_v27  ;;  %v22612_v27 = vld [vmem:[#allocation75_spill] sm:$0xff] }
  0xc1   :  { %13310 = vmatprep.mubr.msk.f32.mxu0 %vm92_vm1, %v16592_v35  ;;  %v22613_v35 = vld [vmem:[#allocation76_spill] sm:$0xff] }
  0xc4   :  { %13311 = vmatmul.mubr.msk.f32.gmra.mrb[8].mxu0 %vm92_vm1, %v16594_v36  ;;  %v22614_v36 = vld [vmem:[#allocation80_spill] sm:$0xff] }
  0xc5   :  { %13313 = vmatprep.mubr.msk.f32.mxu0 %vm92_vm1, %v16604_v40  ;;  %v22615_v40 = vld [vmem:[#allocation81_spill] sm:$0xff]  ;;  %22626 = vst [vmem:[#allocation80_spill] sm:$0xff] %v17561_v32 }
  0xc8   :  { %13314 = vmatmul.mubr.msk.f32.gmra.mrb[10].mxu0 %vm92_vm1, %v16606_v41  ;;  %v22616_v41 = vld [vmem:[#allocation85_spill] sm:$0xff] }
  0xc9   :  { %13316 = vmatprep.mubr.msk.f32.mxu0 %vm92_vm1, %v16623_v51  ;;  %v22617_v51 = vld [vmem:[#allocation86_spill] sm:$0xff] }
  0xcc   :  { %13317 = vmatmul.mubr.msk.f32.gmra.mrb[12].mxu0 %vm92_vm1, %v16631_v55  ;;  %v1787_v55 = vrot.slane %v17384_v0, 2  ;;  %v1793_v0 = vrot.slane %v17529_v58, 2  ;;  %v1798_v58 = vrot.slane %v17542_v23, 2  ;;  %v1802_v23 = vrot.slane %v17561_v32, 2 }
  0xcd   :  { %13319 = vmatprep.mubr.msk.f32.mxu0 %vm92_vm1, %v16637_v59  ;;  %v1788_v59 = vrot.slane %v17393_v19, 2 }
  0xce   :  { %v17537_v29 = vsel %vm1786_vm5, %v1792_v46, %v1793_v0  ;;  %v17556_v46 = vsel %vm1786_vm5, %v1793_v0, %v1795_v34  ;;  %v15998_v34 = vld [vmem:[#allocation2 + $0x58] sm:$0x3] }
  0xcf   :  { %v1789_v53 = vsel %vm1786_vm5, %v1787_v55, %v1788_v59  ;;  %v1791_v19 = vsel %vm1786_vm5, %v1788_v59, %v1790_v42  ;;  %22621 = vst [vmem:[#allocation66_spill] sm:$0xff] %v17537_v29  ;;  %v17539_v55 = vld [vmem:[#allocation2 + $0x30] sm:$0xff]  ;;  %22624 = vst [vmem:[#allocation75_spill] sm:$0xff] %v17556_v46  ;;  %v15995_v59 = vld [vmem:[#allocation2 + $0x40] sm:$0x3] }
  0xd0   :  { %13320 = vmatmul.mubr.msk.f32.gmra.mrb[14].mxu0 %vm92_vm1, %v16664_v11  ;;  %v22618_v11 = vld [vmem:[#allocation90_spill] sm:$0xff]  ;;  %22622 = vst [vmem:[#allocation70_spill] sm:$0xff] %v17539_v55  ;;  %v1797_v47 = vrot.slane %v17539_v55, 2  ;;  %v1800_v42 = vrot.slane %v15995_v59, 2  ;;  %v17579_v59 = vld [vmem:[#allocation2 + $0x60] sm:$0xff] }
  0xd1   :  { %13322 = vmatprep.mubr.msk.f32.mxu0 %vm92_vm1, %v16707_v45  ;;  %v17564_v55 = vld [vmem:[#allocation2 + $0x50] sm:$0xff]  ;;  %22630 = vst [vmem:[#allocation90_spill] sm:$0xff] %v17579_v59 }
  0xd2   :  { %22627 = vst [vmem:[#allocation81_spill] sm:$0xff] %v17564_v55 }
  0xd4   :  { %13323 = vmatmul.mubr.msk.f32.gmra.mrb[16].mxu0 %vm92_vm1, %v16745_v12 }
  0xd5   :  { %13325 = vmatprep.mubr.msk.f32.mxu0 %vm92_vm1, %v16799_v50 }
  0xd8   :  { %13326 = vmatmul.mubr.msk.f32.gmra.mrb[18].mxu0 %vm92_vm1, %v16801_v52 }
  0xd9   :  { %13328 = vmatprep.mubr.msk.f32.mxu0 %vm92_vm1, %v16833_v31 }
  0xdc   :  { %13329 = vmatmul.mubr.msk.f32.gmra.mrb[20].mxu0 %vm92_vm1, %v16835_v10 }
  0xdd   :  { %13331 = vmatprep.mubr.msk.f32.mxu0 %vm92_vm1, %v16848_v25 }
  0xe0   :  { %13332 = vmatmul.mubr.msk.f32.gmra.mrb[22].mxu0 %vm92_vm1, %v16850_v28 }
  0xe1   :  { %13334 = vmatprep.mubr.msk.f32.mxu0 %vm92_vm1, %v16870_v61 }
  0xe4   :  { %13335 = vmatmul.mubr.msk.f32.gmra.mrb[24].mxu0 %vm92_vm1, %v16872_v63 }
  0xe5   :  { %13337 = vmatprep.mubr.msk.f32.mxu0 %vm92_vm1, %v16888_v37 }
  0xe8   :  { %13338 = vmatmul.mubr.msk.f32.gmra.mrb[26].mxu0 %vm92_vm1, %v16890_v1 }
  0xe9   :  { %13340 = vmatprep.mubr.msk.f32.mxu0 %vm92_vm1, %v16933_v9 }
  0xec   :  { %13341 = vmatmul.mubr.msk.f32.gmra.mrb[28].mxu0 %vm92_vm1, %v16996_v48 }
  0xed   :  { %13343 = vmatprep.mubr.msk.f32.mxu0 %vm92_vm1, %v17035_v54 }
  0xf0   :  { %13344 = vmatmul.mubr.msk.f32.gmra.mrb[30].mxu0 %vm92_vm1, %v17037_v57 }
  0xf1   :  { %13346 = vmatprep.mubr.msk.f32.mxu0 %vm92_vm1, %v17066_v20 }
  0xf4   :  { %13347 = vmatmul.mubr.msk.f32.gmra.mrb[32].mxu0 %vm92_vm1, %v17068_v5 }
  0xf5   :  { %13349 = vmatprep.mubr.msk.f32.mxu0 %vm92_vm1, %v17085_v39 }
  0xf8   :  { %13350 = vmatmul.mubr.msk.f32.gmra.mrb[34].mxu0 %vm92_vm1, %v17087_v3 }
  0xf9   :  { %13352 = vmatprep.mubr.msk.f32.mxu0 %vm92_vm1, %v17102_v56 }
  0xfc   :  { %13353 = vmatmul.mubr.msk.f32.gmra.mrb[36].mxu0 %vm92_vm1, %v17104_v62 }
  0xfd   :  { %13355 = vmatprep.mubr.msk.f32.mxu0 %vm92_vm1, %v17118_v43 }
 0x100   :  { %13356 = vmatmul.mubr.msk.f32.gmra.mrb[38].mxu0 %vm92_vm1, %v17120_v38 }
 0x101   :  { %13358 = vmatprep.mubr.msk.f32.mxu0 %vm92_vm1, %v17136_v30 }
 0x104   :  { %13359 = vmatmul.mubr.msk.f32.gmra.mrb[40].mxu0 %vm92_vm1, %v17138_v4 }
 0x105   :  { %13361 = vmatprep.mubr.msk.f32.mxu0 %vm92_vm1, %v17155_v60 }
 0x108   :  { %13362 = vmatmul.mubr.msk.f32.gmra.mrb[42].mxu0 %vm92_vm1, %v17157_v15 }
 0x109   :  { %13364 = vmatprep.mubr.msk.f32.mxu0 %vm92_vm1, %v17174_v7 }
 0x10c   :  { %13365 = vmatmul.mubr.msk.f32.gmra.mrb[44].mxu0 %vm92_vm1, %v17176_v18 }
 0x10d   :  { %13367 = vmatprep.mubr.msk.f32.mxu0 %vm92_vm1, %v17193_v44 }
 0x110   :  { %13368 = vmatmul.mubr.msk.f32.gmra.mrb[46].mxu0 %vm92_vm1, %v17195_v17 }
 0x111   :  { %13370 = vmatprep.mubr.msk.f32.mxu0 %vm92_vm1, %v17212_v33 }
 0x114   :  { %13371 = vmatmul.mubr.msk.f32.gmra.mrb[48].mxu0 %vm92_vm1, %v22607_v8 }
 0x115   :  { %13373 = vmatprep.mubr.msk.f32.mxu0 %vm92_vm1, %v22608_v13 }
 0x118   :  { %13374 = vmatmul.mubr.msk.f32.gmra.mrb[50].mxu0 %vm92_vm1, %v22609_v16 }
 0x119   :  { %13376 = vmatprep.mubr.msk.f32.mxu0 %vm92_vm1, %v22610_v22 }
 0x11c   :  { %13377 = vmatmul.mubr.msk.f32.gmra.mrb[52].mxu0 %vm92_vm1, %v22611_v26 }
 0x11d   :  { %13379 = vmatprep.mubr.msk.f32.mxu0 %vm92_vm1, %v22612_v27 }
 0x120   :  { %13380 = vmatmul.mubr.msk.f32.gmra.mrb[54].mxu0 %vm92_vm1, %v22613_v35 }
 0x121   :  { %13382 = vmatprep.mubr.msk.f32.mxu0 %vm92_vm1, %v22614_v36 }
 0x124   :  { %13383 = vmatmul.mubr.msk.f32.gmra.mrb[56].mxu0 %vm92_vm1, %v22615_v40 }
 0x125   :  { %13385 = vmatprep.mubr.msk.f32.mxu0 %vm92_vm1, %v22616_v41 }
 0x128   :  { %13386 = vmatmul.mubr.msk.f32.gmra.mrb[58].mxu0 %vm92_vm1, %v22617_v51 }
 0x129   :  { %13388 = vmatprep.mubr.msk.f32.mxu0 %vm92_vm1, %v17326_v24 }
 0x12c   :  { %13389 = vmatmul.mubr.msk.f32.gmra.mrb[60].mxu0 %vm92_vm1, %v22618_v11 }
 0x12d   :  { %13391 = vmatprep.mubr.msk.f32.mxu0 %vm92_vm1, %v17345_v2 }
 0x130   :  { %13392 = vmatmul.mubr.msk.f32.gmra.mrb[62].mxu0 %vm92_vm1, %v17347_v14 }
 0x131   :  { %13396 = vmatprep.mubr.msk.f32.mxu0 %vm92_vm1, %v1789_v53  ;;  %v17559_v53 = vsel %vm1786_vm5, %v1797_v47, %v1798_v58  ;;  %v17574_v47 = vsel %vm1786_vm5, %v1798_v58, %v1800_v42  ;;  %v16001_v42 = vld [vmem:[#allocation2 + $0x70] sm:$0x3] }
 0x132   :  { %22625 = vst [vmem:[#allocation76_spill] sm:$0xff] %v17559_v53  ;;  %22628 = vst [vmem:[#allocation85_spill] sm:$0xff] %v17574_v47 }
 0x134   :  { %13397 = vmatmul.mubr.msk.f32.vlgmr.msra.gmra.mrb[0].mxu0 %vm92_vm1, %v1791_v19  ;;  %v1803_v19 = vrot.slane %v17564_v55, 2  ;;  %v17582_v55 = vld [vmem:[#allocation2 + $0x68] sm:$0xff] }
 0x135   :  { %13493 = vmatpush3.msk.msra.mxu0 %vm881_vm0, %v17391_v49  ;;  %13399 = vmatprep.mubr.msk.f32.mxu0 %vm92_vm1, %v17537_v29  ;;  %v1805_v49 = vrot.slane %v15998_v34, 2  ;;  %v1807_v29 = vrot.slane %v17579_v59, 2  ;;  %22631 = vst [vmem:[#allocation99_spill] sm:$0xff] %v17582_v55  ;;  %v1808_v32 = vrot.slane %v17582_v55, 2  ;;  %v17598_v59 = vld [vmem:[#allocation2 + $0x80] sm:$0xff] }
 0x136   :  { %13590 = vmatprep.subr.msk.mxu0 %vm881_vm0, %v17548_v6  ;;  %v17577_v0 = vsel %vm1786_vm5, %v1802_v23, %v1803_v19  ;;  %v1810_v23 = vrot.slane %v16001_v42, 2  ;;  %22635 = vst [vmem:[#allocation103_spill] sm:$0xff] %v17598_v59  ;;  %v1813_v55 = vrot.slane %v17598_v59, 2 }
 0x137   :  { %22629 = vst [vmem:[#allocation86_spill] sm:$0xff] %v17577_v0  ;;  %v17590_v58 = vsel %vm1786_vm5, %v1803_v19, %v1805_v49  ;;  %v17593_v34 = vsel %vm1786_vm5, %v1807_v29, %v1808_v32  ;;  %v16004_v49 = vld [vmem:[#allocation2 + $0x88] sm:$0x3] }
 0x138   :  { %13400 = vmatmul.mubr.msk.f32.gmra.mrb[2].mxu0 %vm92_vm1, %v17556_v46  ;;  %22632 = vst [vmem:[#allocation100_spill] sm:$0xff] %v17590_v58  ;;  %22633 = vst [vmem:[#allocation101_spill] sm:$0xff] %v17593_v34  ;;  %v17606_v19 = vsel %vm1786_vm5, %v1808_v32, %v1810_v23  ;;  %v1815_v29 = vrot.slane %v16004_v49, 2  ;;  %v16007_v23 = vld [vmem:[#allocation2 + $0xa0] sm:$0x3] }
 0x139   :  { %13402 = vmatprep.mubr.msk.f32.mxu0 %vm92_vm1, %v17559_v53  ;;  %v17595_v53 = vld [vmem:[#allocation2 + $0x78] sm:$0xff]  ;;  %22636 = vst [vmem:[#allocation104_spill] sm:$0xff] %v17606_v19 }
 0x13a   :  { %22634 = vst [vmem:[#allocation102_spill] sm:$0xff] %v17595_v53  ;;  %v1812_v46 = vrot.slane %v17595_v53, 2  ;;  %v17614_v53 = vld [vmem:[#allocation2 + $0x98] sm:$0xff]  ;;  %v17622_v32 = vsel %vm1786_vm5, %v1813_v55, %v1815_v29 }
 0x13b   :  { %22639 = vst [vmem:[#allocation107_spill] sm:$0xff] %v17614_v53  ;;  %v1818_v59 = vrot.slane %v17614_v53, 2  ;;  %v16010_v29 = vld [vmem:[#allocation2 + $0xb8] sm:$0x3] }
 0x13c   :  { %13403 = vmatmul.mubr.msk.f32.gmra.mrb[4].mxu0 %vm92_vm1, %v17574_v47  ;;  %v17609_v42 = vsel %vm1786_vm5, %v1812_v46, %v1813_v55  ;;  %v1820_v46 = vrot.slane %v16007_v23, 2 }
 0x13d   :  { %13405 = vmatprep.mubr.msk.f32.mxu0 %vm92_vm1, %v17577_v0  ;;  %22637 = vst [vmem:[#allocation105_spill] sm:$0xff] %v17609_v42  ;;  %v17611_v0 = vld [vmem:[#allocation2 + $0x90] sm:$0xff] }
 0x13e   :  { %22638 = vst [vmem:[#allocation106_spill] sm:$0xff] %v17611_v0  ;;  %v1817_v47 = vrot.slane %v17611_v0, 2  ;;  %v17630_v0 = vld [vmem:[#allocation2 + $0xb0] sm:$0xff]  ;;  %v17638_v55 = vsel %vm1786_vm5, %v1818_v59, %v1820_v46 }
 0x13f   :  { %22642 = vst [vmem:[#allocation110_spill] sm:$0xff] %v17630_v0  ;;  %v1823_v53 = vrot.slane %v17630_v0, 2 }
 0x140   :  { %13406 = vmatmul.mubr.msk.f32.gmra.mrb[6].mxu0 %vm92_vm1, %v17590_v58  ;;  %v17625_v49 = vsel %vm1786_vm5, %v1817_v47, %v1818_v59  ;;  %v1825_v47 = vrot.slane %v16010_v29, 2  ;;  %v22645_v59 = vld [vmem:[#allocation17_spill] sm:$0xff] }
 0x141   :  { %13408 = vmatprep.mubr.msk.f32.mxu0 %vm92_vm1, %v17593_v34  ;;  %22640 = vst [vmem:[#allocation108_spill] sm:$0xff] %v17625_v49  ;;  %v17627_v34 = vld [vmem:[#allocation2 + $0xa8] sm:$0xff]  ;;  %v1830_v46 = vrot.slane %v22645_v59, 2 }
 0x142   :  { %22641 = vst [vmem:[#allocation109_spill] sm:$0xff] %v17627_v34  ;;  %v1822_v58 = vrot.slane %v17627_v34, 2 }
 0x144   :  { %13409 = vmatmul.mubr.msk.f32.gmra.mrb[8].mxu0 %vm92_vm1, %v17606_v19  ;;  %v17641_v23 = vsel %vm1786_vm5, %v1822_v58, %v1823_v53  ;;  %v1828_v19 = vrot.slane %v16745_v12, 2  ;;  %v1832_v58 = vrot.slane %v16799_v50, 2  ;;  %v1838_v50 = vrot.slane %v16835_v10, 2 }
 0x145   :  { %13411 = vmatprep.mubr.msk.f32.mxu0 %vm92_vm1, %v17609_v42  ;;  %22643 = vst [vmem:[#allocation111_spill] sm:$0xff] %v17641_v23  ;;  %v1827_v42 = vrot.slane %v16707_v45, 2  ;;  %v1833_v45 = vrot.slane %v16801_v52, 2 }
 0x146   :  { %v17663_v12 = vsel %vm1786_vm5, %v1828_v19, %v1830_v46 }
 0x147   :  { %v17654_v29 = vsel %vm1786_vm5, %v1827_v42, %v1828_v19  ;;  %22647 = vst [vmem:[#allocation113_spill] sm:$0xff] %v17663_v12  ;;  %v17667_v59 = vsel %vm1786_vm5, %v1832_v58, %v1833_v45  ;;  %v1837_v42 = vrot.slane %v16833_v31, 2  ;;  %v22650_v19 = vld [vmem:[#allocation21_spill] sm:$0xff]  ;;  %v1842_v58 = vrot.slane %v16848_v25, 2 }
 0x148   :  { %13412 = vmatmul.mubr.msk.f32.gmra.mrb[10].mxu0 %vm92_vm1, %v17622_v32  ;;  %22646 = vst [vmem:[#allocation17_spill] sm:$0xff] %v17654_v29  ;;  %v1840_v46 = vrot.slane %v22650_v19, 2  ;;  %v1843_v31 = vrot.slane %v16850_v28, 2  ;;  %v1848_v25 = vrot.slane %v16872_v63, 2 }
 0x149   :  { %13414 = vmatprep.mubr.msk.f32.mxu0 %vm92_vm1, %v17625_v49  ;;  %v17650_v49 = vsel %vm1786_vm5, %v1823_v53, %v1825_v47  ;;  %v22648_v53 = vld [vmem:[#allocation20_spill] sm:$0xff] }
 0x14a   :  { %22644 = vst [vmem:[#allocation112_spill] sm:$0xff] %v17650_v49  ;;  %v1835_v47 = vrot.slane %v22648_v53, 2  ;;  %22649 = vst [vmem:[#allocation20_spill] sm:$0xff] %v17667_v59  ;;  %v17680_v53 = vsel %vm1786_vm5, %v1837_v42, %v1838_v50  ;;  %v17689_v10 = vsel %vm1786_vm5, %v1838_v50, %v1840_v46  ;;  %v17693_v19 = vsel %vm1786_vm5, %v1842_v58, %v1843_v31  ;;  %v22655_v50 = vld [vmem:[#allocation26_spill] sm:$0xff] }
 0x14b   :  { %22651 = vst [vmem:[#allocation21_spill] sm:$0xff] %v17689_v10  ;;  %v1847_v42 = vrot.slane %v16870_v61, 2  ;;  %v1850_v46 = vrot.slane %v22655_v50, 2  ;;  %v1852_v58 = vrot.slane %v16888_v37, 2  ;;  %v1853_v61 = vrot.slane %v16890_v1, 2  ;;  %v58_v1 = vld [vmem:[%s21952_s0 + $0xf0] sm:$0xff] }
 0x14c   :  { %13415 = vmatmul.mubr.msk.f32.gmra.mrb[12].mxu0 %vm92_vm1, %v17638_v55  ;;  %v17676_v52 = vsel %vm1786_vm5, %v1833_v45, %v1835_v47  ;;  %v22652_v45 = vld [vmem:[#allocation23_spill] sm:$0xff]  ;;  %v1858_v37 = vrot.slane %v16996_v48, 2 }
 0x14d   :  { %13417 = vmatprep.mubr.msk.f32.mxu0 %vm92_vm1, %v17641_v23  ;;  %v1845_v47 = vrot.slane %v22652_v45, 2  ;;  %22653 = vst [vmem:[#allocation23_spill] sm:$0xff] %v17693_v19  ;;  %v17706_v45 = vsel %vm1786_vm5, %v1847_v42, %v1848_v25  ;;  %v17715_v63 = vsel %vm1786_vm5, %v1848_v25, %v1850_v46  ;;  %v17719_v50 = vsel %vm1786_vm5, %v1852_v58, %v1853_v61  ;;  %v59_v46 = vld [vmem:[%s21952_s0 + $0xf8] sm:$0xff] }
 0x14e   :  { %22656 = vst [vmem:[#allocation26_spill] sm:$0xff] %v17706_v45  ;;  %22657 = vst [vmem:[#allocation115_spill] sm:$0xff] %v17715_v63  ;;  %v1857_v42 = vrot.slane %v16933_v9, 2  ;;  %v22660_v58 = vld [vmem:[#allocation35_spill] sm:$0xff] }
 0x14f   :  { %v17702_v28 = vsel %vm1786_vm5, %v1843_v31, %v1845_v47  ;;  %v22658_v31 = vld [vmem:[#allocation31_spill] sm:$0xff] }
 0x150   :  { %13418 = vmatmul.mubr.msk.f32.gmra.mrb[14].mxu0 %vm92_vm1, %v17650_v49  ;;  %22654 = vst [vmem:[#allocation114_spill] sm:$0xff] %v17702_v28  ;;  %v1855_v47 = vrot.slane %v22658_v31, 2  ;;  %22659 = vst [vmem:[#allocation31_spill] sm:$0xff] %v17719_v50  ;;  %v1860_v31 = vrot.slane %v22660_v58, 2  ;;  %v1872_v58 = vrot.slane %v17085_v39, 2 }
 0x151   :  { %13420 = vmatprep.mubr.msk.f32.mxu0 %vm92_vm1, %v17654_v29 }
 0x152   :  { %v17741_v9 = vsel %vm1786_vm5, %v1853_v61, %v1855_v47  ;;  %v17763_v61 = vsel %vm1786_vm5, %v1858_v37, %v1860_v31  ;;  %v22663_v47 = vld [vmem:[#allocation38_spill] sm:$0xff]  ;;  %v1873_v31 = vrot.slane %v17087_v3, 2 }
 0x153   :  { %22662 = vst [vmem:[#allocation116_spill] sm:$0xff] %v17763_v61 }
 0x154   :  { %13421 = vmatmul.mubr.msk.f32.gmra.mrb[16].mxu0 %vm92_vm1, %v17663_v12 }
 0x155   :  { %13423 = vmatprep.mubr.msk.f32.mxu0 %vm92_vm1, %v17667_v59 }
 0x158   :  { %13424 = vmatmul.mubr.msk.f32.gmra.mrb[18].mxu0 %vm92_vm1, %v17676_v52 }
 0x159   :  { %13426 = vmatprep.mubr.msk.f32.mxu0 %vm92_vm1, %v17680_v53 }
 0x15c   :  { %13427 = vmatmul.mubr.msk.f32.gmra.mrb[20].mxu0 %vm92_vm1, %v17689_v10 }
 0x15d   :  { %13429 = vmatprep.mubr.msk.f32.mxu0 %vm92_vm1, %v17693_v19  ;;  %v17751_v19 = vsel %vm1786_vm5, %v1857_v42, %v1858_v37  ;;  %v1865_v42 = vrot.slane %v22663_v47, 2  ;;  %v22666_v37 = vld [vmem:[#allocation41_spill] sm:$0xff]  ;;  %v1877_v47 = vrot.slane %v17102_v56, 2 }
 0x15e   :  { %22661 = vst [vmem:[#allocation35_spill] sm:$0xff] %v17751_v19 }
 0x160   :  { %13430 = vmatmul.mubr.msk.f32.gmra.mrb[22].mxu0 %vm92_vm1, %v17702_v28 }
 0x161   :  { %13432 = vmatprep.mubr.msk.f32.mxu0 %vm92_vm1, %v17706_v45  ;;  %v17729_v45 = vld [vmem:[%s21953_s3] ss:$0 sm:$0xff] }
 0x162   :  { %v216_v25 = vmul.f32 %v17729_v45, %v58_v1  ;;  %v217_v48 = vmul.f32 %v17729_v45, %v59_v46  ;;  %v17747_v1 = vld [vmem:[%s21954_s4] ss:$0 sm:$0xff]  ;;  %v1862_v46 = vrot.slane %v17035_v54, 2 }
 0x164   :  { %13433 = vmatmul.mubr.msk.f32.gmra.mrb[24].mxu0 %vm92_vm1, %v17715_v63  ;;  %v286_v28 = vadd.f32 %v17747_v1, %v216_v25  ;;  %v1863_v63 = vrot.slane %v17037_v57, 2  ;;  %v1867_v57 = vrot.slane %v17066_v20, 2  ;;  %v1870_v25 = vrot.slane %v22666_v37, 2  ;;  %v22670_v37 = vld [vmem:[#allocation45_spill] sm:$0xff] }
 0x165   :  { %13435 = vmatprep.mubr.msk.f32.mxu0 %vm92_vm1, %v17719_v50  ;;  %v287_v50 = vadd.f32 %v17747_v1, %v217_v48 }
 0x166   :  { %351 = vst.msk [vmem:[#allocation2 + $0x181] sm:$0xff] %vm92_vm1, %v286_v28  ;;  %v17767_v54 = vsel %vm1786_vm5, %v1862_v46, %v1863_v63  ;;  %v1868_v28 = vrot.slane %v17068_v5, 2  ;;  %v22667_v5 = vld [vmem:[#allocation43_spill] sm:$0xff] }
 0x167   :  { %352 = vst.msk [vmem:[#allocation2 + $0x189] sm:$0xff] %vm92_vm1, %v287_v50  ;;  %22664 = vst [vmem:[#allocation38_spill] sm:$0xff] %v17767_v54  ;;  %v17776_v50 = vsel %vm1786_vm5, %v1863_v63, %v1865_v42  ;;  %v1875_v46 = vrot.slane %v22667_v5, 2  ;;  %v17788_v63 = vsel %vm1786_vm5, %v1872_v58, %v1873_v31  ;;  %v1878_v42 = vrot.slane %v17104_v62, 2 }
 0x168   :  { %13436 = vmatmul.mubr.msk.f32.gmra.mrb[26].mxu0 %vm92_vm1, %v17741_v9  ;;  %22665 = vst [vmem:[#allocation117_spill] sm:$0xff] %v17776_v50  ;;  %v1869_v48 = vsel %vm1786_vm5, %v1867_v57, %v1868_v28  ;;  %v1871_v20 = vsel %vm1786_vm5, %v1868_v28, %v1870_v25  ;;  %22668 = vst [vmem:[#allocation41_spill] sm:$0xff] %v17788_v63  ;;  %v1882_v25 = vrot.slane %v17118_v43, 2  ;;  %v1883_v58 = vrot.slane %v17120_v38, 2 }
 0x169   :  { %13438 = vmatprep.mubr.msk.f32.mxu0 %vm92_vm1, %v17751_v19  ;;  %v17796_v57 = vsel %vm1786_vm5, %v1873_v31, %v1875_v46  ;;  %v17800_v28 = vsel %vm1786_vm5, %v1877_v47, %v1878_v42  ;;  %v22673_v31 = vld [vmem:[#allocation48_spill] sm:$0xff]  ;;  %v1887_v47 = vrot.slane %v17136_v30, 2 }
 0x16a   :  { %22669 = vst [vmem:[#allocation43_spill] sm:$0xff] %v17796_v57  ;;  %22671 = vst [vmem:[#allocation45_spill] sm:$0xff] %v17800_v28  ;;  %v1885_v5 = vrot.slane %v22673_v31, 2  ;;  %v17813_v46 = vsel %vm1786_vm5, %v1882_v25, %v1883_v58  ;;  %v1892_v25 = vrot.slane %v17155_v60, 2 }
 0x16b   :  { %22674 = vst [vmem:[#allocation48_spill] sm:$0xff] %v17813_v46 }
 0x16c   :  { %13439 = vmatmul.mubr.msk.f32.gmra.mrb[28].mxu0 %vm92_vm1, %v17763_v61 }
 0x16d   :  { %13441 = vmatprep.mubr.msk.f32.mxu0 %vm92_vm1, %v17767_v54  ;;  %v1943_v54 = vrot.slane %v17347_v14, 2 }
 0x170   :  { %13442 = vmatmul.mubr.msk.f32.gmra.mrb[30].mxu0 %vm92_vm1, %v17776_v50  ;;  %v1942_v50 = vrot.slane %v17345_v2, 2 }
 0x171   :  { %13444 = vmatprep.mubr.msk.f32.mxu0 %vm92_vm1, %v1869_v48  ;;  %v1880_v48 = vrot.slane %v22670_v37, 2  ;;  %v1888_v37 = vrot.slane %v17138_v4, 2 }
 0x173   :  { %v17826_v31 = vsel %vm1786_vm5, %v1887_v47, %v1888_v37  ;;  %v1897_v47 = vrot.slane %v17174_v7, 2 }
 0x174   :  { %13445 = vmatmul.mubr.msk.f32.gmra.mrb[32].mxu0 %vm92_vm1, %v1871_v20  ;;  %v17809_v20 = vsel %vm1786_vm5, %v1878_v42, %v1880_v48  ;;  %v22676_v42 = vld [vmem:[#allocation51_spill] sm:$0xff] }
 0x175   :  { %13447 = vmatprep.mubr.msk.f32.mxu0 %vm92_vm1, %v17788_v63  ;;  %22672 = vst [vmem:[#allocation118_spill] sm:$0xff] %v17809_v20  ;;  %v1890_v48 = vrot.slane %v22676_v42, 2  ;;  %22677 = vst [vmem:[#allocation51_spill] sm:$0xff] %v17826_v31  ;;  %v90_v63 = vld [vmem:[%s21952_s0 + $0x1f0] sm:$0xff] }
 0x178   :  { %13448 = vmatmul.mubr.msk.f32.gmra.mrb[34].mxu0 %vm92_vm1, %v17796_v57  ;;  %v1893_v57 = vrot.slane %v17157_v15, 2 }
 0x179   :  { %13450 = vmatprep.mubr.msk.f32.mxu0 %vm92_vm1, %v17800_v28  ;;  %v17822_v28 = vsel %vm1786_vm5, %v1883_v58, %v1885_v5  ;;  %v22679_v58 = vld [vmem:[#allocation54_spill] sm:$0xff] }
 0x17a   :  { %22675 = vst [vmem:[#allocation119_spill] sm:$0xff] %v17822_v28  ;;  %v1895_v5 = vrot.slane %v22679_v58, 2  ;;  %v17839_v42 = vsel %vm1786_vm5, %v1892_v25, %v1893_v57  ;;  %v1902_v25 = vrot.slane %v17193_v44, 2 }
 0x17b   :  { %22680 = vst [vmem:[#allocation54_spill] sm:$0xff] %v17839_v42 }
 0x17c   :  { %13451 = vmatmul.mubr.msk.f32.gmra.mrb[36].mxu0 %vm92_vm1, %v17809_v20  ;;  %v1898_v20 = vrot.slane %v17176_v18, 2 }
 0x17d   :  { %13453 = vmatprep.mubr.msk.f32.mxu0 %vm92_vm1, %v17813_v46  ;;  %v17835_v46 = vsel %vm1786_vm5, %v1888_v37, %v1890_v48  ;;  %v22682_v37 = vld [vmem:[#allocation57_spill] sm:$0xff] }
 0x17e   :  { %22678 = vst [vmem:[#allocation120_spill] sm:$0xff] %v17835_v46  ;;  %v1900_v48 = vrot.slane %v22682_v37, 2  ;;  %v17852_v58 = vsel %vm1786_vm5, %v1897_v47, %v1898_v20  ;;  %v1907_v47 = vrot.slane %v17212_v33, 2 }
 0x17f   :  { %22683 = vst [vmem:[#allocation57_spill] sm:$0xff] %v17852_v58 }
 0x180   :  { %13454 = vmatmul.mubr.msk.f32.gmra.mrb[38].mxu0 %vm92_vm1, %v17822_v28  ;;  %v1903_v28 = vrot.slane %v17195_v17, 2 }
 0x181   :  { %13456 = vmatprep.mubr.msk.f32.mxu0 %vm92_vm1, %v17826_v31  ;;  %v17848_v31 = vsel %vm1786_vm5, %v1893_v57, %v1895_v5  ;;  %v22685_v57 = vld [vmem:[#allocation60_spill] sm:$0xff] }
 0x182   :  { %22681 = vst [vmem:[#allocation121_spill] sm:$0xff] %v17848_v31  ;;  %v1905_v5 = vrot.slane %v22685_v57, 2  ;;  %v17865_v37 = vsel %vm1786_vm5, %v1902_v25, %v1903_v28  ;;  %v1912_v25 = vrot.slane %v22608_v13, 2 }
 0x183   :  { %22686 = vst [vmem:[#allocation60_spill] sm:$0xff] %v17865_v37 }
 0x184   :  { %13457 = vmatmul.mubr.msk.f32.gmra.mrb[40].mxu0 %vm92_vm1, %v17835_v46  ;;  %v1908_v46 = vrot.slane %v22607_v8, 2 }
 0x185   :  { %13459 = vmatprep.mubr.msk.f32.mxu0 %vm92_vm1, %v17839_v42  ;;  %v17861_v42 = vsel %vm1786_vm5, %v1898_v20, %v1900_v48  ;;  %v22688_v20 = vld [vmem:[#allocation64_spill] sm:$0xff] }
 0x186   :  { %22684 = vst [vmem:[#allocation122_spill] sm:$0xff] %v17861_v42  ;;  %v1910_v48 = vrot.slane %v22688_v20, 2  ;;  %v17878_v57 = vsel %vm1786_vm5, %v1907_v47, %v1908_v46  ;;  %v1917_v47 = vrot.slane %v22610_v22, 2 }
 0x187   :  { %22689 = vst [vmem:[#allocation64_spill] sm:$0xff] %v17878_v57 }
 0x188   :  { %13460 = vmatmul.mubr.msk.f32.gmra.mrb[42].mxu0 %vm92_vm1, %v17848_v31  ;;  %v1913_v31 = vrot.slane %v22609_v16, 2 }
 0x189   :  { %13462 = vmatprep.mubr.msk.f32.mxu0 %vm92_vm1, %v17852_v58  ;;  %v17874_v58 = vsel %vm1786_vm5, %v1903_v28, %v1905_v5  ;;  %v22691_v28 = vld [vmem:[#allocation69_spill] sm:$0xff] }
 0x18a   :  { %22687 = vst [vmem:[#allocation123_spill] sm:$0xff] %v17874_v58  ;;  %v1915_v5 = vrot.slane %v22691_v28, 2  ;;  %v17891_v20 = vsel %vm1786_vm5, %v1912_v25, %v1913_v31  ;;  %v1922_v25 = vrot.slane %v22612_v27, 2 }
 0x18b   :  { %22692 = vst [vmem:[#allocation69_spill] sm:$0xff] %v17891_v20 }
 0x18c   :  { %13463 = vmatmul.mubr.msk.f32.gmra.mrb[44].mxu0 %vm92_vm1, %v17861_v42  ;;  %v1918_v42 = vrot.slane %v22611_v26, 2 }
 0x18d   :  { %13465 = vmatprep.mubr.msk.f32.mxu0 %vm92_vm1, %v17865_v37  ;;  %v17887_v37 = vsel %vm1786_vm5, %v1908_v46, %v1910_v48  ;;  %v22694_v46 = vld [vmem:[#allocation74_spill] sm:$0xff] }
 0x18e   :  { %22690 = vst [vmem:[#allocation124_spill] sm:$0xff] %v17887_v37  ;;  %v1920_v48 = vrot.slane %v22694_v46, 2  ;;  %v17904_v28 = vsel %vm1786_vm5, %v1917_v47, %v1918_v42  ;;  %v1927_v47 = vrot.slane %v22614_v36, 2 }
 0x18f   :  { %22695 = vst [vmem:[#allocation74_spill] sm:$0xff] %v17904_v28 }
 0x190   :  { %13466 = vmatmul.mubr.msk.f32.gmra.mrb[46].mxu0 %vm92_vm1, %v17874_v58  ;;  %v1923_v58 = vrot.slane %v22613_v35, 2 }
 0x191   :  { %13468 = vmatprep.mubr.msk.f32.mxu0 %vm92_vm1, %v17878_v57  ;;  %v17900_v57 = vsel %vm1786_vm5, %v1913_v31, %v1915_v5  ;;  %v22697_v31 = vld [vmem:[#allocation79_spill] sm:$0xff] }
 0x192   :  { %22693 = vst [vmem:[#allocation125_spill] sm:$0xff] %v17900_v57  ;;  %v1925_v5 = vrot.slane %v22697_v31, 2  ;;  %v17917_v46 = vsel %vm1786_vm5, %v1922_v25, %v1923_v58  ;;  %v1932_v25 = vrot.slane %v22616_v41, 2 }
 0x193   :  { %22698 = vst [vmem:[#allocation79_spill] sm:$0xff] %v17917_v46 }
 0x194   :  { %13469 = vmatmul.mubr.msk.f32.gmra.mrb[48].mxu0 %vm92_vm1, %v17887_v37  ;;  %v1928_v37 = vrot.slane %v22615_v40, 2 }
 0x195   :  { %13471 = vmatprep.mubr.msk.f32.mxu0 %vm92_vm1, %v17891_v20  ;;  %v17913_v20 = vsel %vm1786_vm5, %v1918_v42, %v1920_v48  ;;  %v22700_v42 = vld [vmem:[#allocation84_spill] sm:$0xff] }
 0x196   :  { %22696 = vst [vmem:[#allocation126_spill] sm:$0xff] %v17913_v20  ;;  %v1930_v48 = vrot.slane %v22700_v42, 2  ;;  %v17930_v31 = vsel %vm1786_vm5, %v1927_v47, %v1928_v37  ;;  %v1937_v47 = vrot.slane %v17326_v24, 2 }
 0x197   :  { %22701 = vst [vmem:[#allocation84_spill] sm:$0xff] %v17930_v31 }
 0x198   :  { %13472 = vmatmul.mubr.msk.f32.gmra.mrb[50].mxu0 %vm92_vm1, %v17900_v57  ;;  %v1933_v57 = vrot.slane %v22617_v51, 2 }
 0x199   :  { %13474 = vmatprep.mubr.msk.f32.mxu0 %vm92_vm1, %v17904_v28  ;;  %v17926_v28 = vsel %vm1786_vm5, %v1923_v58, %v1925_v5  ;;  %v22703_v58 = vld [vmem:[#allocation89_spill] sm:$0xff] }
 0x19a   :  { %22699 = vst [vmem:[#allocation127_spill] sm:$0xff] %v17926_v28  ;;  %v1935_v5 = vrot.slane %v22703_v58, 2  ;;  %v17943_v42 = vsel %vm1786_vm5, %v1932_v25, %v1933_v57  ;;  %v1940_v58 = vrot.slane %v17343_v21, 2 }
 0x19b   :  { %22704 = vst [vmem:[#allocation89_spill] sm:$0xff] %v17943_v42 }
 0x19c   :  { %13475 = vmatmul.mubr.msk.f32.gmra.mrb[52].mxu0 %vm92_vm1, %v17913_v20  ;;  %v1938_v20 = vrot.slane %v22618_v11, 2  ;;  %v17960_v25 = vsel %vm1786_vm5, %v1933_v57, %v1935_v5  ;;  %v22711_v5 = vld [vmem:[#allocation80_spill] sm:$0xff] }
 0x19d   :  { %13477 = vmatprep.mubr.msk.f32.mxu0 %vm92_vm1, %v17917_v46  ;;  %v17939_v46 = vsel %vm1786_vm5, %v1928_v37, %v1930_v48  ;;  %v91_v37 = vld [vmem:[%s21952_s0 + $0x1f8] sm:$0xff] }
 0x19e   :  { %22702 = vst [vmem:[#allocation128_spill] sm:$0xff] %v17939_v46  ;;  %v249_v48 = vmul.f32 %v17729_v45, %v91_v37  ;;  %v17977_v21 = vsel %vm1786_vm5, %v1938_v20, %v1940_v58  ;;  %v22713_v37 = vld [vmem:[#allocation90_spill] sm:$0xff]  ;;  %v22716_v58 = vld [vmem:[#allocation103_spill] sm:$0xff] }
 0x1a0   :  { %13478 = vmatmul.mubr.msk.f32.gmra.mrb[54].mxu0 %vm92_vm1, %v17926_v28  ;;  %v248_v28 = vmul.f32 %v17729_v45, %v90_v63  ;;  %v17965_v63 = vsel %vm1786_vm5, %v1937_v47, %v1938_v20  ;;  %v22706_v45 = vld [vmem:[#allocation95_spill] sm:$0xff]  ;;  %v22708_v20 = vld [vmem:[#allocation65_spill] sm:$0xff] }
 0x1a1   :  { %13480 = vmatprep.mubr.msk.f32.mxu0 %vm92_vm1, %v17930_v31  ;;  %22705 = vst [vmem:[#allocation129_spill] sm:$0xff] %v17965_v63  ;;  %v1945_v57 = vrot.slane %v22706_v45, 2  ;;  %v22712_v47 = vld [vmem:[#allocation81_spill] sm:$0xff]  ;;  %v22717_v45 = vld [vmem:[#allocation106_spill] sm:$0xff] }
 0x1a2   :  { %v318_v31 = vadd.f32 %v17747_v1, %v248_v28  ;;  %v17981_v28 = vsel %vm1786_vm5, %v1942_v50, %v1943_v54  ;;  %v17997_v50 = vld [vmem:[%s21951_s1 + $0x14] sm:$0xf] }
 0x1a4   :  { %13481 = vmatmul.mubr.msk.f32.gmra.mrb[56].mxu0 %vm92_vm1, %v17939_v46  ;;  %v319_v46 = vadd.f32 %v17747_v1, %v249_v48  ;;  %383 = vst.msk [vmem:[#allocation2 + $0x331] sm:$0xff] %vm92_vm1, %v318_v31  ;;  %v17988_v1 = vsel %vm1786_vm5, %v1943_v54, %v1945_v57  ;;  %v22709_v31 = vld [vmem:[#allocation70_spill] sm:$0xff]  ;;  %v22710_v54 = vld [vmem:[#allocation71_spill] sm:$0xff] }
 0x1a5   :  { %13483 = vmatprep.mubr.msk.f32.mxu0 %vm92_vm1, %v17943_v42  ;;  %v22714_v48 = vld [vmem:[#allocation99_spill] sm:$0xff] }
 0x1a6   :  { %384 = vst.msk [vmem:[#allocation2 + $0x339] sm:$0xff] %vm92_vm1, %v319_v46  ;;  %v22707_v46 = vld [vmem:[#allocation61_spill] sm:$0xff]  ;;  %v22718_v57 = vld [vmem:[#allocation107_spill] sm:$0xff] }
 0x1a8   :  { %13484 = vmatmul.mubr.msk.f32.gmra.mrb[58].mxu0 %vm92_vm1, %v17960_v25 }
 0x1a9   :  { %13486 = vmatprep.mubr.msk.f32.mxu0 %vm92_vm1, %v17965_v63 }
 0x1ac   :  { %13487 = vmatmul.mubr.msk.f32.gmra.mrb[60].mxu0 %vm92_vm1, %v17977_v21 }
 0x1ad   :  { %13489 = vmatprep.mubr.msk.f32.mxu0 %vm92_vm1, %v17981_v28 }
 0x1b0   :  { %13490 = vmatmul.mubr.msk.f32.gmra.mrb[62].mxu0 %vm92_vm1, %v17988_v1 }
 0x1b1   :  { %13494 = vmatprep.mubr.msk.f32.mxu0 %vm92_vm1, %v22707_v46  ;;  %v18029_v46 = vld [vmem:[#allocation2 + $0xc0] sm:$0xff] }
 0x1b2   :  { %22719 = vst [vmem:[#allocation95_spill] sm:$0xff] %v18029_v46 }
 0x1b4   :  { %13495 = vmatmul.mubr.msk.f32.vlgmr.msra.gmra.mrb[0].mxu0 %vm92_vm1, %v22708_v20  ;;  %v18033_v20 = vld [vmem:[#allocation2 + $0xc8] sm:$0xff] }
 0x1b5   :  { %13591 = vmatpush3.msk.msra.mxu0 %vm881_vm0, %v17548_v6  ;;  %13497 = vmatprep.mubr.msk.f32.mxu0 %vm92_vm1, %v22709_v31  ;;  %v22715_v6 = vld [vmem:[#allocation102_spill] sm:$0xff]  ;;  %22720 = vst [vmem:[#allocation61_spill] sm:$0xff] %v18033_v20 }
 0x1b6   :  { %13688 = vmatprep.subr.msk.mxu0 %vm881_vm0, %v17997_v50 }
 0x1b8   :  { %13498 = vmatmul.mubr.msk.f32.gmra.mrb[2].mxu0 %vm92_vm1, %v22710_v54 }
 0x1b9   :  { %13500 = vmatprep.mubr.msk.f32.mxu0 %vm92_vm1, %v22711_v5 }
 0x1bc   :  { %13501 = vmatmul.mubr.msk.f32.gmra.mrb[4].mxu0 %vm92_vm1, %v22712_v47 }
 0x1bd   :  { %13503 = vmatprep.mubr.msk.f32.mxu0 %vm92_vm1, %v22713_v37 }
 0x1c0   :  { %13504 = vmatmul.mubr.msk.f32.gmra.mrb[6].mxu0 %vm92_vm1, %v22714_v48 }
 0x1c1   :  { %13506 = vmatprep.mubr.msk.f32.mxu0 %vm92_vm1, %v22715_v6 }
 0x1c4   :  { %13507 = vmatmul.mubr.msk.f32.gmra.mrb[8].mxu0 %vm92_vm1, %v22716_v58 }
 0x1c5   :  { %13509 = vmatprep.mubr.msk.f32.mxu0 %vm92_vm1, %v22717_v45  ;;  %v18037_v45 = vld [vmem:[#allocation2 + $0xd8] sm:$0xff] }
 0x1c6   :  { %22721 = vst [vmem:[#allocation65_spill] sm:$0xff] %v18037_v45 }
 0x1c8   :  { %13510 = vmatmul.mubr.msk.f32.gmra.mrb[10].mxu0 %vm92_vm1, %v22718_v57  ;;  %v18041_v57 = vld [vmem:[#allocation2 + $0xe0] sm:$0xff] }
 0x1c9   :  { %13512 = vmatprep.mubr.msk.f32.mxu0 %vm92_vm1, %v17627_v34  ;;  %22722 = vst [vmem:[#allocation70_spill] sm:$0xff] %v18041_v57  ;;  %v18091_v34 = vld [vmem:[#allocation2 + $0x170] sm:$0xff] }
 0x1cc   :  { %13513 = vmatmul.mubr.msk.f32.gmra.mrb[12].mxu0 %vm92_vm1, %v17630_v0  ;;  %v18045_v0 = vld [vmem:[#allocation2 + $0xf0] sm:$0xff] }
 0x1cd   :  { %13515 = vmatprep.mubr.msk.f32.mxu0 %vm92_vm1, %v18029_v46  ;;  %22723 = vst [vmem:[#allocation71_spill] sm:$0xff] %v18045_v0  ;;  %v18049_v46 = vld [vmem:[#allocation2 + $0xf8] sm:$0xff] }
 0x1ce   :  { %22724 = vst [vmem:[#allocation80_spill] sm:$0xff] %v18049_v46 }
 0x1d0   :  { %13516 = vmatmul.mubr.msk.f32.gmra.mrb[14].mxu0 %vm92_vm1, %v18033_v20  ;;  %v18053_v20 = vld [vmem:[#allocation2 + $0x108] sm:$0xff] }
 0x1d1   :  { %13518 = vmatprep.mubr.msk.f32.mxu0 %vm92_vm1, %v18037_v45  ;;  %22725 = vst [vmem:[#allocation81_spill] sm:$0xff] %v18053_v20  ;;  %v18057_v45 = vld [vmem:[#allocation2 + $0x110] sm:$0xff] }
 0x1d2   :  { %22726 = vst [vmem:[#allocation90_spill] sm:$0xff] %v18057_v45 }
 0x1d4   :  { %13519 = vmatmul.mubr.msk.f32.gmra.mrb[16].mxu0 %vm92_vm1, %v18041_v57  ;;  %v18061_v57 = vld [vmem:[#allocation2 + $0x120] sm:$0xff] }
 0x1d5   :  { %13521 = vmatprep.mubr.msk.f32.mxu0 %vm92_vm1, %v18045_v0  ;;  %22727 = vst [vmem:[#allocation99_spill] sm:$0xff] %v18061_v57  ;;  %v18065_v0 = vld [vmem:[#allocation2 + $0x128] sm:$0xff] }
 0x1d6   :  { %22728 = vst [vmem:[#allocation102_spill] sm:$0xff] %v18065_v0 }
 0x1d8   :  { %13522 = vmatmul.mubr.msk.f32.gmra.mrb[18].mxu0 %vm92_vm1, %v18049_v46  ;;  %v18069_v46 = vld [vmem:[#allocation2 + $0x138] sm:$0xff] }
 0x1d9   :  { %13524 = vmatprep.mubr.msk.f32.mxu0 %vm92_vm1, %v18053_v20  ;;  %22729 = vst [vmem:[#allocation103_spill] sm:$0xff] %v18069_v46  ;;  %v18073_v20 = vld [vmem:[#allocation2 + $0x140] sm:$0xff] }
 0x1dc   :  { %13525 = vmatmul.mubr.msk.f32.gmra.mrb[20].mxu0 %vm92_vm1, %v18057_v45  ;;  %v18077_v45 = vld [vmem:[#allocation2 + $0x150] sm:$0xff] }
 0x1dd   :  { %13527 = vmatprep.mubr.msk.f32.mxu0 %vm92_vm1, %v18061_v57  ;;  %22730 = vst [vmem:[#allocation130_spill] sm:$0xff] %v18077_v45  ;;  %v18081_v57 = vld [vmem:[#allocation2 + $0x158] sm:$0xff] }
 0x1e0   :  { %13528 = vmatmul.mubr.msk.f32.gmra.mrb[22].mxu0 %vm92_vm1, %v18065_v0  ;;  %v18085_v0 = vld [vmem:[#allocation2 + $0x168] sm:$0xff] }
 0x1e1   :  { %13530 = vmatprep.mubr.msk.f32.mxu0 %vm92_vm1, %v18069_v46  ;;  %v18089_v46 = vld [vmem:[#allocation2 + $0x180] sm:$0xff] }
 0x1e4   :  { %13531 = vmatmul.mubr.msk.f32.gmra.mrb[24].mxu0 %vm92_vm1, %v18073_v20 }
 0x1e5   :  { %13533 = vmatprep.mubr.msk.f32.mxu0 %vm92_vm1, %v18077_v45  ;;  %v18097_v45 = vld [vmem:[#allocation2 + $0x188] sm:$0xff] }
 0x1e8   :  { %13534 = vmatmul.mubr.msk.f32.gmra.mrb[26].mxu0 %vm92_vm1, %v18081_v57 }
 0x1e9   :  { %13536 = vmatprep.mubr.msk.f32.mxu0 %vm92_vm1, %v18085_v0 }
 0x1ec   :  { %13537 = vmatmul.mubr.msk.f32.gmra.mrb[28].mxu0 %vm92_vm1, %v18091_v34 }
 0x1ed   :  { %13539 = vmatprep.mubr.msk.f32.mxu0 %vm92_vm1, %v18089_v46 }
 0x1f0   :  { %13540 = vmatmul.mubr.msk.f32.gmra.mrb[30].mxu0 %vm92_vm1, %v18097_v45 }
 0x1f1   :  { %13542 = vmatprep.mubr.msk.f32.mxu0 %vm92_vm1, %v17085_v39  ;;  %v22738_v39 = vld [vmem:[#allocation11_spill] sm:$0xff] }
 0x1f4   :  { %13543 = vmatmul.mubr.msk.f32.gmra.mrb[32].mxu0 %vm92_vm1, %v17087_v3  ;;  %v22739_v3 = vld [vmem:[#allocation12_spill] sm:$0xff] }
 0x1f5   :  { %13545 = vmatprep.mubr.msk.f32.mxu0 %vm92_vm1, %v17102_v56  ;;  %v22735_v56 = vld [vmem:[#allocation8_spill] sm:$0xff] }
 0x1f8   :  { %13546 = vmatmul.mubr.msk.f32.gmra.mrb[34].mxu0 %vm92_vm1, %v17104_v62  ;;  %v22734_v62 = vld [vmem:[#allocation7_spill] sm:$0xff] }
 0x1f9   :  { %13548 = vmatprep.mubr.msk.f32.mxu0 %vm92_vm1, %v17118_v43  ;;  %v22731_v43 = vld [vmem:[#allocation4_spill] sm:$0xff] }
 0x1fc   :  { %13549 = vmatmul.mubr.msk.f32.gmra.mrb[36].mxu0 %vm92_vm1, %v17120_v38  ;;  %v18165_v38 = vld [vmem:[#allocation2 + $0x338] sm:$0xff] }
 0x1fd   :  { %13551 = vmatprep.mubr.msk.f32.mxu0 %vm92_vm1, %v17136_v30  ;;  %v18159_v30 = vld [vmem:[#allocation2 + $0x330] sm:$0xff] }
 0x200   :  { %13552 = vmatmul.mubr.msk.f32.gmra.mrb[38].mxu0 %vm92_vm1, %v17138_v4  ;;  %v22741_v4 = vld [vmem:[#allocation14_spill] sm:$0xff] }
 0x201   :  { %13554 = vmatprep.mubr.msk.f32.mxu0 %vm92_vm1, %v17155_v60  ;;  %v22736_v60 = vld [vmem:[#allocation9_spill] sm:$0xff] }
 0x204   :  { %13555 = vmatmul.mubr.msk.f32.gmra.mrb[40].mxu0 %vm92_vm1, %v17157_v15  ;;  %v22740_v15 = vld [vmem:[#allocation13_spill] sm:$0xff] }
 0x205   :  { %13557 = vmatprep.mubr.msk.f32.mxu0 %vm92_vm1, %v17174_v7  ;;  %v22737_v7 = vld [vmem:[#allocation10_spill] sm:$0xff] }
 0x208   :  { %13558 = vmatmul.mubr.msk.f32.gmra.mrb[42].mxu0 %vm92_vm1, %v17176_v18  ;;  %v22742_v18 = vld [vmem:[#allocation15_spill] sm:$0xff] }
 0x209   :  { %13560 = vmatprep.mubr.msk.f32.mxu0 %vm92_vm1, %v17193_v44  ;;  %v18174_v44 = vld [vmem:[%s21951_s1 + $0x18] sm:$0xf] }
 0x20c   :  { %13561 = vmatmul.mubr.msk.f32.gmra.mrb[44].mxu0 %vm92_vm1, %v17195_v17  ;;  %v22743_v17 = vld [vmem:[#allocation16_spill] sm:$0xff] }
 0x20d   :  { %13563 = vmatprep.mubr.msk.f32.mxu0 %vm92_vm1, %v17212_v33  ;;  %v22733_v33 = vld [vmem:[#allocation6_spill] sm:$0xff] }
 0x210   :  { %13564 = vmatmul.mubr.msk.f32.gmra.mrb[46].mxu0 %vm92_vm1, %v22607_v8  ;;  %v22746_v8 = vld [vmem:[#allocation22_spill] sm:$0xff] }
 0x211   :  { %13566 = vmatprep.mubr.msk.f32.mxu0 %vm92_vm1, %v22608_v13  ;;  %v22747_v13 = vld [vmem:[#allocation24_spill] sm:$0xff] }
 0x214   :  { %13567 = vmatmul.mubr.msk.f32.gmra.mrb[48].mxu0 %vm92_vm1, %v22609_v16  ;;  %v22748_v16 = vld [vmem:[#allocation25_spill] sm:$0xff] }
 0x215   :  { %13569 = vmatprep.mubr.msk.f32.mxu0 %vm92_vm1, %v22610_v22  ;;  %v22749_v22 = vld [vmem:[#allocation27_spill] sm:$0xff] }
 0x218   :  { %13570 = vmatmul.mubr.msk.f32.gmra.mrb[50].mxu0 %vm92_vm1, %v22611_v26  ;;  %v22750_v26 = vld [vmem:[#allocation28_spill] sm:$0xff] }
 0x219   :  { %13572 = vmatprep.mubr.msk.f32.mxu0 %vm92_vm1, %v22612_v27  ;;  %v22751_v27 = vld [vmem:[#allocation29_spill] sm:$0xff] }
 0x21c   :  { %13573 = vmatmul.mubr.msk.f32.gmra.mrb[52].mxu0 %vm92_vm1, %v22613_v35  ;;  %v22752_v35 = vld [vmem:[#allocation30_spill] sm:$0xff] }
 0x21d   :  { %13575 = vmatprep.mubr.msk.f32.mxu0 %vm92_vm1, %v22614_v36  ;;  %v22753_v36 = vld [vmem:[#allocation32_spill] sm:$0xff] }
 0x220   :  { %13576 = vmatmul.mubr.msk.f32.gmra.mrb[54].mxu0 %vm92_vm1, %v22615_v40  ;;  %v22754_v40 = vld [vmem:[#allocation33_spill] sm:$0xff] }
 0x221   :  { %13578 = vmatprep.mubr.msk.f32.mxu0 %vm92_vm1, %v22616_v41  ;;  %v22755_v41 = vld [vmem:[#allocation34_spill] sm:$0xff] }
 0x224   :  { %13579 = vmatmul.mubr.msk.f32.gmra.mrb[56].mxu0 %vm92_vm1, %v22617_v51  ;;  %v22756_v51 = vld [vmem:[#allocation36_spill] sm:$0xff] }
 0x225   :  { %13581 = vmatprep.mubr.msk.f32.mxu0 %vm92_vm1, %v17326_v24  ;;  %v22744_v24 = vld [vmem:[#allocation18_spill] sm:$0xff] }
 0x228   :  { %13582 = vmatmul.mubr.msk.f32.gmra.mrb[58].mxu0 %vm92_vm1, %v22618_v11  ;;  %v22757_v11 = vld [vmem:[#allocation37_spill] sm:$0xff] }
 0x229   :  { %13584 = vmatprep.mubr.msk.f32.mxu0 %vm92_vm1, %v17345_v2  ;;  %v22732_v2 = vld [vmem:[#allocation5_spill] sm:$0xff] }
 0x22c   :  { %13585 = vmatmul.mubr.msk.f32.gmra.mrb[60].mxu0 %vm92_vm1, %v17347_v14  ;;  %v22745_v14 = vld [vmem:[#allocation19_spill] sm:$0xff] }
 0x22d   :  { %13587 = vmatprep.mubr.msk.f32.mxu0 %vm92_vm1, %v18159_v30 }
 0x230   :  { %13588 = vmatmul.mubr.msk.f32.gmra.mrb[62].mxu0 %vm92_vm1, %v18165_v38 }
 0x231   :  { %13592 = vmatprep.mubr.msk.f32.mxu0 %vm92_vm1, %v22731_v43  ;;  %v2998_v43 = vrot.slane %v18097_v45, 1 }
 0x234   :  { %13593 = vmatmul.mubr.msk.f32.vlgmr.msra.gmra.mrb[0].mxu0 %vm92_vm1, %v22732_v2  ;;  %v18234_v2 = vld [vmem:[#allocation2 + $0x190] sm:$0x3] }
 0x235   :  { %13689 = vmatpush3.msk.msra.mxu0 %vm881_vm0, %v17997_v50  ;;  %13595 = vmatprep.mubr.msk.f32.mxu0 %vm92_vm1, %v22733_v33  ;;  %v2997_v50 = vrot.slane %v18089_v46, 1 }
 0x236   :  { %13786 = vmatprep.subr.msk.mxu0 %vm881_vm0, %v18174_v44 }
 0x238   :  { %13596 = vmatmul.mubr.msk.f32.gmra.mrb[2].mxu0 %vm92_vm1, %v22734_v62 }
 0x239   :  { %13598 = vmatprep.mubr.msk.f32.mxu0 %vm92_vm1, %v22735_v56 }
 0x23c   :  { %13599 = vmatmul.mubr.msk.f32.gmra.mrb[4].mxu0 %vm92_vm1, %v22736_v60 }
 0x23d   :  { %13601 = vmatprep.mubr.msk.f32.mxu0 %vm92_vm1, %v22737_v7 }
 0x240   :  { %13602 = vmatmul.mubr.msk.f32.gmra.mrb[6].mxu0 %vm92_vm1, %v22738_v39 }
 0x241   :  { %13604 = vmatprep.mubr.msk.f32.mxu0 %vm92_vm1, %v22739_v3 }
 0x244   :  { %13605 = vmatmul.mubr.msk.f32.gmra.mrb[8].mxu0 %vm92_vm1, %v22740_v15 }
 0x245   :  { %13607 = vmatprep.mubr.msk.f32.mxu0 %vm92_vm1, %v22741_v4 }
 0x248   :  { %13608 = vmatmul.mubr.msk.f32.gmra.mrb[10].mxu0 %vm92_vm1, %v22742_v18 }
 0x249   :  { %13610 = vmatprep.mubr.msk.f32.mxu0 %vm92_vm1, %v22743_v17 }
 0x24c   :  { %13611 = vmatmul.mubr.msk.f32.gmra.mrb[12].mxu0 %vm92_vm1, %v22744_v24 }
 0x24d   :  { %13613 = vmatprep.mubr.msk.f32.mxu0 %vm92_vm1, %v22745_v14 }
 0x250   :  { %13614 = vmatmul.mubr.msk.f32.gmra.mrb[14].mxu0 %vm92_vm1, %v22746_v8 }
 0x251   :  { %13616 = vmatprep.mubr.msk.f32.mxu0 %vm92_vm1, %v22747_v13 }
 0x254   :  { %13617 = vmatmul.mubr.msk.f32.gmra.mrb[16].mxu0 %vm92_vm1, %v22748_v16 }
 0x255   :  { %13619 = vmatprep.mubr.msk.f32.mxu0 %vm92_vm1, %v22749_v22 }
 0x258   :  { %13620 = vmatmul.mubr.msk.f32.gmra.mrb[18].mxu0 %vm92_vm1, %v22750_v26 }
 0x259   :  { %13622 = vmatprep.mubr.msk.f32.mxu0 %vm92_vm1, %v22751_v27  ;;  %v22766_v27 = vld [vmem:[#allocation49_spill] sm:$0xff] }
 0x25c   :  { %13623 = vmatmul.mubr.msk.f32.gmra.mrb[20].mxu0 %vm92_vm1, %v22752_v35  ;;  %v22758_v35 = vld [vmem:[#allocation39_spill] sm:$0xff] }
 0x25d   :  { %13625 = vmatprep.mubr.msk.f32.mxu0 %vm92_vm1, %v22753_v36  ;;  %v22759_v36 = vld [vmem:[#allocation40_spill] sm:$0xff] }
 0x260   :  { %13626 = vmatmul.mubr.msk.f32.gmra.mrb[22].mxu0 %vm92_vm1, %v22754_v40  ;;  %v18242_v40 = vsel %vm590_vm4, %v2997_v50, %v2998_v43  ;;  %v22765_v50 = vld [vmem:[#allocation47_spill] sm:$0xff] }
 0x261   :  { %13628 = vmatprep.mubr.msk.f32.mxu0 %vm92_vm1, %v22755_v41  ;;  %v3000_v41 = vrot.slane %v18234_v2, 1  ;;  %22760 = vst [vmem:[#allocation4_spill] sm:$0xff] %v18242_v40 }
 0x264   :  { %13629 = vmatmul.mubr.msk.f32.gmra.mrb[24].mxu0 %vm92_vm1, %v22756_v51  ;;  %v22761_v51 = vld [vmem:[#allocation42_spill] sm:$0xff] }
 0x265   :  { %13631 = vmatprep.mubr.msk.f32.mxu0 %vm92_vm1, %v22757_v11  ;;  %v18249_v11 = vsel %vm590_vm4, %v2998_v43, %v3000_v41  ;;  %v22768_v41 = vld [vmem:[#allocation52_spill] sm:$0xff]  ;;  %v22769_v43 = vld [vmem:[#allocation53_spill] sm:$0xff] }
 0x266   :  { %22762 = vst [vmem:[#allocation5_spill] sm:$0xff] %v18249_v11 }
 0x268   :  { %13632 = vmatmul.mubr.msk.f32.gmra.mrb[26].mxu0 %vm92_vm1, %v22758_v35  ;;  %v22763_v35 = vld [vmem:[#allocation44_spill] sm:$0xff] }
 0x269   :  { %13634 = vmatprep.mubr.msk.f32.mxu0 %vm92_vm1, %v22759_v36  ;;  %v22764_v36 = vld [vmem:[#allocation46_spill] sm:$0xff] }
 0x26c   :  { %13635 = vmatmul.mubr.msk.f32.gmra.mrb[28].mxu0 %vm92_vm1, %v22761_v51  ;;  %v22767_v51 = vld [vmem:[#allocation50_spill] sm:$0xff] }
 0x26d   :  { %13637 = vmatprep.mubr.msk.f32.mxu0 %vm92_vm1, %v18242_v40  ;;  %v22790_v40 = vld [vmem:[#allocation96_spill] sm:$0xff] }
 0x270   :  { %13638 = vmatmul.mubr.msk.f32.gmra.mrb[30].mxu0 %vm92_vm1, %v18249_v11  ;;  %v22770_v11 = vld [vmem:[#allocation55_spill] sm:$0xff] }
 0x271   :  { %13640 = vmatprep.mubr.msk.f32.mxu0 %vm92_vm1, %v22763_v35  ;;  %v22771_v35 = vld [vmem:[#allocation56_spill] sm:$0xff] }
 0x274   :  { %13641 = vmatmul.mubr.msk.f32.gmra.mrb[32].mxu0 %vm92_vm1, %v22764_v36  ;;  %v22772_v36 = vld [vmem:[#allocation58_spill] sm:$0xff] }
 0x275   :  { %13643 = vmatprep.mubr.msk.f32.mxu0 %vm92_vm1, %v22765_v50  ;;  %v22773_v50 = vld [vmem:[#allocation59_spill] sm:$0xff] }
 0x278   :  { %13644 = vmatmul.mubr.msk.f32.gmra.mrb[34].mxu0 %vm92_vm1, %v22766_v27  ;;  %v22774_v27 = vld [vmem:[#allocation62_spill] sm:$0xff] }
 0x279   :  { %13646 = vmatprep.mubr.msk.f32.mxu0 %vm92_vm1, %v22767_v51  ;;  %v22775_v51 = vld [vmem:[#allocation63_spill] sm:$0xff] }
 0x27c   :  { %13647 = vmatmul.mubr.msk.f32.gmra.mrb[36].mxu0 %vm92_vm1, %v22768_v41  ;;  %v22776_v41 = vld [vmem:[#allocation67_spill] sm:$0xff] }
 0x27d   :  { %13649 = vmatprep.mubr.msk.f32.mxu0 %vm92_vm1, %v22769_v43  ;;  %v22777_v43 = vld [vmem:[#allocation68_spill] sm:$0xff] }
 0x280   :  { %13650 = vmatmul.mubr.msk.f32.gmra.mrb[38].mxu0 %vm92_vm1, %v22770_v11  ;;  %v22778_v11 = vld [vmem:[#allocation72_spill] sm:$0xff] }
 0x281   :  { %13652 = vmatprep.mubr.msk.f32.mxu0 %vm92_vm1, %v22771_v35  ;;  %v22779_v35 = vld [vmem:[#allocation73_spill] sm:$0xff] }
 0x284   :  { %13653 = vmatmul.mubr.msk.f32.gmra.mrb[40].mxu0 %vm92_vm1, %v22772_v36  ;;  %v22780_v36 = vld [vmem:[#allocation77_spill] sm:$0xff] }
 0x285   :  { %13655 = vmatprep.mubr.msk.f32.mxu0 %vm92_vm1, %v22773_v50  ;;  %v22781_v50 = vld [vmem:[#allocation78_spill] sm:$0xff] }
 0x288   :  { %13656 = vmatmul.mubr.msk.f32.gmra.mrb[42].mxu0 %vm92_vm1, %v22774_v27  ;;  %v22782_v27 = vld [vmem:[#allocation82_spill] sm:$0xff] }
 0x289   :  { %13658 = vmatprep.mubr.msk.f32.mxu0 %vm92_vm1, %v22775_v51  ;;  %v22783_v51 = vld [vmem:[#allocation83_spill] sm:$0xff] }
 0x28c   :  { %13659 = vmatmul.mubr.msk.f32.gmra.mrb[44].mxu0 %vm92_vm1, %v22776_v41  ;;  %v22784_v41 = vld [vmem:[#allocation87_spill] sm:$0xff] }
 0x28d   :  { %13661 = vmatprep.mubr.msk.f32.mxu0 %vm92_vm1, %v22777_v43  ;;  %v22785_v43 = vld [vmem:[#allocation88_spill] sm:$0xff] }
 0x290   :  { %13662 = vmatmul.mubr.msk.f32.gmra.mrb[46].mxu0 %vm92_vm1, %v22778_v11  ;;  %v22786_v11 = vld [vmem:[#allocation91_spill] sm:$0xff] }
 0x291   :  { %13664 = vmatprep.mubr.msk.f32.mxu0 %vm92_vm1, %v22779_v35  ;;  %v22787_v35 = vld [vmem:[#allocation92_spill] sm:$0xff] }
 0x294   :  { %13665 = vmatmul.mubr.msk.f32.gmra.mrb[48].mxu0 %vm92_vm1, %v22780_v36  ;;  %v22788_v36 = vld [vmem:[#allocation93_spill] sm:$0xff] }
 0x295   :  { %13667 = vmatprep.mubr.msk.f32.mxu0 %vm92_vm1, %v22781_v50  ;;  %v22789_v50 = vld [vmem:[#allocation94_spill] sm:$0xff] }
 0x298   :  { %13668 = vmatmul.mubr.msk.f32.gmra.mrb[50].mxu0 %vm92_vm1, %v22782_v27  ;;  %v3003_v27 = vrot.slane %v18165_v38, 1 }
 0x299   :  { %13670 = vmatprep.mubr.msk.f32.mxu0 %vm92_vm1, %v22783_v51  ;;  %v3002_v51 = vrot.slane %v18159_v30, 1 }
 0x29c   :  { %13671 = vmatmul.mubr.msk.f32.gmra.mrb[52].mxu0 %vm92_vm1, %v22784_v41  ;;  %v18309_v41 = vld [vmem:[#allocation2 + $0x340] sm:$0x3] }
 0x29d   :  { %13673 = vmatprep.mubr.msk.f32.mxu0 %vm92_vm1, %v22785_v43  ;;  %v22791_v43 = vld [vmem:[#allocation97_spill] sm:$0xff] }
 0x2a0   :  { %13674 = vmatmul.mubr.msk.f32.gmra.mrb[54].mxu0 %vm92_vm1, %v22786_v11  ;;  %v18317_v11 = vsel %vm590_vm4, %v3002_v51, %v3003_v27  ;;  %v18333_v51 = vld [vmem:[%s21951_s1 + $0x1c] sm:$0xf] }
 0x2a1   :  { %13676 = vmatprep.mubr.msk.f32.mxu0 %vm92_vm1, %v22787_v35  ;;  %v3005_v35 = vrot.slane %v18309_v41, 1  ;;  %22792 = vst [vmem:[#allocation6_spill] sm:$0xff] %v18317_v11 }
 0x2a4   :  { %13677 = vmatmul.mubr.msk.f32.gmra.mrb[56].mxu0 %vm92_vm1, %v22788_v36  ;;  %v22793_v36 = vld [vmem:[#allocation98_spill] sm:$0xff] }
 0x2a5   :  { %13679 = vmatprep.mubr.msk.f32.mxu0 %vm92_vm1, %v22789_v50  ;;  %v18324_v50 = vsel %vm590_vm4, %v3003_v27, %v3005_v35  ;;  %v22798_v27 = vld [vmem:[#allocation85_spill] sm:$0xff]  ;;  %v22800_v35 = vld [vmem:[#allocation100_spill] sm:$0xff] }
 0x2a6   :  { %22794 = vst [vmem:[#allocation7_spill] sm:$0xff] %v18324_v50 }
 0x2a8   :  { %13680 = vmatmul.mubr.msk.f32.gmra.mrb[58].mxu0 %vm92_vm1, %v22790_v40  ;;  %v22795_v40 = vld [vmem:[#allocation66_spill] sm:$0xff] }
 0x2a9   :  { %13682 = vmatprep.mubr.msk.f32.mxu0 %vm92_vm1, %v22791_v43  ;;  %v22796_v43 = vld [vmem:[#allocation75_spill] sm:$0xff] }
 0x2ac   :  { %13683 = vmatmul.mubr.msk.f32.gmra.mrb[60].mxu0 %vm92_vm1, %v22793_v36 }
 0x2ad   :  { %13685 = vmatprep.mubr.msk.f32.mxu0 %vm92_vm1, %v18317_v11  ;;  %v22797_v11 = vld [vmem:[#allocation76_spill] sm:$0xff] }
 0x2b0   :  { %13686 = vmatmul.mubr.msk.f32.gmra.mrb[62].mxu0 %vm92_vm1, %v18324_v50  ;;  %v22801_v50 = vld [vmem:[#allocation101_spill] sm:$0xff] }
 0x2b1   :  { %13690 = vmatprep.mubr.msk.f32.mxu0 %vm92_vm1, %v22795_v40  ;;  %v22799_v40 = vld [vmem:[#allocation86_spill] sm:$0xff] }
 0x2b4   :  { %13691 = vmatmul.mubr.msk.f32.vlgmr.msra.gmra.mrb[0].mxu0 %vm92_vm1, %v22796_v43  ;;  %v22802_v43 = vld [vmem:[#allocation104_spill] sm:$0xff] }
 0x2b5   :  { %13787 = vmatpush3.msk.msra.mxu0 %vm881_vm0, %v18174_v44  ;;  %13693 = vmatprep.mubr.msk.f32.mxu0 %vm92_vm1, %v22797_v11  ;;  %v22803_v44 = vld [vmem:[#allocation105_spill] sm:$0xff]  ;;  %v22804_v11 = vld [vmem:[#allocation108_spill] sm:$0xff] }
 0x2b6   :  { %13884 = vmatprep.subr.msk.mxu0 %vm881_vm0, %v18333_v51 }
 0x2b8   :  { %13694 = vmatmul.mubr.msk.f32.gmra.mrb[2].mxu0 %vm92_vm1, %v22798_v27 }
 0x2b9   :  { %13696 = vmatprep.mubr.msk.f32.mxu0 %vm92_vm1, %v22799_v40 }
 0x2bc   :  { %13697 = vmatmul.mubr.msk.f32.gmra.mrb[4].mxu0 %vm92_vm1, %v22800_v35 }
 0x2bd   :  { %13699 = vmatprep.mubr.msk.f32.mxu0 %vm92_vm1, %v22801_v50 }
 0x2c0   :  { %13700 = vmatmul.mubr.msk.f32.gmra.mrb[6].mxu0 %vm92_vm1, %v22802_v43 }
 0x2c1   :  { %13702 = vmatprep.mubr.msk.f32.mxu0 %vm92_vm1, %v22803_v44 }
 0x2c4   :  { %13703 = vmatmul.mubr.msk.f32.gmra.mrb[8].mxu0 %vm92_vm1, %v17622_v32 }
 0x2c5   :  { %13705 = vmatprep.mubr.msk.f32.mxu0 %vm92_vm1, %v22804_v11 }
 0x2c8   :  { %13706 = vmatmul.mubr.msk.f32.gmra.mrb[10].mxu0 %vm92_vm1, %v17638_v55 }
 0x2c9   :  { %13708 = vmatprep.mubr.msk.f32.mxu0 %vm92_vm1, %v17641_v23  ;;  %v22805_v23 = vld [vmem:[#allocation23_spill] sm:$0xff] }
 0x2cc   :  { %13709 = vmatmul.mubr.msk.f32.gmra.mrb[12].mxu0 %vm92_vm1, %v17650_v49  ;;  %v22806_v49 = vld [vmem:[#allocation114_spill] sm:$0xff] }
 0x2cd   :  { %13711 = vmatprep.mubr.msk.f32.mxu0 %vm92_vm1, %v17654_v29  ;;  %v22807_v29 = vld [vmem:[#allocation26_spill] sm:$0xff] }
 0x2d0   :  { %13712 = vmatmul.mubr.msk.f32.gmra.mrb[14].mxu0 %vm92_vm1, %v17663_v12  ;;  %v22808_v12 = vld [vmem:[#allocation115_spill] sm:$0xff] }
 0x2d1   :  { %13714 = vmatprep.mubr.msk.f32.mxu0 %vm92_vm1, %v17667_v59  ;;  %v22809_v59 = vld [vmem:[#allocation31_spill] sm:$0xff] }
 0x2d4   :  { %13715 = vmatmul.mubr.msk.f32.gmra.mrb[16].mxu0 %vm92_vm1, %v17676_v52 }
 0x2d5   :  { %13717 = vmatprep.mubr.msk.f32.mxu0 %vm92_vm1, %v17680_v53 }
 0x2d8   :  { %13718 = vmatmul.mubr.msk.f32.gmra.mrb[18].mxu0 %vm92_vm1, %v17689_v10  ;;  %v3470_v10 = vrot.slane %v18097_v45, 2 }
 0x2d9   :  { %13720 = vmatprep.mubr.msk.f32.mxu0 %vm92_vm1, %v22805_v23  ;;  %v3469_v23 = vrot.slane %v18089_v46, 2 }
 0x2dc   :  { %13721 = vmatmul.mubr.msk.f32.gmra.mrb[20].mxu0 %vm92_vm1, %v22806_v49  ;;  %v22811_v49 = vld [vmem:[#allocation117_spill] sm:$0xff] }
 0x2dd   :  { %13723 = vmatprep.mubr.msk.f32.mxu0 %vm92_vm1, %v22807_v29  ;;  %v22810_v29 = vld [vmem:[#allocation38_spill] sm:$0xff] }
 0x2e0   :  { %13724 = vmatmul.mubr.msk.f32.gmra.mrb[22].mxu0 %vm92_vm1, %v22808_v12  ;;  %v3472_v12 = vrot.slane %v18234_v2, 2  ;;  %v22816_v2 = vld [vmem:[#allocation118_spill] sm:$0xff] }
 0x2e1   :  { %13726 = vmatprep.mubr.msk.f32.mxu0 %vm92_vm1, %v22809_v59  ;;  %v18399_v59 = vsel %vm1786_vm5, %v3469_v23, %v3470_v10  ;;  %v22815_v23 = vld [vmem:[#allocation45_spill] sm:$0xff] }
 0x2e4   :  { %13727 = vmatmul.mubr.msk.f32.gmra.mrb[24].mxu0 %vm92_vm1, %v17741_v9 }
 0x2e5   :  { %13729 = vmatprep.mubr.msk.f32.mxu0 %vm92_vm1, %v17751_v19  ;;  %v18406_v19 = vsel %vm1786_vm5, %v3470_v10, %v3472_v12  ;;  %v22818_v12 = vld [vmem:[#allocation119_spill] sm:$0xff] }
 0x2e6   :  { %22812 = vst [vmem:[#allocation8_spill] sm:$0xff] %v18406_v19  ;;  %v22819_v10 = vld [vmem:[#allocation51_spill] sm:$0xff] }
 0x2e8   :  { %13730 = vmatmul.mubr.msk.f32.gmra.mrb[26].mxu0 %vm92_vm1, %v17763_v61  ;;  %v22813_v61 = vld [vmem:[#allocation41_spill] sm:$0xff] }
 0x2e9   :  { %13732 = vmatprep.mubr.msk.f32.mxu0 %vm92_vm1, %v22810_v29  ;;  %v22814_v29 = vld [vmem:[#allocation43_spill] sm:$0xff] }
 0x2ec   :  { %13733 = vmatmul.mubr.msk.f32.gmra.mrb[28].mxu0 %vm92_vm1, %v22811_v49  ;;  %v22817_v49 = vld [vmem:[#allocation48_spill] sm:$0xff] }
 0x2ed   :  { %13735 = vmatprep.mubr.msk.f32.mxu0 %vm92_vm1, %v18399_v59 }
 0x2f0   :  { %13736 = vmatmul.mubr.msk.f32.gmra.mrb[30].mxu0 %vm92_vm1, %v18406_v19  ;;  %v22820_v19 = vld [vmem:[#allocation120_spill] sm:$0xff] }
 0x2f1   :  { %13738 = vmatprep.mubr.msk.f32.mxu0 %vm92_vm1, %v22813_v61  ;;  %v22821_v61 = vld [vmem:[#allocation54_spill] sm:$0xff] }
 0x2f4   :  { %13739 = vmatmul.mubr.msk.f32.gmra.mrb[32].mxu0 %vm92_vm1, %v22814_v29  ;;  %v22822_v29 = vld [vmem:[#allocation121_spill] sm:$0xff] }
 0x2f5   :  { %13741 = vmatprep.mubr.msk.f32.mxu0 %vm92_vm1, %v22815_v23  ;;  %v22823_v23 = vld [vmem:[#allocation57_spill] sm:$0xff] }
 0x2f8   :  { %13742 = vmatmul.mubr.msk.f32.gmra.mrb[34].mxu0 %vm92_vm1, %v22816_v2  ;;  %v22824_v2 = vld [vmem:[#allocation122_spill] sm:$0xff] }
 0x2f9   :  { %13744 = vmatprep.mubr.msk.f32.mxu0 %vm92_vm1, %v22817_v49  ;;  %v22825_v49 = vld [vmem:[#allocation60_spill] sm:$0xff] }
 0x2fc   :  { %13745 = vmatmul.mubr.msk.f32.gmra.mrb[36].mxu0 %vm92_vm1, %v22818_v12  ;;  %v22826_v12 = vld [vmem:[#allocation123_spill] sm:$0xff] }
 0x2fd   :  { %13747 = vmatprep.mubr.msk.f32.mxu0 %vm92_vm1, %v22819_v10  ;;  %v22827_v10 = vld [vmem:[#allocation64_spill] sm:$0xff] }
 0x300   :  { %13748 = vmatmul.mubr.msk.f32.gmra.mrb[38].mxu0 %vm92_vm1, %v22820_v19  ;;  %v22828_v19 = vld [vmem:[#allocation124_spill] sm:$0xff] }
 0x301   :  { %13750 = vmatprep.mubr.msk.f32.mxu0 %vm92_vm1, %v22821_v61  ;;  %v22829_v61 = vld [vmem:[#allocation69_spill] sm:$0xff] }
 0x304   :  { %13751 = vmatmul.mubr.msk.f32.gmra.mrb[40].mxu0 %vm92_vm1, %v22822_v29  ;;  %v22830_v29 = vld [vmem:[#allocation125_spill] sm:$0xff] }
 0x305   :  { %13753 = vmatprep.mubr.msk.f32.mxu0 %vm92_vm1, %v22823_v23  ;;  %v22831_v23 = vld [vmem:[#allocation74_spill] sm:$0xff] }
 0x308   :  { %13754 = vmatmul.mubr.msk.f32.gmra.mrb[42].mxu0 %vm92_vm1, %v22824_v2  ;;  %v22832_v2 = vld [vmem:[#allocation126_spill] sm:$0xff] }
 0x309   :  { %13756 = vmatprep.mubr.msk.f32.mxu0 %vm92_vm1, %v22825_v49  ;;  %v22833_v49 = vld [vmem:[#allocation79_spill] sm:$0xff] }
 0x30c   :  { %13757 = vmatmul.mubr.msk.f32.gmra.mrb[44].mxu0 %vm92_vm1, %v22826_v12  ;;  %v22834_v12 = vld [vmem:[#allocation127_spill] sm:$0xff] }
 0x30d   :  { %13759 = vmatprep.mubr.msk.f32.mxu0 %vm92_vm1, %v22827_v10  ;;  %v22835_v10 = vld [vmem:[#allocation84_spill] sm:$0xff] }
 0x310   :  { %13760 = vmatmul.mubr.msk.f32.gmra.mrb[46].mxu0 %vm92_vm1, %v22828_v19  ;;  %v22836_v19 = vld [vmem:[#allocation128_spill] sm:$0xff] }
 0x311   :  { %13762 = vmatprep.mubr.msk.f32.mxu0 %vm92_vm1, %v22829_v61 }
 0x314   :  { %13763 = vmatmul.mubr.msk.f32.gmra.mrb[48].mxu0 %vm92_vm1, %v22830_v29 }
 0x315   :  { %13765 = vmatprep.mubr.msk.f32.mxu0 %vm92_vm1, %v22831_v23 }
 0x318   :  { %13766 = vmatmul.mubr.msk.f32.gmra.mrb[50].mxu0 %vm92_vm1, %v22832_v2  ;;  %v3475_v2 = vrot.slane %v18165_v38, 2 }
 0x319   :  { %13768 = vmatprep.mubr.msk.f32.mxu0 %vm92_vm1, %v22833_v49  ;;  %v3474_v49 = vrot.slane %v18159_v30, 2 }
 0x31c   :  { %13769 = vmatmul.mubr.msk.f32.gmra.mrb[52].mxu0 %vm92_vm1, %v22834_v12 }
 0x31d   :  { %13771 = vmatprep.mubr.msk.f32.mxu0 %vm92_vm1, %v22835_v10 }
 0x320   :  { %13772 = vmatmul.mubr.msk.f32.gmra.mrb[54].mxu0 %vm92_vm1, %v22836_v19  ;;  %v3477_v19 = vrot.slane %v18309_v41, 2  ;;  %v22846_v41 = vld [vmem:[#allocation80_spill] sm:$0xff] }
 0x321   :  { %13774 = vmatprep.mubr.msk.f32.mxu0 %vm92_vm1, %v17943_v42  ;;  %v18472_v42 = vsel %vm1786_vm5, %v3474_v49, %v3475_v2  ;;  %v18488_v49 = vld [vmem:[%s21951_s1 + $0x20] sm:$0xf] }
 0x324   :  { %13775 = vmatmul.mubr.msk.f32.gmra.mrb[56].mxu0 %vm92_vm1, %v17960_v25 }
 0x325   :  { %13777 = vmatprep.mubr.msk.f32.mxu0 %vm92_vm1, %v17965_v63  ;;  %v18479_v63 = vsel %vm1786_vm5, %v3475_v2, %v3477_v19  ;;  %v22837_v19 = vld [vmem:[#allocation106_spill] sm:$0xff] }
 0x326   :  { %v22848_v2 = vld [vmem:[#allocation90_spill] sm:$0xff] }
 0x328   :  { %13778 = vmatmul.mubr.msk.f32.gmra.mrb[58].mxu0 %vm92_vm1, %v17977_v21 }
 0x329   :  { %13780 = vmatprep.mubr.msk.f32.mxu0 %vm92_vm1, %v17981_v28 }
 0x32c   :  { %13781 = vmatmul.mubr.msk.f32.gmra.mrb[60].mxu0 %vm92_vm1, %v17988_v1 }
 0x32d   :  { %13783 = vmatprep.mubr.msk.f32.mxu0 %vm92_vm1, %v18472_v42 }
 0x330   :  { %13784 = vmatmul.mubr.msk.f32.gmra.mrb[62].mxu0 %vm92_vm1, %v18479_v63 }
 0x331   :  { %13788 = vmatprep.mubr.msk.f32.mxu0 %vm92_vm1, %v22709_v31  ;;  %v22838_v31 = vld [vmem:[#allocation107_spill] sm:$0xff] }
 0x334   :  { %13789 = vmatmul.mubr.msk.f32.vlgmr.msra.gmra.mrb[0].mxu0 %vm92_vm1, %v22710_v54  ;;  %v22839_v54 = vld [vmem:[#allocation109_spill] sm:$0xff] }
 0x335   :  { %13885 = vmatpush3.msk.msra.mxu0 %vm881_vm0, %v18333_v51  ;;  %13791 = vmatprep.mubr.msk.f32.mxu0 %vm92_vm1, %v22711_v5  ;;  %v22840_v5 = vld [vmem:[#allocation110_spill] sm:$0xff]  ;;  %v22847_v51 = vld [vmem:[#allocation81_spill] sm:$0xff] }
 0x336   :  { %13982 = vmatprep.subr.msk.mxu0 %vm881_vm0, %v18488_v49 }
 0x338   :  { %13792 = vmatmul.mubr.msk.f32.gmra.mrb[2].mxu0 %vm92_vm1, %v22712_v47  ;;  %v22841_v47 = vld [vmem:[#allocation95_spill] sm:$0xff] }
 0x339   :  { %13794 = vmatprep.mubr.msk.f32.mxu0 %vm92_vm1, %v22713_v37  ;;  %v22842_v37 = vld [vmem:[#allocation61_spill] sm:$0xff] }
 0x33c   :  { %13795 = vmatmul.mubr.msk.f32.gmra.mrb[4].mxu0 %vm92_vm1, %v22714_v48  ;;  %v22843_v48 = vld [vmem:[#allocation65_spill] sm:$0xff] }
 0x33d   :  { %13797 = vmatprep.mubr.msk.f32.mxu0 %vm92_vm1, %v22715_v6  ;;  %v22844_v6 = vld [vmem:[#allocation70_spill] sm:$0xff] }
 0x340   :  { %13798 = vmatmul.mubr.msk.f32.gmra.mrb[6].mxu0 %vm92_vm1, %v22716_v58  ;;  %v22845_v58 = vld [vmem:[#allocation71_spill] sm:$0xff] }
 0x341   :  { %13800 = vmatprep.mubr.msk.f32.mxu0 %vm92_vm1, %v22837_v19  ;;  %v22849_v19 = vld [vmem:[#allocation99_spill] sm:$0xff] }
 0x344   :  { %13801 = vmatmul.mubr.msk.f32.gmra.mrb[8].mxu0 %vm92_vm1, %v22838_v31  ;;  %v22850_v31 = vld [vmem:[#allocation102_spill] sm:$0xff] }
 0x345   :  { %13803 = vmatprep.mubr.msk.f32.mxu0 %vm92_vm1, %v22839_v54  ;;  %v22851_v54 = vld [vmem:[#allocation103_spill] sm:$0xff] }
 0x348   :  { %13804 = vmatmul.mubr.msk.f32.gmra.mrb[10].mxu0 %vm92_vm1, %v22840_v5  ;;  %v22852_v5 = vld [vmem:[#allocation130_spill] sm:$0xff] }
 0x349   :  { %13806 = vmatprep.mubr.msk.f32.mxu0 %vm92_vm1, %v22841_v47  ;;  %v18550_v47 = vld [vmem:[#allocation2 + $0x198] sm:$0xff] }
 0x34c   :  { %13807 = vmatmul.mubr.msk.f32.gmra.mrb[12].mxu0 %vm92_vm1, %v22842_v37  ;;  %v16034_v37 = vld [vmem:[#allocation2 + $0x218] sm:$0xff] }
 0x34d   :  { %13809 = vmatprep.mubr.msk.f32.mxu0 %vm92_vm1, %v22843_v48  ;;  %v16035_v48 = vld [vmem:[#allocation2 + $0x228] sm:$0xff] }
 0x350   :  { %13810 = vmatmul.mubr.msk.f32.gmra.mrb[14].mxu0 %vm92_vm1, %v22844_v6  ;;  %v16036_v6 = vld [vmem:[#allocation2 + $0x230] sm:$0xff] }
 0x351   :  { %13812 = vmatprep.mubr.msk.f32.mxu0 %vm92_vm1, %v22845_v58  ;;  %v16037_v58 = vld [vmem:[#allocation2 + $0x240] sm:$0xff] }
 0x354   :  { %13813 = vmatmul.mubr.msk.f32.gmra.mrb[16].mxu0 %vm92_vm1, %v22846_v41  ;;  %v16038_v41 = vld [vmem:[#allocation2 + $0x248] sm:$0xff] }
 0x355   :  { %13815 = vmatprep.mubr.msk.f32.mxu0 %vm92_vm1, %v22847_v51  ;;  %v16039_v51 = vld [vmem:[#allocation2 + $0x258] sm:$0xff] }
 0x358   :  { %13816 = vmatmul.mubr.msk.f32.gmra.mrb[18].mxu0 %vm92_vm1, %v22848_v2  ;;  %v16040_v2 = vld [vmem:[#allocation2 + $0x260] sm:$0xff] }
 0x359   :  { %13818 = vmatprep.mubr.msk.f32.mxu0 %vm92_vm1, %v22849_v19  ;;  %v16041_v19 = vld [vmem:[#allocation2 + $0x270] sm:$0xff] }
 0x35c   :  { %13819 = vmatmul.mubr.msk.f32.gmra.mrb[20].mxu0 %vm92_vm1, %v22850_v31  ;;  %v16042_v31 = vld [vmem:[#allocation2 + $0x278] sm:$0xff] }
 0x35d   :  { %13821 = vmatprep.mubr.msk.f32.mxu0 %vm92_vm1, %v22851_v54  ;;  %v16043_v54 = vld [vmem:[#allocation2 + $0x288] sm:$0xff] }
 0x360   :  { %13822 = vmatmul.mubr.msk.f32.gmra.mrb[22].mxu0 %vm92_vm1, %v18073_v20  ;;  %v18556_v20 = vld [vmem:[#allocation2 + $0x1a0] sm:$0xff] }
 0x361   :  { %13824 = vmatprep.mubr.msk.f32.mxu0 %vm92_vm1, %v22852_v5  ;;  %v16044_v5 = vld [vmem:[#allocation2 + $0x290] sm:$0xff] }
 0x364   :  { %13825 = vmatmul.mubr.msk.f32.gmra.mrb[24].mxu0 %vm92_vm1, %v18081_v57  ;;  %v16031_v57 = vld [vmem:[#allocation2 + $0x1f8] sm:$0xff] }
 0x365   :  { %13827 = vmatprep.mubr.msk.f32.mxu0 %vm92_vm1, %v18085_v0  ;;  %v16029_v0 = vld [vmem:[#allocation2 + $0x1e0] sm:$0xff] }
 0x368   :  { %13828 = vmatmul.mubr.msk.f32.gmra.mrb[26].mxu0 %vm92_vm1, %v18091_v34  ;;  %v16030_v34 = vld [vmem:[#allocation2 + $0x1e8] sm:$0xff] }
 0x369   :  { %13830 = vmatprep.mubr.msk.f32.mxu0 %vm92_vm1, %v18089_v46  ;;  %v16032_v46 = vld [vmem:[#allocation2 + $0x200] sm:$0xff] }
 0x36c   :  { %13831 = vmatmul.mubr.msk.f32.gmra.mrb[28].mxu0 %vm92_vm1, %v18097_v45  ;;  %v16033_v45 = vld [vmem:[#allocation2 + $0x210] sm:$0xff] }
 0x36d   :  { %13833 = vmatprep.mubr.msk.f32.mxu0 %vm92_vm1, %v18550_v47 }
 0x370   :  { %13834 = vmatmul.mubr.msk.f32.gmra.mrb[30].mxu0 %vm92_vm1, %v18556_v20 }
 0x371   :  { %13836 = vmatprep.mubr.msk.f32.mxu0 %vm92_vm1, %v16029_v0  ;;  %v16045_v0 = vld [vmem:[#allocation2 + $0x2a0] sm:$0xff] }
 0x374   :  { %13837 = vmatmul.mubr.msk.f32.gmra.mrb[32].mxu0 %vm92_vm1, %v16030_v34  ;;  %v16046_v34 = vld [vmem:[#allocation2 + $0x2a8] sm:$0xff] }
 0x375   :  { %13839 = vmatprep.mubr.msk.f32.mxu0 %vm92_vm1, %v16031_v57  ;;  %v16047_v57 = vld [vmem:[#allocation2 + $0x2b8] sm:$0xff] }
 0x378   :  { %13840 = vmatmul.mubr.msk.f32.gmra.mrb[34].mxu0 %vm92_vm1, %v16032_v46  ;;  %v16048_v46 = vld [vmem:[#allocation2 + $0x2c0] sm:$0xff] }
 0x379   :  { %13842 = vmatprep.mubr.msk.f32.mxu0 %vm92_vm1, %v16033_v45  ;;  %v16049_v45 = vld [vmem:[#allocation2 + $0x2d0] sm:$0xff] }
 0x37c   :  { %13843 = vmatmul.mubr.msk.f32.gmra.mrb[36].mxu0 %vm92_vm1, %v16034_v37  ;;  %v16050_v37 = vld [vmem:[#allocation2 + $0x2d8] sm:$0xff] }
 0x37d   :  { %13845 = vmatprep.mubr.msk.f32.mxu0 %vm92_vm1, %v16035_v48  ;;  %v16051_v48 = vld [vmem:[#allocation2 + $0x2e8] sm:$0xff] }
 0x380   :  { %13846 = vmatmul.mubr.msk.f32.gmra.mrb[38].mxu0 %vm92_vm1, %v16036_v6  ;;  %v16052_v6 = vld [vmem:[#allocation2 + $0x2f0] sm:$0xff] }
 0x381   :  { %13848 = vmatprep.mubr.msk.f32.mxu0 %vm92_vm1, %v16037_v58  ;;  %v16053_v58 = vld [vmem:[#allocation2 + $0x300] sm:$0xff] }
 0x384   :  { %13849 = vmatmul.mubr.msk.f32.gmra.mrb[40].mxu0 %vm92_vm1, %v16038_v41  ;;  %v16054_v41 = vld [vmem:[#allocation2 + $0x308] sm:$0xff] }
 0x385   :  { %13851 = vmatprep.mubr.msk.f32.mxu0 %vm92_vm1, %v16039_v51  ;;  %v16055_v51 = vld [vmem:[#allocation2 + $0x318] sm:$0xff] }
 0x388   :  { %13852 = vmatmul.mubr.msk.f32.gmra.mrb[42].mxu0 %vm92_vm1, %v16040_v2  ;;  %v16056_v2 = vld [vmem:[#allocation2 + $0x320] sm:$0xff] }
 0x389   :  { %13854 = vmatprep.mubr.msk.f32.mxu0 %vm92_vm1, %v16041_v19  ;;  %v18590_v19 = vld [vmem:[#allocation2 + $0x348] sm:$0xff] }
 0x38c   :  { %13855 = vmatmul.mubr.msk.f32.gmra.mrb[44].mxu0 %vm92_vm1, %v16042_v31  ;;  %v18596_v31 = vld [vmem:[#allocation2 + $0x350] sm:$0xff] }
 0x38d   :  { %13857 = vmatprep.mubr.msk.f32.mxu0 %vm92_vm1, %v16043_v54  ;;  %v22868_v54 = vld [vmem:[#allocation52_spill] sm:$0xff] }
 0x390   :  { %13858 = vmatmul.mubr.msk.f32.gmra.mrb[46].mxu0 %vm92_vm1, %v16044_v5  ;;  %v22869_v5 = vld [vmem:[#allocation53_spill] sm:$0xff] }
 0x391   :  { %13860 = vmatprep.mubr.msk.f32.mxu0 %vm92_vm1, %v16045_v0  ;;  %v22870_v0 = vld [vmem:[#allocation55_spill] sm:$0xff] }
 0x394   :  { %13861 = vmatmul.mubr.msk.f32.gmra.mrb[48].mxu0 %vm92_vm1, %v16046_v34  ;;  %v22871_v34 = vld [vmem:[#allocation56_spill] sm:$0xff] }
 0x395   :  { %13863 = vmatprep.mubr.msk.f32.mxu0 %vm92_vm1, %v16047_v57  ;;  %v22872_v57 = vld [vmem:[#allocation58_spill] sm:$0xff] }
 0x398   :  { %13864 = vmatmul.mubr.msk.f32.gmra.mrb[50].mxu0 %vm92_vm1, %v16048_v46  ;;  %v22873_v46 = vld [vmem:[#allocation59_spill] sm:$0xff] }
 0x399   :  { %13866 = vmatprep.mubr.msk.f32.mxu0 %vm92_vm1, %v16049_v45  ;;  %v22874_v45 = vld [vmem:[#allocation62_spill] sm:$0xff] }
 0x39c   :  { %13867 = vmatmul.mubr.msk.f32.gmra.mrb[52].mxu0 %vm92_vm1, %v16050_v37  ;;  %v22875_v37 = vld [vmem:[#allocation63_spill] sm:$0xff] }
 0x39d   :  { %13869 = vmatprep.mubr.msk.f32.mxu0 %vm92_vm1, %v16051_v48  ;;  %v22876_v48 = vld [vmem:[#allocation67_spill] sm:$0xff] }
 0x3a0   :  { %13870 = vmatmul.mubr.msk.f32.gmra.mrb[54].mxu0 %vm92_vm1, %v16052_v6  ;;  %v22877_v6 = vld [vmem:[#allocation68_spill] sm:$0xff] }
 0x3a1   :  { %13872 = vmatprep.mubr.msk.f32.mxu0 %vm92_vm1, %v16053_v58  ;;  %v22878_v58 = vld [vmem:[#allocation72_spill] sm:$0xff] }
 0x3a4   :  { %13873 = vmatmul.mubr.msk.f32.gmra.mrb[56].mxu0 %vm92_vm1, %v16054_v41  ;;  %v22879_v41 = vld [vmem:[#allocation73_spill] sm:$0xff] }
 0x3a5   :  { %13875 = vmatprep.mubr.msk.f32.mxu0 %vm92_vm1, %v16055_v51  ;;  %v22880_v51 = vld [vmem:[#allocation77_spill] sm:$0xff] }
 0x3a8   :  { %13876 = vmatmul.mubr.msk.f32.gmra.mrb[58].mxu0 %vm92_vm1, %v16056_v2  ;;  %v22881_v2 = vld [vmem:[#allocation78_spill] sm:$0xff] }
 0x3a9   :  { %13878 = vmatprep.mubr.msk.f32.mxu0 %vm92_vm1, %v18159_v30  ;;  %v22853_v30 = vld [vmem:[#allocation29_spill] sm:$0xff] }
 0x3ac   :  { %13879 = vmatmul.mubr.msk.f32.gmra.mrb[60].mxu0 %vm92_vm1, %v18165_v38  ;;  %v22854_v38 = vld [vmem:[#allocation30_spill] sm:$0xff] }
 0x3ad   :  { %13881 = vmatprep.mubr.msk.f32.mxu0 %vm92_vm1, %v18590_v19 }
 0x3b0   :  { %13882 = vmatmul.mubr.msk.f32.gmra.mrb[62].mxu0 %vm92_vm1, %v18596_v31 }
 0x3b1   :  { %13886 = vmatprep.mubr.msk.f32.mxu0 %vm92_vm1, %v22733_v33  ;;  %v22855_v33 = vld [vmem:[#allocation32_spill] sm:$0xff] }
 0x3b4   :  { %13887 = vmatmul.mubr.msk.f32.vlgmr.msra.gmra.mrb[0].mxu0 %vm92_vm1, %v22734_v62  ;;  %v22856_v62 = vld [vmem:[#allocation33_spill] sm:$0xff] }
 0x3b5   :  { %13983 = vmatpush3.msk.msra.mxu0 %vm881_vm0, %v18488_v49  ;;  %13889 = vmatprep.mubr.msk.f32.mxu0 %vm92_vm1, %v22735_v56  ;;  %v22857_v56 = vld [vmem:[#allocation34_spill] sm:$0xff] }
 0x3b6   :  { %v22867_v49 = vld [vmem:[#allocation50_spill] sm:$0xff] }
 0x3b8   :  { %13890 = vmatmul.mubr.msk.f32.gmra.mrb[2].mxu0 %vm92_vm1, %v22736_v60  ;;  %v22858_v60 = vld [vmem:[#allocation36_spill] sm:$0xff] }
 0x3b9   :  { %13892 = vmatprep.mubr.msk.f32.mxu0 %vm92_vm1, %v22737_v7  ;;  %v22859_v7 = vld [vmem:[#allocation37_spill] sm:$0xff] }
 0x3bc   :  { %13893 = vmatmul.mubr.msk.f32.gmra.mrb[4].mxu0 %vm92_vm1, %v22738_v39  ;;  %v22860_v39 = vld [vmem:[#allocation39_spill] sm:$0xff] }
 0x3bd   :  { %13895 = vmatprep.mubr.msk.f32.mxu0 %vm92_vm1, %v22739_v3  ;;  %v22861_v3 = vld [vmem:[#allocation40_spill] sm:$0xff] }
 0x3c0   :  { %13896 = vmatmul.mubr.msk.f32.gmra.mrb[6].mxu0 %vm92_vm1, %v22740_v15  ;;  %v4409_v15 = vrot.slane %v18550_v47, 1 }
 0x3c1   :  { %13898 = vmatprep.mubr.msk.f32.mxu0 %vm92_vm1, %v22741_v4  ;;  %v4410_v4 = vrot.slane %v18556_v20, 1 }
 0x3c4   :  { %13899 = vmatmul.mubr.msk.f32.gmra.mrb[8].mxu0 %vm92_vm1, %v22742_v18  ;;  %v18658_v18 = vld [vmem:[#allocation2 + $0x1a8] sm:$0x3] }
 0x3c5   :  { %13901 = vmatprep.mubr.msk.f32.mxu0 %vm92_vm1, %v22743_v17  ;;  %v22862_v17 = vld [vmem:[#allocation42_spill] sm:$0xff] }
 0x3c8   :  { %13902 = vmatmul.mubr.msk.f32.gmra.mrb[10].mxu0 %vm92_vm1, %v22744_v24  ;;  %v22863_v24 = vld [vmem:[#allocation4_spill] sm:$0xff] }
 0x3c9   :  { %13904 = vmatprep.mubr.msk.f32.mxu0 %vm92_vm1, %v22745_v14  ;;  %v4412_v14 = vrot.slane %v18658_v18, 1 }
 0x3cc   :  { %13905 = vmatmul.mubr.msk.f32.gmra.mrb[12].mxu0 %vm92_vm1, %v22746_v8  ;;  %v4411_v8 = vsel %vm590_vm4, %v4409_v15, %v4410_v4  ;;  %v22891_v15 = vld [vmem:[#allocation97_spill] sm:$0xff] }
 0x3cd   :  { %13907 = vmatprep.mubr.msk.f32.mxu0 %vm92_vm1, %v22747_v13  ;;  %v22864_v13 = vld [vmem:[#allocation5_spill] sm:$0xff] }
 0x3d0   :  { %13908 = vmatmul.mubr.msk.f32.gmra.mrb[14].mxu0 %vm92_vm1, %v22748_v16  ;;  %v4413_v16 = vsel %vm590_vm4, %v4410_v4, %v4412_v14  ;;  %v4414_v4 = vrot.slane %v18590_v19, 1  ;;  %v22892_v14 = vld [vmem:[#allocation6_spill] sm:$0xff] }
 0x3d1   :  { %13910 = vmatprep.mubr.msk.f32.mxu0 %vm92_vm1, %v22749_v22  ;;  %v22865_v22 = vld [vmem:[#allocation47_spill] sm:$0xff] }
 0x3d4   :  { %13911 = vmatmul.mubr.msk.f32.gmra.mrb[16].mxu0 %vm92_vm1, %v22750_v26  ;;  %v22866_v26 = vld [vmem:[#allocation49_spill] sm:$0xff] }
 0x3d5   :  { %13913 = vmatprep.mubr.msk.f32.mxu0 %vm92_vm1, %v22853_v30  ;;  %v22882_v30 = vld [vmem:[#allocation82_spill] sm:$0xff] }
 0x3d8   :  { %13914 = vmatmul.mubr.msk.f32.gmra.mrb[18].mxu0 %vm92_vm1, %v22854_v38  ;;  %v22883_v38 = vld [vmem:[#allocation83_spill] sm:$0xff] }
 0x3d9   :  { %13916 = vmatprep.mubr.msk.f32.mxu0 %vm92_vm1, %v22855_v33  ;;  %v22884_v33 = vld [vmem:[#allocation87_spill] sm:$0xff] }
 0x3dc   :  { %13917 = vmatmul.mubr.msk.f32.gmra.mrb[20].mxu0 %vm92_vm1, %v22856_v62  ;;  %v22885_v62 = vld [vmem:[#allocation88_spill] sm:$0xff] }
 0x3dd   :  { %13919 = vmatprep.mubr.msk.f32.mxu0 %vm92_vm1, %v22857_v56  ;;  %v22886_v56 = vld [vmem:[#allocation91_spill] sm:$0xff] }
 0x3e0   :  { %13920 = vmatmul.mubr.msk.f32.gmra.mrb[22].mxu0 %vm92_vm1, %v22858_v60  ;;  %v22887_v60 = vld [vmem:[#allocation92_spill] sm:$0xff] }
 0x3e1   :  { %13922 = vmatprep.mubr.msk.f32.mxu0 %vm92_vm1, %v22859_v7  ;;  %v22888_v7 = vld [vmem:[#allocation93_spill] sm:$0xff] }
 0x3e4   :  { %13923 = vmatmul.mubr.msk.f32.gmra.mrb[24].mxu0 %vm92_vm1, %v22860_v39  ;;  %v22889_v39 = vld [vmem:[#allocation94_spill] sm:$0xff] }
 0x3e5   :  { %13925 = vmatprep.mubr.msk.f32.mxu0 %vm92_vm1, %v22861_v3  ;;  %v22890_v3 = vld [vmem:[#allocation96_spill] sm:$0xff] }
 0x3e8   :  { %13926 = vmatmul.mubr.msk.f32.gmra.mrb[26].mxu0 %vm92_vm1, %v22862_v17  ;;  %v4415_v17 = vrot.slane %v18596_v31, 1 }
 0x3e9   :  { %13928 = vmatprep.mubr.msk.f32.mxu0 %vm92_vm1, %v22863_v24  ;;  %v18727_v24 = vld [vmem:[#allocation2 + $0x358] sm:$0x3] }
 0x3ec   :  { %13929 = vmatmul.mubr.msk.f32.gmra.mrb[28].mxu0 %vm92_vm1, %v22864_v13  ;;  %v4416_v13 = vsel %vm590_vm4, %v4414_v4, %v4415_v17 }
 0x3ed   :  { %13931 = vmatprep.mubr.msk.f32.mxu0 %vm92_vm1, %v4411_v8  ;;  %v4417_v8 = vrot.slane %v18727_v24, 1 }
 0x3f0   :  { %13932 = vmatmul.mubr.msk.f32.gmra.mrb[30].mxu0 %vm92_vm1, %v4413_v16  ;;  %v22893_v16 = vld [vmem:[#allocation7_spill] sm:$0xff] }
 0x3f1   :  { %13934 = vmatprep.mubr.msk.f32.mxu0 %vm92_vm1, %v22865_v22  ;;  %v4418_v22 = vsel %vm590_vm4, %v4415_v17, %v4417_v8  ;;  %v22928_v8 = vld [vmem:[#allocation128_spill] sm:$0xff] }
 0x3f4   :  { %13935 = vmatmul.mubr.msk.f32.gmra.mrb[32].mxu0 %vm92_vm1, %v22866_v26  ;;  %v22894_v26 = vld [vmem:[#allocation76_spill] sm:$0xff] }
 0x3f5   :  { %13937 = vmatprep.mubr.msk.f32.mxu0 %vm92_vm1, %v22867_v49  ;;  %v22905_v49 = vld [vmem:[#allocation31_spill] sm:$0xff] }
 0x3f8   :  { %13938 = vmatmul.mubr.msk.f32.gmra.mrb[34].mxu0 %vm92_vm1, %v22868_v54  ;;  %v22908_v54 = vld [vmem:[#allocation38_spill] sm:$0xff] }
 0x3f9   :  { %13940 = vmatprep.mubr.msk.f32.mxu0 %vm92_vm1, %v22869_v5  ;;  %v4881_v5 = vrot.slane %v18550_v47, 2  ;;  %v22911_v47 = vld [vmem:[#allocation45_spill] sm:$0xff] }
 0x3fc   :  { %13941 = vmatmul.mubr.msk.f32.gmra.mrb[36].mxu0 %vm92_vm1, %v22870_v0  ;;  %v4882_v0 = vrot.slane %v18556_v20, 2  ;;  %v22912_v20 = vld [vmem:[#allocation118_spill] sm:$0xff] }
 0x3fd   :  { %13943 = vmatprep.mubr.msk.f32.mxu0 %vm92_vm1, %v22871_v34  ;;  %v22909_v34 = vld [vmem:[#allocation117_spill] sm:$0xff] }
 0x400   :  { %13944 = vmatmul.mubr.msk.f32.gmra.mrb[38].mxu0 %vm92_vm1, %v22872_v57  ;;  %v4883_v57 = vsel %vm1786_vm5, %v4881_v5, %v4882_v0 }
 0x401   :  { %13946 = vmatprep.mubr.msk.f32.mxu0 %vm92_vm1, %v22873_v46  ;;  %v22910_v46 = vld [vmem:[#allocation8_spill] sm:$0xff] }
 0x404   :  { %13947 = vmatmul.mubr.msk.f32.gmra.mrb[40].mxu0 %vm92_vm1, %v22874_v45 }
 0x405   :  { %13949 = vmatprep.mubr.msk.f32.mxu0 %vm92_vm1, %v22875_v37  ;;  %v22915_v37 = vld [vmem:[#allocation51_spill] sm:$0xff] }
 0x408   :  { %13950 = vmatmul.mubr.msk.f32.gmra.mrb[42].mxu0 %vm92_vm1, %v22876_v48  ;;  %v22916_v48 = vld [vmem:[#allocation120_spill] sm:$0xff] }
 0x409   :  { %13952 = vmatprep.mubr.msk.f32.mxu0 %vm92_vm1, %v22877_v6  ;;  %v22917_v6 = vld [vmem:[#allocation54_spill] sm:$0xff] }
 0x40c   :  { %13953 = vmatmul.mubr.msk.f32.gmra.mrb[44].mxu0 %vm92_vm1, %v22878_v58  ;;  %v22918_v58 = vld [vmem:[#allocation121_spill] sm:$0xff] }
 0x40d   :  { %13955 = vmatprep.mubr.msk.f32.mxu0 %vm92_vm1, %v22879_v41  ;;  %v22919_v41 = vld [vmem:[#allocation57_spill] sm:$0xff] }
 0x410   :  { %13956 = vmatmul.mubr.msk.f32.gmra.mrb[46].mxu0 %vm92_vm1, %v22880_v51  ;;  %v22920_v51 = vld [vmem:[#allocation122_spill] sm:$0xff] }
 0x411   :  { %13958 = vmatprep.mubr.msk.f32.mxu0 %vm92_vm1, %v22881_v2  ;;  %v22921_v2 = vld [vmem:[#allocation60_spill] sm:$0xff] }
 0x414   :  { %13959 = vmatmul.mubr.msk.f32.gmra.mrb[48].mxu0 %vm92_vm1, %v22882_v30  ;;  %v22922_v30 = vld [vmem:[#allocation123_spill] sm:$0xff] }
 0x415   :  { %13961 = vmatprep.mubr.msk.f32.mxu0 %vm92_vm1, %v22883_v38  ;;  %v22923_v38 = vmov 0.0  }
 0x416   :  { %5489 = vst.msk [vmem:[#allocation3] sm:$0xff] %vm5488_vm6, %v22923_v38  ;;  %5490 = vst.msk [vmem:[#allocation3 + $0x8] sm:$0xff] %vm5488_vm6, %v22923_v38 }
 0x417   :  { %5493 = vst.msk [vmem:[#allocation3 + $0x1b0] sm:$0xff] %vm5488_vm6, %v22923_v38  ;;  %5494 = vst.msk [vmem:[#allocation3 + $0x1b8] sm:$0xff] %vm5488_vm6, %v22923_v38 }
 0x418   :  { %13962 = vmatmul.mubr.msk.f32.gmra.mrb[50].mxu0 %vm92_vm1, %v22884_v33  ;;  %5497 = vst.msk [vmem:[#allocation3 + $0x198] sm:$0xff] %vm5488_vm6, %v22923_v38  ;;  %5498 = vst.msk [vmem:[#allocation3 + $0x1a0] sm:$0xff] %vm5488_vm6, %v22923_v38  ;;  %v22924_v33 = vld [vmem:[#allocation64_spill] sm:$0xff] }
 0x419   :  { %13964 = vmatprep.mubr.msk.f32.mxu0 %vm92_vm1, %v22885_v62  ;;  %5500 = vst.msk [vmem:[#allocation3 + $0x348] sm:$0xff] %vm5488_vm6, %v22923_v38  ;;  %5501 = vst.msk [vmem:[#allocation3 + $0x350] sm:$0xff] %vm5488_vm6, %v22923_v38  ;;  %v22925_v62 = vld [vmem:[#allocation124_spill] sm:$0xff] }
 0x41a   :  { %5504 = vst.msk [vmem:[#allocation3] sm:$0x1] %vm5503_vm7, %v22923_v38  ;;  %5505 = vst.msk [vmem:[#allocation3 + $0x18] sm:$0x1] %vm5503_vm7, %v22923_v38 }
 0x41b   :  { %5506 = vst.msk [vmem:[#allocation3 + $0x30] sm:$0x1] %vm5503_vm7, %v22923_v38  ;;  %5507 = vst.msk [vmem:[#allocation3 + $0x48] sm:$0x1] %vm5503_vm7, %v22923_v38 }
 0x41c   :  { %13965 = vmatmul.mubr.msk.f32.gmra.mrb[52].mxu0 %vm92_vm1, %v22886_v56  ;;  %5508 = vst.msk [vmem:[#allocation3 + $0x60] sm:$0x1] %vm5503_vm7, %v22923_v38  ;;  %5509 = vst.msk [vmem:[#allocation3 + $0x78] sm:$0x1] %vm5503_vm7, %v22923_v38 }
 0x41d   :  { %13967 = vmatprep.mubr.msk.f32.mxu0 %vm92_vm1, %v22887_v60  ;;  %5510 = vst.msk [vmem:[#allocation3 + $0x90] sm:$0x1] %vm5503_vm7, %v22923_v38  ;;  %5511 = vst.msk [vmem:[#allocation3 + $0xa8] sm:$0x1] %vm5503_vm7, %v22923_v38  ;;  %v5642_v60 = vld [vmem:[#allocation3 + $0x8] sm:$0xff] }
 0x41e   :  { %5512 = vst.msk [vmem:[#allocation3 + $0xc0] sm:$0x1] %vm5503_vm7, %v22923_v38  ;;  %5513 = vst.msk [vmem:[#allocation3 + $0xd8] sm:$0x1] %vm5503_vm7, %v22923_v38 }
 0x41f   :  { %5514 = vst.msk [vmem:[#allocation3 + $0xf0] sm:$0x1] %vm5503_vm7, %v22923_v38  ;;  %5515 = vst.msk [vmem:[#allocation3 + $0x108] sm:$0x1] %vm5503_vm7, %v22923_v38 }
 0x420   :  { %13968 = vmatmul.mubr.msk.f32.gmra.mrb[54].mxu0 %vm92_vm1, %v22888_v7  ;;  %5516 = vst.msk [vmem:[#allocation3 + $0x120] sm:$0x1] %vm5503_vm7, %v22923_v38  ;;  %5517 = vst.msk [vmem:[#allocation3 + $0x138] sm:$0x1] %vm5503_vm7, %v22923_v38 }
 0x421   :  { %13970 = vmatprep.mubr.msk.f32.mxu0 %vm92_vm1, %v22889_v39  ;;  %5518 = vst.msk [vmem:[#allocation3 + $0x150] sm:$0x1] %vm5503_vm7, %v22923_v38  ;;  %5519 = vst.msk [vmem:[#allocation3 + $0x168] sm:$0x1] %vm5503_vm7, %v22923_v38  ;;  %v5641_v56 = vld [vmem:[#allocation3] sm:$0xff]  ;;  %v5847_v39 = vrot.slane %v5642_v60, 1 }
 0x422   :  { %5520 = vst.msk [vmem:[#allocation3 + $0x180] sm:$0x1] %vm5503_vm7, %v22923_v38  ;;  %5521 = vst.msk [vmem:[#allocation3 + $0x198] sm:$0x1] %vm5503_vm7, %v22923_v38  ;;  %v5846_v7 = vrot.slane %v5641_v56, 1 }
 0x423   :  { %5522 = vst.msk [vmem:[#allocation3 + $0x1b0] sm:$0x1] %vm5503_vm7, %v22923_v38  ;;  %5523 = vst.msk [vmem:[#allocation3 + $0x1c8] sm:$0x1] %vm5503_vm7, %v22923_v38 }
 0x424   :  { %13971 = vmatmul.mubr.msk.f32.gmra.mrb[56].mxu0 %vm92_vm1, %v22890_v3  ;;  %5524 = vst.msk [vmem:[#allocation3 + $0x1e0] sm:$0x1] %vm5503_vm7, %v22923_v38  ;;  %5525 = vst.msk [vmem:[#allocation3 + $0x1f8] sm:$0x1] %vm5503_vm7, %v22923_v38  ;;  %v5848_v17 = vsel %vm590_vm4, %v5846_v7, %v5847_v39 }
 0x425   :  { %13973 = vmatprep.mubr.msk.f32.mxu0 %vm92_vm1, %v22891_v15  ;;  %5526 = vst.msk [vmem:[#allocation3 + $0x210] sm:$0x1] %vm5503_vm7, %v22923_v38  ;;  %5527 = vst.msk [vmem:[#allocation3 + $0x228] sm:$0x1] %vm5503_vm7, %v22923_v38  ;;  %v11443_v15 = vld [vmem:[%s21955_s2 + $0x8] sm:$0xff]  ;;  %14082 = vmatprep.mubr.msk.f32.mxu1 %vm5488_vm6, %v5848_v17 }
 0x426   :  { %5528 = vst.msk [vmem:[#allocation3 + $0x240] sm:$0x1] %vm5503_vm7, %v22923_v38  ;;  %5529 = vst.msk [vmem:[#allocation3 + $0x258] sm:$0x1] %vm5503_vm7, %v22923_v38  ;;  %14080 = vmatprep.subr.mxu1 %v11443_v15 }
 0x427   :  { %5530 = vst.msk [vmem:[#allocation3 + $0x270] sm:$0x1] %vm5503_vm7, %v22923_v38  ;;  %5531 = vst.msk [vmem:[#allocation3 + $0x288] sm:$0x1] %vm5503_vm7, %v22923_v38  ;;  %14081 = vmatpush3.msra.mxu1 %v11443_v15 }
 0x428   :  { %13974 = vmatmul.mubr.msk.f32.gmra.mrb[58].mxu0 %vm92_vm1, %v22793_v36  ;;  %v22895_v36 = vld [vmem:[#allocation111_spill] sm:$0xff]  ;;  %5532 = vst.msk [vmem:[#allocation3 + $0x2a0] sm:$0x1] %vm5503_vm7, %v22923_v38  ;;  %5533 = vst.msk [vmem:[#allocation3 + $0x2b8] sm:$0x1] %vm5503_vm7, %v22923_v38 }
 0x429   :  { %13976 = vmatprep.mubr.msk.f32.mxu0 %vm92_vm1, %v22892_v14  ;;  %5534 = vst.msk [vmem:[#allocation3 + $0x2d0] sm:$0x1] %vm5503_vm7, %v22923_v38  ;;  %5535 = vst.msk [vmem:[#allocation3 + $0x2e8] sm:$0x1] %vm5503_vm7, %v22923_v38  ;;  %v22927_v14 = vld [vmem:[#allocation79_spill] sm:$0xff] }
 0x42a   :  { %5536 = vst.msk [vmem:[#allocation3 + $0x300] sm:$0x1] %vm5503_vm7, %v22923_v38  ;;  %5537 = vst.msk [vmem:[#allocation3 + $0x318] sm:$0x1] %vm5503_vm7, %v22923_v38 }
 0x42b   :  { %5538 = vst.msk [vmem:[#allocation3 + $0x330] sm:$0x1] %vm5503_vm7, %v22923_v38  ;;  %5539 = vst.msk [vmem:[#allocation3 + $0x348] sm:$0x1] %vm5503_vm7, %v22923_v38 }
 0x42c   :  { %13977 = vmatmul.mubr.msk.f32.gmra.mrb[60].mxu0 %vm92_vm1, %v22893_v16  ;;  %5541 = vst.msk [vmem:[#allocation3 + $0x29] sm:$0x1] %vm5503_vm7, %v22923_v38  ;;  %5542 = vst.msk [vmem:[#allocation3 + $0x41] sm:$0x1] %vm5503_vm7, %v22923_v38  ;;  %v22930_v16 = vld [vmem:[#allocation129_spill] sm:$0xff] }
 0x42d   :  { %13979 = vmatprep.mubr.msk.f32.mxu0 %vm92_vm1, %v4416_v13  ;;  %5543 = vst.msk [vmem:[#allocation3 + $0x59] sm:$0x1] %vm5503_vm7, %v22923_v38  ;;  %5544 = vst.msk [vmem:[#allocation3 + $0x71] sm:$0x1] %vm5503_vm7, %v22923_v38  ;;  %v22929_v13 = vld [vmem:[#allocation89_spill] sm:$0xff] }
 0x42e   :  { %5545 = vst.msk [vmem:[#allocation3 + $0x89] sm:$0x1] %vm5503_vm7, %v22923_v38  ;;  %5546 = vst.msk [vmem:[#allocation3 + $0xa1] sm:$0x1] %vm5503_vm7, %v22923_v38 }
 0x42f   :  { %5547 = vst.msk [vmem:[#allocation3 + $0xb9] sm:$0x1] %vm5503_vm7, %v22923_v38  ;;  %5548 = vst.msk [vmem:[#allocation3 + $0xd1] sm:$0x1] %vm5503_vm7, %v22923_v38 }
 0x430   :  { %13980 = vmatmul.mubr.msk.f32.gmra.mrb[62].mxu0 %vm92_vm1, %v4418_v22  ;;  %5549 = vst.msk [vmem:[#allocation3 + $0xe9] sm:$0x1] %vm5503_vm7, %v22923_v38  ;;  %5550 = vst.msk [vmem:[#allocation3 + $0x101] sm:$0x1] %vm5503_vm7, %v22923_v38 }
 0x431   :  { %13984 = vmatprep.mubr.msk.f32.mxu0 %vm92_vm1, %v22894_v26  ;;  %5551 = vst.msk [vmem:[#allocation3 + $0x119] sm:$0x1] %vm5503_vm7, %v22923_v38  ;;  %5552 = vst.msk [vmem:[#allocation3 + $0x131] sm:$0x1] %vm5503_vm7, %v22923_v38 }
 0x432   :  { %5553 = vst.msk [vmem:[#allocation3 + $0x149] sm:$0x1] %vm5503_vm7, %v22923_v38  ;;  %5554 = vst.msk [vmem:[#allocation3 + $0x161] sm:$0x1] %vm5503_vm7, %v22923_v38 }
 0x433   :  { %5555 = vst.msk [vmem:[#allocation3 + $0x179] sm:$0x1] %vm5503_vm7, %v22923_v38  ;;  %5556 = vst.msk [vmem:[#allocation3 + $0x191] sm:$0x1] %vm5503_vm7, %v22923_v38 }
 0x434   :  { %13985 = vmatmul.mubr.msk.f32.vlgmr.msra.gmra.mrb[0].mxu0 %vm92_vm1, %v22798_v27  ;;  %v22896_v27 = vld [vmem:[#allocation112_spill] sm:$0xff]  ;;  %5559 = vst.msk [vmem:[#allocation3 + $0x1d9] sm:$0x1] %vm5503_vm7, %v22923_v38  ;;  %5560 = vst.msk [vmem:[#allocation3 + $0x1f1] sm:$0x1] %vm5503_vm7, %v22923_v38 }
 0x435   :  { %13987 = vmatprep.mubr.msk.f32.mxu0 %vm92_vm1, %v22799_v40  ;;  %v22898_v40 = vld [vmem:[#allocation113_spill] sm:$0xff]  ;;  %5561 = vst.msk [vmem:[#allocation3 + $0x209] sm:$0x1] %vm5503_vm7, %v22923_v38  ;;  %5562 = vst.msk [vmem:[#allocation3 + $0x221] sm:$0x1] %vm5503_vm7, %v22923_v38 }
 0x436   :  { %5563 = vst.msk [vmem:[#allocation3 + $0x239] sm:$0x1] %vm5503_vm7, %v22923_v38  ;;  %5564 = vst.msk [vmem:[#allocation3 + $0x251] sm:$0x1] %vm5503_vm7, %v22923_v38 }
 0x437   :  { %5565 = vst.msk [vmem:[#allocation3 + $0x269] sm:$0x1] %vm5503_vm7, %v22923_v38  ;;  %5566 = vst.msk [vmem:[#allocation3 + $0x281] sm:$0x1] %vm5503_vm7, %v22923_v38 }
 0x438   :  { %13988 = vmatmul.mubr.msk.f32.gmra.mrb[2].mxu0 %vm92_vm1, %v22800_v35  ;;  %v22899_v35 = vld [vmem:[#allocation20_spill] sm:$0xff]  ;;  %5567 = vst.msk [vmem:[#allocation3 + $0x299] sm:$0x1] %vm5503_vm7, %v22923_v38  ;;  %5568 = vst.msk [vmem:[#allocation3 + $0x2b1] sm:$0x1] %vm5503_vm7, %v22923_v38 }
 0x439   :  { %13990 = vmatprep.mubr.msk.f32.mxu0 %vm92_vm1, %v22801_v50  ;;  %v22897_v50 = vld [vmem:[#allocation17_spill] sm:$0xff]  ;;  %5569 = vst.msk [vmem:[#allocation3 + $0x2c9] sm:$0x1] %vm5503_vm7, %v22923_v38  ;;  %5570 = vst.msk [vmem:[#allocation3 + $0x2e1] sm:$0x1] %vm5503_vm7, %v22923_v38 }
 0x43a   :  { %5571 = vst.msk [vmem:[#allocation3 + $0x2f9] sm:$0x1] %vm5503_vm7, %v22923_v38  ;;  %5572 = vst.msk [vmem:[#allocation3 + $0x311] sm:$0x1] %vm5503_vm7, %v22923_v38 }
 0x43b   :  { %5573 = vst.msk [vmem:[#allocation3 + $0x329] sm:$0x1] %vm5503_vm7, %v22923_v38  ;;  %5574 = vst.msk [vmem:[#allocation3 + $0x341] sm:$0x1] %vm5503_vm7, %v22923_v38 }
 0x43c   :  { %13991 = vmatmul.mubr.msk.f32.gmra.mrb[4].mxu0 %vm92_vm1, %v22802_v43  ;;  %v22903_v43 = vld [vmem:[#allocation26_spill] sm:$0xff]  ;;  %5492 = vst.msk [vmem:[#allocation3 + $0x10] sm:$0x3] %vm5491_vm8, %v22923_v38  ;;  %5495 = vst.msk [vmem:[#allocation3 + $0x1c0] sm:$0x3] %vm5491_vm8, %v22923_v38 }
 0x43d   :  { %13993 = vmatprep.mubr.msk.f32.mxu0 %vm92_vm1, %v22803_v44  ;;  %v22904_v44 = vld [vmem:[#allocation115_spill] sm:$0xff]  ;;  %5499 = vst.msk [vmem:[#allocation3 + $0x1a8] sm:$0x3] %vm5491_vm8, %v22923_v38  ;;  %5502 = vst.msk [vmem:[#allocation3 + $0x358] sm:$0x3] %vm5491_vm8, %v22923_v38 }
 0x43e   :  { %5540 = vst.msk [vmem:[#allocation3 + $0x11] sm:$0x1] %vm5503_vm7, %v22923_v38  ;;  %5557 = vst.msk [vmem:[#allocation3 + $0x1a9] sm:$0x1] %vm5503_vm7, %v22923_v38 }
 0x43f   :  { %5558 = vst.msk [vmem:[#allocation3 + $0x1c1] sm:$0x1] %vm5503_vm7, %v22923_v38  ;;  %5575 = vst.msk [vmem:[#allocation3 + $0x359] sm:$0x1] %vm5503_vm7, %v22923_v38 }
 0x440   :  { %13994 = vmatmul.mubr.msk.f32.gmra.mrb[6].mxu0 %vm92_vm1, %v17622_v32  ;;  %v22900_v32 = vld [vmem:[#allocation21_spill] sm:$0xff] }
 0x441   :  { %13996 = vmatprep.mubr.msk.f32.mxu0 %vm92_vm1, %v22804_v11  ;;  %v22902_v11 = vld [vmem:[#allocation114_spill] sm:$0xff] }
 0x444   :  { %13997 = vmatmul.mubr.msk.f32.gmra.mrb[8].mxu0 %vm92_vm1, %v17638_v55  ;;  %v22901_v55 = vld [vmem:[#allocation23_spill] sm:$0xff] }
 0x445   :  { %13999 = vmatprep.mubr.msk.f32.mxu0 %vm92_vm1, %v22895_v36  ;;  %v5643_v3 = vld [vmem:[#allocation3 + $0x10] sm:$0x3] }
 0x446   :  { %v5849_v4 = vrot.slane %v5643_v3, 1 }
 0x448   :  { %14000 = vmatmul.mubr.msk.f32.gmra.mrb[10].mxu0 %vm92_vm1, %v22896_v27 }
 0x449   :  { %14002 = vmatprep.mubr.msk.f32.mxu0 %vm92_vm1, %v22897_v50 }
 0x44c   :  { %14003 = vmatmul.mubr.msk.f32.gmra.mrb[12].mxu0 %vm92_vm1, %v22898_v40 }
 0x44d   :  { %14005 = vmatprep.mubr.msk.f32.mxu0 %vm92_vm1, %v22899_v35 }
 0x450   :  { %14006 = vmatmul.mubr.msk.f32.gmra.mrb[14].mxu0 %vm92_vm1, %v17676_v52  ;;  %v22906_v52 = vld [vmem:[#allocation35_spill] sm:$0xff] }
 0x451   :  { %14008 = vmatprep.mubr.msk.f32.mxu0 %vm92_vm1, %v17680_v53  ;;  %v22907_v53 = vld [vmem:[#allocation116_spill] sm:$0xff] }
 0x454   :  { %14009 = vmatmul.mubr.msk.f32.gmra.mrb[16].mxu0 %vm92_vm1, %v22900_v32 }
 0x455   :  { %14011 = vmatprep.mubr.msk.f32.mxu0 %vm92_vm1, %v22901_v55 }
 0x458   :  { %14012 = vmatmul.mubr.msk.f32.gmra.mrb[18].mxu0 %vm92_vm1, %v22902_v11 }
 0x459   :  { %14014 = vmatprep.mubr.msk.f32.mxu0 %vm92_vm1, %v22903_v43 }
 0x45c   :  { %14015 = vmatmul.mubr.msk.f32.gmra.mrb[20].mxu0 %vm92_vm1, %v22904_v44 }
 0x45d   :  { %14017 = vmatprep.mubr.msk.f32.mxu0 %vm92_vm1, %v22905_v49  ;;  %v11572_v49 = vld [vmem:[%s21955_s2 + $0x10] sm:$0xff] }
 0x460   :  { %14018 = vmatmul.mubr.msk.f32.gmra.mrb[22].mxu0 %vm92_vm1, %v17741_v9  ;;  %v4884_v9 = vrot.slane %v18658_v18, 2  ;;  %v22914_v18 = vld [vmem:[#allocation119_spill] sm:$0xff] }
 0x461   :  { %14020 = vmatprep.mubr.msk.f32.mxu0 %vm92_vm1, %v22906_v52 }
 0x462   :  { %v4885_v45 = vsel %vm1786_vm5, %v4882_v0, %v4884_v9 }
 0x464   :  { %14021 = vmatmul.mubr.msk.f32.gmra.mrb[24].mxu0 %vm92_vm1, %v22907_v53 }
 0x465   :  { %14023 = vmatprep.mubr.msk.f32.mxu0 %vm92_vm1, %v22908_v54 }
 0x468   :  { %14024 = vmatmul.mubr.msk.f32.gmra.mrb[26].mxu0 %vm92_vm1, %v22909_v34 }
 0x469   :  { %14026 = vmatprep.mubr.msk.f32.mxu0 %vm92_vm1, %v18399_v59  ;;  %v22913_v59 = vld [vmem:[#allocation48_spill] sm:$0xff] }
 0x46c   :  { %14027 = vmatmul.mubr.msk.f32.gmra.mrb[28].mxu0 %vm92_vm1, %v22910_v46 }
 0x46d   :  { %14029 = vmatprep.mubr.msk.f32.mxu0 %vm92_vm1, %v4883_v57 }
 0x470   :  { %14030 = vmatmul.mubr.msk.f32.gmra.mrb[30].mxu0 %vm92_vm1, %v4885_v45 }
 0x471   :  { %14032 = vmatprep.mubr.msk.f32.mxu0 %vm92_vm1, %v22911_v47 }
 0x474   :  { %14033 = vmatmul.mubr.msk.f32.gmra.mrb[32].mxu0 %vm92_vm1, %v22912_v20 }
 0x475   :  { %14035 = vmatprep.mubr.msk.f32.mxu0 %vm92_vm1, %v22913_v59 }
 0x478   :  { %14036 = vmatmul.mubr.msk.f32.gmra.mrb[34].mxu0 %vm92_vm1, %v22914_v18 }
 0x479   :  { %14038 = vmatprep.mubr.msk.f32.mxu0 %vm92_vm1, %v22915_v37 }
 0x47c   :  { %14039 = vmatmul.mubr.msk.f32.gmra.mrb[36].mxu0 %vm92_vm1, %v22916_v48 }
 0x47d   :  { %14041 = vmatprep.mubr.msk.f32.mxu0 %vm92_vm1, %v22917_v6 }
 0x480   :  { %14042 = vmatmul.mubr.msk.f32.gmra.mrb[38].mxu0 %vm92_vm1, %v22918_v58 }
 0x481   :  { %14044 = vmatprep.mubr.msk.f32.mxu0 %vm92_vm1, %v22919_v41 }
 0x484   :  { %14045 = vmatmul.mubr.msk.f32.gmra.mrb[40].mxu0 %vm92_vm1, %v22920_v51 }
 0x485   :  { %14047 = vmatprep.mubr.msk.f32.mxu0 %vm92_vm1, %v22921_v2 }
 0x488   :  { %14048 = vmatmul.mubr.msk.f32.gmra.mrb[42].mxu0 %vm92_vm1, %v22922_v30 }
 0x489   :  { %14050 = vmatprep.mubr.msk.f32.mxu0 %vm92_vm1, %v22924_v33 }
 0x48c   :  { %14051 = vmatmul.mubr.msk.f32.gmra.mrb[44].mxu0 %vm92_vm1, %v22925_v62 }
 0x48d   :  { %14053 = vmatprep.mubr.msk.f32.mxu0 %vm92_vm1, %v22829_v61  ;;  %v22926_v61 = vld [vmem:[#allocation126_spill] sm:$0xff] }
 0x490   :  { %14054 = vmatmul.mubr.msk.f32.gmra.mrb[46].mxu0 %vm92_vm1, %v22830_v29  ;;  %v5850_v29 = vsel %vm590_vm4, %v5847_v39, %v5849_v4 }
 0x491   :  { %14056 = vmatprep.mubr.msk.f32.mxu0 %vm92_vm1, %v22831_v23  ;;  %14083 = vmatmul.mubr.msk.f32.vlgmr.msra.gmra.mrb[0].mxu1 %vm5488_vm6, %v5850_v29  ;;  %v5749_v23 = vld [vmem:[%s21955_s2] sm:$0xff] }
 0x492   :  { %14178 = vmatprep.subr.mxu1 %v5749_v23 }
 0x493   :  { %14179 = vmatpush3.msra.mxu1 %v5749_v23 }
 0x494   :  { %14057 = vmatmul.mubr.msk.f32.gmra.mrb[48].mxu0 %vm92_vm1, %v22926_v61  ;;  %14276 = vmatprep.subr.mxu1 %v11572_v49 }
 0x495   :  { %14059 = vmatprep.mubr.msk.f32.mxu0 %vm92_vm1, %v22927_v14 }
 0x498   :  { %14060 = vmatmul.mubr.msk.f32.gmra.mrb[50].mxu0 %vm92_vm1, %v22834_v12  ;;  %v4886_v12 = vrot.slane %v18590_v19, 2 }
 0x499   :  { %14062 = vmatprep.mubr.msk.f32.mxu0 %vm92_vm1, %v22835_v10  ;;  %v4887_v10 = vrot.slane %v18596_v31, 2 }
 0x49b   :  { %v4888_v22 = vsel %vm1786_vm5, %v4886_v12, %v4887_v10 }
 0x49c   :  { %14063 = vmatmul.mubr.msk.f32.gmra.mrb[52].mxu0 %vm92_vm1, %v22928_v8 }
 0x49d   :  { %14065 = vmatprep.mubr.msk.f32.mxu0 %vm92_vm1, %v22929_v13 }
 0x4a0   :  { %14066 = vmatmul.mubr.msk.f32.gmra.mrb[54].mxu0 %vm92_vm1, %v17960_v25  ;;  %v4889_v25 = vrot.slane %v18727_v24, 2 }
 0x4a1   :  { %14068 = vmatprep.mubr.msk.f32.mxu0 %vm92_vm1, %v22930_v16 }
 0x4a4   :  { %14069 = vmatmul.mubr.msk.f32.gmra.mrb[56].mxu0 %vm92_vm1, %v17977_v21  ;;  %v4890_v21 = vsel %vm1786_vm5, %v4887_v10, %v4889_v25 }
 0x4a5   :  { %14071 = vmatprep.mubr.msk.f32.mxu0 %vm92_vm1, %v17981_v28  ;;  %v19055_v28 = vld [vmem:[%s21956_s5] ss:$0 sm:$0xff] }
 0x4a8   :  { %14072 = vmatmul.mubr.msk.f32.gmra.mrb[58].mxu0 %vm92_vm1, %v17988_v1 }
 0x4a9   :  { %14074 = vmatprep.mubr.msk.f32.mxu0 %vm92_vm1, %v18472_v42 }
 0x4ac   :  { %14075 = vmatmul.mubr.msk.f32.gmra.mrb[60].mxu0 %vm92_vm1, %v18479_v63 }
 0x4ad   :  { %14077 = vmatprep.mubr.msk.f32.mxu0 %vm92_vm1, %v4888_v22 }
 0x4b0   :  { %14078 = vmatmul.mubr.msk.f32.gmra.mrb[62].mxu0 %vm92_vm1, %v4890_v21 }
 0x507   :  { %v13986_v1 = vpop.f32.mrb[0].mxu0 }
 0x508   :  { %v5361_v42 = vadd.f32 %v13986_v1, %v19055_v28  ;;  %v4970_v19 = vpop.f32.mrb[1].mxu0 }
 0x509   :  { %v5360_v31 = vadd.f32 %v19055_v28, %v4970_v19 }
 0x50a   :  { %v5425_v24 = vmax.f32 %v5361_v42, 0.0 }
 0x50b   :  { %v5424_v26 = vmax.f32 %v5360_v31, 0.0  ;;  %v13989_v63 = vpop.f32.mrb[2].mxu0 }
 0x50c   :  { %5578 = vst.msk [vmem:[#allocation3 + $0x21] sm:$0xff] %vm5488_vm6, %v5425_v24  ;;  %v5363_v36 = vadd.f32 %v13989_v63, %v19055_v28  ;;  %v4980_v27 = vpop.f32.mrb[3].mxu0 }
 0x50d   :  { %5577 = vst.msk [vmem:[#allocation3 + $0x19] sm:$0xff] %vm5488_vm6, %v5424_v26  ;;  %v5362_v50 = vadd.f32 %v19055_v28, %v4980_v27 }
 0x50e   :  { %v5427_v40 = vmax.f32 %v5363_v36, 0.0 }
 0x50f   :  { %v5426_v35 = vmax.f32 %v5362_v50, 0.0  ;;  %v13992_v32 = vpop.f32.mrb[4].mxu0 }
 0x510   :  { %5580 = vst.msk [vmem:[#allocation3 + $0x39] sm:$0xff] %vm5488_vm6, %v5427_v40  ;;  %v5365_v55 = vadd.f32 %v13992_v32, %v19055_v28  ;;  %v4990_v11 = vpop.f32.mrb[5].mxu0 }
 0x511   :  { %5579 = vst.msk [vmem:[#allocation3 + $0x31] sm:$0xff] %vm5488_vm6, %v5426_v35  ;;  %v5364_v43 = vadd.f32 %v19055_v28, %v4990_v11 }
 0x512   :  { %v5429_v44 = vmax.f32 %v5365_v55, 0.0 }
 0x513   :  { %v5428_v52 = vmax.f32 %v5364_v43, 0.0  ;;  %v13995_v53 = vpop.f32.mrb[6].mxu0  ;;  %v5646_v54 = vld [vmem:[#allocation3 + $0x28] sm:$0x3] }
 0x514   :  { %5582 = vst.msk [vmem:[#allocation3 + $0x51] sm:$0xff] %vm5488_vm6, %v5429_v44  ;;  %v5367_v5 = vadd.f32 %v13995_v53, %v19055_v28  ;;  %v5000_v0 = vpop.f32.mrb[7].mxu0  ;;  %v5644_v34 = vld [vmem:[#allocation3 + $0x18] sm:$0xff]  ;;  %v5645_v9 = vld [vmem:[#allocation3 + $0x20] sm:$0xff]  ;;  %v5854_v57 = vrot.slane %v5646_v54, 1 }
 0x515   :  { %5581 = vst.msk [vmem:[#allocation3 + $0x49] sm:$0xff] %vm5488_vm6, %v5428_v52  ;;  %v5366_v46 = vadd.f32 %v19055_v28, %v5000_v0  ;;  %v5851_v45 = vrot.slane %v5644_v34, 1  ;;  %v5852_v47 = vrot.slane %v5645_v9, 1 }
 0x516   :  { %v5431_v20 = vmax.f32 %v5367_v5, 0.0 }
 0x517   :  { %v5430_v59 = vmax.f32 %v5366_v46, 0.0  ;;  %v13998_v18 = vpop.f32.mrb[8].mxu0  ;;  %v19075_v37 = vsel %vm590_vm4, %v5851_v45, %v5852_v47  ;;  %v19078_v48 = vsel %vm590_vm4, %v5852_v47, %v5854_v57  ;;  %v5649_v6 = vld [vmem:[#allocation3 + $0x40] sm:$0x3] }
 0x518   :  { %22931 = vst [vmem:[#allocation9_spill] sm:$0xff] %v19075_v37  ;;  %22932 = vst [vmem:[#allocation10_spill] sm:$0xff] %v19078_v48  ;;  %v5369_v58 = vadd.f32 %v13998_v18, %v19055_v28  ;;  %v5010_v41 = vpop.f32.mrb[9].mxu0  ;;  %14085 = vmatprep.mubr.msk.f32.mxu1 %vm5488_vm6, %v19075_v37  ;;  %v5647_v51 = vld [vmem:[#allocation3 + $0x30] sm:$0xff]  ;;  %v5648_v2 = vld [vmem:[#allocation3 + $0x38] sm:$0xff]  ;;  %v5859_v30 = vrot.slane %v5649_v6, 1 }
 0x519   :  { %5584 = vst.msk [vmem:[#allocation3 + $0x69] sm:$0xff] %vm5488_vm6, %v5431_v20  ;;  %5583 = vst.msk [vmem:[#allocation3 + $0x61] sm:$0xff] %vm5488_vm6, %v5430_v59  ;;  %v5368_v38 = vadd.f32 %v19055_v28, %v5010_v41  ;;  %14086 = vmatmul.mubr.msk.f32.gmra.mrb[2].mxu1 %vm5488_vm6, %v19078_v48  ;;  %v5856_v33 = vrot.slane %v5647_v51, 1  ;;  %v5857_v62 = vrot.slane %v5648_v2, 1 }
 0x51a   :  { %v5433_v56 = vmax.f32 %v5369_v58, 0.0 }
 0x51b   :  { %v5432_v60 = vmax.f32 %v5368_v38, 0.0  ;;  %v14001_v7 = vpop.f32.mrb[10].mxu0  ;;  %v19089_v39 = vsel %vm590_vm4, %v5856_v33, %v5857_v62  ;;  %v19092_v3 = vsel %vm590_vm4, %v5857_v62, %v5859_v30  ;;  %v5652_v15 = vld [vmem:[#allocation3 + $0x58] sm:$0x3] }
 0x51c   :  { %22933 = vst [vmem:[#allocation11_spill] sm:$0xff] %v19089_v39  ;;  %22934 = vst [vmem:[#allocation12_spill] sm:$0xff] %v19092_v3  ;;  %v5371_v4 = vadd.f32 %v14001_v7, %v19055_v28  ;;  %v5020_v17 = vpop.f32.mrb[11].mxu0  ;;  %14088 = vmatprep.mubr.msk.f32.mxu1 %vm5488_vm6, %v19089_v39  ;;  %v5650_v61 = vld [vmem:[#allocation3 + $0x48] sm:$0xff]  ;;  %v5651_v29 = vld [vmem:[#allocation3 + $0x50] sm:$0xff]  ;;  %v5864_v14 = vrot.slane %v5652_v15, 1 }
 0x51d   :  { %5586 = vst.msk [vmem:[#allocation3 + $0x81] sm:$0xff] %vm5488_vm6, %v5433_v56  ;;  %5585 = vst.msk [vmem:[#allocation3 + $0x79] sm:$0xff] %vm5488_vm6, %v5432_v60  ;;  %v5370_v23 = vadd.f32 %v19055_v28, %v5020_v17  ;;  %14089 = vmatmul.mubr.msk.f32.gmra.mrb[4].mxu1 %vm5488_vm6, %v19092_v3  ;;  %v5861_v8 = vrot.slane %v5650_v61, 1  ;;  %v5862_v13 = vrot.slane %v5651_v29, 1 }
 0x51e   :  { %v5435_v16 = vmax.f32 %v5371_v4, 0.0 }
 0x51f   :  { %v5434_v12 = vmax.f32 %v5370_v23, 0.0  ;;  %v14004_v10 = vpop.f32.mrb[12].mxu0  ;;  %v19103_v25 = vsel %vm590_vm4, %v5861_v8, %v5862_v13  ;;  %v19106_v22 = vsel %vm590_vm4, %v5862_v13, %v5864_v14 }
 0x520   :  { %22935 = vst [vmem:[#allocation13_spill] sm:$0xff] %v19103_v25  ;;  %22936 = vst [vmem:[#allocation14_spill] sm:$0xff] %v19106_v22  ;;  %v5655_v21 = vld [vmem:[#allocation3 + $0x70] sm:$0x3]  ;;  %v5373_v1 = vadd.f32 %v14004_v10, %v19055_v28  ;;  %v5030_v42 = vpop.f32.mrb[13].mxu0  ;;  %14091 = vmatprep.mubr.msk.f32.mxu1 %vm5488_vm6, %v19103_v25  ;;  %v19112_v19 = vld [vmem:[#allocation3 + $0x60] sm:$0xff] }
 0x521   :  { %5588 = vst.msk [vmem:[#allocation3 + $0x99] sm:$0xff] %vm5488_vm6, %v5435_v16  ;;  %v19114_v31 = vld [vmem:[#allocation3 + $0x68] sm:$0xff]  ;;  %v5869_v24 = vrot.slane %v5655_v21, 1  ;;  %5587 = vst.msk [vmem:[#allocation3 + $0x91] sm:$0xff] %vm5488_vm6, %v5434_v12  ;;  %v5372_v26 = vadd.f32 %v19055_v28, %v5030_v42  ;;  %14092 = vmatmul.mubr.msk.f32.gmra.mrb[6].mxu1 %vm5488_vm6, %v19106_v22  ;;  %v5866_v63 = vrot.slane %v19112_v19, 1 }
 0x522   :  { %v5867_v36 = vrot.slane %v19114_v31, 1  ;;  %v5437_v27 = vmax.f32 %v5373_v1, 0.0 }
 0x523   :  { %v5436_v50 = vmax.f32 %v5372_v26, 0.0  ;;  %v14007_v40 = vpop.f32.mrb[14].mxu0 }
 0x524   :  { %v19123_v35 = vsel %vm590_vm4, %v5866_v63, %v5867_v36  ;;  %v19126_v32 = vsel %vm590_vm4, %v5867_v36, %v5869_v24  ;;  %v5658_v55 = vld [vmem:[#allocation3 + $0x88] sm:$0x3]  ;;  %5590 = vst.msk [vmem:[#allocation3 + $0xb1] sm:$0xff] %vm5488_vm6, %v5437_v27  ;;  %v5375_v11 = vadd.f32 %v14007_v40, %v19055_v28  ;;  %v5040_v43 = vpop.f32.mrb[15].mxu0  ;;  %v19132_v44 = vld [vmem:[#allocation3 + $0x78] sm:$0xff]  ;;  %v19134_v49 = vld [vmem:[#allocation3 + $0x80] sm:$0xff] }
 0x525   :  { %22937 = vst [vmem:[#allocation15_spill] sm:$0xff] %v19123_v35  ;;  %22938 = vst [vmem:[#allocation16_spill] sm:$0xff] %v19126_v32  ;;  %14094 = vmatprep.mubr.msk.f32.mxu1 %vm5488_vm6, %v19123_v35  ;;  %v5874_v52 = vrot.slane %v5658_v55, 1  ;;  %v5374_v53 = vadd.f32 %v19055_v28, %v5040_v43  ;;  %v5871_v54 = vrot.slane %v19132_v44, 1  ;;  %v5872_v5 = vrot.slane %v19134_v49, 1 }
 0x526   :  { %5589 = vst.msk [vmem:[#allocation3 + $0xa9] sm:$0xff] %vm5488_vm6, %v5436_v50  ;;  %14095 = vmatmul.mubr.msk.f32.gmra.mrb[8].mxu1 %vm5488_vm6, %v19126_v32  ;;  %v5439_v0 = vmax.f32 %v5375_v11, 0.0 }
 0x527   :  { %v5438_v34 = vmax.f32 %v5374_v53, 0.0  ;;  %v14010_v9 = vpop.f32.mrb[16].mxu0  ;;  %v19143_v57 = vsel %vm590_vm4, %v5871_v54, %v5872_v5  ;;  %v19146_v46 = vsel %vm590_vm4, %v5872_v5, %v5874_v52 }
 0x528   :  { %22939 = vst [vmem:[#allocation18_spill] sm:$0xff] %v19143_v57  ;;  %22940 = vst [vmem:[#allocation19_spill] sm:$0xff] %v19146_v46  ;;  %v5661_v45 = vld [vmem:[#allocation3 + $0xa0] sm:$0x3]  ;;  %v5377_v47 = vadd.f32 %v14010_v9, %v19055_v28  ;;  %v5050_v20 = vpop.f32.mrb[17].mxu0  ;;  %14097 = vmatprep.mubr.msk.f32.mxu1 %vm5488_vm6, %v19143_v57  ;;  %v19152_v59 = vld [vmem:[#allocation3 + $0x90] sm:$0xff] }
 0x529   :  { %5592 = vst.msk [vmem:[#allocation3 + $0xc9] sm:$0xff] %vm5488_vm6, %v5439_v0  ;;  %v19154_v18 = vld [vmem:[#allocation3 + $0x98] sm:$0xff]  ;;  %v5879_v6 = vrot.slane %v5661_v45, 1  ;;  %5591 = vst.msk [vmem:[#allocation3 + $0xc1] sm:$0xff] %vm5488_vm6, %v5438_v34  ;;  %v5376_v58 = vadd.f32 %v19055_v28, %v5050_v20  ;;  %v5876_v41 = vrot.slane %v19152_v59, 1 }
 0x52a   :  { %14098 = vmatmul.mubr.msk.f32.gmra.mrb[10].mxu1 %vm5488_vm6, %v19146_v46  ;;  %v5877_v51 = vrot.slane %v19154_v18, 1  ;;  %v5441_v2 = vmax.f32 %v5377_v47, 0.0 }
 0x52b   :  { %v5440_v30 = vmax.f32 %v5376_v58, 0.0  ;;  %v14013_v38 = vpop.f32.mrb[18].mxu0  ;;  %v5664_v56 = vld [vmem:[#allocation3 + $0xb8] sm:$0x3] }
 0x52c   :  { %v19163_v33 = vsel %vm590_vm4, %v5876_v41, %v5877_v51  ;;  %v19166_v62 = vsel %vm590_vm4, %v5877_v51, %v5879_v6  ;;  %5594 = vst.msk [vmem:[#allocation3 + $0xe1] sm:$0xff] %vm5488_vm6, %v5441_v2  ;;  %v5379_v60 = vadd.f32 %v14013_v38, %v19055_v28  ;;  %v5060_v7 = vpop.f32.mrb[19].mxu0  ;;  %v5884_v17 = vrot.slane %v5664_v56, 1 }
 0x52d   :  { %22941 = vst [vmem:[#allocation22_spill] sm:$0xff] %v19163_v33  ;;  %22942 = vst [vmem:[#allocation24_spill] sm:$0xff] %v19166_v62  ;;  %14100 = vmatprep.mubr.msk.f32.mxu1 %vm5488_vm6, %v19163_v33  ;;  %v19172_v15 = vld [vmem:[#allocation3 + $0xa8] sm:$0xff]  ;;  %v19174_v4 = vld [vmem:[#allocation3 + $0xb0] sm:$0xff]  ;;  %v5378_v61 = vadd.f32 %v19055_v28, %v5060_v7 }
 0x52e   :  { %5593 = vst.msk [vmem:[#allocation3 + $0xd9] sm:$0xff] %vm5488_vm6, %v5440_v30  ;;  %14101 = vmatmul.mubr.msk.f32.gmra.mrb[12].mxu1 %vm5488_vm6, %v19166_v62  ;;  %v5881_v29 = vrot.slane %v19172_v15, 1  ;;  %v5882_v14 = vrot.slane %v19174_v4, 1  ;;  %v5443_v23 = vmax.f32 %v5379_v60, 0.0 }
 0x52f   :  { %v5442_v8 = vmax.f32 %v5378_v61, 0.0  ;;  %v14016_v13 = vpop.f32.mrb[20].mxu0 }
 0x530   :  { %v19183_v16 = vsel %vm590_vm4, %v5881_v29, %v5882_v14  ;;  %v19186_v12 = vsel %vm590_vm4, %v5882_v14, %v5884_v17  ;;  %v5667_v10 = vld [vmem:[#allocation3 + $0xd0] sm:$0x3]  ;;  %5596 = vst.msk [vmem:[#allocation3 + $0xf9] sm:$0xff] %vm5488_vm6, %v5443_v23  ;;  %v5381_v21 = vadd.f32 %v14016_v13, %v19055_v28  ;;  %v5070_v1 = vpop.f32.mrb[21].mxu0  ;;  %v19192_v42 = vld [vmem:[#allocation3 + $0xc0] sm:$0xff]  ;;  %v19194_v24 = vld [vmem:[#allocation3 + $0xc8] sm:$0xff] }
 0x531   :  { %22943 = vst [vmem:[#allocation25_spill] sm:$0xff] %v19183_v16  ;;  %22944 = vst [vmem:[#allocation27_spill] sm:$0xff] %v19186_v12  ;;  %14103 = vmatprep.mubr.msk.f32.mxu1 %vm5488_vm6, %v19183_v16  ;;  %v5889_v26 = vrot.slane %v5667_v10, 1  ;;  %v5380_v63 = vadd.f32 %v19055_v28, %v5070_v1  ;;  %v5886_v36 = vrot.slane %v19192_v42, 1  ;;  %v5887_v27 = vrot.slane %v19194_v24, 1 }
 0x532   :  { %5595 = vst.msk [vmem:[#allocation3 + $0xf1] sm:$0xff] %vm5488_vm6, %v5442_v8  ;;  %14104 = vmatmul.mubr.msk.f32.gmra.mrb[14].mxu1 %vm5488_vm6, %v19186_v12  ;;  %v5445_v50 = vmax.f32 %v5381_v21, 0.0 }
 0x533   :  { %v5444_v40 = vmax.f32 %v5380_v63, 0.0  ;;  %v14019_v55 = vpop.f32.mrb[22].mxu0  ;;  %v19203_v11 = vsel %vm590_vm4, %v5886_v36, %v5887_v27  ;;  %v19206_v43 = vsel %vm590_vm4, %v5887_v27, %v5889_v26  ;;  %v5670_v52 = vld [vmem:[#allocation3 + $0xe8] sm:$0x3] }
 0x534   :  { %22945 = vst [vmem:[#allocation28_spill] sm:$0xff] %v19203_v11  ;;  %22946 = vst [vmem:[#allocation44_spill] sm:$0xff] %v19206_v43  ;;  %v5383_v53 = vadd.f32 %v14019_v55, %v19055_v28  ;;  %v5080_v54 = vpop.f32.mrb[23].mxu0  ;;  %14106 = vmatprep.mubr.msk.f32.mxu1 %vm5488_vm6, %v19203_v11  ;;  %v5894_v34 = vrot.slane %v5670_v52, 1 }
 0x535   :  { %5598 = vst.msk [vmem:[#allocation3 + $0x111] sm:$0xff] %vm5488_vm6, %v5445_v50  ;;  %v19212_v5 = vld [vmem:[#allocation3 + $0xd8] sm:$0xff]  ;;  %v19214_v0 = vld [vmem:[#allocation3 + $0xe0] sm:$0xff]  ;;  %5597 = vst.msk [vmem:[#allocation3 + $0x109] sm:$0xff] %vm5488_vm6, %v5444_v40  ;;  %v5382_v9 = vadd.f32 %v19055_v28, %v5080_v54 }
 0x536   :  { %14107 = vmatmul.mubr.msk.f32.gmra.mrb[16].mxu1 %vm5488_vm6, %v19206_v43  ;;  %v5891_v45 = vrot.slane %v19212_v5, 1  ;;  %v5892_v47 = vrot.slane %v19214_v0, 1  ;;  %v5447_v20 = vmax.f32 %v5383_v53, 0.0 }
 0x537   :  { %v5446_v6 = vmax.f32 %v5382_v9, 0.0  ;;  %v14022_v58 = vpop.f32.mrb[24].mxu0  ;;  %v5673_v2 = vld [vmem:[#allocation3 + $0x100] sm:$0x3] }
 0x538   :  { %v19223_v41 = vsel %vm590_vm4, %v5891_v45, %v5892_v47  ;;  %v19226_v51 = vsel %vm590_vm4, %v5892_v47, %v5894_v34  ;;  %5600 = vst.msk [vmem:[#allocation3 + $0x129] sm:$0xff] %vm5488_vm6, %v5447_v20  ;;  %v5385_v30 = vadd.f32 %v14022_v58, %v19055_v28  ;;  %v5090_v38 = vpop.f32.mrb[25].mxu0  ;;  %v5899_v7 = vrot.slane %v5673_v2, 1 }
 0x539   :  { %22947 = vst [vmem:[#allocation46_spill] sm:$0xff] %v19223_v41  ;;  %22948 = vst [vmem:[#allocation98_spill] sm:$0xff] %v19226_v51  ;;  %14109 = vmatprep.mubr.msk.f32.mxu1 %vm5488_vm6, %v19223_v41  ;;  %v19232_v56 = vld [vmem:[#allocation3 + $0xf0] sm:$0xff]  ;;  %v19234_v60 = vld [vmem:[#allocation3 + $0xf8] sm:$0xff]  ;;  %v5384_v17 = vadd.f32 %v19055_v28, %v5090_v38 }
 0x53a   :  { %5599 = vst.msk [vmem:[#allocation3 + $0x121] sm:$0xff] %vm5488_vm6, %v5446_v6  ;;  %14110 = vmatmul.mubr.msk.f32.gmra.mrb[18].mxu1 %vm5488_vm6, %v19226_v51  ;;  %v5896_v61 = vrot.slane %v19232_v56, 1  ;;  %v5897_v29 = vrot.slane %v19234_v60, 1  ;;  %v5449_v14 = vmax.f32 %v5385_v30, 0.0 }
 0x53b   :  { %v5448_v23 = vmax.f32 %v5384_v17, 0.0  ;;  %v14025_v8 = vpop.f32.mrb[26].mxu0 }
 0x53c   :  { %v19243_v13 = vsel %vm590_vm4, %v5896_v61, %v5897_v29  ;;  %v19246_v10 = vsel %vm590_vm4, %v5897_v29, %v5899_v7  ;;  %v5676_v21 = vld [vmem:[#allocation3 + $0x118] sm:$0x3]  ;;  %5602 = vst.msk [vmem:[#allocation3 + $0x141] sm:$0xff] %vm5488_vm6, %v5449_v14  ;;  %v5387_v1 = vadd.f32 %v14025_v8, %v19055_v28  ;;  %v5100_v26 = vpop.f32.mrb[27].mxu0  ;;  %v19252_v63 = vld [vmem:[#allocation3 + $0x108] sm:$0xff]  ;;  %v19254_v36 = vld [vmem:[#allocation3 + $0x110] sm:$0xff] }
 0x53d   :  { %22949 = vst [vmem:[#allocation66_spill] sm:$0xff] %v19243_v13  ;;  %22950 = vst [vmem:[#allocation75_spill] sm:$0xff] %v19246_v10  ;;  %14112 = vmatprep.mubr.msk.f32.mxu1 %vm5488_vm6, %v19243_v13  ;;  %v5904_v27 = vrot.slane %v5676_v21, 1  ;;  %v5386_v50 = vadd.f32 %v19055_v28, %v5100_v26  ;;  %v5901_v40 = vrot.slane %v19252_v63, 1  ;;  %v5902_v55 = vrot.slane %v19254_v36, 1 }
 0x53e   :  { %5601 = vst.msk [vmem:[#allocation3 + $0x139] sm:$0xff] %vm5488_vm6, %v5448_v23  ;;  %14113 = vmatmul.mubr.msk.f32.gmra.mrb[20].mxu1 %vm5488_vm6, %v19246_v10  ;;  %v5451_v52 = vmax.f32 %v5387_v1, 0.0 }
 0x53f   :  { %v5450_v53 = vmax.f32 %v5386_v50, 0.0  ;;  %v14028_v54 = vpop.f32.mrb[28].mxu0  ;;  %v19263_v34 = vsel %vm590_vm4, %v5901_v40, %v5902_v55  ;;  %v19266_v9 = vsel %vm590_vm4, %v5902_v55, %v5904_v27  ;;  %v19268_v45 = vld [vmem:[#allocation3 + $0x130] sm:$0x3] }
 0x540   :  { %22951 = vst [vmem:[#allocation85_spill] sm:$0xff] %v19263_v34  ;;  %22952 = vst [vmem:[#allocation86_spill] sm:$0xff] %v19266_v9  ;;  %v5389_v47 = vadd.f32 %v14028_v54, %v19055_v28  ;;  %v5110_v20 = vpop.f32.mrb[29].mxu0  ;;  %14115 = vmatprep.mubr.msk.f32.mxu1 %vm5488_vm6, %v19263_v34  ;;  %v5909_v2 = vrot.slane %v19268_v45, 1 }
 0x541   :  { %22953 = vst [vmem:[#allocation100_spill] sm:$0xff] %v19268_v45  ;;  %5604 = vst.msk [vmem:[#allocation3 + $0x159] sm:$0xff] %vm5488_vm6, %v5451_v52  ;;  %v19274_v6 = vld [vmem:[#allocation3 + $0x120] sm:$0xff]  ;;  %v19276_v58 = vld [vmem:[#allocation3 + $0x128] sm:$0xff]  ;;  %v5388_v30 = vadd.f32 %v19055_v28, %v5110_v20 }
 0x542   :  { %5603 = vst.msk [vmem:[#allocation3 + $0x151] sm:$0xff] %vm5488_vm6, %v5450_v53  ;;  %14116 = vmatmul.mubr.msk.f32.gmra.mrb[22].mxu1 %vm5488_vm6, %v19266_v9  ;;  %v5906_v38 = vrot.slane %v19274_v6, 1  ;;  %v5907_v7 = vrot.slane %v19276_v58, 1  ;;  %v5453_v17 = vmax.f32 %v5389_v47, 0.0 }
 0x543   :  { %v5452_v61 = vmax.f32 %v5388_v30, 0.0  ;;  %v14031_v29 = vpop.f32.mrb[30].mxu0  ;;  %v19291_v8 = vld [vmem:[#allocation3 + $0x148] sm:$0x3] }
 0x544   :  { %v19286_v14 = vsel %vm590_vm4, %v5906_v38, %v5907_v7  ;;  %v19289_v23 = vsel %vm590_vm4, %v5907_v7, %v5909_v2  ;;  %22956 = vst [vmem:[#allocation105_spill] sm:$0xff] %v19291_v8  ;;  %5606 = vst.msk [vmem:[#allocation3 + $0x171] sm:$0xff] %vm5488_vm6, %v5453_v17  ;;  %v5391_v21 = vadd.f32 %v14031_v29, %v19055_v28  ;;  %v5120_v1 = vpop.f32.mrb[31].mxu0  ;;  %v5914_v50 = vrot.slane %v19291_v8, 1  ;;  %v19316_v38 = vld [vmem:[#allocation3 + $0x1b0] sm:$0xff]  ;;  %v19318_v7 = vld [vmem:[#allocation3 + $0x1b8] sm:$0xff] }
 0x545   :  { %22954 = vst [vmem:[#allocation101_spill] sm:$0xff] %v19286_v14  ;;  %22955 = vst [vmem:[#allocation104_spill] sm:$0xff] %v19289_v23  ;;  %14118 = vmatprep.mubr.msk.f32.mxu1 %vm5488_vm6, %v19286_v14  ;;  %v19297_v26 = vld [vmem:[#allocation3 + $0x138] sm:$0xff]  ;;  %v19299_v27 = vld [vmem:[#allocation3 + $0x140] sm:$0xff]  ;;  %v5390_v40 = vadd.f32 %v19055_v28, %v5120_v1 }
 0x546   :  { %5605 = vst.msk [vmem:[#allocation3 + $0x169] sm:$0xff] %vm5488_vm6, %v5452_v61  ;;  %14119 = vmatmul.mubr.msk.f32.gmra.mrb[24].mxu1 %vm5488_vm6, %v19289_v23  ;;  %v5911_v55 = vrot.slane %v19297_v26, 1  ;;  %v5912_v52 = vrot.slane %v19299_v27, 1  ;;  %v5455_v53 = vmax.f32 %v5391_v21, 0.0 }
 0x547   :  { %v5454_v54 = vmax.f32 %v5390_v40, 0.0  ;;  %v14034_v47 = vpop.f32.mrb[32].mxu0 }
 0x548   :  { %v19309_v20 = vsel %vm590_vm4, %v5911_v55, %v5912_v52  ;;  %v19312_v2 = vsel %vm590_vm4, %v5912_v52, %v5914_v50  ;;  %v19314_v30 = vld [vmem:[#allocation3 + $0x160] sm:$0x3]  ;;  %5608 = vst.msk [vmem:[#allocation3 + $0x189] sm:$0xff] %vm5488_vm6, %v5455_v53  ;;  %v5393_v17 = vadd.f32 %v14034_v47, %v19055_v28  ;;  %v5130_v61 = vpop.f32.mrb[33].mxu0  ;;  %v5926_v53 = vrot.slane %v19316_v38, 1 }
 0x549   :  { %22957 = vst [vmem:[#allocation108_spill] sm:$0xff] %v19309_v20  ;;  %22958 = vst [vmem:[#allocation41_spill] sm:$0xff] %v19312_v2  ;;  %14121 = vmatprep.mubr.msk.f32.mxu1 %vm5488_vm6, %v19309_v20  ;;  %v19324_v29 = vld [vmem:[#allocation3 + $0x150] sm:$0xff]  ;;  %v19326_v21 = vld [vmem:[#allocation3 + $0x158] sm:$0xff]  ;;  %v5919_v1 = vrot.slane %v19314_v30, 1  ;;  %v5392_v50 = vadd.f32 %v19055_v28, %v5130_v61  ;;  %v5927_v47 = vrot.slane %v19318_v7, 1 }
 0x54a   :  { %22959 = vst [vmem:[#allocation43_spill] sm:$0xff] %v19314_v30  ;;  %5607 = vst.msk [vmem:[#allocation3 + $0x181] sm:$0xff] %vm5488_vm6, %v5454_v54  ;;  %14122 = vmatmul.mubr.msk.f32.gmra.mrb[26].mxu1 %vm5488_vm6, %v19312_v2  ;;  %v5916_v40 = vrot.slane %v19324_v29, 1  ;;  %v5917_v55 = vrot.slane %v19326_v21, 1  ;;  %v5457_v52 = vmax.f32 %v5393_v17, 0.0 }
 0x54b   :  { %v5456_v20 = vmax.f32 %v5392_v50, 0.0  ;;  %v14037_v23 = vpop.f32.mrb[34].mxu0  ;;  %v19343_v61 = vld [vmem:[#allocation3 + $0x178] sm:$0x3]  ;;  %v19345_v2 = vld [vmem:[#allocation3 + $0x1c0] sm:$0x3] }
 0x54c   :  { %v19338_v14 = vsel %vm590_vm4, %v5916_v40, %v5917_v55  ;;  %v19341_v54 = vsel %vm590_vm4, %v5917_v55, %v5919_v1  ;;  %22962 = vst [vmem:[#allocation74_spill] sm:$0xff] %v19343_v61  ;;  %22963 = vst [vmem:[#allocation127_spill] sm:$0xff] %v19345_v2  ;;  %v5395_v17 = vadd.f32 %v14037_v23, %v19055_v28  ;;  %v5140_v9 = vpop.f32.mrb[35].mxu0  ;;  %v5924_v40 = vrot.slane %v19343_v61, 1 }
 0x54d   :  { %22960 = vst [vmem:[#allocation69_spill] sm:$0xff] %v19338_v14  ;;  %22961 = vst [vmem:[#allocation125_spill] sm:$0xff] %v19341_v54  ;;  %14124 = vmatprep.mubr.msk.f32.mxu1 %vm5488_vm6, %v19338_v14  ;;  %v19351_v50 = vld [vmem:[#allocation3 + $0x168] sm:$0xff]  ;;  %v19353_v34 = vld [vmem:[#allocation3 + $0x170] sm:$0xff]  ;;  %v5394_v1 = vadd.f32 %v19055_v28, %v5140_v9  ;;  %v5929_v14 = vrot.slane %v19345_v2, 1  ;;  %v5928_v9 = vsel %vm590_vm4, %v5926_v53, %v5927_v47 }
 0x54e   :  { %5610 = vst.msk [vmem:[#allocation3 + $0x1d1] sm:$0xff] %vm5488_vm6, %v5457_v52  ;;  %5609 = vst.msk [vmem:[#allocation3 + $0x1c9] sm:$0xff] %vm5488_vm6, %v5456_v20  ;;  %14125 = vmatmul.mubr.msk.f32.gmra.mrb[28].mxu1 %vm5488_vm6, %v19341_v54  ;;  %v5921_v55 = vrot.slane %v19351_v50, 1  ;;  %v5922_v23 = vrot.slane %v19353_v34, 1  ;;  %v5459_v52 = vmax.f32 %v5395_v17, 0.0 }
 0x54f   :  { %v5458_v10 = vmax.f32 %v5394_v1, 0.0  ;;  %v14040_v13 = vpop.f32.mrb[36].mxu0  ;;  %v5930_v53 = vsel %vm590_vm4, %v5927_v47, %v5929_v14 }
 0x550   :  { %v19364_v51 = vsel %vm590_vm4, %v5921_v55, %v5922_v23  ;;  %v19367_v41 = vsel %vm590_vm4, %v5922_v23, %v5924_v40  ;;  %5612 = vst.msk [vmem:[#allocation3 + $0x1e9] sm:$0xff] %vm5488_vm6, %v5459_v52  ;;  %v5397_v20 = vadd.f32 %v14040_v13, %v19055_v28  ;;  %v5150_v54 = vpop.f32.mrb[37].mxu0 }
 0x551   :  { %22964 = vst [vmem:[#allocation84_spill] sm:$0xff] %v19364_v51  ;;  %22965 = vst [vmem:[#allocation106_spill] sm:$0xff] %v19367_v41  ;;  %14127 = vmatprep.mubr.msk.f32.mxu1 %vm5488_vm6, %v19364_v51  ;;  %v5396_v17 = vadd.f32 %v19055_v28, %v5150_v54 }
 0x552   :  { %5611 = vst.msk [vmem:[#allocation3 + $0x1e1] sm:$0xff] %vm5488_vm6, %v5458_v10  ;;  %14128 = vmatmul.mubr.msk.f32.gmra.mrb[30].mxu1 %vm5488_vm6, %v19367_v41  ;;  %v5461_v1 = vmax.f32 %v5397_v20, 0.0 }
 0x553   :  { %14130 = vmatprep.mubr.msk.f32.mxu1 %vm5488_vm6, %v5928_v9  ;;  %v5460_v40 = vmax.f32 %v5396_v17, 0.0  ;;  %v14043_v55 = vpop.f32.mrb[38].mxu0 }
 0x554   :  { %5614 = vst.msk [vmem:[#allocation3 + $0x201] sm:$0xff] %vm5488_vm6, %v5461_v1  ;;  %v5399_v13 = vadd.f32 %v14043_v55, %v19055_v28  ;;  %v5160_v52 = vpop.f32.mrb[39].mxu0 }
 0x555   :  { %v19380_v23 = vld [vmem:[#allocation3 + $0x1d8] sm:$0x3]  ;;  %v19384_v10 = vld [vmem:[#allocation3 + $0x1c8] sm:$0xff]  ;;  %v19386_v54 = vld [vmem:[#allocation3 + $0x1d0] sm:$0xff]  ;;  %5613 = vst.msk [vmem:[#allocation3 + $0x1f9] sm:$0xff] %vm5488_vm6, %v5460_v40  ;;  %v5398_v9 = vadd.f32 %v19055_v28, %v5160_v52 }
 0x556   :  { %22966 = vst [vmem:[#allocation107_spill] sm:$0xff] %v19380_v23  ;;  %v5934_v41 = vrot.slane %v19380_v23, 1  ;;  %14131 = vmatmul.mubr.msk.f32.gmra.mrb[32].mxu1 %vm5488_vm6, %v5930_v53  ;;  %v5931_v14 = vrot.slane %v19384_v10, 1  ;;  %v5932_v47 = vrot.slane %v19386_v54, 1  ;;  %v5463_v20 = vmax.f32 %v5399_v13, 0.0 }
 0x557   :  { %v5462_v17 = vmax.f32 %v5398_v9, 0.0  ;;  %v14046_v1 = vpop.f32.mrb[40].mxu0  ;;  %v19400_v43 = vld [vmem:[#allocation3 + $0x1f0] sm:$0x3] }
 0x558   :  { %v19395_v55 = vsel %vm590_vm4, %v5931_v14, %v5932_v47  ;;  %v19398_v51 = vsel %vm590_vm4, %v5932_v47, %v5934_v41  ;;  %22969 = vst [vmem:[#allocation95_spill] sm:$0xff] %v19400_v43  ;;  %5616 = vst.msk [vmem:[#allocation3 + $0x219] sm:$0xff] %vm5488_vm6, %v5463_v20  ;;  %v5401_v40 = vadd.f32 %v14046_v1, %v19055_v28  ;;  %v5170_v53 = vpop.f32.mrb[41].mxu0  ;;  %v5939_v9 = vrot.slane %v19400_v43, 1 }
 0x559   :  { %22967 = vst [vmem:[#allocation109_spill] sm:$0xff] %v19395_v55  ;;  %22968 = vst [vmem:[#allocation110_spill] sm:$0xff] %v19398_v51  ;;  %14133 = vmatprep.mubr.msk.f32.mxu1 %vm5488_vm6, %v19395_v55  ;;  %v19406_v52 = vld [vmem:[#allocation3 + $0x1e0] sm:$0xff]  ;;  %v19408_v13 = vld [vmem:[#allocation3 + $0x1e8] sm:$0xff]  ;;  %v5400_v41 = vadd.f32 %v19055_v28, %v5170_v53 }
 0x55a   :  { %5615 = vst.msk [vmem:[#allocation3 + $0x211] sm:$0xff] %vm5488_vm6, %v5462_v17  ;;  %14134 = vmatmul.mubr.msk.f32.gmra.mrb[34].mxu1 %vm5488_vm6, %v19398_v51  ;;  %v5936_v14 = vrot.slane %v19406_v52, 1  ;;  %v5937_v47 = vrot.slane %v19408_v13, 1  ;;  %v5465_v20 = vmax.f32 %v5401_v40, 0.0 }
 0x55b   :  { %v5464_v1 = vmax.f32 %v5400_v41, 0.0  ;;  %v14049_v55 = vpop.f32.mrb[42].mxu0  ;;  %v19423_v16 = vld [vmem:[#allocation3 + $0x208] sm:$0x3] }
 0x55c   :  { %v19418_v11 = vsel %vm590_vm4, %v5936_v14, %v5937_v47  ;;  %v19421_v12 = vsel %vm590_vm4, %v5937_v47, %v5939_v9  ;;  %22972 = vst [vmem:[#allocation70_spill] sm:$0xff] %v19423_v16  ;;  %5618 = vst.msk [vmem:[#allocation3 + $0x231] sm:$0xff] %vm5488_vm6, %v5465_v20  ;;  %v5403_v17 = vadd.f32 %v14049_v55, %v19055_v28  ;;  %v5180_v53 = vpop.f32.mrb[43].mxu0  ;;  %v19429_v51 = vld [vmem:[#allocation3 + $0x1f8] sm:$0xff]  ;;  %v19431_v40 = vld [vmem:[#allocation3 + $0x200] sm:$0xff]  ;;  %v5944_v41 = vrot.slane %v19423_v16, 1 }
 0x55d   :  { %22970 = vst [vmem:[#allocation61_spill] sm:$0xff] %v19418_v11  ;;  %22971 = vst [vmem:[#allocation65_spill] sm:$0xff] %v19421_v12  ;;  %14136 = vmatprep.mubr.msk.f32.mxu1 %vm5488_vm6, %v19418_v11  ;;  %v5402_v9 = vadd.f32 %v19055_v28, %v5180_v53  ;;  %v5941_v14 = vrot.slane %v19429_v51, 1  ;;  %v5942_v55 = vrot.slane %v19431_v40, 1 }
 0x55e   :  { %5617 = vst.msk [vmem:[#allocation3 + $0x229] sm:$0xff] %vm5488_vm6, %v5464_v1  ;;  %14137 = vmatmul.mubr.msk.f32.gmra.mrb[36].mxu1 %vm5488_vm6, %v19421_v12  ;;  %v5467_v47 = vmax.f32 %v5403_v17, 0.0 }
 0x55f   :  { %v5466_v20 = vmax.f32 %v5402_v9, 0.0  ;;  %v14052_v11 = vpop.f32.mrb[44].mxu0  ;;  %v19441_v62 = vsel %vm590_vm4, %v5941_v14, %v5942_v55  ;;  %v19444_v33 = vsel %vm590_vm4, %v5942_v55, %v5944_v41  ;;  %v19446_v46 = vld [vmem:[#allocation3 + $0x220] sm:$0x3] }
 0x560   :  { %22973 = vst [vmem:[#allocation71_spill] sm:$0xff] %v19441_v62  ;;  %22974 = vst [vmem:[#allocation80_spill] sm:$0xff] %v19444_v33  ;;  %v5405_v1 = vadd.f32 %v14052_v11, %v19055_v28  ;;  %v5190_v53 = vpop.f32.mrb[45].mxu0  ;;  %14139 = vmatprep.mubr.msk.f32.mxu1 %vm5488_vm6, %v19441_v62  ;;  %v5949_v9 = vrot.slane %v19446_v46, 1 }
 0x561   :  { %22975 = vst [vmem:[#allocation81_spill] sm:$0xff] %v19446_v46  ;;  %5620 = vst.msk [vmem:[#allocation3 + $0x249] sm:$0xff] %vm5488_vm6, %v5467_v47  ;;  %v19452_v12 = vld [vmem:[#allocation3 + $0x210] sm:$0xff]  ;;  %v19454_v17 = vld [vmem:[#allocation3 + $0x218] sm:$0xff]  ;;  %v5404_v41 = vadd.f32 %v19055_v28, %v5190_v53 }
 0x562   :  { %5619 = vst.msk [vmem:[#allocation3 + $0x241] sm:$0xff] %vm5488_vm6, %v5466_v20  ;;  %14140 = vmatmul.mubr.msk.f32.gmra.mrb[38].mxu1 %vm5488_vm6, %v19444_v33  ;;  %v5946_v14 = vrot.slane %v19452_v12, 1  ;;  %v5947_v11 = vrot.slane %v19454_v17, 1  ;;  %v5469_v55 = vmax.f32 %v5405_v1, 0.0 }
 0x563   :  { %v5468_v47 = vmax.f32 %v5404_v41, 0.0  ;;  %v14055_v62 = vpop.f32.mrb[46].mxu0  ;;  %v19469_v35 = vld [vmem:[#allocation3 + $0x238] sm:$0x3] }
 0x564   :  { %v19464_v57 = vsel %vm590_vm4, %v5946_v14, %v5947_v11  ;;  %v19467_v32 = vsel %vm590_vm4, %v5947_v11, %v5949_v9  ;;  %22978 = vst [vmem:[#allocation102_spill] sm:$0xff] %v19469_v35  ;;  %5622 = vst.msk [vmem:[#allocation3 + $0x261] sm:$0xff] %vm5488_vm6, %v5469_v55  ;;  %v5407_v20 = vadd.f32 %v14055_v62, %v19055_v28  ;;  %v5200_v53 = vpop.f32.mrb[47].mxu0  ;;  %v5954_v41 = vrot.slane %v19469_v35, 1 }
 0x565   :  { %22976 = vst [vmem:[#allocation90_spill] sm:$0xff] %v19464_v57  ;;  %22977 = vst [vmem:[#allocation99_spill] sm:$0xff] %v19467_v32  ;;  %14142 = vmatprep.mubr.msk.f32.mxu1 %vm5488_vm6, %v19464_v57  ;;  %v19475_v33 = vld [vmem:[#allocation3 + $0x228] sm:$0xff]  ;;  %v19477_v1 = vld [vmem:[#allocation3 + $0x230] sm:$0xff]  ;;  %v5406_v9 = vadd.f32 %v19055_v28, %v5200_v53 }
 0x566   :  { %5621 = vst.msk [vmem:[#allocation3 + $0x259] sm:$0xff] %vm5488_vm6, %v5468_v47  ;;  %14143 = vmatmul.mubr.msk.f32.gmra.mrb[40].mxu1 %vm5488_vm6, %v19467_v32  ;;  %v5951_v14 = vrot.slane %v19475_v33, 1  ;;  %v5952_v62 = vrot.slane %v19477_v1, 1  ;;  %v5471_v11 = vmax.f32 %v5407_v20, 0.0 }
 0x567   :  { %v5470_v55 = vmax.f32 %v5406_v9, 0.0  ;;  %v14058_v57 = vpop.f32.mrb[48].mxu0 }
 0x568   :  { %v19487_v22 = vsel %vm590_vm4, %v5951_v14, %v5952_v62  ;;  %v19490_v25 = vsel %vm590_vm4, %v5952_v62, %v5954_v41  ;;  %v19492_v3 = vld [vmem:[#allocation3 + $0x250] sm:$0x3]  ;;  %5624 = vst.msk [vmem:[#allocation3 + $0x279] sm:$0xff] %vm5488_vm6, %v5471_v11  ;;  %v5409_v47 = vadd.f32 %v14058_v57, %v19055_v28  ;;  %v5210_v53 = vpop.f32.mrb[49].mxu0 }
 0x569   :  { %22979 = vst [vmem:[#allocation103_spill] sm:$0xff] %v19487_v22  ;;  %22980 = vst [vmem:[#allocation130_spill] sm:$0xff] %v19490_v25  ;;  %14145 = vmatprep.mubr.msk.f32.mxu1 %vm5488_vm6, %v19487_v22  ;;  %v19498_v32 = vld [vmem:[#allocation3 + $0x240] sm:$0xff]  ;;  %v19500_v20 = vld [vmem:[#allocation3 + $0x248] sm:$0xff]  ;;  %v5959_v9 = vrot.slane %v19492_v3, 1  ;;  %v5408_v41 = vadd.f32 %v19055_v28, %v5210_v53 }
 0x56a   :  { %22981 = vst [vmem:[#allocation29_spill] sm:$0xff] %v19492_v3  ;;  %5623 = vst.msk [vmem:[#allocation3 + $0x271] sm:$0xff] %vm5488_vm6, %v5470_v55  ;;  %14146 = vmatmul.mubr.msk.f32.gmra.mrb[42].mxu1 %vm5488_vm6, %v19490_v25  ;;  %v5956_v14 = vrot.slane %v19498_v32, 1  ;;  %v5957_v57 = vrot.slane %v19500_v20, 1  ;;  %v5473_v62 = vmax.f32 %v5409_v47, 0.0 }
 0x56b   :  { %v5472_v11 = vmax.f32 %v5408_v41, 0.0  ;;  %v14061_v22 = vpop.f32.mrb[50].mxu0  ;;  %v19515_v37 = vld [vmem:[#allocation3 + $0x268] sm:$0x3] }
 0x56c   :  { %v19510_v39 = vsel %vm590_vm4, %v5956_v14, %v5957_v57  ;;  %v19513_v48 = vsel %vm590_vm4, %v5957_v57, %v5959_v9  ;;  %22984 = vst [vmem:[#allocation33_spill] sm:$0xff] %v19515_v37  ;;  %5626 = vst.msk [vmem:[#allocation3 + $0x291] sm:$0xff] %vm5488_vm6, %v5473_v62  ;;  %v5411_v55 = vadd.f32 %v14061_v22, %v19055_v28  ;;  %v5220_v53 = vpop.f32.mrb[51].mxu0  ;;  %v5964_v41 = vrot.slane %v19515_v37, 1 }
 0x56d   :  { %22982 = vst [vmem:[#allocation30_spill] sm:$0xff] %v19510_v39  ;;  %22983 = vst [vmem:[#allocation32_spill] sm:$0xff] %v19513_v48  ;;  %14148 = vmatprep.mubr.msk.f32.mxu1 %vm5488_vm6, %v19510_v39  ;;  %v19521_v25 = vld [vmem:[#allocation3 + $0x258] sm:$0xff]  ;;  %v19523_v47 = vld [vmem:[#allocation3 + $0x260] sm:$0xff]  ;;  %v5410_v9 = vadd.f32 %v19055_v28, %v5220_v53 }
 0x56e   :  { %5625 = vst.msk [vmem:[#allocation3 + $0x289] sm:$0xff] %vm5488_vm6, %v5472_v11  ;;  %14149 = vmatmul.mubr.msk.f32.gmra.mrb[44].mxu1 %vm5488_vm6, %v19513_v48  ;;  %v5961_v14 = vrot.slane %v19521_v25, 1  ;;  %v5962_v22 = vrot.slane %v19523_v47, 1  ;;  %v5475_v57 = vmax.f32 %v5411_v55, 0.0 }
 0x56f   :  { %v5474_v62 = vmax.f32 %v5410_v9, 0.0  ;;  %v14064_v39 = vpop.f32.mrb[52].mxu0  ;;  %v19538_v37 = vld [vmem:[#allocation3 + $0x280] sm:$0x3] }
 0x570   :  { %v19533_v3 = vsel %vm590_vm4, %v5961_v14, %v5962_v22  ;;  %v19536_v35 = vsel %vm590_vm4, %v5962_v22, %v5964_v41  ;;  %22987 = vst [vmem:[#allocation37_spill] sm:$0xff] %v19538_v37  ;;  %5628 = vst.msk [vmem:[#allocation3 + $0x2a9] sm:$0xff] %vm5488_vm6, %v5475_v57  ;;  %v5413_v11 = vadd.f32 %v14064_v39, %v19055_v28  ;;  %v5230_v53 = vpop.f32.mrb[53].mxu0  ;;  %v5969_v9 = vrot.slane %v19538_v37, 1 }
 0x571   :  { %22985 = vst [vmem:[#allocation34_spill] sm:$0xff] %v19533_v3  ;;  %22986 = vst [vmem:[#allocation36_spill] sm:$0xff] %v19536_v35  ;;  %14151 = vmatprep.mubr.msk.f32.mxu1 %vm5488_vm6, %v19533_v3  ;;  %v19544_v48 = vld [vmem:[#allocation3 + $0x270] sm:$0xff]  ;;  %v19546_v55 = vld [vmem:[#allocation3 + $0x278] sm:$0xff]  ;;  %v5412_v41 = vadd.f32 %v19055_v28, %v5230_v53 }
 0x572   :  { %5627 = vst.msk [vmem:[#allocation3 + $0x2a1] sm:$0xff] %vm5488_vm6, %v5474_v62  ;;  %14152 = vmatmul.mubr.msk.f32.gmra.mrb[46].mxu1 %vm5488_vm6, %v19536_v35  ;;  %v5966_v14 = vrot.slane %v19544_v48, 1  ;;  %v5967_v39 = vrot.slane %v19546_v55, 1  ;;  %v5477_v22 = vmax.f32 %v5413_v11, 0.0 }
 0x573   :  { %v5476_v57 = vmax.f32 %v5412_v41, 0.0  ;;  %v14067_v3 = vpop.f32.mrb[54].mxu0  ;;  %v19561_v37 = vld [vmem:[#allocation3 + $0x298] sm:$0x3] }
 0x574   :  { %v19556_v46 = vsel %vm590_vm4, %v5966_v14, %v5967_v39  ;;  %v19559_v16 = vsel %vm590_vm4, %v5967_v39, %v5969_v9  ;;  %22990 = vst [vmem:[#allocation42_spill] sm:$0xff] %v19561_v37  ;;  %5630 = vst.msk [vmem:[#allocation3 + $0x2c1] sm:$0xff] %vm5488_vm6, %v5477_v22  ;;  %v5415_v62 = vadd.f32 %v14067_v3, %v19055_v28  ;;  %v5240_v53 = vpop.f32.mrb[55].mxu0  ;;  %v5974_v41 = vrot.slane %v19561_v37, 1 }
 0x575   :  { %22988 = vst [vmem:[#allocation39_spill] sm:$0xff] %v19556_v46  ;;  %22989 = vst [vmem:[#allocation40_spill] sm:$0xff] %v19559_v16  ;;  %14154 = vmatprep.mubr.msk.f32.mxu1 %vm5488_vm6, %v19556_v46  ;;  %v19567_v35 = vld [vmem:[#allocation3 + $0x288] sm:$0xff]  ;;  %v19569_v11 = vld [vmem:[#allocation3 + $0x290] sm:$0xff]  ;;  %v5414_v9 = vadd.f32 %v19055_v28, %v5240_v53 }
 0x576   :  { %5629 = vst.msk [vmem:[#allocation3 + $0x2b9] sm:$0xff] %vm5488_vm6, %v5476_v57  ;;  %14155 = vmatmul.mubr.msk.f32.gmra.mrb[48].mxu1 %vm5488_vm6, %v19559_v16  ;;  %v5971_v14 = vrot.slane %v19567_v35, 1  ;;  %v5972_v3 = vrot.slane %v19569_v11, 1  ;;  %v5479_v39 = vmax.f32 %v5415_v62, 0.0 }
 0x577   :  { %v5478_v22 = vmax.f32 %v5414_v9, 0.0  ;;  %v14070_v46 = vpop.f32.mrb[56].mxu0  ;;  %v19584_v37 = vld [vmem:[#allocation3 + $0x2b0] sm:$0x3] }
 0x578   :  { %v19579_v43 = vsel %vm590_vm4, %v5971_v14, %v5972_v3  ;;  %v19582_v23 = vsel %vm590_vm4, %v5972_v3, %v5974_v41  ;;  %22993 = vst [vmem:[#allocation47_spill] sm:$0xff] %v19584_v37  ;;  %5632 = vst.msk [vmem:[#allocation3 + $0x2d9] sm:$0xff] %vm5488_vm6, %v5479_v39  ;;  %v5417_v57 = vadd.f32 %v14070_v46, %v19055_v28  ;;  %v5250_v53 = vpop.f32.mrb[57].mxu0  ;;  %v5979_v9 = vrot.slane %v19584_v37, 1 }
 0x579   :  { %22991 = vst [vmem:[#allocation4_spill] sm:$0xff] %v19579_v43  ;;  %22992 = vst [vmem:[#allocation5_spill] sm:$0xff] %v19582_v23  ;;  %14157 = vmatprep.mubr.msk.f32.mxu1 %vm5488_vm6, %v19579_v43  ;;  %v19590_v16 = vld [vmem:[#allocation3 + $0x2a0] sm:$0xff]  ;;  %v19592_v62 = vld [vmem:[#allocation3 + $0x2a8] sm:$0xff]  ;;  %v5416_v41 = vadd.f32 %v19055_v28, %v5250_v53 }
 0x57a   :  { %5631 = vst.msk [vmem:[#allocation3 + $0x2d1] sm:$0xff] %vm5488_vm6, %v5478_v22  ;;  %14158 = vmatmul.mubr.msk.f32.gmra.mrb[50].mxu1 %vm5488_vm6, %v19582_v23  ;;  %v5976_v14 = vrot.slane %v19590_v16, 1  ;;  %v5977_v46 = vrot.slane %v19592_v62, 1  ;;  %v5481_v3 = vmax.f32 %v5417_v57, 0.0 }
 0x57b   :  { %v5480_v39 = vmax.f32 %v5416_v41, 0.0  ;;  %v14073_v43 = vpop.f32.mrb[58].mxu0  ;;  %v19607_v37 = vld [vmem:[#allocation3 + $0x2c8] sm:$0x3] }
 0x57c   :  { %v19602_v2 = vsel %vm590_vm4, %v5976_v14, %v5977_v46  ;;  %v19605_v61 = vsel %vm590_vm4, %v5977_v46, %v5979_v9  ;;  %22996 = vst [vmem:[#allocation52_spill] sm:$0xff] %v19607_v37  ;;  %5634 = vst.msk [vmem:[#allocation3 + $0x2f1] sm:$0xff] %vm5488_vm6, %v5481_v3  ;;  %v5419_v22 = vadd.f32 %v14073_v43, %v19055_v28  ;;  %v5260_v53 = vpop.f32.mrb[59].mxu0  ;;  %v5984_v41 = vrot.slane %v19607_v37, 1 }
 0x57d   :  { %22994 = vst [vmem:[#allocation49_spill] sm:$0xff] %v19602_v2  ;;  %22995 = vst [vmem:[#allocation50_spill] sm:$0xff] %v19605_v61  ;;  %14160 = vmatprep.mubr.msk.f32.mxu1 %vm5488_vm6, %v19602_v2  ;;  %v19613_v23 = vld [vmem:[#allocation3 + $0x2b8] sm:$0xff]  ;;  %v19615_v57 = vld [vmem:[#allocation3 + $0x2c0] sm:$0xff]  ;;  %v5418_v9 = vadd.f32 %v19055_v28, %v5260_v53 }
 0x57e   :  { %22997 = vst [vmem:[#allocation53_spill] sm:$0xff] %v19615_v57  ;;  %5633 = vst.msk [vmem:[#allocation3 + $0x2e9] sm:$0xff] %vm5488_vm6, %v5480_v39  ;;  %14161 = vmatmul.mubr.msk.f32.gmra.mrb[52].mxu1 %vm5488_vm6, %v19605_v61  ;;  %v5981_v14 = vrot.slane %v19613_v23, 1  ;;  %v5982_v43 = vrot.slane %v19615_v57, 1  ;;  %v5483_v46 = vmax.f32 %v5419_v22, 0.0 }
 0x57f   :  { %v5482_v3 = vmax.f32 %v5418_v9, 0.0  ;;  %v14076_v2 = vpop.f32.mrb[60].mxu0  ;;  %v19630_v37 = vld [vmem:[#allocation3 + $0x2e0] sm:$0x3] }
 0x580   :  { %v19625_v30 = vsel %vm590_vm4, %v5981_v14, %v5982_v43  ;;  %v19628_v8 = vsel %vm590_vm4, %v5982_v43, %v5984_v41  ;;  %23000 = vst [vmem:[#allocation58_spill] sm:$0xff] %v19630_v37  ;;  %5636 = vst.msk [vmem:[#allocation3 + $0x309] sm:$0xff] %vm5488_vm6, %v5483_v46  ;;  %v16057_v28 = vld [vmem:[%s21956_s5] ss:$0 sm:$0xff]  ;;  %v5270_v53 = vpop.f32.mrb[61].mxu0  ;;  %v5989_v41 = vrot.slane %v19630_v37, 1 }
 0x581   :  { %22998 = vst [vmem:[#allocation55_spill] sm:$0xff] %v19625_v30  ;;  %22999 = vst [vmem:[#allocation56_spill] sm:$0xff] %v19628_v8  ;;  %v5421_v39 = vadd.f32 %v16057_v28, %v14076_v2  ;;  %14163 = vmatprep.mubr.msk.f32.mxu1 %vm5488_vm6, %v19625_v30  ;;  %v19638_v22 = vld [vmem:[#allocation3 + $0x2d0] sm:$0xff]  ;;  %v19640_v9 = vld [vmem:[#allocation3 + $0x2d8] sm:$0xff]  ;;  %v5420_v14 = vadd.f32 %v16057_v28, %v5270_v53 }
 0x582   :  { %23001 = vst [vmem:[#allocation59_spill] sm:$0xff] %v19638_v22  ;;  %23002 = vst [vmem:[#allocation62_spill] sm:$0xff] %v19640_v9  ;;  %14164 = vmatmul.mubr.msk.f32.gmra.mrb[54].mxu1 %vm5488_vm6, %v19628_v8  ;;  %v5986_v43 = vrot.slane %v19638_v22, 1  ;;  %v5987_v2 = vrot.slane %v19640_v9, 1 }
 0x583   :  { %5635 = vst.msk [vmem:[#allocation3 + $0x301] sm:$0xff] %vm5488_vm6, %v5482_v3  ;;  %v5485_v46 = vmax.f32 %v5421_v39, 0.0  ;;  %v5484_v61 = vmax.f32 %v5420_v14, 0.0  ;;  %v14079_v45 = vpop.f32.mrb[62].mxu0  ;;  %v19654_v37 = vld [vmem:[#allocation3 + $0x2f8] sm:$0x3] }
 0x584   :  { %v19649_v30 = vsel %vm590_vm4, %v5986_v43, %v5987_v2  ;;  %v19652_v57 = vsel %vm590_vm4, %v5987_v2, %v5989_v41  ;;  %v5423_v3 = vadd.f32 %v16057_v28, %v14079_v45  ;;  %v5280_v53 = vpop.f32.mrb[63].mxu0  ;;  %v5994_v14 = vrot.slane %v19654_v37, 1 }
 0x585   :  { %23003 = vst [vmem:[#allocation63_spill] sm:$0xff] %v19649_v30  ;;  %23004 = vst [vmem:[#allocation67_spill] sm:$0xff] %v19652_v57  ;;  %14166 = vmatprep.mubr.msk.f32.mxu1 %vm5488_vm6, %v19649_v30  ;;  %v19659_v8 = vld [vmem:[#allocation3 + $0x2e8] sm:$0xff]  ;;  %v19661_v39 = vld [vmem:[#allocation3 + $0x2f0] sm:$0xff]  ;;  %v5422_v43 = vadd.f32 %v16057_v28, %v5280_v53 }
 0x586   :  { %5638 = vst.msk [vmem:[#allocation3 + $0x321] sm:$0xff] %vm5488_vm6, %v5485_v46  ;;  %5637 = vst.msk [vmem:[#allocation3 + $0x319] sm:$0xff] %vm5488_vm6, %v5484_v61  ;;  %14167 = vmatmul.mubr.msk.f32.gmra.mrb[56].mxu1 %vm5488_vm6, %v19652_v57  ;;  %v5991_v41 = vrot.slane %v19659_v8, 1  ;;  %v5992_v45 = vrot.slane %v19661_v39, 1  ;;  %v5487_v2 = vmax.f32 %v5423_v3, 0.0  ;;  %v19748_v57 = vld [vmem:[#allocation3 + $0x38] sm:$0xff] }
 0x587   :  { %v5486_v46 = vmax.f32 %v5422_v43, 0.0  ;;  %v19675_v22 = vld [vmem:[#allocation3 + $0x310] sm:$0x3] }
 0x588   :  { %v19670_v30 = vsel %vm590_vm4, %v5991_v41, %v5992_v45  ;;  %v19673_v9 = vsel %vm590_vm4, %v5992_v45, %v5994_v14  ;;  %5640 = vst.msk [vmem:[#allocation3 + $0x339] sm:$0xff] %vm5488_vm6, %v5487_v2  ;;  %v5999_v3 = vrot.slane %v19675_v22, 1 }
 0x589   :  { %23005 = vst [vmem:[#allocation68_spill] sm:$0xff] %v19670_v30  ;;  %23006 = vst [vmem:[#allocation72_spill] sm:$0xff] %v19673_v9  ;;  %14169 = vmatprep.mubr.msk.f32.mxu1 %vm5488_vm6, %v19670_v30 }
 0x58a   :  { %v19680_v61 = vld [vmem:[#allocation3 + $0x300] sm:$0xff]  ;;  %v19682_v28 = vld [vmem:[#allocation3 + $0x308] sm:$0xff]  ;;  %5639 = vst.msk [vmem:[#allocation3 + $0x331] sm:$0xff] %vm5488_vm6, %v5486_v46  ;;  %14170 = vmatmul.mubr.msk.f32.gmra.mrb[58].mxu1 %vm5488_vm6, %v19673_v9 }
 0x58b   :  { %v5996_v53 = vrot.slane %v19680_v61, 1  ;;  %v5997_v14 = vrot.slane %v19682_v28, 1 }
 0x58d   :  { %v19691_v43 = vsel %vm590_vm4, %v5996_v53, %v5997_v14  ;;  %v19694_v41 = vsel %vm590_vm4, %v5997_v14, %v5999_v3  ;;  %v19696_v45 = vld [vmem:[#allocation3 + $0x328] sm:$0x3]  ;;  %v19700_v2 = vld [vmem:[#allocation3 + $0x318] sm:$0xff]  ;;  %v19702_v46 = vld [vmem:[#allocation3 + $0x320] sm:$0xff] }
 0x58e   :  { %23007 = vst [vmem:[#allocation73_spill] sm:$0xff] %v19691_v43  ;;  %23008 = vst [vmem:[#allocation77_spill] sm:$0xff] %v19694_v41  ;;  %14172 = vmatprep.mubr.msk.f32.mxu1 %vm5488_vm6, %v19691_v43  ;;  %v6004_v9 = vrot.slane %v19696_v45, 1  ;;  %v6001_v53 = vrot.slane %v19700_v2, 1  ;;  %v6002_v30 = vrot.slane %v19702_v46, 1  ;;  %v19719_v43 = vld [vmem:[#allocation3] sm:$0xff] }
 0x58f   :  { %23009 = vst [vmem:[#allocation78_spill] sm:$0xff] %v19696_v45  ;;  %14173 = vmatmul.mubr.msk.f32.gmra.mrb[60].mxu1 %vm5488_vm6, %v19694_v41  ;;  %v19726_v41 = vld [vmem:[%s21955_s2 + $0x18] sm:$0xff]  ;;  %v19756_v45 = vld [vmem:[#allocation3 + $0x50] sm:$0xff] }
 0x590   :  { %v19710_v3 = vsel %vm590_vm4, %v6001_v53, %v6002_v30  ;;  %v19713_v14 = vsel %vm590_vm4, %v6002_v30, %v6004_v9  ;;  %v19728_v53 = vld [vmem:[#allocation3 + $0x8] sm:$0xff]  ;;  %v16060_v30 = vld [vmem:[%s21955_s2 + $0x10] sm:$0xff]  ;;  %v19735_v9 = vld [vmem:[#allocation3 + $0x18] sm:$0xff] }
 0x591   :  { %23010 = vst [vmem:[#allocation82_spill] sm:$0xff] %v19710_v3  ;;  %23011 = vst [vmem:[#allocation83_spill] sm:$0xff] %v19713_v14  ;;  %14175 = vmatprep.mubr.msk.f32.mxu1 %vm5488_vm6, %v19710_v3  ;;  %v19744_v3 = vld [vmem:[#allocation3 + $0x30] sm:$0xff] }
 0x593   :  { %14176 = vmatmul.mubr.msk.f32.gmra.mrb[62].mxu1 %vm5488_vm6, %v19713_v14  ;;  %v19740_v14 = vld [vmem:[#allocation3 + $0x20] sm:$0xff] }
 0x594   :  { %14180 = vmatprep.mubr.msk.f32.mxu1 %vm5488_vm6, %v19719_v43 }
 0x597   :  { %14181 = vmatmul.mubr.msk.f32.vlgmr.msra.gmra.mrb[0].mxu1 %vm5488_vm6, %v19728_v53 }
 0x598   :  { %14277 = vmatpush3.msra.mxu1 %v16060_v30  ;;  %14183 = vmatprep.mubr.msk.f32.mxu1 %vm5488_vm6, %v19735_v9  ;;  %v19752_v30 = vld [vmem:[#allocation3 + $0x48] sm:$0xff] }
 0x599   :  { %14374 = vmatprep.subr.mxu1 %v19726_v41 }
 0x59b   :  { %14184 = vmatmul.mubr.msk.f32.gmra.mrb[2].mxu1 %vm5488_vm6, %v19740_v14 }
 0x59c   :  { %14186 = vmatprep.mubr.msk.f32.mxu1 %vm5488_vm6, %v19744_v3 }
 0x59f   :  { %14187 = vmatmul.mubr.msk.f32.gmra.mrb[4].mxu1 %vm5488_vm6, %v19748_v57 }
 0x5a0   :  { %14189 = vmatprep.mubr.msk.f32.mxu1 %vm5488_vm6, %v19752_v30 }
 0x5a3   :  { %14190 = vmatmul.mubr.msk.f32.gmra.mrb[6].mxu1 %vm5488_vm6, %v19756_v45 }
 0x5a4   :  { %14192 = vmatprep.mubr.msk.f32.mxu1 %vm5488_vm6, %v19112_v19  ;;  %v23012_v19 = vld [vmem:[#allocation53_spill] sm:$0xff] }
 0x5a7   :  { %14193 = vmatmul.mubr.msk.f32.gmra.mrb[8].mxu1 %vm5488_vm6, %v19114_v31  ;;  %v23013_v31 = vld [vmem:[#allocation59_spill] sm:$0xff] }
 0x5a8   :  { %14195 = vmatprep.mubr.msk.f32.mxu1 %vm5488_vm6, %v19132_v44  ;;  %v23014_v44 = vld [vmem:[#allocation62_spill] sm:$0xff] }
 0x5ab   :  { %14196 = vmatmul.mubr.msk.f32.gmra.mrb[10].mxu1 %vm5488_vm6, %v19134_v49  ;;  %v7034_v49 = vrot.slane %v19719_v43, 2 }
 0x5ac   :  { %14198 = vmatprep.mubr.msk.f32.mxu1 %vm5488_vm6, %v19152_v59  ;;  %v7035_v59 = vrot.slane %v19728_v53, 2  ;;  %v7044_v53 = vrot.slane %v19744_v3, 2 }
 0x5af   :  { %14199 = vmatmul.mubr.msk.f32.gmra.mrb[12].mxu1 %vm5488_vm6, %v19154_v18  ;;  %v16067_v18 = vld [vmem:[#allocation3 + $0x10] sm:$0x3] }
 0x5b0   :  { %14201 = vmatprep.mubr.msk.f32.mxu1 %vm5488_vm6, %v19172_v15  ;;  %v7037_v15 = vrot.slane %v16067_v18, 2  ;;  %v16069_v18 = vld [vmem:[#allocation3 + $0x40] sm:$0x3] }
 0x5b3   :  { %14202 = vmatmul.mubr.msk.f32.gmra.mrb[14].mxu1 %vm5488_vm6, %v19174_v4  ;;  %v7036_v4 = vsel %vm1786_vm5, %v7034_v49, %v7035_v59  ;;  %v7045_v49 = vrot.slane %v19748_v57, 2 }
 0x5b4   :  { %14204 = vmatprep.mubr.msk.f32.mxu1 %vm5488_vm6, %v19192_v42  ;;  %v7039_v42 = vrot.slane %v19735_v9, 2 }
 0x5b7   :  { %14205 = vmatmul.mubr.msk.f32.gmra.mrb[16].mxu1 %vm5488_vm6, %v19194_v24  ;;  %v7040_v24 = vrot.slane %v19740_v14, 2 }
 0x5b8   :  { %14207 = vmatprep.mubr.msk.f32.mxu1 %vm5488_vm6, %v19212_v5  ;;  %v7038_v5 = vsel %vm1786_vm5, %v7035_v59, %v7037_v15  ;;  %v7047_v15 = vrot.slane %v16069_v18, 2 }
 0x5b9   :  { %v19886_v43 = vsel %vm1786_vm5, %v7039_v42, %v7040_v24  ;;  %v7049_v42 = vrot.slane %v19752_v30, 2 }
 0x5ba   :  { %23015 = vst [vmem:[#allocation87_spill] sm:$0xff] %v19886_v43 }
 0x5bb   :  { %14208 = vmatmul.mubr.msk.f32.gmra.mrb[18].mxu1 %vm5488_vm6, %v19214_v0  ;;  %v16068_v0 = vld [vmem:[#allocation3 + $0x28] sm:$0x3] }
 0x5bc   :  { %14210 = vmatprep.mubr.msk.f32.mxu1 %vm5488_vm6, %v19232_v56  ;;  %v7042_v56 = vrot.slane %v16068_v0, 2 }
 0x5be   :  { %v19895_v59 = vsel %vm1786_vm5, %v7040_v24, %v7042_v56  ;;  %v16070_v24 = vld [vmem:[#allocation3 + $0x58] sm:$0x3] }
 0x5bf   :  { %14211 = vmatmul.mubr.msk.f32.gmra.mrb[20].mxu1 %vm5488_vm6, %v19234_v60  ;;  %v19882_v60 = vld [vmem:[%s21955_s2 + $0x20] sm:$0xff]  ;;  %23016 = vst [vmem:[#allocation88_spill] sm:$0xff] %v19895_v59  ;;  %v7052_v0 = vrot.slane %v16070_v24, 2 }
 0x5c0   :  { %14213 = vmatprep.mubr.msk.f32.mxu1 %vm5488_vm6, %v19252_v63 }
 0x5c3   :  { %14214 = vmatmul.mubr.msk.f32.gmra.mrb[22].mxu1 %vm5488_vm6, %v19254_v36 }
 0x5c4   :  { %14216 = vmatprep.mubr.msk.f32.mxu1 %vm5488_vm6, %v19274_v6 }
 0x5c7   :  { %14217 = vmatmul.mubr.msk.f32.gmra.mrb[24].mxu1 %vm5488_vm6, %v19276_v58 }
 0x5c8   :  { %14219 = vmatprep.mubr.msk.f32.mxu1 %vm5488_vm6, %v19297_v26 }
 0x5cb   :  { %14220 = vmatmul.mubr.msk.f32.gmra.mrb[26].mxu1 %vm5488_vm6, %v19299_v27 }
 0x5cc   :  { %14222 = vmatprep.mubr.msk.f32.mxu1 %vm5488_vm6, %v19324_v29 }
 0x5cf   :  { %14223 = vmatmul.mubr.msk.f32.gmra.mrb[28].mxu1 %vm5488_vm6, %v19326_v21 }
 0x5d0   :  { %14225 = vmatprep.mubr.msk.f32.mxu1 %vm5488_vm6, %v19351_v50 }
 0x5d3   :  { %14226 = vmatmul.mubr.msk.f32.gmra.mrb[30].mxu1 %vm5488_vm6, %v19353_v34 }
 0x5d4   :  { %14228 = vmatprep.mubr.msk.f32.mxu1 %vm5488_vm6, %v19316_v38 }
 0x5d7   :  { %14229 = vmatmul.mubr.msk.f32.gmra.mrb[32].mxu1 %vm5488_vm6, %v19318_v7 }
 0x5d8   :  { %14231 = vmatprep.mubr.msk.f32.mxu1 %vm5488_vm6, %v19384_v10 }
 0x5db   :  { %14232 = vmatmul.mubr.msk.f32.gmra.mrb[34].mxu1 %vm5488_vm6, %v19386_v54 }
 0x5dc   :  { %14234 = vmatprep.mubr.msk.f32.mxu1 %vm5488_vm6, %v19406_v52 }
 0x5df   :  { %14235 = vmatmul.mubr.msk.f32.gmra.mrb[36].mxu1 %vm5488_vm6, %v19408_v13 }
 0x5e0   :  { %14237 = vmatprep.mubr.msk.f32.mxu1 %vm5488_vm6, %v19429_v51 }
 0x5e3   :  { %14238 = vmatmul.mubr.msk.f32.gmra.mrb[38].mxu1 %vm5488_vm6, %v19431_v40 }
 0x5e4   :  { %14240 = vmatprep.mubr.msk.f32.mxu1 %vm5488_vm6, %v19452_v12 }
 0x5e7   :  { %14241 = vmatmul.mubr.msk.f32.gmra.mrb[40].mxu1 %vm5488_vm6, %v19454_v17 }
 0x5e8   :  { %14243 = vmatprep.mubr.msk.f32.mxu1 %vm5488_vm6, %v19475_v33 }
 0x5eb   :  { %14244 = vmatmul.mubr.msk.f32.gmra.mrb[42].mxu1 %vm5488_vm6, %v19477_v1 }
 0x5ec   :  { %14246 = vmatprep.mubr.msk.f32.mxu1 %vm5488_vm6, %v19498_v32 }
 0x5ef   :  { %14247 = vmatmul.mubr.msk.f32.gmra.mrb[44].mxu1 %vm5488_vm6, %v19500_v20 }
 0x5f0   :  { %14249 = vmatprep.mubr.msk.f32.mxu1 %vm5488_vm6, %v19521_v25 }
 0x5f3   :  { %14250 = vmatmul.mubr.msk.f32.gmra.mrb[46].mxu1 %vm5488_vm6, %v19523_v47 }
 0x5f4   :  { %14252 = vmatprep.mubr.msk.f32.mxu1 %vm5488_vm6, %v19544_v48 }
 0x5f7   :  { %14253 = vmatmul.mubr.msk.f32.gmra.mrb[48].mxu1 %vm5488_vm6, %v19546_v55 }
 0x5f8   :  { %14255 = vmatprep.mubr.msk.f32.mxu1 %vm5488_vm6, %v19567_v35 }
 0x5fb   :  { %14256 = vmatmul.mubr.msk.f32.gmra.mrb[50].mxu1 %vm5488_vm6, %v19569_v11 }
 0x5fc   :  { %14258 = vmatprep.mubr.msk.f32.mxu1 %vm5488_vm6, %v19590_v16 }
 0x5ff   :  { %14259 = vmatmul.mubr.msk.f32.gmra.mrb[52].mxu1 %vm5488_vm6, %v19592_v62 }
 0x600   :  { %14261 = vmatprep.mubr.msk.f32.mxu1 %vm5488_vm6, %v19613_v23 }
 0x603   :  { %14262 = vmatmul.mubr.msk.f32.gmra.mrb[54].mxu1 %vm5488_vm6, %v23012_v19 }
 0x604   :  { %14264 = vmatprep.mubr.msk.f32.mxu1 %vm5488_vm6, %v23013_v31 }
 0x607   :  { %14265 = vmatmul.mubr.msk.f32.gmra.mrb[56].mxu1 %vm5488_vm6, %v23014_v44 }
 0x608   :  { %14267 = vmatprep.mubr.msk.f32.mxu1 %vm5488_vm6, %v19659_v8 }
 0x60b   :  { %14268 = vmatmul.mubr.msk.f32.gmra.mrb[58].mxu1 %vm5488_vm6, %v19661_v39 }
 0x60c   :  { %14270 = vmatprep.mubr.msk.f32.mxu1 %vm5488_vm6, %v19680_v61 }
 0x60f   :  { %14271 = vmatmul.mubr.msk.f32.gmra.mrb[60].mxu1 %vm5488_vm6, %v19682_v28 }
 0x610   :  { %14273 = vmatprep.mubr.msk.f32.mxu1 %vm5488_vm6, %v19700_v2 }
 0x613   :  { %14274 = vmatmul.mubr.msk.f32.gmra.mrb[62].mxu1 %vm5488_vm6, %v19702_v46 }
 0x614   :  { %14278 = vmatprep.mubr.msk.f32.mxu1 %vm5488_vm6, %v7036_v4  ;;  %v19900_v4 = vsel %vm1786_vm5, %v7044_v53, %v7045_v49  ;;  %v19914_v53 = vld [vmem:[#allocation3 + $0x60] sm:$0xff] }
 0x615   :  { %23017 = vst [vmem:[#allocation91_spill] sm:$0xff] %v19900_v4  ;;  %23020 = vst [vmem:[#allocation94_spill] sm:$0xff] %v19914_v53  ;;  %v7054_v18 = vrot.slane %v19914_v53, 2  ;;  %v19933_v53 = vld [vmem:[#allocation3 + $0x80] sm:$0xff] }
 0x616   :  { %23025 = vst [vmem:[#allocation76_spill] sm:$0xff] %v19933_v53 }
 0x617   :  { %14279 = vmatmul.mubr.msk.f32.vlgmr.msra.gmra.mrb[0].mxu1 %vm5488_vm6, %v7038_v5  ;;  %v19907_v5 = vsel %vm1786_vm5, %v7045_v49, %v7047_v15  ;;  %v16073_v15 = vld [vmem:[#allocation3 + $0x70] sm:$0x3] }
 0x618   :  { %14375 = vmatpush3.msra.mxu1 %v19726_v41  ;;  %14281 = vmatprep.mubr.msk.f32.mxu1 %vm5488_vm6, %v19886_v43  ;;  %v7050_v41 = vrot.slane %v19756_v45, 2  ;;  %23018 = vst [vmem:[#allocation92_spill] sm:$0xff] %v19907_v5  ;;  %v7057_v24 = vrot.slane %v16073_v15, 2 }
 0x619   :  { %14472 = vmatprep.subr.mxu1 %v19882_v60 }
 0x61a   :  { %v19912_v56 = vsel %vm1786_vm5, %v7049_v42, %v7050_v41  ;;  %v19923_v49 = vsel %vm1786_vm5, %v7050_v41, %v7052_v0  ;;  %v16076_v0 = vld [vmem:[#allocation3 + $0x88] sm:$0x3] }
 0x61b   :  { %14282 = vmatmul.mubr.msk.f32.gmra.mrb[2].mxu1 %vm5488_vm6, %v19895_v59  ;;  %23019 = vst [vmem:[#allocation93_spill] sm:$0xff] %v19912_v56  ;;  %v19917_v59 = vld [vmem:[#allocation3 + $0x68] sm:$0xff]  ;;  %23022 = vst [vmem:[#allocation97_spill] sm:$0xff] %v19923_v49  ;;  %v7062_v15 = vrot.slane %v16076_v0, 2 }
 0x61c   :  { %14284 = vmatprep.mubr.msk.f32.mxu1 %vm5488_vm6, %v19900_v4  ;;  %23021 = vst [vmem:[#allocation96_spill] sm:$0xff] %v19917_v59  ;;  %v7055_v43 = vrot.slane %v19917_v59, 2  ;;  %v7060_v59 = vrot.slane %v19933_v53, 2 }
 0x61e   :  { %v19928_v42 = vsel %vm1786_vm5, %v7054_v18, %v7055_v43  ;;  %v19939_v41 = vsel %vm1786_vm5, %v7055_v43, %v7057_v24  ;;  %v19955_v43 = vsel %vm1786_vm5, %v7060_v59, %v7062_v15  ;;  %v16079_v24 = vld [vmem:[#allocation3 + $0xa0] sm:$0x3]  ;;  %v16082_v15 = vld [vmem:[#allocation3 + $0xb8] sm:$0x3] }
 0x61f   :  { %14285 = vmatmul.mubr.msk.f32.gmra.mrb[4].mxu1 %vm5488_vm6, %v19907_v5  ;;  %23023 = vst [vmem:[#allocation6_spill] sm:$0xff] %v19928_v42  ;;  %v19930_v5 = vld [vmem:[#allocation3 + $0x78] sm:$0xff]  ;;  %23026 = vst [vmem:[#allocation111_spill] sm:$0xff] %v19939_v41  ;;  %v7067_v0 = vrot.slane %v16079_v24, 2  ;;  %v7072_v24 = vrot.slane %v16082_v15, 2 }
 0x620   :  { %14287 = vmatprep.mubr.msk.f32.mxu1 %vm5488_vm6, %v19912_v56  ;;  %23024 = vst [vmem:[#allocation7_spill] sm:$0xff] %v19930_v5  ;;  %v7059_v4 = vrot.slane %v19930_v5, 2  ;;  %v19949_v5 = vld [vmem:[#allocation3 + $0x98] sm:$0xff]  ;;  %23030 = vst [vmem:[#allocation20_spill] sm:$0xff] %v19955_v43 }
 0x621   :  { %23029 = vst [vmem:[#allocation113_spill] sm:$0xff] %v19949_v5  ;;  %v7065_v53 = vrot.slane %v19949_v5, 2 }
 0x622   :  { %v19944_v18 = vsel %vm1786_vm5, %v7059_v4, %v7060_v59 }
 0x623   :  { %14288 = vmatmul.mubr.msk.f32.gmra.mrb[6].mxu1 %vm5488_vm6, %v19923_v49  ;;  %23027 = vst [vmem:[#allocation112_spill] sm:$0xff] %v19944_v18  ;;  %v19946_v49 = vld [vmem:[#allocation3 + $0x90] sm:$0xff]  ;;  %v19971_v59 = vsel %vm1786_vm5, %v7065_v53, %v7067_v0 }
 0x624   :  { %14290 = vmatprep.mubr.msk.f32.mxu1 %vm5488_vm6, %v19928_v42  ;;  %23028 = vst [vmem:[#allocation17_spill] sm:$0xff] %v19946_v49  ;;  %v7064_v56 = vrot.slane %v19946_v49, 2  ;;  %v19965_v49 = vld [vmem:[#allocation3 + $0xb0] sm:$0xff]  ;;  %23034 = vst [vmem:[#allocation26_spill] sm:$0xff] %v19971_v59 }
 0x625   :  { %23033 = vst [vmem:[#allocation114_spill] sm:$0xff] %v19965_v49  ;;  %v7070_v5 = vrot.slane %v19965_v49, 2  ;;  %v16085_v0 = vld [vmem:[#allocation3 + $0xd0] sm:$0x3] }
 0x626   :  { %v19960_v4 = vsel %vm1786_vm5, %v7064_v56, %v7065_v53  ;;  %v7077_v15 = vrot.slane %v16085_v0, 2 }
 0x627   :  { %14291 = vmatmul.mubr.msk.f32.gmra.mrb[8].mxu1 %vm5488_vm6, %v19939_v41  ;;  %23031 = vst [vmem:[#allocation21_spill] sm:$0xff] %v19960_v4  ;;  %v19962_v41 = vld [vmem:[#allocation3 + $0xa8] sm:$0xff]  ;;  %v19987_v53 = vsel %vm1786_vm5, %v7070_v5, %v7072_v24 }
 0x628   :  { %14293 = vmatprep.mubr.msk.f32.mxu1 %vm5488_vm6, %v19944_v18  ;;  %23032 = vst [vmem:[#allocation23_spill] sm:$0xff] %v19962_v41  ;;  %v7069_v42 = vrot.slane %v19962_v41, 2  ;;  %v19981_v41 = vld [vmem:[#allocation3 + $0xc8] sm:$0xff]  ;;  %23038 = vst [vmem:[#allocation116_spill] sm:$0xff] %v19987_v53 }
 0x629   :  { %23037 = vst [vmem:[#allocation35_spill] sm:$0xff] %v19981_v41  ;;  %v7075_v49 = vrot.slane %v19981_v41, 2  ;;  %v16088_v24 = vld [vmem:[#allocation3 + $0xe8] sm:$0x3] }
 0x62a   :  { %v19976_v56 = vsel %vm1786_vm5, %v7069_v42, %v7070_v5  ;;  %v7082_v0 = vrot.slane %v16088_v24, 2 }
 0x62b   :  { %14294 = vmatmul.mubr.msk.f32.gmra.mrb[10].mxu1 %vm5488_vm6, %v19955_v43  ;;  %23035 = vst [vmem:[#allocation115_spill] sm:$0xff] %v19976_v56  ;;  %v19978_v43 = vld [vmem:[#allocation3 + $0xc0] sm:$0xff]  ;;  %v20003_v5 = vsel %vm1786_vm5, %v7075_v49, %v7077_v15 }
 0x62c   :  { %14296 = vmatprep.mubr.msk.f32.mxu1 %vm5488_vm6, %v19960_v4  ;;  %23036 = vst [vmem:[#allocation31_spill] sm:$0xff] %v19978_v43  ;;  %v7074_v18 = vrot.slane %v19978_v43, 2  ;;  %v19997_v43 = vld [vmem:[#allocation3 + $0xe0] sm:$0xff]  ;;  %23042 = vst [vmem:[#allocation45_spill] sm:$0xff] %v20003_v5 }
 0x62d   :  { %23041 = vst [vmem:[#allocation8_spill] sm:$0xff] %v19997_v43  ;;  %v7080_v41 = vrot.slane %v19997_v43, 2  ;;  %v16091_v15 = vld [vmem:[#allocation3 + $0x100] sm:$0x3] }
 0x62e   :  { %v19992_v42 = vsel %vm1786_vm5, %v7074_v18, %v7075_v49  ;;  %v7087_v24 = vrot.slane %v16091_v15, 2 }
 0x62f   :  { %14297 = vmatmul.mubr.msk.f32.gmra.mrb[12].mxu1 %vm5488_vm6, %v19971_v59  ;;  %23039 = vst [vmem:[#allocation38_spill] sm:$0xff] %v19992_v42  ;;  %v19994_v59 = vld [vmem:[#allocation3 + $0xd8] sm:$0xff]  ;;  %v20019_v49 = vsel %vm1786_vm5, %v7080_v41, %v7082_v0 }
 0x630   :  { %14299 = vmatprep.mubr.msk.f32.mxu1 %vm5488_vm6, %v19976_v56  ;;  %23040 = vst [vmem:[#allocation117_spill] sm:$0xff] %v19994_v59  ;;  %v7079_v4 = vrot.slane %v19994_v59, 2  ;;  %v20013_v59 = vld [vmem:[#allocation3 + $0xf8] sm:$0xff] }
 0x631   :  { %23045 = vst [vmem:[#allocation119_spill] sm:$0xff] %v20013_v59  ;;  %v7085_v43 = vrot.slane %v20013_v59, 2 }
 0x632   :  { %v20008_v18 = vsel %vm1786_vm5, %v7079_v4, %v7080_v41  ;;  %v16092_v41 = vld [vmem:[#allocation3 + $0x118] sm:$0x3] }
 0x633   :  { %14300 = vmatmul.mubr.msk.f32.gmra.mrb[14].mxu1 %vm5488_vm6, %v19987_v53  ;;  %23043 = vst [vmem:[#allocation118_spill] sm:$0xff] %v20008_v18  ;;  %v20010_v53 = vld [vmem:[#allocation3 + $0xf0] sm:$0xff]  ;;  %v7092_v0 = vrot.slane %v16092_v41, 2 }
 0x634   :  { %14302 = vmatprep.mubr.msk.f32.mxu1 %vm5488_vm6, %v19992_v42  ;;  %23044 = vst [vmem:[#allocation48_spill] sm:$0xff] %v20010_v53  ;;  %v7084_v56 = vrot.slane %v20010_v53, 2  ;;  %v7090_v42 = vrot.slane %v19254_v36, 2 }
 0x636   :  { %v20024_v4 = vsel %vm1786_vm5, %v7084_v56, %v7085_v43  ;;  %v7094_v56 = vrot.slane %v19274_v6, 2  ;;  %v20043_v36 = vsel %vm1786_vm5, %v7090_v42, %v7092_v0  ;;  %v7100_v6 = vrot.slane %v19299_v27, 2 }
 0x637   :  { %14303 = vmatmul.mubr.msk.f32.gmra.mrb[16].mxu1 %vm5488_vm6, %v20003_v5  ;;  %v7089_v5 = vrot.slane %v19252_v63, 2  ;;  %v7095_v63 = vrot.slane %v19276_v58, 2 }
 0x638   :  { %14305 = vmatprep.mubr.msk.f32.mxu1 %vm5488_vm6, %v20008_v18  ;;  %v20031_v18 = vsel %vm1786_vm5, %v7085_v43, %v7087_v24  ;;  %v23048_v43 = vld [vmem:[#allocation100_spill] sm:$0xff] }
 0x639   :  { %23046 = vst [vmem:[#allocation51_spill] sm:$0xff] %v20031_v18  ;;  %v20036_v15 = vsel %vm1786_vm5, %v7089_v5, %v7090_v42  ;;  %v7097_v24 = vrot.slane %v23048_v43, 2  ;;  %v20049_v41 = vsel %vm1786_vm5, %v7094_v56, %v7095_v63  ;;  %v7099_v5 = vrot.slane %v19297_v26, 2  ;;  %v23051_v42 = vld [vmem:[#allocation105_spill] sm:$0xff] }
 0x63a   :  { %23047 = vst [vmem:[#allocation120_spill] sm:$0xff] %v20036_v15  ;;  %23049 = vst [vmem:[#allocation54_spill] sm:$0xff] %v20049_v41  ;;  %v7102_v0 = vrot.slane %v23051_v42, 2  ;;  %v7104_v56 = vrot.slane %v19324_v29, 2  ;;  %v7105_v26 = vrot.slane %v19326_v21, 2  ;;  %v7110_v29 = vrot.slane %v19353_v34, 2 }
 0x63b   :  { %14306 = vmatmul.mubr.msk.f32.gmra.mrb[18].mxu1 %vm5488_vm6, %v20019_v49  ;;  %v20056_v58 = vsel %vm1786_vm5, %v7095_v63, %v7097_v24  ;;  %v20062_v43 = vsel %vm1786_vm5, %v7099_v5, %v7100_v6  ;;  %v23054_v63 = vld [vmem:[#allocation43_spill] sm:$0xff]  ;;  %v7109_v5 = vrot.slane %v19351_v50, 2  ;;  %v7114_v21 = vrot.slane %v19316_v38, 2 }
 0x63c   :  { %14308 = vmatprep.mubr.msk.f32.mxu1 %vm5488_vm6, %v20024_v4  ;;  %23050 = vst [vmem:[#allocation121_spill] sm:$0xff] %v20056_v58  ;;  %23052 = vst [vmem:[#allocation57_spill] sm:$0xff] %v20062_v43  ;;  %v20069_v27 = vsel %vm1786_vm5, %v7100_v6, %v7102_v0  ;;  %v7107_v24 = vrot.slane %v23054_v63, 2  ;;  %v20075_v42 = vsel %vm1786_vm5, %v7104_v56, %v7105_v26  ;;  %v7115_v6 = vrot.slane %v19318_v7, 2  ;;  %v23056_v63 = vld [vmem:[#allocation74_spill] sm:$0xff]  ;;  %v23058_v34 = vld [vmem:[#allocation127_spill] sm:$0xff] }
 0x63d   :  { %23053 = vst [vmem:[#allocation122_spill] sm:$0xff] %v20069_v27  ;;  %23055 = vst [vmem:[#allocation60_spill] sm:$0xff] %v20075_v42  ;;  %v20090_v56 = vsel %vm1786_vm5, %v7109_v5, %v7110_v29  ;;  %v7117_v50 = vrot.slane %v23058_v34, 2 }
 0x63e   :  { %v20084_v0 = vsel %vm1786_vm5, %v7105_v26, %v7107_v24  ;;  %23057 = vst [vmem:[#allocation123_spill] sm:$0xff] %v20090_v56  ;;  %v7116_v38 = vsel %vm1786_vm5, %v7114_v21, %v7115_v6  ;;  %v7119_v26 = vrot.slane %v19384_v10, 2  ;;  %v7120_v24 = vrot.slane %v19386_v54, 2  ;;  %v23060_v54 = vld [vmem:[#allocation95_spill] sm:$0xff] }
 0x63f   :  { %14309 = vmatmul.mubr.msk.f32.gmra.mrb[20].mxu1 %vm5488_vm6, %v20031_v18  ;;  %v7118_v5 = vsel %vm1786_vm5, %v7115_v6, %v7117_v50  ;;  %v7127_v34 = vrot.slane %v23060_v54, 2  ;;  %v7129_v50 = vrot.slane %v19429_v51, 2  ;;  %v7135_v51 = vrot.slane %v19454_v17, 2  ;;  %v23063_v54 = vld [vmem:[#allocation102_spill] sm:$0xff] }
 0x640   :  { %14311 = vmatprep.mubr.msk.f32.mxu1 %vm5488_vm6, %v20036_v15  ;;  %v20108_v21 = vsel %vm1786_vm5, %v7119_v26, %v7120_v24 }
 0x643   :  { %14312 = vmatmul.mubr.msk.f32.gmra.mrb[22].mxu1 %vm5488_vm6, %v20043_v36 }
 0x644   :  { %14314 = vmatprep.mubr.msk.f32.mxu1 %vm5488_vm6, %v20049_v41 }
 0x647   :  { %14315 = vmatmul.mubr.msk.f32.gmra.mrb[24].mxu1 %vm5488_vm6, %v20056_v58 }
 0x648   :  { %14317 = vmatprep.mubr.msk.f32.mxu1 %vm5488_vm6, %v20062_v43  ;;  %v7112_v43 = vrot.slane %v23056_v63, 2  ;;  %v23059_v63 = vld [vmem:[#allocation107_spill] sm:$0xff] }
 0x64a   :  { %v20097_v7 = vsel %vm1786_vm5, %v7110_v29, %v7112_v43  ;;  %v7124_v43 = vrot.slane %v19406_v52, 2  ;;  %v7125_v29 = vrot.slane %v19408_v13, 2  ;;  %v7130_v52 = vrot.slane %v19431_v40, 2 }
 0x64b   :  { %14318 = vmatmul.mubr.msk.f32.gmra.mrb[26].mxu1 %vm5488_vm6, %v20069_v27 }
 0x64c   :  { %14320 = vmatprep.mubr.msk.f32.mxu1 %vm5488_vm6, %v20075_v42  ;;  %v20121_v6 = vsel %vm1786_vm5, %v7124_v43, %v7125_v29  ;;  %v20128_v13 = vsel %vm1786_vm5, %v7125_v29, %v7127_v34  ;;  %v20134_v26 = vsel %vm1786_vm5, %v7129_v50, %v7130_v52  ;;  %v7139_v29 = vrot.slane %v19475_v33, 2 }
 0x64d   :  { %v7142_v34 = vrot.slane %v23063_v54, 2  ;;  %v7145_v33 = vrot.slane %v19500_v20, 2 }
 0x64f   :  { %14321 = vmatmul.mubr.msk.f32.gmra.mrb[28].mxu1 %vm5488_vm6, %v20084_v0 }
 0x650   :  { %14323 = vmatprep.mubr.msk.f32.mxu1 %vm5488_vm6, %v20090_v56  ;;  %v7122_v56 = vrot.slane %v23059_v63, 2 }
 0x652   :  { %v20115_v10 = vsel %vm1786_vm5, %v7120_v24, %v7122_v56  ;;  %v23061_v56 = vld [vmem:[#allocation70_spill] sm:$0xff]  ;;  %v7134_v24 = vrot.slane %v19452_v12, 2  ;;  %v7140_v12 = vrot.slane %v19477_v1, 2 }
 0x653   :  { %14324 = vmatmul.mubr.msk.f32.gmra.mrb[30].mxu1 %vm5488_vm6, %v20097_v7 }
 0x654   :  { %14326 = vmatprep.mubr.msk.f32.mxu1 %vm5488_vm6, %v7116_v38  ;;  %v7132_v38 = vrot.slane %v23061_v56, 2  ;;  %v20147_v43 = vsel %vm1786_vm5, %v7134_v24, %v7135_v51  ;;  %v20160_v50 = vsel %vm1786_vm5, %v7139_v29, %v7140_v12  ;;  %v20167_v1 = vsel %vm1786_vm5, %v7140_v12, %v7142_v34  ;;  %v23065_v56 = vld [vmem:[#allocation29_spill] sm:$0xff] }
 0x655   :  { %23064 = vst [vmem:[#allocation64_spill] sm:$0xff] %v20167_v1  ;;  %v23068_v29 = vld [vmem:[#allocation33_spill] sm:$0xff]  ;;  %v7154_v34 = vrot.slane %v19544_v48, 2 }
 0x656   :  { %v20141_v40 = vsel %vm1786_vm5, %v7130_v52, %v7132_v38  ;;  %v7144_v52 = vrot.slane %v19498_v32, 2  ;;  %v7147_v38 = vrot.slane %v23065_v56, 2  ;;  %v7152_v12 = vrot.slane %v23068_v29, 2 }
 0x657   :  { %14327 = vmatmul.mubr.msk.f32.gmra.mrb[32].mxu1 %vm5488_vm6, %v7118_v5  ;;  %v23062_v5 = vld [vmem:[#allocation81_spill] sm:$0xff] }
 0x658   :  { %14329 = vmatprep.mubr.msk.f32.mxu1 %vm5488_vm6, %v20108_v21  ;;  %v7137_v63 = vrot.slane %v23062_v5, 2  ;;  %v20173_v24 = vsel %vm1786_vm5, %v7144_v52, %v7145_v33  ;;  %v7150_v5 = vrot.slane %v19523_v47, 2  ;;  %v7155_v52 = vrot.slane %v19546_v55, 2 }
 0x659   :  { %23066 = vst [vmem:[#allocation124_spill] sm:$0xff] %v20173_v24 }
 0x65a   :  { %v20154_v17 = vsel %vm1786_vm5, %v7135_v51, %v7137_v63  ;;  %v7149_v51 = vrot.slane %v19521_v25, 2  ;;  %v20180_v63 = vsel %vm1786_vm5, %v7145_v33, %v7147_v38  ;;  %v20193_v56 = vsel %vm1786_vm5, %v7150_v5, %v7152_v12  ;;  %v23071_v33 = vld [vmem:[#allocation37_spill] sm:$0xff] }
 0x65b   :  { %14330 = vmatmul.mubr.msk.f32.gmra.mrb[34].mxu1 %vm5488_vm6, %v20115_v10  ;;  %23067 = vst [vmem:[#allocation126_spill] sm:$0xff] %v20180_v63  ;;  %23070 = vst [vmem:[#allocation128_spill] sm:$0xff] %v20193_v56  ;;  %v7157_v38 = vrot.slane %v23071_v33, 2  ;;  %v20199_v29 = vsel %vm1786_vm5, %v7154_v34, %v7155_v52  ;;  %v7164_v34 = vrot.slane %v19590_v16, 2 }
 0x65c   :  { %14332 = vmatprep.mubr.msk.f32.mxu1 %vm5488_vm6, %v20121_v6  ;;  %v20186_v54 = vsel %vm1786_vm5, %v7149_v51, %v7150_v5  ;;  %23072 = vst [vmem:[#allocation89_spill] sm:$0xff] %v20199_v29  ;;  %v7159_v51 = vrot.slane %v19567_v35, 2  ;;  %v23074_v5 = vld [vmem:[#allocation42_spill] sm:$0xff] }
 0x65d   :  { %23069 = vst [vmem:[#allocation79_spill] sm:$0xff] %v20186_v54  ;;  %v7162_v12 = vrot.slane %v23074_v5, 2 }
 0x65f   :  { %14333 = vmatmul.mubr.msk.f32.gmra.mrb[36].mxu1 %vm5488_vm6, %v20128_v13 }
 0x660   :  { %14335 = vmatprep.mubr.msk.f32.mxu1 %vm5488_vm6, %v20134_v26 }
 0x663   :  { %14336 = vmatmul.mubr.msk.f32.gmra.mrb[38].mxu1 %vm5488_vm6, %v20141_v40 }
 0x664   :  { %14338 = vmatprep.mubr.msk.f32.mxu1 %vm5488_vm6, %v20147_v43 }
 0x667   :  { %14339 = vmatmul.mubr.msk.f32.gmra.mrb[40].mxu1 %vm5488_vm6, %v20154_v17 }
 0x668   :  { %14341 = vmatprep.mubr.msk.f32.mxu1 %vm5488_vm6, %v20160_v50 }
 0x66b   :  { %14342 = vmatmul.mubr.msk.f32.gmra.mrb[42].mxu1 %vm5488_vm6, %v20167_v1 }
 0x66c   :  { %14344 = vmatprep.mubr.msk.f32.mxu1 %vm5488_vm6, %v20173_v24 }
 0x66f   :  { %14345 = vmatmul.mubr.msk.f32.gmra.mrb[44].mxu1 %vm5488_vm6, %v20180_v63  ;;  %v7160_v63 = vrot.slane %v19569_v11, 2 }
 0x670   :  { %14347 = vmatprep.mubr.msk.f32.mxu1 %vm5488_vm6, %v20186_v54  ;;  %v20206_v54 = vsel %vm1786_vm5, %v7155_v52, %v7157_v38  ;;  %v23077_v52 = vld [vmem:[#allocation47_spill] sm:$0xff] }
 0x671   :  { %23073 = vst [vmem:[#allocation129_spill] sm:$0xff] %v20206_v54  ;;  %v20212_v33 = vsel %vm1786_vm5, %v7159_v51, %v7160_v63  ;;  %v7167_v38 = vrot.slane %v23077_v52, 2  ;;  %v7169_v51 = vrot.slane %v19613_v23, 2 }
 0x672   :  { %23075 = vst [vmem:[#allocation53_spill] sm:$0xff] %v20212_v33 }
 0x673   :  { %14348 = vmatmul.mubr.msk.f32.gmra.mrb[46].mxu1 %vm5488_vm6, %v20193_v56  ;;  %v7165_v56 = vrot.slane %v19592_v62, 2 }
 0x674   :  { %14350 = vmatprep.mubr.msk.f32.mxu1 %vm5488_vm6, %v20199_v29  ;;  %v20219_v29 = vsel %vm1786_vm5, %v7160_v63, %v7162_v12  ;;  %v23080_v63 = vld [vmem:[#allocation52_spill] sm:$0xff] }
 0x675   :  { %23076 = vst [vmem:[#allocation59_spill] sm:$0xff] %v20219_v29  ;;  %v20225_v5 = vsel %vm1786_vm5, %v7164_v34, %v7165_v56  ;;  %v7172_v12 = vrot.slane %v23080_v63, 2  ;;  %v7174_v34 = vrot.slane %v23013_v31, 2 }
 0x676   :  { %23078 = vst [vmem:[#allocation62_spill] sm:$0xff] %v20225_v5 }
 0x677   :  { %14351 = vmatmul.mubr.msk.f32.gmra.mrb[48].mxu1 %vm5488_vm6, %v20206_v54  ;;  %v7170_v54 = vrot.slane %v23012_v19, 2 }
 0x678   :  { %14353 = vmatprep.mubr.msk.f32.mxu1 %vm5488_vm6, %v20212_v33  ;;  %v20232_v33 = vsel %vm1786_vm5, %v7165_v56, %v7167_v38  ;;  %v23082_v56 = vld [vmem:[#allocation58_spill] sm:$0xff] }
 0x679   :  { %23079 = vst [vmem:[#allocation100_spill] sm:$0xff] %v20232_v33  ;;  %v20238_v52 = vsel %vm1786_vm5, %v7169_v51, %v7170_v54  ;;  %v7177_v38 = vrot.slane %v23082_v56, 2  ;;  %v7179_v51 = vrot.slane %v19659_v8, 2  ;;  %v7185_v56 = vrot.slane %v19682_v28, 2 }
 0x67a   :  { %23081 = vst [vmem:[#allocation105_spill] sm:$0xff] %v20238_v52 }
 0x67b   :  { %14354 = vmatmul.mubr.msk.f32.gmra.mrb[50].mxu1 %vm5488_vm6, %v20219_v29  ;;  %v7175_v29 = vrot.slane %v23014_v44, 2 }
 0x67c   :  { %14356 = vmatprep.mubr.msk.f32.mxu1 %vm5488_vm6, %v20225_v5  ;;  %v20245_v5 = vsel %vm1786_vm5, %v7170_v54, %v7172_v12  ;;  %v7182_v54 = vrot.slane %v19654_v37, 2 }
 0x67d   :  { %v20251_v63 = vsel %vm1786_vm5, %v7174_v34, %v7175_v29  ;;  %v7184_v34 = vrot.slane %v19680_v61, 2 }
 0x67e   :  { %23083 = vst [vmem:[#allocation43_spill] sm:$0xff] %v20251_v63 }
 0x67f   :  { %14357 = vmatmul.mubr.msk.f32.gmra.mrb[52].mxu1 %vm5488_vm6, %v20232_v33  ;;  %v7180_v33 = vrot.slane %v19661_v39, 2  ;;  %v20277_v37 = vsel %vm1786_vm5, %v7184_v34, %v7185_v56 }
 0x680   :  { %14359 = vmatprep.mubr.msk.f32.mxu1 %vm5488_vm6, %v20238_v52  ;;  %v20258_v52 = vsel %vm1786_vm5, %v7175_v29, %v7177_v38  ;;  %v7187_v29 = vrot.slane %v19675_v22, 2  ;;  %23087 = vst [vmem:[#allocation95_spill] sm:$0xff] %v20277_v37  ;;  %v7189_v38 = vrot.slane %v19700_v2, 2 }
 0x681   :  { %23084 = vst [vmem:[#allocation74_spill] sm:$0xff] %v20258_v52  ;;  %v20264_v12 = vsel %vm1786_vm5, %v7179_v51, %v7180_v33  ;;  %v7190_v51 = vrot.slane %v19702_v46, 2 }
 0x682   :  { %23085 = vst [vmem:[#allocation127_spill] sm:$0xff] %v20264_v12 }
 0x683   :  { %14360 = vmatmul.mubr.msk.f32.gmra.mrb[54].mxu1 %vm5488_vm6, %v20245_v5  ;;  %v20290_v22 = vsel %vm1786_vm5, %v7189_v38, %v7190_v51  ;;  %v23099_v38 = vld [vmem:[#allocation31_spill] sm:$0xff] }
 0x684   :  { %14362 = vmatprep.mubr.msk.f32.mxu1 %vm5488_vm6, %v20251_v63  ;;  %v20271_v63 = vsel %vm1786_vm5, %v7180_v33, %v7182_v54  ;;  %v23089_v33 = vld [vmem:[#allocation78_spill] sm:$0xff] }
 0x685   :  { %23086 = vst [vmem:[#allocation107_spill] sm:$0xff] %v20271_v63  ;;  %v7192_v54 = vrot.slane %v23089_v33, 2  ;;  %v23101_v33 = vld [vmem:[#allocation117_spill] sm:$0xff] }
 0x687   :  { %14363 = vmatmul.mubr.msk.f32.gmra.mrb[56].mxu1 %vm5488_vm6, %v20258_v52  ;;  %v20295_v34 = vsel %vm1786_vm5, %v7190_v51, %v7192_v54  ;;  %v23100_v51 = vld [vmem:[#allocation35_spill] sm:$0xff]  ;;  %v23102_v54 = vld [vmem:[#allocation8_spill] sm:$0xff] }
 0x688   :  { %14365 = vmatprep.mubr.msk.f32.mxu1 %vm5488_vm6, %v20264_v12  ;;  %v20284_v12 = vsel %vm1786_vm5, %v7185_v56, %v7187_v29  ;;  %23090 = vst [vmem:[#allocation81_spill] sm:$0xff] %v20295_v34  ;;  %v20304_v56 = vld [vmem:[%s21955_s2 + $0x28] sm:$0xff] }
 0x689   :  { %23088 = vst [vmem:[#allocation70_spill] sm:$0xff] %v20284_v12  ;;  %v23095_v29 = vld [vmem:[#allocation17_spill] sm:$0xff] }
 0x68b   :  { %14366 = vmatmul.mubr.msk.f32.gmra.mrb[58].mxu1 %vm5488_vm6, %v20271_v63 }
 0x68c   :  { %14368 = vmatprep.mubr.msk.f32.mxu1 %vm5488_vm6, %v20277_v37 }
 0x68f   :  { %14369 = vmatmul.mubr.msk.f32.gmra.mrb[60].mxu1 %vm5488_vm6, %v20284_v12 }
 0x690   :  { %14371 = vmatprep.mubr.msk.f32.mxu1 %vm5488_vm6, %v20290_v22 }
 0x693   :  { %14372 = vmatmul.mubr.msk.f32.gmra.mrb[62].mxu1 %vm5488_vm6, %v20295_v34 }
 0x694   :  { %14376 = vmatprep.mubr.msk.f32.mxu1 %vm5488_vm6, %v19735_v9  ;;  %v23091_v9 = vld [vmem:[#allocation94_spill] sm:$0xff] }
 0x697   :  { %14377 = vmatmul.mubr.msk.f32.vlgmr.msra.gmra.mrb[0].mxu1 %vm5488_vm6, %v19740_v14  ;;  %v23092_v14 = vld [vmem:[#allocation96_spill] sm:$0xff] }
 0x698   :  { %14473 = vmatpush3.msra.mxu1 %v19882_v60  ;;  %14379 = vmatprep.mubr.msk.f32.mxu1 %vm5488_vm6, %v19744_v3  ;;  %v23093_v60 = vld [vmem:[#allocation7_spill] sm:$0xff]  ;;  %v23094_v3 = vld [vmem:[#allocation76_spill] sm:$0xff] }
 0x699   :  { %14570 = vmatprep.subr.mxu1 %v20304_v56 }
 0x69b   :  { %14380 = vmatmul.mubr.msk.f32.gmra.mrb[2].mxu1 %vm5488_vm6, %v19748_v57  ;;  %v23096_v57 = vld [vmem:[#allocation113_spill] sm:$0xff] }
 0x69c   :  { %14382 = vmatprep.mubr.msk.f32.mxu1 %vm5488_vm6, %v19752_v30  ;;  %v23097_v30 = vld [vmem:[#allocation23_spill] sm:$0xff] }
 0x69f   :  { %14383 = vmatmul.mubr.msk.f32.gmra.mrb[4].mxu1 %vm5488_vm6, %v19756_v45  ;;  %v23098_v45 = vld [vmem:[#allocation114_spill] sm:$0xff] }
 0x6a0   :  { %14385 = vmatprep.mubr.msk.f32.mxu1 %vm5488_vm6, %v23091_v9 }
 0x6a3   :  { %14386 = vmatmul.mubr.msk.f32.gmra.mrb[6].mxu1 %vm5488_vm6, %v23092_v14 }
 0x6a4   :  { %14388 = vmatprep.mubr.msk.f32.mxu1 %vm5488_vm6, %v23093_v60 }
 0x6a7   :  { %14389 = vmatmul.mubr.msk.f32.gmra.mrb[8].mxu1 %vm5488_vm6, %v23094_v3 }
 0x6a8   :  { %14391 = vmatprep.mubr.msk.f32.mxu1 %vm5488_vm6, %v23095_v29 }
 0x6ab   :  { %14392 = vmatmul.mubr.msk.f32.gmra.mrb[10].mxu1 %vm5488_vm6, %v23096_v57 }
 0x6ac   :  { %14394 = vmatprep.mubr.msk.f32.mxu1 %vm5488_vm6, %v23097_v30  ;;  %v20346_v30 = vld [vmem:[#allocation3 + $0x108] sm:$0xff] }
 0x6ad   :  { %23103 = vst [vmem:[#allocation102_spill] sm:$0xff] %v20346_v30 }
 0x6af   :  { %14395 = vmatmul.mubr.msk.f32.gmra.mrb[12].mxu1 %vm5488_vm6, %v23098_v45  ;;  %v20408_v45 = vld [vmem:[#allocation3 + $0x200] sm:$0xff] }
 0x6b0   :  { %14397 = vmatprep.mubr.msk.f32.mxu1 %vm5488_vm6, %v23099_v38  ;;  %v20350_v38 = vld [vmem:[#allocation3 + $0x110] sm:$0xff] }
 0x6b1   :  { %23104 = vst [vmem:[#allocation29_spill] sm:$0xff] %v20350_v38 }
 0x6b3   :  { %14398 = vmatmul.mubr.msk.f32.gmra.mrb[14].mxu1 %vm5488_vm6, %v23100_v51  ;;  %v20404_v51 = vld [vmem:[#allocation3 + $0x1f8] sm:$0xff] }
 0x6b4   :  { %14400 = vmatprep.mubr.msk.f32.mxu1 %vm5488_vm6, %v23101_v33  ;;  %v20354_v33 = vld [vmem:[#allocation3 + $0x120] sm:$0xff]  ;;  %23114 = vst [vmem:[#allocation7_spill] sm:$0xff] %v20404_v51 }
 0x6b5   :  { %23105 = vst [vmem:[#allocation33_spill] sm:$0xff] %v20354_v33 }
 0x6b7   :  { %14401 = vmatmul.mubr.msk.f32.gmra.mrb[16].mxu1 %vm5488_vm6, %v23102_v54  ;;  %v20358_v54 = vld [vmem:[#allocation3 + $0x128] sm:$0xff] }
 0x6b8   :  { %14403 = vmatprep.mubr.msk.f32.mxu1 %vm5488_vm6, %v20010_v53  ;;  %23106 = vst [vmem:[#allocation37_spill] sm:$0xff] %v20358_v54  ;;  %v16104_v53 = vld [vmem:[#allocation3 + $0x1d0] sm:$0xff] }
 0x6bb   :  { %14404 = vmatmul.mubr.msk.f32.gmra.mrb[18].mxu1 %vm5488_vm6, %v20013_v59  ;;  %v20362_v59 = vld [vmem:[#allocation3 + $0x138] sm:$0xff] }
 0x6bc   :  { %14406 = vmatprep.mubr.msk.f32.mxu1 %vm5488_vm6, %v20346_v30  ;;  %23107 = vst [vmem:[#allocation42_spill] sm:$0xff] %v20362_v59  ;;  %v20366_v30 = vld [vmem:[#allocation3 + $0x140] sm:$0xff] }
 0x6bd   :  { %23108 = vst [vmem:[#allocation47_spill] sm:$0xff] %v20366_v30 }
 0x6bf   :  { %14407 = vmatmul.mubr.msk.f32.gmra.mrb[20].mxu1 %vm5488_vm6, %v20350_v38  ;;  %v20370_v38 = vld [vmem:[#allocation3 + $0x150] sm:$0xff] }
 0x6c0   :  { %14409 = vmatprep.mubr.msk.f32.mxu1 %vm5488_vm6, %v20354_v33  ;;  %23109 = vst [vmem:[#allocation52_spill] sm:$0xff] %v20370_v38  ;;  %v20374_v33 = vld [vmem:[#allocation3 + $0x158] sm:$0xff] }
 0x6c1   :  { %23110 = vst [vmem:[#allocation58_spill] sm:$0xff] %v20374_v33 }
 0x6c3   :  { %14410 = vmatmul.mubr.msk.f32.gmra.mrb[22].mxu1 %vm5488_vm6, %v20358_v54  ;;  %v20378_v54 = vld [vmem:[#allocation3 + $0x168] sm:$0xff] }
 0x6c4   :  { %14412 = vmatprep.mubr.msk.f32.mxu1 %vm5488_vm6, %v20362_v59  ;;  %23111 = vst [vmem:[#allocation78_spill] sm:$0xff] %v20378_v54  ;;  %v20382_v59 = vld [vmem:[#allocation3 + $0x170] sm:$0xff] }
 0x6c5   :  { %23112 = vst [vmem:[#allocation94_spill] sm:$0xff] %v20382_v59 }
 0x6c7   :  { %14413 = vmatmul.mubr.msk.f32.gmra.mrb[24].mxu1 %vm5488_vm6, %v20366_v30  ;;  %v20386_v30 = vld [vmem:[#allocation3 + $0x180] sm:$0xff] }
 0x6c8   :  { %14415 = vmatprep.mubr.msk.f32.mxu1 %vm5488_vm6, %v20370_v38  ;;  %v20390_v38 = vld [vmem:[#allocation3 + $0x188] sm:$0xff] }
 0x6cb   :  { %14416 = vmatmul.mubr.msk.f32.gmra.mrb[26].mxu1 %vm5488_vm6, %v20374_v33  ;;  %v16103_v33 = vld [vmem:[#allocation3 + $0x1c8] sm:$0xff] }
 0x6cc   :  { %14418 = vmatprep.mubr.msk.f32.mxu1 %vm5488_vm6, %v20378_v54  ;;  %v20396_v54 = vld [vmem:[#allocation3 + $0x1e0] sm:$0xff] }
 0x6cf   :  { %14419 = vmatmul.mubr.msk.f32.gmra.mrb[28].mxu1 %vm5488_vm6, %v20382_v59  ;;  %v20400_v59 = vld [vmem:[#allocation3 + $0x1e8] sm:$0xff] }
 0x6d0   :  { %14421 = vmatprep.mubr.msk.f32.mxu1 %vm5488_vm6, %v20386_v30  ;;  %23113 = vst [vmem:[#allocation96_spill] sm:$0xff] %v20400_v59 }
 0x6d3   :  { %14422 = vmatmul.mubr.msk.f32.gmra.mrb[30].mxu1 %vm5488_vm6, %v20390_v38 }
 0x6d4   :  { %14424 = vmatprep.mubr.msk.f32.mxu1 %vm5488_vm6, %v16103_v33  ;;  %v20416_v33 = vld [vmem:[#allocation3 + $0x218] sm:$0xff] }
 0x6d7   :  { %14425 = vmatmul.mubr.msk.f32.gmra.mrb[32].mxu1 %vm5488_vm6, %v16104_v53  ;;  %v20412_v53 = vld [vmem:[#allocation3 + $0x210] sm:$0xff] }
 0x6d8   :  { %14427 = vmatprep.mubr.msk.f32.mxu1 %vm5488_vm6, %v20396_v54 }
 0x6db   :  { %14428 = vmatmul.mubr.msk.f32.gmra.mrb[34].mxu1 %vm5488_vm6, %v20400_v59  ;;  %v20420_v59 = vld [vmem:[#allocation3 + $0x228] sm:$0xff] }
 0x6dc   :  { %14430 = vmatprep.mubr.msk.f32.mxu1 %vm5488_vm6, %v20404_v51  ;;  %v20424_v51 = vld [vmem:[#allocation3 + $0x230] sm:$0xff] }
 0x6df   :  { %14431 = vmatmul.mubr.msk.f32.gmra.mrb[36].mxu1 %vm5488_vm6, %v20408_v45 }
 0x6e0   :  { %14433 = vmatprep.mubr.msk.f32.mxu1 %vm5488_vm6, %v20412_v53 }
 0x6e3   :  { %14434 = vmatmul.mubr.msk.f32.gmra.mrb[38].mxu1 %vm5488_vm6, %v20416_v33 }
 0x6e4   :  { %14436 = vmatprep.mubr.msk.f32.mxu1 %vm5488_vm6, %v20420_v59 }
 0x6e7   :  { %14437 = vmatmul.mubr.msk.f32.gmra.mrb[40].mxu1 %vm5488_vm6, %v20424_v51 }
 0x6e8   :  { %14439 = vmatprep.mubr.msk.f32.mxu1 %vm5488_vm6, %v19498_v32  ;;  %v20481_v32 = vld [vmem:[%s21955_s2 + $0x30] sm:$0xff] }
 0x6eb   :  { %14440 = vmatmul.mubr.msk.f32.gmra.mrb[42].mxu1 %vm5488_vm6, %v19500_v20  ;;  %v23119_v20 = vld [vmem:[#allocation13_spill] sm:$0xff] }
 0x6ec   :  { %14442 = vmatprep.mubr.msk.f32.mxu1 %vm5488_vm6, %v19521_v25  ;;  %v20472_v25 = vld [vmem:[#allocation3 + $0x338] sm:$0xff] }
 0x6ef   :  { %14443 = vmatmul.mubr.msk.f32.gmra.mrb[44].mxu1 %vm5488_vm6, %v19523_v47  ;;  %v23120_v47 = vld [vmem:[#allocation14_spill] sm:$0xff] }
 0x6f0   :  { %14445 = vmatprep.mubr.msk.f32.mxu1 %vm5488_vm6, %v19544_v48  ;;  %v20468_v48 = vld [vmem:[#allocation3 + $0x330] sm:$0xff] }
 0x6f3   :  { %14446 = vmatmul.mubr.msk.f32.gmra.mrb[46].mxu1 %vm5488_vm6, %v19546_v55  ;;  %v23121_v55 = vld [vmem:[#allocation15_spill] sm:$0xff] }
 0x6f4   :  { %14448 = vmatprep.mubr.msk.f32.mxu1 %vm5488_vm6, %v19567_v35  ;;  %v23115_v35 = vld [vmem:[#allocation9_spill] sm:$0xff] }
 0x6f7   :  { %14449 = vmatmul.mubr.msk.f32.gmra.mrb[48].mxu1 %vm5488_vm6, %v19569_v11  ;;  %v23122_v11 = vld [vmem:[#allocation16_spill] sm:$0xff] }
 0x6f8   :  { %14451 = vmatprep.mubr.msk.f32.mxu1 %vm5488_vm6, %v19590_v16  ;;  %v23116_v16 = vld [vmem:[#allocation10_spill] sm:$0xff] }
 0x6fb   :  { %14452 = vmatmul.mubr.msk.f32.gmra.mrb[50].mxu1 %vm5488_vm6, %v19592_v62  ;;  %v23123_v62 = vld [vmem:[#allocation18_spill] sm:$0xff] }
 0x6fc   :  { %14454 = vmatprep.mubr.msk.f32.mxu1 %vm5488_vm6, %v19613_v23  ;;  %v23118_v23 = vld [vmem:[#allocation12_spill] sm:$0xff] }
 0x6ff   :  { %14455 = vmatmul.mubr.msk.f32.gmra.mrb[52].mxu1 %vm5488_vm6, %v23012_v19  ;;  %v23129_v19 = vld [vmem:[#allocation28_spill] sm:$0xff] }
 0x700   :  { %14457 = vmatprep.mubr.msk.f32.mxu1 %vm5488_vm6, %v23013_v31  ;;  %v23130_v31 = vld [vmem:[#allocation44_spill] sm:$0xff] }
 0x703   :  { %14458 = vmatmul.mubr.msk.f32.gmra.mrb[54].mxu1 %vm5488_vm6, %v23014_v44  ;;  %v23131_v44 = vld [vmem:[#allocation46_spill] sm:$0xff] }
 0x704   :  { %14460 = vmatprep.mubr.msk.f32.mxu1 %vm5488_vm6, %v19659_v8  ;;  %v23117_v8 = vld [vmem:[#allocation11_spill] sm:$0xff] }
 0x707   :  { %14461 = vmatmul.mubr.msk.f32.gmra.mrb[56].mxu1 %vm5488_vm6, %v19661_v39  ;;  %v23124_v39 = vld [vmem:[#allocation19_spill] sm:$0xff] }
 0x708   :  { %14463 = vmatprep.mubr.msk.f32.mxu1 %vm5488_vm6, %v19680_v61  ;;  %v23125_v61 = vld [vmem:[#allocation22_spill] sm:$0xff] }
 0x70b   :  { %14464 = vmatmul.mubr.msk.f32.gmra.mrb[58].mxu1 %vm5488_vm6, %v19682_v28  ;;  %v23126_v28 = vld [vmem:[#allocation24_spill] sm:$0xff] }
 0x70c   :  { %14466 = vmatprep.mubr.msk.f32.mxu1 %vm5488_vm6, %v19700_v2  ;;  %v23127_v2 = vld [vmem:[#allocation25_spill] sm:$0xff] }
 0x70f   :  { %14467 = vmatmul.mubr.msk.f32.gmra.mrb[60].mxu1 %vm5488_vm6, %v19702_v46  ;;  %v23128_v46 = vld [vmem:[#allocation27_spill] sm:$0xff] }
 0x710   :  { %14469 = vmatprep.mubr.msk.f32.mxu1 %vm5488_vm6, %v20468_v48 }
 0x713   :  { %14470 = vmatmul.mubr.msk.f32.gmra.mrb[62].mxu1 %vm5488_vm6, %v20472_v25 }
 0x714   :  { %14474 = vmatprep.mubr.msk.f32.mxu1 %vm5488_vm6, %v23115_v35  ;;  %v23133_v35 = vld [vmem:[#allocation66_spill] sm:$0xff] }
 0x717   :  { %14475 = vmatmul.mubr.msk.f32.vlgmr.msra.gmra.mrb[0].mxu1 %vm5488_vm6, %v23116_v16  ;;  %v23134_v16 = vld [vmem:[#allocation75_spill] sm:$0xff] }
 0x718   :  { %14571 = vmatpush3.msra.mxu1 %v20304_v56  ;;  %14477 = vmatprep.mubr.msk.f32.mxu1 %vm5488_vm6, %v23117_v8  ;;  %v23132_v56 = vld [vmem:[#allocation98_spill] sm:$0xff] }
 0x719   :  { %14668 = vmatprep.subr.mxu1 %v20481_v32 }
 0x71b   :  { %14478 = vmatmul.mubr.msk.f32.gmra.mrb[2].mxu1 %vm5488_vm6, %v23118_v23 }
 0x71c   :  { %14480 = vmatprep.mubr.msk.f32.mxu1 %vm5488_vm6, %v23119_v20 }
 0x71f   :  { %14481 = vmatmul.mubr.msk.f32.gmra.mrb[4].mxu1 %vm5488_vm6, %v23120_v47 }
 0x720   :  { %14483 = vmatprep.mubr.msk.f32.mxu1 %vm5488_vm6, %v23121_v55 }
 0x723   :  { %14484 = vmatmul.mubr.msk.f32.gmra.mrb[6].mxu1 %vm5488_vm6, %v23122_v11 }
 0x724   :  { %14486 = vmatprep.mubr.msk.f32.mxu1 %vm5488_vm6, %v23123_v62 }
 0x727   :  { %14487 = vmatmul.mubr.msk.f32.gmra.mrb[8].mxu1 %vm5488_vm6, %v23124_v39 }
 0x728   :  { %14489 = vmatprep.mubr.msk.f32.mxu1 %vm5488_vm6, %v23125_v61  ;;  %v23149_v61 = vld [vmem:[#allocation61_spill] sm:$0xff] }
 0x72b   :  { %14490 = vmatmul.mubr.msk.f32.gmra.mrb[10].mxu1 %vm5488_vm6, %v23126_v28  ;;  %v23143_v28 = vld [vmem:[#allocation84_spill] sm:$0xff] }
 0x72c   :  { %14492 = vmatprep.mubr.msk.f32.mxu1 %vm5488_vm6, %v23127_v2  ;;  %v23135_v2 = vld [vmem:[#allocation85_spill] sm:$0xff] }
 0x72f   :  { %14493 = vmatmul.mubr.msk.f32.gmra.mrb[12].mxu1 %vm5488_vm6, %v23128_v46  ;;  %v23136_v46 = vld [vmem:[#allocation86_spill] sm:$0xff] }
 0x730   :  { %14495 = vmatprep.mubr.msk.f32.mxu1 %vm5488_vm6, %v23129_v19  ;;  %v23137_v19 = vld [vmem:[#allocation101_spill] sm:$0xff] }
 0x733   :  { %14496 = vmatmul.mubr.msk.f32.gmra.mrb[14].mxu1 %vm5488_vm6, %v23130_v31  ;;  %v23138_v31 = vld [vmem:[#allocation104_spill] sm:$0xff] }
 0x734   :  { %14498 = vmatprep.mubr.msk.f32.mxu1 %vm5488_vm6, %v23131_v44  ;;  %v23139_v44 = vld [vmem:[#allocation108_spill] sm:$0xff] }
 0x737   :  { %14499 = vmatmul.mubr.msk.f32.gmra.mrb[16].mxu1 %vm5488_vm6, %v23132_v56  ;;  %v23140_v56 = vld [vmem:[#allocation41_spill] sm:$0xff] }
 0x738   :  { %14501 = vmatprep.mubr.msk.f32.mxu1 %vm5488_vm6, %v23133_v35  ;;  %v23141_v35 = vld [vmem:[#allocation69_spill] sm:$0xff] }
 0x73b   :  { %14502 = vmatmul.mubr.msk.f32.gmra.mrb[18].mxu1 %vm5488_vm6, %v23134_v16  ;;  %v8239_v16 = vrot.slane %v20390_v38, 1 }
 0x73c   :  { %14504 = vmatprep.mubr.msk.f32.mxu1 %vm5488_vm6, %v23135_v2  ;;  %v8238_v2 = vrot.slane %v20386_v30, 1 }
 0x73f   :  { %14505 = vmatmul.mubr.msk.f32.gmra.mrb[20].mxu1 %vm5488_vm6, %v23136_v46  ;;  %v23142_v46 = vld [vmem:[#allocation125_spill] sm:$0xff] }
 0x740   :  { %14507 = vmatprep.mubr.msk.f32.mxu1 %vm5488_vm6, %v23137_v19  ;;  %v20541_v19 = vld [vmem:[#allocation3 + $0x190] sm:$0x3] }
 0x743   :  { %14508 = vmatmul.mubr.msk.f32.gmra.mrb[22].mxu1 %vm5488_vm6, %v23138_v31  ;;  %v23144_v31 = vld [vmem:[#allocation106_spill] sm:$0xff] }
 0x744   :  { %14510 = vmatprep.mubr.msk.f32.mxu1 %vm5488_vm6, %v23139_v44  ;;  %v8241_v44 = vrot.slane %v20541_v19, 1 }
 0x747   :  { %14511 = vmatmul.mubr.msk.f32.gmra.mrb[24].mxu1 %vm5488_vm6, %v23140_v56  ;;  %v20549_v56 = vsel %vm590_vm4, %v8238_v2, %v8239_v16  ;;  %v23150_v2 = vld [vmem:[#allocation65_spill] sm:$0xff] }
 0x748   :  { %14513 = vmatprep.mubr.msk.f32.mxu1 %vm5488_vm6, %v23141_v35  ;;  %23145 = vst [vmem:[#allocation76_spill] sm:$0xff] %v20549_v56  ;;  %v20554_v35 = vsel %vm590_vm4, %v8239_v16, %v8241_v44  ;;  %v23152_v44 = vld [vmem:[#allocation80_spill] sm:$0xff]  ;;  %v23153_v16 = vld [vmem:[#allocation90_spill] sm:$0xff] }
 0x749   :  { %23146 = vst [vmem:[#allocation17_spill] sm:$0xff] %v20554_v35 }
 0x74b   :  { %14514 = vmatmul.mubr.msk.f32.gmra.mrb[26].mxu1 %vm5488_vm6, %v23142_v46  ;;  %v23147_v46 = vld [vmem:[#allocation109_spill] sm:$0xff] }
 0x74c   :  { %14516 = vmatprep.mubr.msk.f32.mxu1 %vm5488_vm6, %v23143_v28  ;;  %v23148_v28 = vld [vmem:[#allocation110_spill] sm:$0xff] }
 0x74f   :  { %14517 = vmatmul.mubr.msk.f32.gmra.mrb[28].mxu1 %vm5488_vm6, %v23144_v31  ;;  %v23151_v31 = vld [vmem:[#allocation71_spill] sm:$0xff] }
 0x750   :  { %14519 = vmatprep.mubr.msk.f32.mxu1 %vm5488_vm6, %v20549_v56  ;;  %v23175_v56 = vld [vmem:[#allocation82_spill] sm:$0xff] }
 0x753   :  { %14520 = vmatmul.mubr.msk.f32.gmra.mrb[30].mxu1 %vm5488_vm6, %v20554_v35  ;;  %v23154_v35 = vld [vmem:[#allocation99_spill] sm:$0xff] }
 0x754   :  { %14522 = vmatprep.mubr.msk.f32.mxu1 %vm5488_vm6, %v23147_v46  ;;  %v23155_v46 = vld [vmem:[#allocation103_spill] sm:$0xff] }
 0x757   :  { %14523 = vmatmul.mubr.msk.f32.gmra.mrb[32].mxu1 %vm5488_vm6, %v23148_v28  ;;  %v23156_v28 = vld [vmem:[#allocation130_spill] sm:$0xff] }
 0x758   :  { %14525 = vmatprep.mubr.msk.f32.mxu1 %vm5488_vm6, %v23149_v61  ;;  %v23157_v61 = vld [vmem:[#allocation30_spill] sm:$0xff] }
 0x75b   :  { %14526 = vmatmul.mubr.msk.f32.gmra.mrb[34].mxu1 %vm5488_vm6, %v23150_v2  ;;  %v23158_v2 = vld [vmem:[#allocation32_spill] sm:$0xff] }
 0x75c   :  { %14528 = vmatprep.mubr.msk.f32.mxu1 %vm5488_vm6, %v23151_v31  ;;  %v23159_v31 = vld [vmem:[#allocation34_spill] sm:$0xff] }
 0x75f   :  { %14529 = vmatmul.mubr.msk.f32.gmra.mrb[36].mxu1 %vm5488_vm6, %v23152_v44  ;;  %v23160_v44 = vld [vmem:[#allocation36_spill] sm:$0xff] }
 0x760   :  { %14531 = vmatprep.mubr.msk.f32.mxu1 %vm5488_vm6, %v23153_v16  ;;  %v23161_v16 = vld [vmem:[#allocation39_spill] sm:$0xff] }
 0x763   :  { %14532 = vmatmul.mubr.msk.f32.gmra.mrb[38].mxu1 %vm5488_vm6, %v23154_v35  ;;  %v23162_v35 = vld [vmem:[#allocation40_spill] sm:$0xff] }
 0x764   :  { %14534 = vmatprep.mubr.msk.f32.mxu1 %vm5488_vm6, %v23155_v46  ;;  %v23163_v46 = vld [vmem:[#allocation4_spill] sm:$0xff] }
 0x767   :  { %14535 = vmatmul.mubr.msk.f32.gmra.mrb[40].mxu1 %vm5488_vm6, %v23156_v28  ;;  %v23164_v28 = vld [vmem:[#allocation5_spill] sm:$0xff] }
 0x768   :  { %14537 = vmatprep.mubr.msk.f32.mxu1 %vm5488_vm6, %v23157_v61  ;;  %v23165_v61 = vld [vmem:[#allocation49_spill] sm:$0xff] }
 0x76b   :  { %14538 = vmatmul.mubr.msk.f32.gmra.mrb[42].mxu1 %vm5488_vm6, %v23158_v2  ;;  %v23166_v2 = vld [vmem:[#allocation50_spill] sm:$0xff] }
 0x76c   :  { %14540 = vmatprep.mubr.msk.f32.mxu1 %vm5488_vm6, %v23159_v31  ;;  %v23167_v31 = vld [vmem:[#allocation55_spill] sm:$0xff] }
 0x76f   :  { %14541 = vmatmul.mubr.msk.f32.gmra.mrb[44].mxu1 %vm5488_vm6, %v23160_v44  ;;  %v23168_v44 = vld [vmem:[#allocation56_spill] sm:$0xff] }
 0x770   :  { %14543 = vmatprep.mubr.msk.f32.mxu1 %vm5488_vm6, %v23161_v16  ;;  %v23169_v16 = vld [vmem:[#allocation63_spill] sm:$0xff] }
 0x773   :  { %14544 = vmatmul.mubr.msk.f32.gmra.mrb[46].mxu1 %vm5488_vm6, %v23162_v35  ;;  %v23170_v35 = vld [vmem:[#allocation67_spill] sm:$0xff] }
 0x774   :  { %14546 = vmatprep.mubr.msk.f32.mxu1 %vm5488_vm6, %v23163_v46  ;;  %v23171_v46 = vld [vmem:[#allocation68_spill] sm:$0xff] }
 0x777   :  { %14547 = vmatmul.mubr.msk.f32.gmra.mrb[48].mxu1 %vm5488_vm6, %v23164_v28  ;;  %v23172_v28 = vld [vmem:[#allocation72_spill] sm:$0xff] }
 0x778   :  { %14549 = vmatprep.mubr.msk.f32.mxu1 %vm5488_vm6, %v23165_v61  ;;  %v23173_v61 = vld [vmem:[#allocation73_spill] sm:$0xff] }
 0x77b   :  { %14550 = vmatmul.mubr.msk.f32.gmra.mrb[50].mxu1 %vm5488_vm6, %v23166_v2  ;;  %v8244_v2 = vrot.slane %v20472_v25, 1 }
 0x77c   :  { %14552 = vmatprep.mubr.msk.f32.mxu1 %vm5488_vm6, %v23167_v31  ;;  %v8243_v31 = vrot.slane %v20468_v48, 1 }
 0x77f   :  { %14553 = vmatmul.mubr.msk.f32.gmra.mrb[52].mxu1 %vm5488_vm6, %v23168_v44  ;;  %v23174_v44 = vld [vmem:[#allocation77_spill] sm:$0xff] }
 0x780   :  { %14555 = vmatprep.mubr.msk.f32.mxu1 %vm5488_vm6, %v23169_v16  ;;  %v20616_v16 = vld [vmem:[#allocation3 + $0x340] sm:$0x3] }
 0x783   :  { %14556 = vmatmul.mubr.msk.f32.gmra.mrb[54].mxu1 %vm5488_vm6, %v23170_v35  ;;  %v23176_v35 = vld [vmem:[#allocation83_spill] sm:$0xff] }
 0x784   :  { %14558 = vmatprep.mubr.msk.f32.mxu1 %vm5488_vm6, %v23171_v46  ;;  %v8246_v46 = vrot.slane %v20616_v16, 1 }
 0x787   :  { %14559 = vmatmul.mubr.msk.f32.gmra.mrb[56].mxu1 %vm5488_vm6, %v23172_v28  ;;  %v20624_v28 = vsel %vm590_vm4, %v8243_v31, %v8244_v2  ;;  %v23181_v31 = vld [vmem:[#allocation91_spill] sm:$0xff] }
 0x788   :  { %14561 = vmatprep.mubr.msk.f32.mxu1 %vm5488_vm6, %v23173_v61  ;;  %23177 = vst [vmem:[#allocation113_spill] sm:$0xff] %v20624_v28  ;;  %v20629_v61 = vsel %vm590_vm4, %v8244_v2, %v8246_v46  ;;  %v23182_v2 = vld [vmem:[#allocation92_spill] sm:$0xff]  ;;  %v23183_v46 = vld [vmem:[#allocation93_spill] sm:$0xff] }
 0x789   :  { %23178 = vst [vmem:[#allocation9_spill] sm:$0xff] %v20629_v61 }
 0x78b   :  { %14562 = vmatmul.mubr.msk.f32.gmra.mrb[58].mxu1 %vm5488_vm6, %v23174_v44  ;;  %v23179_v44 = vld [vmem:[#allocation87_spill] sm:$0xff] }
 0x78c   :  { %14564 = vmatprep.mubr.msk.f32.mxu1 %vm5488_vm6, %v23175_v56  ;;  %v20638_v56 = vld [vmem:[%s21955_s2 + $0x38] sm:$0xff] }
 0x78f   :  { %14565 = vmatmul.mubr.msk.f32.gmra.mrb[60].mxu1 %vm5488_vm6, %v23176_v35  ;;  %v23180_v35 = vld [vmem:[#allocation88_spill] sm:$0xff] }
 0x790   :  { %14567 = vmatprep.mubr.msk.f32.mxu1 %vm5488_vm6, %v20624_v28  ;;  %v23189_v28 = vld [vmem:[#allocation21_spill] sm:$0xff] }
 0x793   :  { %14568 = vmatmul.mubr.msk.f32.gmra.mrb[62].mxu1 %vm5488_vm6, %v20629_v61  ;;  %v23185_v61 = vld [vmem:[#allocation6_spill] sm:$0xff] }
 0x794   :  { %14572 = vmatprep.mubr.msk.f32.mxu1 %vm5488_vm6, %v23179_v44  ;;  %v23184_v44 = vld [vmem:[#allocation97_spill] sm:$0xff] }
 0x797   :  { %14573 = vmatmul.mubr.msk.f32.vlgmr.msra.gmra.mrb[0].mxu1 %vm5488_vm6, %v23180_v35  ;;  %v23186_v35 = vld [vmem:[#allocation111_spill] sm:$0xff] }
 0x798   :  { %14669 = vmatpush3.msra.mxu1 %v20481_v32  ;;  %14575 = vmatprep.mubr.msk.f32.mxu1 %vm5488_vm6, %v23181_v31  ;;  %v23187_v32 = vld [vmem:[#allocation112_spill] sm:$0xff] }
 0x799   :  { %14766 = vmatprep.subr.mxu1 %v20638_v56  ;;  %v23188_v31 = vld [vmem:[#allocation20_spill] sm:$0xff] }
 0x79b   :  { %14576 = vmatmul.mubr.msk.f32.gmra.mrb[2].mxu1 %vm5488_vm6, %v23182_v2  ;;  %v23190_v2 = vld [vmem:[#allocation26_spill] sm:$0xff] }
 0x79c   :  { %14578 = vmatprep.mubr.msk.f32.mxu1 %vm5488_vm6, %v23183_v46  ;;  %v23191_v46 = vld [vmem:[#allocation115_spill] sm:$0xff] }
 0x79f   :  { %14579 = vmatmul.mubr.msk.f32.gmra.mrb[4].mxu1 %vm5488_vm6, %v23184_v44  ;;  %v23192_v44 = vld [vmem:[#allocation116_spill] sm:$0xff] }
 0x7a0   :  { %14581 = vmatprep.mubr.msk.f32.mxu1 %vm5488_vm6, %v23185_v61  ;;  %v23193_v61 = vld [vmem:[#allocation38_spill] sm:$0xff] }
 0x7a3   :  { %14582 = vmatmul.mubr.msk.f32.gmra.mrb[6].mxu1 %vm5488_vm6, %v23186_v35  ;;  %v23194_v35 = vld [vmem:[#allocation45_spill] sm:$0xff] }
 0x7a4   :  { %14584 = vmatprep.mubr.msk.f32.mxu1 %vm5488_vm6, %v23187_v32  ;;  %v23195_v32 = vld [vmem:[#allocation118_spill] sm:$0xff] }
 0x7a7   :  { %14585 = vmatmul.mubr.msk.f32.gmra.mrb[8].mxu1 %vm5488_vm6, %v23188_v31 }
 0x7a8   :  { %14587 = vmatprep.mubr.msk.f32.mxu1 %vm5488_vm6, %v23189_v28 }
 0x7ab   :  { %14588 = vmatmul.mubr.msk.f32.gmra.mrb[10].mxu1 %vm5488_vm6, %v23190_v2 }
 0x7ac   :  { %14590 = vmatprep.mubr.msk.f32.mxu1 %vm5488_vm6, %v23191_v46 }
 0x7af   :  { %14591 = vmatmul.mubr.msk.f32.gmra.mrb[12].mxu1 %vm5488_vm6, %v23192_v44 }
 0x7b0   :  { %14593 = vmatprep.mubr.msk.f32.mxu1 %vm5488_vm6, %v23193_v61 }
 0x7b3   :  { %14594 = vmatmul.mubr.msk.f32.gmra.mrb[14].mxu1 %vm5488_vm6, %v23194_v35 }
 0x7b4   :  { %14596 = vmatprep.mubr.msk.f32.mxu1 %vm5488_vm6, %v23195_v32  ;;  %v23196_v32 = vld [vmem:[#allocation57_spill] sm:$0xff] }
 0x7b7   :  { %14597 = vmatmul.mubr.msk.f32.gmra.mrb[16].mxu1 %vm5488_vm6, %v20019_v49 }
 0x7b8   :  { %14599 = vmatprep.mubr.msk.f32.mxu1 %vm5488_vm6, %v20024_v4 }
 0x7bb   :  { %14600 = vmatmul.mubr.msk.f32.gmra.mrb[18].mxu1 %vm5488_vm6, %v20031_v18  ;;  %v8708_v18 = vrot.slane %v20390_v38, 2 }
 0x7bc   :  { %14602 = vmatprep.mubr.msk.f32.mxu1 %vm5488_vm6, %v20036_v15  ;;  %v8707_v15 = vrot.slane %v20386_v30, 2 }
 0x7bf   :  { %14603 = vmatmul.mubr.msk.f32.gmra.mrb[20].mxu1 %vm5488_vm6, %v20043_v36 }
 0x7c0   :  { %14605 = vmatprep.mubr.msk.f32.mxu1 %vm5488_vm6, %v20049_v41  ;;  %v23197_v41 = vld [vmem:[#allocation123_spill] sm:$0xff] }
 0x7c3   :  { %14606 = vmatmul.mubr.msk.f32.gmra.mrb[22].mxu1 %vm5488_vm6, %v20056_v58  ;;  %v8710_v58 = vrot.slane %v20541_v19, 2  ;;  %v23203_v19 = vld [vmem:[#allocation53_spill] sm:$0xff] }
 0x7c4   :  { %14608 = vmatprep.mubr.msk.f32.mxu1 %vm5488_vm6, %v23196_v32 }
 0x7c7   :  { %14609 = vmatmul.mubr.msk.f32.gmra.mrb[24].mxu1 %vm5488_vm6, %v20069_v27  ;;  %v20704_v27 = vsel %vm1786_vm5, %v8707_v15, %v8708_v18  ;;  %v23199_v15 = vld [vmem:[#allocation79_spill] sm:$0xff] }
 0x7c8   :  { %14611 = vmatprep.mubr.msk.f32.mxu1 %vm5488_vm6, %v20075_v42  ;;  %v20709_v42 = vsel %vm1786_vm5, %v8708_v18, %v8710_v58  ;;  %v23198_v18 = vld [vmem:[#allocation126_spill] sm:$0xff]  ;;  %v23200_v58 = vld [vmem:[#allocation128_spill] sm:$0xff] }
 0x7cb   :  { %14612 = vmatmul.mubr.msk.f32.gmra.mrb[26].mxu1 %vm5488_vm6, %v20084_v0 }
 0x7cc   :  { %14614 = vmatprep.mubr.msk.f32.mxu1 %vm5488_vm6, %v23197_v41 }
 0x7cf   :  { %14615 = vmatmul.mubr.msk.f32.gmra.mrb[28].mxu1 %vm5488_vm6, %v20097_v7 }
 0x7d0   :  { %14617 = vmatprep.mubr.msk.f32.mxu1 %vm5488_vm6, %v20704_v27 }
 0x7d3   :  { %14618 = vmatmul.mubr.msk.f32.gmra.mrb[30].mxu1 %vm5488_vm6, %v20709_v42 }
 0x7d4   :  { %14620 = vmatprep.mubr.msk.f32.mxu1 %vm5488_vm6, %v20108_v21  ;;  %v23201_v21 = vld [vmem:[#allocation89_spill] sm:$0xff] }
 0x7d7   :  { %14621 = vmatmul.mubr.msk.f32.gmra.mrb[32].mxu1 %vm5488_vm6, %v20115_v10  ;;  %v23202_v10 = vld [vmem:[#allocation129_spill] sm:$0xff] }
 0x7d8   :  { %14623 = vmatprep.mubr.msk.f32.mxu1 %vm5488_vm6, %v20121_v6 }
 0x7db   :  { %14624 = vmatmul.mubr.msk.f32.gmra.mrb[34].mxu1 %vm5488_vm6, %v20128_v13 }
 0x7dc   :  { %14626 = vmatprep.mubr.msk.f32.mxu1 %vm5488_vm6, %v20134_v26 }
 0x7df   :  { %14627 = vmatmul.mubr.msk.f32.gmra.mrb[36].mxu1 %vm5488_vm6, %v20141_v40 }
 0x7e0   :  { %14629 = vmatprep.mubr.msk.f32.mxu1 %vm5488_vm6, %v20147_v43 }
 0x7e3   :  { %14630 = vmatmul.mubr.msk.f32.gmra.mrb[38].mxu1 %vm5488_vm6, %v20154_v17 }
 0x7e4   :  { %14632 = vmatprep.mubr.msk.f32.mxu1 %vm5488_vm6, %v20160_v50 }
 0x7e7   :  { %14633 = vmatmul.mubr.msk.f32.gmra.mrb[40].mxu1 %vm5488_vm6, %v20167_v1  ;;  %v23204_v1 = vld [vmem:[#allocation59_spill] sm:$0xff] }
 0x7e8   :  { %14635 = vmatprep.mubr.msk.f32.mxu1 %vm5488_vm6, %v20173_v24  ;;  %v23205_v24 = vld [vmem:[#allocation62_spill] sm:$0xff] }
 0x7eb   :  { %14636 = vmatmul.mubr.msk.f32.gmra.mrb[42].mxu1 %vm5488_vm6, %v23198_v18  ;;  %v23206_v18 = vld [vmem:[#allocation100_spill] sm:$0xff] }
 0x7ec   :  { %14638 = vmatprep.mubr.msk.f32.mxu1 %vm5488_vm6, %v23199_v15  ;;  %v23207_v15 = vld [vmem:[#allocation105_spill] sm:$0xff] }
 0x7ef   :  { %14639 = vmatmul.mubr.msk.f32.gmra.mrb[44].mxu1 %vm5488_vm6, %v23200_v58 }
 0x7f0   :  { %14641 = vmatprep.mubr.msk.f32.mxu1 %vm5488_vm6, %v23201_v21  ;;  %v23208_v21 = vld [vmem:[#allocation43_spill] sm:$0xff] }
 0x7f3   :  { %14642 = vmatmul.mubr.msk.f32.gmra.mrb[46].mxu1 %vm5488_vm6, %v23202_v10 }
 0x7f4   :  { %14644 = vmatprep.mubr.msk.f32.mxu1 %vm5488_vm6, %v23203_v19  ;;  %v23209_v19 = vld [vmem:[#allocation127_spill] sm:$0xff] }
 0x7f7   :  { %14645 = vmatmul.mubr.msk.f32.gmra.mrb[48].mxu1 %vm5488_vm6, %v23204_v1 }
 0x7f8   :  { %14647 = vmatprep.mubr.msk.f32.mxu1 %vm5488_vm6, %v23205_v24 }
 0x7fb   :  { %14648 = vmatmul.mubr.msk.f32.gmra.mrb[50].mxu1 %vm5488_vm6, %v23206_v18  ;;  %v8713_v18 = vrot.slane %v20472_v25, 2 }
 0x7fc   :  { %14650 = vmatprep.mubr.msk.f32.mxu1 %vm5488_vm6, %v23207_v15  ;;  %v8712_v15 = vrot.slane %v20468_v48, 2 }
 0x7ff   :  { %14651 = vmatmul.mubr.msk.f32.gmra.mrb[52].mxu1 %vm5488_vm6, %v20245_v5 }
 0x800   :  { %14653 = vmatprep.mubr.msk.f32.mxu1 %vm5488_vm6, %v23208_v21 }
 0x803   :  { %14654 = vmatmul.mubr.msk.f32.gmra.mrb[54].mxu1 %vm5488_vm6, %v20258_v52  ;;  %v8715_v52 = vrot.slane %v20616_v16, 2  ;;  %v20790_v16 = vld [vmem:[%s21955_s2 + $0x40] sm:$0xff] }
 0x804   :  { %14656 = vmatprep.mubr.msk.f32.mxu1 %vm5488_vm6, %v23209_v19 }
 0x807   :  { %14657 = vmatmul.mubr.msk.f32.gmra.mrb[56].mxu1 %vm5488_vm6, %v20271_v63  ;;  %v20777_v63 = vsel %vm1786_vm5, %v8712_v15, %v8713_v18  ;;  %v16115_v15 = vld [vmem:[#allocation3 + $0x48] sm:$0xff] }
 0x808   :  { %14659 = vmatprep.mubr.msk.f32.mxu1 %vm5488_vm6, %v20277_v37  ;;  %v20782_v37 = vsel %vm1786_vm5, %v8713_v18, %v8715_v52  ;;  %v16116_v52 = vld [vmem:[#allocation3 + $0x50] sm:$0xff]  ;;  %v23219_v18 = vld [vmem:[#allocation29_spill] sm:$0xff] }
 0x80b   :  { %14660 = vmatmul.mubr.msk.f32.gmra.mrb[58].mxu1 %vm5488_vm6, %v20284_v12  ;;  %v16113_v12 = vld [vmem:[#allocation3 + $0x30] sm:$0xff] }
 0x80c   :  { %14662 = vmatprep.mubr.msk.f32.mxu1 %vm5488_vm6, %v20290_v22 }
 0x80f   :  { %14663 = vmatmul.mubr.msk.f32.gmra.mrb[60].mxu1 %vm5488_vm6, %v20295_v34  ;;  %v16114_v34 = vld [vmem:[#allocation3 + $0x38] sm:$0xff] }
 0x810   :  { %14665 = vmatprep.mubr.msk.f32.mxu1 %vm5488_vm6, %v20777_v63 }
 0x813   :  { %14666 = vmatmul.mubr.msk.f32.gmra.mrb[62].mxu1 %vm5488_vm6, %v20782_v37 }
 0x814   :  { %14670 = vmatprep.mubr.msk.f32.mxu1 %vm5488_vm6, %v16113_v12  ;;  %v23210_v12 = vld [vmem:[#allocation23_spill] sm:$0xff] }
 0x817   :  { %14671 = vmatmul.mubr.msk.f32.vlgmr.msra.gmra.mrb[0].mxu1 %vm5488_vm6, %v16114_v34  ;;  %v23211_v34 = vld [vmem:[#allocation114_spill] sm:$0xff] }
 0x818   :  { %14767 = vmatpush3.msra.mxu1 %v20638_v56  ;;  %14673 = vmatprep.mubr.msk.f32.mxu1 %vm5488_vm6, %v16115_v15  ;;  %v23218_v56 = vld [vmem:[#allocation102_spill] sm:$0xff]  ;;  %v23220_v15 = vld [vmem:[#allocation33_spill] sm:$0xff] }
 0x819   :  { %14864 = vmatprep.subr.mxu1 %v20790_v16 }
 0x81b   :  { %14674 = vmatmul.mubr.msk.f32.gmra.mrb[2].mxu1 %vm5488_vm6, %v16116_v52  ;;  %v23221_v52 = vld [vmem:[#allocation37_spill] sm:$0xff] }
 0x81c   :  { %14676 = vmatprep.mubr.msk.f32.mxu1 %vm5488_vm6, %v23091_v9  ;;  %v23212_v9 = vld [vmem:[#allocation31_spill] sm:$0xff] }
 0x81f   :  { %14677 = vmatmul.mubr.msk.f32.gmra.mrb[4].mxu1 %vm5488_vm6, %v23092_v14  ;;  %v23213_v14 = vld [vmem:[#allocation35_spill] sm:$0xff] }
 0x820   :  { %14679 = vmatprep.mubr.msk.f32.mxu1 %vm5488_vm6, %v23093_v60  ;;  %v23214_v60 = vld [vmem:[#allocation117_spill] sm:$0xff] }
 0x823   :  { %14680 = vmatmul.mubr.msk.f32.gmra.mrb[6].mxu1 %vm5488_vm6, %v23094_v3  ;;  %v23215_v3 = vld [vmem:[#allocation8_spill] sm:$0xff] }
 0x824   :  { %14682 = vmatprep.mubr.msk.f32.mxu1 %vm5488_vm6, %v23095_v29  ;;  %v23216_v29 = vld [vmem:[#allocation48_spill] sm:$0xff] }
 0x827   :  { %14683 = vmatmul.mubr.msk.f32.gmra.mrb[8].mxu1 %vm5488_vm6, %v23096_v57  ;;  %v23217_v57 = vld [vmem:[#allocation119_spill] sm:$0xff] }
 0x828   :  { %14685 = vmatprep.mubr.msk.f32.mxu1 %vm5488_vm6, %v23210_v12  ;;  %v23222_v12 = vld [vmem:[#allocation42_spill] sm:$0xff] }
 0x82b   :  { %14686 = vmatmul.mubr.msk.f32.gmra.mrb[10].mxu1 %vm5488_vm6, %v23211_v34  ;;  %v23223_v34 = vld [vmem:[#allocation47_spill] sm:$0xff] }
 0x82c   :  { %14688 = vmatprep.mubr.msk.f32.mxu1 %vm5488_vm6, %v23212_v9  ;;  %v23224_v9 = vld [vmem:[#allocation52_spill] sm:$0xff] }
 0x82f   :  { %14689 = vmatmul.mubr.msk.f32.gmra.mrb[12].mxu1 %vm5488_vm6, %v23213_v14  ;;  %v23225_v14 = vld [vmem:[#allocation58_spill] sm:$0xff] }
 0x830   :  { %14691 = vmatprep.mubr.msk.f32.mxu1 %vm5488_vm6, %v23214_v60  ;;  %v23226_v60 = vld [vmem:[#allocation78_spill] sm:$0xff] }
 0x833   :  { %14692 = vmatmul.mubr.msk.f32.gmra.mrb[14].mxu1 %vm5488_vm6, %v23215_v3  ;;  %v23227_v3 = vld [vmem:[#allocation94_spill] sm:$0xff] }
 0x834   :  { %14694 = vmatprep.mubr.msk.f32.mxu1 %vm5488_vm6, %v23216_v29  ;;  %v20847_v29 = vld [vmem:[#allocation3 + $0x198] sm:$0xff] }
 0x837   :  { %14695 = vmatmul.mubr.msk.f32.gmra.mrb[16].mxu1 %vm5488_vm6, %v23217_v57  ;;  %v20853_v57 = vld [vmem:[#allocation3 + $0x1a0] sm:$0xff] }
 0x838   :  { %14697 = vmatprep.mubr.msk.f32.mxu1 %vm5488_vm6, %v23218_v56  ;;  %v23228_v56 = vld [vmem:[#allocation96_spill] sm:$0xff] }
 0x83b   :  { %14698 = vmatmul.mubr.msk.f32.gmra.mrb[18].mxu1 %vm5488_vm6, %v23219_v18  ;;  %v16119_v18 = vld [vmem:[#allocation3 + $0x258] sm:$0xff] }
 0x83c   :  { %14700 = vmatprep.mubr.msk.f32.mxu1 %vm5488_vm6, %v23220_v15  ;;  %v16125_v15 = vld [vmem:[#allocation3 + $0x2a0] sm:$0xff] }
 0x83f   :  { %14701 = vmatmul.mubr.msk.f32.gmra.mrb[20].mxu1 %vm5488_vm6, %v23221_v52  ;;  %v16126_v52 = vld [vmem:[#allocation3 + $0x2a8] sm:$0xff] }
 0x840   :  { %14703 = vmatprep.mubr.msk.f32.mxu1 %vm5488_vm6, %v23222_v12  ;;  %v16127_v12 = vld [vmem:[#allocation3 + $0x2b8] sm:$0xff] }
 0x843   :  { %14704 = vmatmul.mubr.msk.f32.gmra.mrb[22].mxu1 %vm5488_vm6, %v23223_v34  ;;  %v16128_v34 = vld [vmem:[#allocation3 + $0x2c0] sm:$0xff] }
 0x844   :  { %14706 = vmatprep.mubr.msk.f32.mxu1 %vm5488_vm6, %v23224_v9  ;;  %v16129_v9 = vld [vmem:[#allocation3 + $0x2d0] sm:$0xff] }
 0x847   :  { %14707 = vmatmul.mubr.msk.f32.gmra.mrb[24].mxu1 %vm5488_vm6, %v23225_v14  ;;  %v16130_v14 = vld [vmem:[#allocation3 + $0x2d8] sm:$0xff] }
 0x848   :  { %14709 = vmatprep.mubr.msk.f32.mxu1 %vm5488_vm6, %v23226_v60  ;;  %v16131_v60 = vld [vmem:[#allocation3 + $0x2e8] sm:$0xff] }
 0x84b   :  { %14710 = vmatmul.mubr.msk.f32.gmra.mrb[26].mxu1 %vm5488_vm6, %v23227_v3  ;;  %v16132_v3 = vld [vmem:[#allocation3 + $0x2f0] sm:$0xff] }
 0x84c   :  { %14712 = vmatprep.mubr.msk.f32.mxu1 %vm5488_vm6, %v20386_v30  ;;  %v23229_v30 = vld [vmem:[#allocation7_spill] sm:$0xff] }
 0x84f   :  { %14713 = vmatmul.mubr.msk.f32.gmra.mrb[28].mxu1 %vm5488_vm6, %v20390_v38  ;;  %v16117_v38 = vld [vmem:[#allocation3 + $0x240] sm:$0xff] }
 0x850   :  { %14715 = vmatprep.mubr.msk.f32.mxu1 %vm5488_vm6, %v20847_v29 }
 0x853   :  { %14716 = vmatmul.mubr.msk.f32.gmra.mrb[30].mxu1 %vm5488_vm6, %v20853_v57 }
 0x854   :  { %14718 = vmatprep.mubr.msk.f32.mxu1 %vm5488_vm6, %v20396_v54  ;;  %v16118_v54 = vld [vmem:[#allocation3 + $0x248] sm:$0xff] }
 0x857   :  { %14719 = vmatmul.mubr.msk.f32.gmra.mrb[32].mxu1 %vm5488_vm6, %v23228_v56  ;;  %v16133_v56 = vld [vmem:[#allocation3 + $0x300] sm:$0xff] }
 0x858   :  { %14721 = vmatprep.mubr.msk.f32.mxu1 %vm5488_vm6, %v23229_v30  ;;  %v16134_v30 = vld [vmem:[#allocation3 + $0x308] sm:$0xff] }
 0x85b   :  { %14722 = vmatmul.mubr.msk.f32.gmra.mrb[34].mxu1 %vm5488_vm6, %v20408_v45  ;;  %v16120_v45 = vld [vmem:[#allocation3 + $0x260] sm:$0xff] }
 0x85c   :  { %14724 = vmatprep.mubr.msk.f32.mxu1 %vm5488_vm6, %v20412_v53  ;;  %v16121_v53 = vld [vmem:[#allocation3 + $0x270] sm:$0xff] }
 0x85f   :  { %14725 = vmatmul.mubr.msk.f32.gmra.mrb[36].mxu1 %vm5488_vm6, %v20416_v33  ;;  %v16122_v33 = vld [vmem:[#allocation3 + $0x278] sm:$0xff] }
 0x860   :  { %14727 = vmatprep.mubr.msk.f32.mxu1 %vm5488_vm6, %v20420_v59  ;;  %v16123_v59 = vld [vmem:[#allocation3 + $0x288] sm:$0xff] }
 0x863   :  { %14728 = vmatmul.mubr.msk.f32.gmra.mrb[38].mxu1 %vm5488_vm6, %v20424_v51  ;;  %v16124_v51 = vld [vmem:[#allocation3 + $0x290] sm:$0xff] }
 0x864   :  { %14730 = vmatprep.mubr.msk.f32.mxu1 %vm5488_vm6, %v16117_v38  ;;  %v16135_v38 = vld [vmem:[#allocation3 + $0x318] sm:$0xff] }
 0x867   :  { %14731 = vmatmul.mubr.msk.f32.gmra.mrb[40].mxu1 %vm5488_vm6, %v16118_v54  ;;  %v16136_v54 = vld [vmem:[#allocation3 + $0x320] sm:$0xff] }
 0x868   :  { %14733 = vmatprep.mubr.msk.f32.mxu1 %vm5488_vm6, %v16119_v18  ;;  %v20895_v18 = vld [vmem:[#allocation3 + $0x348] sm:$0xff] }
 0x86b   :  { %14734 = vmatmul.mubr.msk.f32.gmra.mrb[42].mxu1 %vm5488_vm6, %v16120_v45  ;;  %v20901_v45 = vld [vmem:[#allocation3 + $0x350] sm:$0xff] }
 0x86c   :  { %14736 = vmatprep.mubr.msk.f32.mxu1 %vm5488_vm6, %v16121_v53  ;;  %v23241_v53 = vld [vmem:[#allocation86_spill] sm:$0xff] }
 0x86f   :  { %14737 = vmatmul.mubr.msk.f32.gmra.mrb[44].mxu1 %vm5488_vm6, %v16122_v33  ;;  %v23242_v33 = vld [vmem:[#allocation101_spill] sm:$0xff] }
 0x870   :  { %14739 = vmatprep.mubr.msk.f32.mxu1 %vm5488_vm6, %v16123_v59  ;;  %v23243_v59 = vld [vmem:[#allocation104_spill] sm:$0xff] }
 0x873   :  { %14740 = vmatmul.mubr.msk.f32.gmra.mrb[46].mxu1 %vm5488_vm6, %v16124_v51  ;;  %v23244_v51 = vld [vmem:[#allocation108_spill] sm:$0xff] }
 0x874   :  { %14742 = vmatprep.mubr.msk.f32.mxu1 %vm5488_vm6, %v16125_v15  ;;  %v23245_v15 = vld [vmem:[#allocation41_spill] sm:$0xff] }
 0x877   :  { %14743 = vmatmul.mubr.msk.f32.gmra.mrb[48].mxu1 %vm5488_vm6, %v16126_v52  ;;  %v23246_v52 = vld [vmem:[#allocation69_spill] sm:$0xff] }
 0x878   :  { %14745 = vmatprep.mubr.msk.f32.mxu1 %vm5488_vm6, %v16127_v12  ;;  %v23247_v12 = vld [vmem:[#allocation125_spill] sm:$0xff] }
 0x87b   :  { %14746 = vmatmul.mubr.msk.f32.gmra.mrb[50].mxu1 %vm5488_vm6, %v16128_v34  ;;  %v23248_v34 = vld [vmem:[#allocation84_spill] sm:$0xff] }
 0x87c   :  { %14748 = vmatprep.mubr.msk.f32.mxu1 %vm5488_vm6, %v16129_v9  ;;  %v9641_v9 = vrot.slane %v20847_v29, 1 }
 0x87f   :  { %14749 = vmatmul.mubr.msk.f32.gmra.mrb[52].mxu1 %vm5488_vm6, %v16130_v14  ;;  %v9642_v14 = vrot.slane %v20853_v57, 1 }
 0x880   :  { %14751 = vmatprep.mubr.msk.f32.mxu1 %vm5488_vm6, %v16131_v60  ;;  %v20962_v60 = vld [vmem:[#allocation3 + $0x1a8] sm:$0x3] }
 0x883   :  { %14752 = vmatmul.mubr.msk.f32.gmra.mrb[54].mxu1 %vm5488_vm6, %v16132_v3  ;;  %v23249_v3 = vld [vmem:[#allocation106_spill] sm:$0xff] }
 0x884   :  { %14754 = vmatprep.mubr.msk.f32.mxu1 %vm5488_vm6, %v16133_v56  ;;  %v23250_v56 = vld [vmem:[#allocation76_spill] sm:$0xff] }
 0x887   :  { %14755 = vmatmul.mubr.msk.f32.gmra.mrb[56].mxu1 %vm5488_vm6, %v16134_v30  ;;  %v9644_v30 = vrot.slane %v20962_v60, 1 }
 0x888   :  { %14757 = vmatprep.mubr.msk.f32.mxu1 %vm5488_vm6, %v16135_v38  ;;  %v9643_v38 = vsel %vm590_vm4, %v9641_v9, %v9642_v14  ;;  %v23270_v9 = vld [vmem:[#allocation55_spill] sm:$0xff] }
 0x88b   :  { %14758 = vmatmul.mubr.msk.f32.gmra.mrb[58].mxu1 %vm5488_vm6, %v16136_v54  ;;  %v23251_v54 = vld [vmem:[#allocation17_spill] sm:$0xff] }
 0x88c   :  { %14760 = vmatprep.mubr.msk.f32.mxu1 %vm5488_vm6, %v20468_v48  ;;  %v23230_v48 = vld [vmem:[#allocation22_spill] sm:$0xff] }
 0x88f   :  { %14761 = vmatmul.mubr.msk.f32.gmra.mrb[60].mxu1 %vm5488_vm6, %v20472_v25  ;;  %v23231_v25 = vld [vmem:[#allocation24_spill] sm:$0xff] }
 0x890   :  { %14763 = vmatprep.mubr.msk.f32.mxu1 %vm5488_vm6, %v20895_v18 }
 0x893   :  { %14764 = vmatmul.mubr.msk.f32.gmra.mrb[62].mxu1 %vm5488_vm6, %v20901_v45 }
 0x894   :  { %14768 = vmatprep.mubr.msk.f32.mxu1 %vm5488_vm6, %v23117_v8  ;;  %v23232_v8 = vld [vmem:[#allocation25_spill] sm:$0xff] }
 0x897   :  { %14769 = vmatmul.mubr.msk.f32.vlgmr.msra.gmra.mrb[0].mxu1 %vm5488_vm6, %v23118_v23  ;;  %v23233_v23 = vld [vmem:[#allocation27_spill] sm:$0xff] }
 0x898   :  { %14865 = vmatpush3.msra.mxu1 %v20790_v16  ;;  %14771 = vmatprep.mubr.msk.f32.mxu1 %vm5488_vm6, %v23119_v20  ;;  %v23234_v20 = vld [vmem:[#allocation28_spill] sm:$0xff]  ;;  %v23240_v16 = vld [vmem:[#allocation85_spill] sm:$0xff] }
 0x89b   :  { %14772 = vmatmul.mubr.msk.f32.gmra.mrb[2].mxu1 %vm5488_vm6, %v23120_v47  ;;  %v23235_v47 = vld [vmem:[#allocation44_spill] sm:$0xff] }
 0x89c   :  { %14774 = vmatprep.mubr.msk.f32.mxu1 %vm5488_vm6, %v23121_v55  ;;  %v23236_v55 = vld [vmem:[#allocation46_spill] sm:$0xff] }
 0x89f   :  { %14775 = vmatmul.mubr.msk.f32.gmra.mrb[4].mxu1 %vm5488_vm6, %v23122_v11  ;;  %v23237_v11 = vld [vmem:[#allocation98_spill] sm:$0xff] }
 0x8a0   :  { %14777 = vmatprep.mubr.msk.f32.mxu1 %vm5488_vm6, %v23123_v62  ;;  %v23238_v62 = vld [vmem:[#allocation66_spill] sm:$0xff] }
 0x8a3   :  { %14778 = vmatmul.mubr.msk.f32.gmra.mrb[6].mxu1 %vm5488_vm6, %v23124_v39  ;;  %v23239_v39 = vld [vmem:[#allocation75_spill] sm:$0xff] }
 0x8a4   :  { %14780 = vmatprep.mubr.msk.f32.mxu1 %vm5488_vm6, %v23230_v48  ;;  %v9645_v48 = vsel %vm590_vm4, %v9642_v14, %v9644_v30  ;;  %v23271_v14 = vld [vmem:[#allocation56_spill] sm:$0xff] }
 0x8a5   :  { %v23274_v30 = vld [vmem:[#allocation68_spill] sm:$0xff] }
 0x8a7   :  { %14781 = vmatmul.mubr.msk.f32.gmra.mrb[8].mxu1 %vm5488_vm6, %v23231_v25  ;;  %v23252_v25 = vld [vmem:[#allocation61_spill] sm:$0xff] }
 0x8a8   :  { %14783 = vmatprep.mubr.msk.f32.mxu1 %vm5488_vm6, %v23232_v8  ;;  %v23253_v8 = vld [vmem:[#allocation65_spill] sm:$0xff] }
 0x8ab   :  { %14784 = vmatmul.mubr.msk.f32.gmra.mrb[10].mxu1 %vm5488_vm6, %v23233_v23  ;;  %v23254_v23 = vld [vmem:[#allocation71_spill] sm:$0xff] }
 0x8ac   :  { %14786 = vmatprep.mubr.msk.f32.mxu1 %vm5488_vm6, %v23234_v20  ;;  %v23255_v20 = vld [vmem:[#allocation80_spill] sm:$0xff] }
 0x8af   :  { %14787 = vmatmul.mubr.msk.f32.gmra.mrb[12].mxu1 %vm5488_vm6, %v23235_v47  ;;  %v23256_v47 = vld [vmem:[#allocation90_spill] sm:$0xff] }
 0x8b0   :  { %14789 = vmatprep.mubr.msk.f32.mxu1 %vm5488_vm6, %v23236_v55  ;;  %v23257_v55 = vld [vmem:[#allocation99_spill] sm:$0xff] }
 0x8b3   :  { %14790 = vmatmul.mubr.msk.f32.gmra.mrb[14].mxu1 %vm5488_vm6, %v23237_v11  ;;  %v23258_v11 = vld [vmem:[#allocation103_spill] sm:$0xff] }
 0x8b4   :  { %14792 = vmatprep.mubr.msk.f32.mxu1 %vm5488_vm6, %v23238_v62  ;;  %v23259_v62 = vld [vmem:[#allocation130_spill] sm:$0xff] }
 0x8b7   :  { %14793 = vmatmul.mubr.msk.f32.gmra.mrb[16].mxu1 %vm5488_vm6, %v23239_v39  ;;  %v23260_v39 = vld [vmem:[#allocation30_spill] sm:$0xff] }
 0x8b8   :  { %14795 = vmatprep.mubr.msk.f32.mxu1 %vm5488_vm6, %v23240_v16  ;;  %v23261_v16 = vld [vmem:[#allocation32_spill] sm:$0xff] }
 0x8bb   :  { %14796 = vmatmul.mubr.msk.f32.gmra.mrb[18].mxu1 %vm5488_vm6, %v23241_v53  ;;  %v23262_v53 = vld [vmem:[#allocation34_spill] sm:$0xff] }
 0x8bc   :  { %14798 = vmatprep.mubr.msk.f32.mxu1 %vm5488_vm6, %v23242_v33  ;;  %v23263_v33 = vld [vmem:[#allocation36_spill] sm:$0xff] }
 0x8bf   :  { %14799 = vmatmul.mubr.msk.f32.gmra.mrb[20].mxu1 %vm5488_vm6, %v23243_v59  ;;  %v23264_v59 = vld [vmem:[#allocation39_spill] sm:$0xff] }
 0x8c0   :  { %14801 = vmatprep.mubr.msk.f32.mxu1 %vm5488_vm6, %v23244_v51  ;;  %v23265_v51 = vld [vmem:[#allocation40_spill] sm:$0xff] }
 0x8c3   :  { %14802 = vmatmul.mubr.msk.f32.gmra.mrb[22].mxu1 %vm5488_vm6, %v23245_v15  ;;  %v23266_v15 = vld [vmem:[#allocation4_spill] sm:$0xff] }
 0x8c4   :  { %14804 = vmatprep.mubr.msk.f32.mxu1 %vm5488_vm6, %v23246_v52  ;;  %v23267_v52 = vld [vmem:[#allocation5_spill] sm:$0xff] }
 0x8c7   :  { %14805 = vmatmul.mubr.msk.f32.gmra.mrb[24].mxu1 %vm5488_vm6, %v23247_v12  ;;  %v23268_v12 = vld [vmem:[#allocation49_spill] sm:$0xff] }
 0x8c8   :  { %14807 = vmatprep.mubr.msk.f32.mxu1 %vm5488_vm6, %v23248_v34  ;;  %v23269_v34 = vld [vmem:[#allocation50_spill] sm:$0xff] }
 0x8cb   :  { %14808 = vmatmul.mubr.msk.f32.gmra.mrb[26].mxu1 %vm5488_vm6, %v23249_v3  ;;  %v23272_v3 = vld [vmem:[#allocation63_spill] sm:$0xff] }
 0x8cc   :  { %14810 = vmatprep.mubr.msk.f32.mxu1 %vm5488_vm6, %v23250_v56  ;;  %v23273_v56 = vld [vmem:[#allocation67_spill] sm:$0xff] }
 0x8cf   :  { %14811 = vmatmul.mubr.msk.f32.gmra.mrb[28].mxu1 %vm5488_vm6, %v23251_v54  ;;  %v23276_v54 = vld [vmem:[#allocation73_spill] sm:$0xff] }
 0x8d0   :  { %14813 = vmatprep.mubr.msk.f32.mxu1 %vm5488_vm6, %v9643_v38  ;;  %v23275_v38 = vld [vmem:[#allocation72_spill] sm:$0xff] }
 0x8d3   :  { %14814 = vmatmul.mubr.msk.f32.gmra.mrb[30].mxu1 %vm5488_vm6, %v9645_v48  ;;  %v23277_v48 = vld [vmem:[#allocation77_spill] sm:$0xff] }
 0x8d4   :  { %14816 = vmatprep.mubr.msk.f32.mxu1 %vm5488_vm6, %v23252_v25  ;;  %v23278_v25 = vld [vmem:[#allocation82_spill] sm:$0xff] }
 0x8d7   :  { %14817 = vmatmul.mubr.msk.f32.gmra.mrb[32].mxu1 %vm5488_vm6, %v23253_v8  ;;  %v9646_v8 = vrot.slane %v20895_v18, 1 }
 0x8d8   :  { %14819 = vmatprep.mubr.msk.f32.mxu1 %vm5488_vm6, %v23254_v23  ;;  %v9647_v23 = vrot.slane %v20901_v45, 1 }
 0x8db   :  { %14820 = vmatmul.mubr.msk.f32.gmra.mrb[34].mxu1 %vm5488_vm6, %v23255_v20  ;;  %v21031_v20 = vld [vmem:[#allocation3 + $0x358] sm:$0x3] }
 0x8dc   :  { %14822 = vmatprep.mubr.msk.f32.mxu1 %vm5488_vm6, %v23256_v47  ;;  %v23279_v47 = vld [vmem:[#allocation83_spill] sm:$0xff] }
 0x8df   :  { %14823 = vmatmul.mubr.msk.f32.gmra.mrb[36].mxu1 %vm5488_vm6, %v23257_v55  ;;  %v23280_v55 = vld [vmem:[#allocation113_spill] sm:$0xff] }
 0x8e0   :  { %14825 = vmatprep.mubr.msk.f32.mxu1 %vm5488_vm6, %v23258_v11  ;;  %v9649_v11 = vrot.slane %v21031_v20, 1 }
 0x8e3   :  { %14826 = vmatmul.mubr.msk.f32.gmra.mrb[38].mxu1 %vm5488_vm6, %v23259_v62  ;;  %v9648_v62 = vsel %vm590_vm4, %v9646_v8, %v9647_v23 }
 0x8e4   :  { %14828 = vmatprep.mubr.msk.f32.mxu1 %vm5488_vm6, %v23260_v39  ;;  %v23281_v39 = vld [vmem:[#allocation9_spill] sm:$0xff] }
 0x8e7   :  { %14829 = vmatmul.mubr.msk.f32.gmra.mrb[40].mxu1 %vm5488_vm6, %v23261_v16  ;;  %v9650_v16 = vsel %vm590_vm4, %v9647_v23, %v9649_v11  ;;  %v16142_v11 = vld [vmem:[%s21952_s0 + $0x20] sm:$0xff] }
 0x8e8   :  { %14831 = vmatprep.mubr.msk.f32.mxu1 %vm5488_vm6, %v23262_v53  ;;  %v23282_v53 = vld [vmem:[#allocation91_spill] sm:$0xff] }
 0x8eb   :  { %14832 = vmatmul.mubr.msk.f32.gmra.mrb[42].mxu1 %vm5488_vm6, %v23263_v33  ;;  %v23283_v33 = vld [vmem:[#allocation92_spill] sm:$0xff] }
 0x8ec   :  { %14834 = vmatprep.mubr.msk.f32.mxu1 %vm5488_vm6, %v23264_v59  ;;  %v23284_v59 = vld [vmem:[#allocation93_spill] sm:$0xff] }
 0x8ef   :  { %14835 = vmatmul.mubr.msk.f32.gmra.mrb[44].mxu1 %vm5488_vm6, %v23265_v51  ;;  %v23285_v51 = vld [vmem:[#allocation97_spill] sm:$0xff] }
 0x8f0   :  { %14837 = vmatprep.mubr.msk.f32.mxu1 %vm5488_vm6, %v23266_v15  ;;  %v23286_v15 = vld [vmem:[#allocation6_spill] sm:$0xff] }
 0x8f3   :  { %14838 = vmatmul.mubr.msk.f32.gmra.mrb[46].mxu1 %vm5488_vm6, %v23267_v52  ;;  %v23287_v52 = vld [vmem:[#allocation111_spill] sm:$0xff] }
 0x8f4   :  { %14840 = vmatprep.mubr.msk.f32.mxu1 %vm5488_vm6, %v23268_v12  ;;  %v23288_v12 = vld [vmem:[#allocation112_spill] sm:$0xff] }
 0x8f7   :  { %14841 = vmatmul.mubr.msk.f32.gmra.mrb[48].mxu1 %vm5488_vm6, %v23269_v34  ;;  %v23289_v34 = vld [vmem:[#allocation118_spill] sm:$0xff] }
 0x8f8   :  { %14843 = vmatprep.mubr.msk.f32.mxu1 %vm5488_vm6, %v23270_v9 }
 0x8fb   :  { %14844 = vmatmul.mubr.msk.f32.gmra.mrb[50].mxu1 %vm5488_vm6, %v23271_v14 }
 0x8fc   :  { %14846 = vmatprep.mubr.msk.f32.mxu1 %vm5488_vm6, %v23272_v3 }
 0x8ff   :  { %14847 = vmatmul.mubr.msk.f32.gmra.mrb[52].mxu1 %vm5488_vm6, %v23273_v56 }
 0x900   :  { %14849 = vmatprep.mubr.msk.f32.mxu1 %vm5488_vm6, %v23274_v30  ;;  %v16139_v30 = vld [vmem:[%s21952_s0 + $0x18] sm:$0xff] }
 0x903   :  { %14850 = vmatmul.mubr.msk.f32.gmra.mrb[54].mxu1 %vm5488_vm6, %v23275_v38 }
 0x904   :  { %14852 = vmatprep.mubr.msk.f32.mxu1 %vm5488_vm6, %v23276_v54  ;;  %v16140_v54 = vld [vmem:[%s21952_s0 + $0x10] sm:$0xff] }
 0x907   :  { %14853 = vmatmul.mubr.msk.f32.gmra.mrb[56].mxu1 %vm5488_vm6, %v23277_v48 }
 0x908   :  { %14855 = vmatprep.mubr.msk.f32.mxu1 %vm5488_vm6, %v23278_v25 }
 0x90b   :  { %14856 = vmatmul.mubr.msk.f32.gmra.mrb[58].mxu1 %vm5488_vm6, %v23279_v47  ;;  %v16141_v47 = vld [vmem:[%s21952_s0 + $0x28] sm:$0xff] }
 0x90c   :  { %14858 = vmatprep.mubr.msk.f32.mxu1 %vm5488_vm6, %v23280_v55 }
 0x90f   :  { %14859 = vmatmul.mubr.msk.f32.gmra.mrb[60].mxu1 %vm5488_vm6, %v23281_v39 }
 0x910   :  { %14861 = vmatprep.mubr.msk.f32.mxu1 %vm5488_vm6, %v9648_v62 }
 0x913   :  { %14862 = vmatmul.mubr.msk.f32.gmra.mrb[62].mxu1 %vm5488_vm6, %v9650_v16 }
 0x914   :  { %14866 = vmatprep.mubr.msk.f32.mxu1 %vm5488_vm6, %v23282_v53 }
 0x917   :  { %14867 = vmatmul.mubr.msk.f32.vlgmr.msra.gmra.mrb[0].mxu1 %vm5488_vm6, %v23283_v33 }
 0x918   :  { %14869 = vmatprep.mubr.msk.f32.mxu1 %vm5488_vm6, %v23284_v59  ;;  %v16143_v59 = vld [vmem:[%s21952_s0 + $0x38] sm:$0xff] }
 0x91b   :  { %14870 = vmatmul.mubr.msk.f32.gmra.mrb[2].mxu1 %vm5488_vm6, %v23285_v51 }
 0x91c   :  { %14872 = vmatprep.mubr.msk.f32.mxu1 %vm5488_vm6, %v23286_v15  ;;  %v16144_v15 = vld [vmem:[%s21952_s0 + $0x30] sm:$0xff] }
 0x91f   :  { %14873 = vmatmul.mubr.msk.f32.gmra.mrb[4].mxu1 %vm5488_vm6, %v23287_v52 }
 0x920   :  { %14875 = vmatprep.mubr.msk.f32.mxu1 %vm5488_vm6, %v23288_v12 }
 0x923   :  { %14876 = vmatmul.mubr.msk.f32.gmra.mrb[6].mxu1 %vm5488_vm6, %v23188_v31  ;;  %v23291_v31 = vld [vmem:[#allocation120_spill] sm:$0xff] }
 0x924   :  { %14878 = vmatprep.mubr.msk.f32.mxu1 %vm5488_vm6, %v23189_v28  ;;  %v23290_v28 = vld [vmem:[#allocation51_spill] sm:$0xff] }
 0x927   :  { %14879 = vmatmul.mubr.msk.f32.gmra.mrb[8].mxu1 %vm5488_vm6, %v23190_v2  ;;  %v23293_v2 = vld [vmem:[#allocation121_spill] sm:$0xff] }
 0x928   :  { %14881 = vmatprep.mubr.msk.f32.mxu1 %vm5488_vm6, %v23191_v46  ;;  %v10111_v46 = vrot.slane %v20853_v57, 2 }
 0x92b   :  { %14882 = vmatmul.mubr.msk.f32.gmra.mrb[10].mxu1 %vm5488_vm6, %v23192_v44  ;;  %v10113_v44 = vrot.slane %v20962_v60, 2 }
 0x92c   :  { %14884 = vmatprep.mubr.msk.f32.mxu1 %vm5488_vm6, %v23193_v61  ;;  %v23292_v61 = vld [vmem:[#allocation54_spill] sm:$0xff] }
 0x92f   :  { %14885 = vmatmul.mubr.msk.f32.gmra.mrb[12].mxu1 %vm5488_vm6, %v23194_v35 }
 0x930   :  { %14887 = vmatprep.mubr.msk.f32.mxu1 %vm5488_vm6, %v23289_v34 }
 0x933   :  { %14888 = vmatmul.mubr.msk.f32.gmra.mrb[14].mxu1 %vm5488_vm6, %v20019_v49  ;;  %v23294_v49 = vld [vmem:[#allocation122_spill] sm:$0xff] }
 0x934   :  { %14890 = vmatprep.mubr.msk.f32.mxu1 %vm5488_vm6, %v20024_v4  ;;  %v23295_v4 = vld [vmem:[#allocation60_spill] sm:$0xff] }
 0x937   :  { %14891 = vmatmul.mubr.msk.f32.gmra.mrb[16].mxu1 %vm5488_vm6, %v23290_v28 }
 0x938   :  { %14893 = vmatprep.mubr.msk.f32.mxu1 %vm5488_vm6, %v23291_v31 }
 0x93b   :  { %14894 = vmatmul.mubr.msk.f32.gmra.mrb[18].mxu1 %vm5488_vm6, %v20043_v36  ;;  %v10110_v36 = vrot.slane %v20847_v29, 2 }
 0x93c   :  { %14896 = vmatprep.mubr.msk.f32.mxu1 %vm5488_vm6, %v23292_v61  ;;  %v16145_v61 = vld [vmem:[%s21952_s0 + $0x48] sm:$0xff] }
 0x93d   :  { %v10112_v35 = vsel %vm1786_vm5, %v10110_v36, %v10111_v46 }
 0x93f   :  { %14897 = vmatmul.mubr.msk.f32.gmra.mrb[20].mxu1 %vm5488_vm6, %v23293_v2 }
 0x940   :  { %14899 = vmatprep.mubr.msk.f32.mxu1 %vm5488_vm6, %v23196_v32  ;;  %v23308_v32 = vld [vmem:[#allocation81_spill] sm:$0xff] }
 0x943   :  { %14900 = vmatmul.mubr.msk.f32.gmra.mrb[22].mxu1 %vm5488_vm6, %v23294_v49  ;;  %v16146_v49 = vld [vmem:[%s21952_s0 + $0x40] sm:$0xff] }
 0x944   :  { %14902 = vmatprep.mubr.msk.f32.mxu1 %vm5488_vm6, %v23295_v4 }
 0x947   :  { %14903 = vmatmul.mubr.msk.f32.gmra.mrb[24].mxu1 %vm5488_vm6, %v20084_v0  ;;  %v23298_v0 = vld [vmem:[#allocation126_spill] sm:$0xff] }
 0x948   :  { %14905 = vmatprep.mubr.msk.f32.mxu1 %vm5488_vm6, %v23197_v41  ;;  %v10114_v41 = vsel %vm1786_vm5, %v10111_v46, %v10113_v44 }
 0x94b   :  { %14906 = vmatmul.mubr.msk.f32.gmra.mrb[26].mxu1 %vm5488_vm6, %v20097_v7  ;;  %v23299_v7 = vld [vmem:[#allocation79_spill] sm:$0xff] }
 0x94c   :  { %14908 = vmatprep.mubr.msk.f32.mxu1 %vm5488_vm6, %v20704_v27  ;;  %v23296_v27 = vld [vmem:[#allocation64_spill] sm:$0xff] }
 0x94f   :  { %14909 = vmatmul.mubr.msk.f32.gmra.mrb[28].mxu1 %vm5488_vm6, %v20709_v42  ;;  %v23297_v42 = vld [vmem:[#allocation124_spill] sm:$0xff] }
 0x950   :  { %14911 = vmatprep.mubr.msk.f32.mxu1 %vm5488_vm6, %v10112_v35 }
 0x953   :  { %14912 = vmatmul.mubr.msk.f32.gmra.mrb[30].mxu1 %vm5488_vm6, %v10114_v41  ;;  %v16147_v41 = vld [vmem:[%s21952_s0 + $0x58] sm:$0xff] }
 0x954   :  { %14914 = vmatprep.mubr.msk.f32.mxu1 %vm5488_vm6, %v20121_v6  ;;  %v23300_v6 = vld [vmem:[#allocation89_spill] sm:$0xff] }
 0x957   :  { %14915 = vmatmul.mubr.msk.f32.gmra.mrb[32].mxu1 %vm5488_vm6, %v20128_v13  ;;  %v23301_v13 = vld [vmem:[#allocation53_spill] sm:$0xff] }
 0x958   :  { %14917 = vmatprep.mubr.msk.f32.mxu1 %vm5488_vm6, %v20134_v26  ;;  %v23302_v26 = vld [vmem:[#allocation100_spill] sm:$0xff] }
 0x95b   :  { %14918 = vmatmul.mubr.msk.f32.gmra.mrb[34].mxu1 %vm5488_vm6, %v20141_v40  ;;  %v23303_v40 = vld [vmem:[#allocation105_spill] sm:$0xff] }
 0x95c   :  { %14920 = vmatprep.mubr.msk.f32.mxu1 %vm5488_vm6, %v20147_v43  ;;  %v23304_v43 = vld [vmem:[#allocation74_spill] sm:$0xff] }
 0x95f   :  { %14921 = vmatmul.mubr.msk.f32.gmra.mrb[36].mxu1 %vm5488_vm6, %v20154_v17  ;;  %v23305_v17 = vld [vmem:[#allocation107_spill] sm:$0xff] }
 0x960   :  { %14923 = vmatprep.mubr.msk.f32.mxu1 %vm5488_vm6, %v20160_v50  ;;  %v23306_v50 = vld [vmem:[#allocation95_spill] sm:$0xff] }
 0x963   :  { %14924 = vmatmul.mubr.msk.f32.gmra.mrb[38].mxu1 %vm5488_vm6, %v23296_v27 }
 0x964   :  { %14926 = vmatprep.mubr.msk.f32.mxu1 %vm5488_vm6, %v23297_v42  ;;  %v16148_v42 = vld [vmem:[%s21952_s0 + $0x50] sm:$0xff] }
 0x967   :  { %14927 = vmatmul.mubr.msk.f32.gmra.mrb[40].mxu1 %vm5488_vm6, %v23298_v0 }
 0x968   :  { %14929 = vmatprep.mubr.msk.f32.mxu1 %vm5488_vm6, %v23299_v7 }
 0x96b   :  { %14930 = vmatmul.mubr.msk.f32.gmra.mrb[42].mxu1 %vm5488_vm6, %v23200_v58  ;;  %v10118_v58 = vrot.slane %v21031_v20, 2 }
 0x96c   :  { %14932 = vmatprep.mubr.msk.f32.mxu1 %vm5488_vm6, %v23300_v6 }
 0x96f   :  { %14933 = vmatmul.mubr.msk.f32.gmra.mrb[44].mxu1 %vm5488_vm6, %v23202_v10  ;;  %v21181_v10 = vld [vmem:[%s21957_s6] ss:$0 sm:$0xff] }
 0x970   :  { %14935 = vmatprep.mubr.msk.f32.mxu1 %vm5488_vm6, %v23301_v13 }
 0x973   :  { %14936 = vmatmul.mubr.msk.f32.gmra.mrb[46].mxu1 %vm5488_vm6, %v23204_v1  ;;  %v23307_v1 = vld [vmem:[#allocation70_spill] sm:$0xff] }
 0x974   :  { %14938 = vmatprep.mubr.msk.f32.mxu1 %vm5488_vm6, %v23205_v24  ;;  %v10115_v24 = vrot.slane %v20895_v18, 2 }
 0x977   :  { %14939 = vmatmul.mubr.msk.f32.gmra.mrb[48].mxu1 %vm5488_vm6, %v23302_v26 }
 0x978   :  { %14941 = vmatprep.mubr.msk.f32.mxu1 %vm5488_vm6, %v23303_v40  ;;  %v16149_v40 = vld [vmem:[%s21952_s0 + $0x68] sm:$0xff] }
 0x97b   :  { %14942 = vmatmul.mubr.msk.f32.gmra.mrb[50].mxu1 %vm5488_vm6, %v20245_v5  ;;  %v10116_v5 = vrot.slane %v20901_v45, 2  ;;  %v16138_v45 = vld [vmem:[%s21952_s0] sm:$0xff] }
 0x97c   :  { %14944 = vmatprep.mubr.msk.f32.mxu1 %vm5488_vm6, %v23208_v21 }
 0x97d   :  { %v10117_v21 = vsel %vm1786_vm5, %v10115_v24, %v10116_v5 }
 0x97f   :  { %14945 = vmatmul.mubr.msk.f32.gmra.mrb[52].mxu1 %vm5488_vm6, %v23304_v43 }
 0x980   :  { %14947 = vmatprep.mubr.msk.f32.mxu1 %vm5488_vm6, %v23209_v19 }
 0x983   :  { %14948 = vmatmul.mubr.msk.f32.gmra.mrb[54].mxu1 %vm5488_vm6, %v23305_v17  ;;  %v16150_v17 = vld [vmem:[%s21952_s0 + $0x60] sm:$0xff] }
 0x984   :  { %14950 = vmatprep.mubr.msk.f32.mxu1 %vm5488_vm6, %v23306_v50 }
 0x987   :  { %14951 = vmatmul.mubr.msk.f32.gmra.mrb[56].mxu1 %vm5488_vm6, %v23307_v1 }
 0x988   :  { %14953 = vmatprep.mubr.msk.f32.mxu1 %vm5488_vm6, %v20290_v22  ;;  %v10119_v22 = vsel %vm1786_vm5, %v10116_v5, %v10118_v58  ;;  %v16151_v58 = vld [vmem:[%s21952_s0 + $0x78] sm:$0xff] }
 0x98b   :  { %14954 = vmatmul.mubr.msk.f32.gmra.mrb[58].mxu1 %vm5488_vm6, %v23308_v32 }
 0x98c   :  { %14956 = vmatprep.mubr.msk.f32.mxu1 %vm5488_vm6, %v20777_v63 }
 0x98f   :  { %14957 = vmatmul.mubr.msk.f32.gmra.mrb[60].mxu1 %vm5488_vm6, %v20782_v37  ;;  %v16137_v37 = vld [vmem:[%s21952_s0 + $0x8] sm:$0xff] }
 0x990   :  { %14959 = vmatprep.mubr.msk.f32.mxu1 %vm5488_vm6, %v10117_v21 }
 0x993   :  { %14960 = vmatmul.mubr.msk.f32.gmra.mrb[62].mxu1 %vm5488_vm6, %v10119_v22  ;;  %v16152_v22 = vld [vmem:[%s21952_s0 + $0x70] sm:$0xff] }
 0x9ea   :  { %v14868_v19 = vpop.f32.mrb[0].mxu1 }
 0x9eb   :  { %v10587_v63 = vadd.f32 %v14868_v19, %v21181_v10  ;;  %v10196_v29 = vpop.f32.mrb[1].mxu1 }
 0x9ec   :  { %v10586_v57 = vadd.f32 %v21181_v10, %v10196_v29 }
 0x9ed   :  { %v10651_v18 = vadd.f32 %v16137_v37, %v10587_v63 }
 0x9ee   :  { %v10650_v60 = vadd.f32 %v16138_v45, %v10586_v57  ;;  %v14871_v9 = vpop.f32.mrb[2].mxu1 }
 0x9ef   :  { %10715 = vst.msk [vmem:[%s21958_s7 + $0x8] sm:$0xff] %vm92_vm1, %v10651_v18  ;;  %v10589_v14 = vadd.f32 %v14871_v9, %v21181_v10  ;;  %v10206_v3 = vpop.f32.mrb[3].mxu1  ;;  %v16153_v18 = vld [vmem:[%s21952_s0 + $0x88] sm:$0xff] }
 0x9f0   :  { %10780 = vst.msk [vmem:[%s21958_s7 + $0x8] sm:$0xff] %vm10778_vm9, %v10587_v63  ;;  %v10588_v56 = vadd.f32 %v21181_v10, %v10206_v3 }
 0x9f1   :  { %10714 = vst.msk [vmem:[%s21958_s7] sm:$0xff] %vm92_vm1, %v10650_v60  ;;  %v10653_v38 = vadd.f32 %v16139_v30, %v10589_v14  ;;  %v16154_v60 = vld [vmem:[%s21952_s0 + $0x80] sm:$0xff] }
 0x9f2   :  { %10779 = vst.msk [vmem:[%s21958_s7] sm:$0xff] %vm10778_vm9, %v10586_v57  ;;  %v10652_v48 = vadd.f32 %v16140_v54, %v10588_v56  ;;  %v14874_v25 = vpop.f32.mrb[4].mxu1 }
 0x9f3   :  { %10717 = vst.msk [vmem:[%s21958_s7 + $0x18] sm:$0xff] %vm92_vm1, %v10653_v38  ;;  %v10591_v8 = vadd.f32 %v14874_v25, %v21181_v10  ;;  %v10216_v23 = vpop.f32.mrb[5].mxu1  ;;  %v16155_v38 = vld [vmem:[%s21952_s0 + $0x98] sm:$0xff] }
 0x9f4   :  { %10782 = vst.msk [vmem:[%s21958_s7 + $0x18] sm:$0xff] %vm10778_vm9, %v10589_v14  ;;  %v10590_v20 = vadd.f32 %v21181_v10, %v10216_v23 }
 0x9f5   :  { %10716 = vst.msk [vmem:[%s21958_s7 + $0x10] sm:$0xff] %vm92_vm1, %v10652_v48  ;;  %v10655_v55 = vadd.f32 %v16141_v47, %v10591_v8  ;;  %v16156_v48 = vld [vmem:[%s21952_s0 + $0x90] sm:$0xff] }
 0x9f6   :  { %10781 = vst.msk [vmem:[%s21958_s7 + $0x10] sm:$0xff] %vm10778_vm9, %v10588_v56  ;;  %v10654_v62 = vadd.f32 %v16142_v11, %v10590_v20  ;;  %v14877_v39 = vpop.f32.mrb[6].mxu1 }
 0x9f7   :  { %10719 = vst.msk [vmem:[%s21958_s7 + $0x28] sm:$0xff] %vm92_vm1, %v10655_v55  ;;  %v10593_v16 = vadd.f32 %v14877_v39, %v21181_v10  ;;  %v10226_v53 = vpop.f32.mrb[7].mxu1  ;;  %v16157_v55 = vld [vmem:[%s21952_s0 + $0xa8] sm:$0xff] }
 0x9f8   :  { %10784 = vst.msk [vmem:[%s21958_s7 + $0x28] sm:$0xff] %vm10778_vm9, %v10591_v8  ;;  %v10592_v33 = vadd.f32 %v21181_v10, %v10226_v53 }
 0x9f9   :  { %10718 = vst.msk [vmem:[%s21958_s7 + $0x20] sm:$0xff] %vm92_vm1, %v10654_v62  ;;  %v10657_v51 = vadd.f32 %v16143_v59, %v10593_v16  ;;  %v16158_v62 = vld [vmem:[%s21952_s0 + $0xa0] sm:$0xff] }
 0x9fa   :  { %10783 = vst.msk [vmem:[%s21958_s7 + $0x20] sm:$0xff] %vm10778_vm9, %v10590_v20  ;;  %v10656_v52 = vadd.f32 %v16144_v15, %v10592_v33  ;;  %v14880_v12 = vpop.f32.mrb[8].mxu1 }
 0x9fb   :  { %10721 = vst.msk [vmem:[%s21958_s7 + $0x38] sm:$0xff] %vm92_vm1, %v10657_v51  ;;  %v10595_v34 = vadd.f32 %v14880_v12, %v21181_v10  ;;  %v10236_v28 = vpop.f32.mrb[9].mxu1  ;;  %v16159_v51 = vld [vmem:[%s21952_s0 + $0xb8] sm:$0xff] }
 0x9fc   :  { %10786 = vst.msk [vmem:[%s21958_s7 + $0x38] sm:$0xff] %vm10778_vm9, %v10593_v16  ;;  %v10594_v31 = vadd.f32 %v21181_v10, %v10236_v28 }
 0x9fd   :  { %10720 = vst.msk [vmem:[%s21958_s7 + $0x30] sm:$0xff] %vm92_vm1, %v10656_v52  ;;  %v10659_v2 = vadd.f32 %v16145_v61, %v10595_v34  ;;  %v16160_v52 = vld [vmem:[%s21952_s0 + $0xb0] sm:$0xff] }
 0x9fe   :  { %10785 = vst.msk [vmem:[%s21958_s7 + $0x30] sm:$0xff] %vm10778_vm9, %v10592_v33  ;;  %v10658_v4 = vadd.f32 %v16146_v49, %v10594_v31  ;;  %v14883_v36 = vpop.f32.mrb[10].mxu1 }
 0x9ff   :  { %10723 = vst.msk [vmem:[%s21958_s7 + $0x48] sm:$0xff] %vm92_vm1, %v10659_v2  ;;  %v10597_v46 = vadd.f32 %v14883_v36, %v21181_v10  ;;  %v10246_v44 = vpop.f32.mrb[11].mxu1  ;;  %v16161_v2 = vld [vmem:[%s21952_s0 + $0xc8] sm:$0xff] }
 0xa00   :  { %10788 = vst.msk [vmem:[%s21958_s7 + $0x48] sm:$0xff] %vm10778_vm9, %v10595_v34  ;;  %v10596_v35 = vadd.f32 %v21181_v10, %v10246_v44 }
 0xa01   :  { %10722 = vst.msk [vmem:[%s21958_s7 + $0x40] sm:$0xff] %vm92_vm1, %v10658_v4  ;;  %v10661_v27 = vadd.f32 %v16147_v41, %v10597_v46  ;;  %v16162_v4 = vld [vmem:[%s21952_s0 + $0xc0] sm:$0xff] }
 0xa02   :  { %10787 = vst.msk [vmem:[%s21958_s7 + $0x40] sm:$0xff] %vm10778_vm9, %v10594_v31  ;;  %v10660_v0 = vadd.f32 %v16148_v42, %v10596_v35  ;;  %v14886_v7 = vpop.f32.mrb[12].mxu1 }
 0xa03   :  { %10725 = vst.msk [vmem:[%s21958_s7 + $0x58] sm:$0xff] %vm92_vm1, %v10661_v27  ;;  %v10599_v6 = vadd.f32 %v14886_v7, %v21181_v10  ;;  %v10256_v13 = vpop.f32.mrb[13].mxu1  ;;  %v16163_v27 = vld [vmem:[%s21952_s0 + $0xd8] sm:$0xff] }
 0xa04   :  { %10790 = vst.msk [vmem:[%s21958_s7 + $0x58] sm:$0xff] %vm10778_vm9, %v10597_v46  ;;  %v10598_v26 = vadd.f32 %v21181_v10, %v10256_v13 }
 0xa05   :  { %10724 = vst.msk [vmem:[%s21958_s7 + $0x50] sm:$0xff] %vm92_vm1, %v10660_v0  ;;  %v10663_v43 = vadd.f32 %v16149_v40, %v10599_v6  ;;  %v16164_v0 = vld [vmem:[%s21952_s0 + $0xd0] sm:$0xff] }
 0xa06   :  { %10789 = vst.msk [vmem:[%s21958_s7 + $0x50] sm:$0xff] %vm10778_vm9, %v10596_v35  ;;  %v10662_v50 = vadd.f32 %v16150_v17, %v10598_v26  ;;  %v14889_v1 = vpop.f32.mrb[14].mxu1 }
 0xa07   :  { %10727 = vst.msk [vmem:[%s21958_s7 + $0x68] sm:$0xff] %vm92_vm1, %v10663_v43  ;;  %v10601_v24 = vadd.f32 %v14889_v1, %v21181_v10  ;;  %v10266_v5 = vpop.f32.mrb[15].mxu1  ;;  %v16165_v43 = vld [vmem:[%s21952_s0 + $0xe8] sm:$0xff] }
 0xa08   :  { %10792 = vst.msk [vmem:[%s21958_s7 + $0x68] sm:$0xff] %vm10778_vm9, %v10599_v6  ;;  %v10600_v32 = vadd.f32 %v21181_v10, %v10266_v5 }
 0xa09   :  { %10726 = vst.msk [vmem:[%s21958_s7 + $0x60] sm:$0xff] %vm92_vm1, %v10662_v50  ;;  %v10665_v21 = vadd.f32 %v16151_v58, %v10601_v24  ;;  %v16166_v50 = vld [vmem:[%s21952_s0 + $0xe0] sm:$0xff] }
 0xa0a   :  { %10791 = vst.msk [vmem:[%s21958_s7 + $0x60] sm:$0xff] %vm10778_vm9, %v10598_v26  ;;  %v10664_v19 = vadd.f32 %v16152_v22, %v10600_v32  ;;  %v14892_v63 = vpop.f32.mrb[16].mxu1 }
 0xa0b   :  { %10729 = vst.msk [vmem:[%s21958_s7 + $0x78] sm:$0xff] %vm92_vm1, %v10665_v21  ;;  %v10603_v29 = vadd.f32 %v14892_v63, %v21181_v10  ;;  %v10276_v57 = vpop.f32.mrb[17].mxu1  ;;  %v16167_v21 = vld [vmem:[%s21952_s0 + $0xf8] sm:$0xff] }
 0xa0c   :  { %10794 = vst.msk [vmem:[%s21958_s7 + $0x78] sm:$0xff] %vm10778_vm9, %v10601_v24  ;;  %v10602_v37 = vadd.f32 %v21181_v10, %v10276_v57 }
 0xa0d   :  { %10728 = vst.msk [vmem:[%s21958_s7 + $0x70] sm:$0xff] %vm92_vm1, %v10664_v19  ;;  %v10667_v45 = vadd.f32 %v16153_v18, %v10603_v29  ;;  %v16168_v19 = vld [vmem:[%s21952_s0 + $0xf0] sm:$0xff] }
 0xa0e   :  { %10793 = vst.msk [vmem:[%s21958_s7 + $0x70] sm:$0xff] %vm10778_vm9, %v10600_v32  ;;  %v10666_v9 = vadd.f32 %v16154_v60, %v10602_v37  ;;  %v14895_v14 = vpop.f32.mrb[18].mxu1 }
 0xa0f   :  { %10731 = vst.msk [vmem:[%s21958_s7 + $0x88] sm:$0xff] %vm92_vm1, %v10667_v45  ;;  %v10605_v3 = vadd.f32 %v14895_v14, %v21181_v10  ;;  %v10286_v56 = vpop.f32.mrb[19].mxu1  ;;  %v16169_v45 = vld [vmem:[%s21952_s0 + $0x108] sm:$0xff] }
 0xa10   :  { %10796 = vst.msk [vmem:[%s21958_s7 + $0x88] sm:$0xff] %vm10778_vm9, %v10603_v29  ;;  %v10604_v30 = vadd.f32 %v21181_v10, %v10286_v56 }
 0xa11   :  { %10730 = vst.msk [vmem:[%s21958_s7 + $0x80] sm:$0xff] %vm92_vm1, %v10666_v9  ;;  %v10669_v54 = vadd.f32 %v16155_v38, %v10605_v3  ;;  %v16170_v9 = vld [vmem:[%s21952_s0 + $0x100] sm:$0xff] }
 0xa12   :  { %10795 = vst.msk [vmem:[%s21958_s7 + $0x80] sm:$0xff] %vm10778_vm9, %v10602_v37  ;;  %v10668_v25 = vadd.f32 %v16156_v48, %v10604_v30  ;;  %v14898_v8 = vpop.f32.mrb[20].mxu1 }
 0xa13   :  { %10733 = vst.msk [vmem:[%s21958_s7 + $0x98] sm:$0xff] %vm92_vm1, %v10669_v54  ;;  %v10607_v23 = vadd.f32 %v14898_v8, %v21181_v10  ;;  %v10296_v20 = vpop.f32.mrb[21].mxu1  ;;  %v16171_v54 = vld [vmem:[%s21952_s0 + $0x118] sm:$0xff] }
 0xa14   :  { %10798 = vst.msk [vmem:[%s21958_s7 + $0x98] sm:$0xff] %vm10778_vm9, %v10605_v3  ;;  %v10606_v47 = vadd.f32 %v21181_v10, %v10296_v20 }
 0xa15   :  { %10732 = vst.msk [vmem:[%s21958_s7 + $0x90] sm:$0xff] %vm92_vm1, %v10668_v25  ;;  %v10671_v11 = vadd.f32 %v16157_v55, %v10607_v23  ;;  %v16172_v25 = vld [vmem:[%s21952_s0 + $0x110] sm:$0xff] }
 0xa16   :  { %10797 = vst.msk [vmem:[%s21958_s7 + $0x90] sm:$0xff] %vm10778_vm9, %v10604_v30  ;;  %v10670_v39 = vadd.f32 %v16158_v62, %v10606_v47  ;;  %v14901_v16 = vpop.f32.mrb[22].mxu1 }
 0xa17   :  { %10735 = vst.msk [vmem:[%s21958_s7 + $0xa8] sm:$0xff] %vm92_vm1, %v10671_v11  ;;  %v10609_v53 = vadd.f32 %v14901_v16, %v21181_v10  ;;  %v10306_v33 = vpop.f32.mrb[23].mxu1  ;;  %v16173_v11 = vld [vmem:[%s21952_s0 + $0x128] sm:$0xff] }
 0xa18   :  { %10800 = vst.msk [vmem:[%s21958_s7 + $0xa8] sm:$0xff] %vm10778_vm9, %v10607_v23  ;;  %v10608_v59 = vadd.f32 %v21181_v10, %v10306_v33 }
 0xa19   :  { %10734 = vst.msk [vmem:[%s21958_s7 + $0xa0] sm:$0xff] %vm92_vm1, %v10670_v39  ;;  %v10673_v15 = vadd.f32 %v16159_v51, %v10609_v53  ;;  %v16174_v39 = vld [vmem:[%s21952_s0 + $0x120] sm:$0xff] }
 0xa1a   :  { %10799 = vst.msk [vmem:[%s21958_s7 + $0xa0] sm:$0xff] %vm10778_vm9, %v10606_v47  ;;  %v10672_v12 = vadd.f32 %v16160_v52, %v10608_v59  ;;  %v14904_v34 = vpop.f32.mrb[24].mxu1 }
 0xa1b   :  { %10737 = vst.msk [vmem:[%s21958_s7 + $0xb8] sm:$0xff] %vm92_vm1, %v10673_v15  ;;  %v10611_v28 = vadd.f32 %v14904_v34, %v21181_v10  ;;  %v10316_v31 = vpop.f32.mrb[25].mxu1  ;;  %v16175_v15 = vld [vmem:[%s21952_s0 + $0x138] sm:$0xff] }
 0xa1c   :  { %10802 = vst.msk [vmem:[%s21958_s7 + $0xb8] sm:$0xff] %vm10778_vm9, %v10609_v53  ;;  %v10610_v61 = vadd.f32 %v21181_v10, %v10316_v31 }
 0xa1d   :  { %10736 = vst.msk [vmem:[%s21958_s7 + $0xb0] sm:$0xff] %vm92_vm1, %v10672_v12  ;;  %v10675_v49 = vadd.f32 %v16161_v2, %v10611_v28  ;;  %v16176_v12 = vld [vmem:[%s21952_s0 + $0x130] sm:$0xff] }
 0xa1e   :  { %10801 = vst.msk [vmem:[%s21958_s7 + $0xb0] sm:$0xff] %vm10778_vm9, %v10608_v59  ;;  %v10674_v36 = vadd.f32 %v16162_v4, %v10610_v61  ;;  %v14907_v46 = vpop.f32.mrb[26].mxu1 }
 0xa1f   :  { %10739 = vst.msk [vmem:[%s21958_s7 + $0xc8] sm:$0xff] %vm92_vm1, %v10675_v49  ;;  %v10613_v44 = vadd.f32 %v14907_v46, %v21181_v10  ;;  %v10326_v35 = vpop.f32.mrb[27].mxu1  ;;  %v16177_v49 = vld [vmem:[%s21952_s0 + $0x148] sm:$0xff] }
 0xa20   :  { %10804 = vst.msk [vmem:[%s21958_s7 + $0xc8] sm:$0xff] %vm10778_vm9, %v10611_v28  ;;  %v10612_v41 = vadd.f32 %v21181_v10, %v10326_v35 }
 0xa21   :  { %10738 = vst.msk [vmem:[%s21958_s7 + $0xc0] sm:$0xff] %vm92_vm1, %v10674_v36  ;;  %v10677_v42 = vadd.f32 %v16163_v27, %v10613_v44  ;;  %v16178_v36 = vld [vmem:[%s21952_s0 + $0x140] sm:$0xff] }
 0xa22   :  { %10803 = vst.msk [vmem:[%s21958_s7 + $0xc0] sm:$0xff] %vm10778_vm9, %v10610_v61  ;;  %v10676_v7 = vadd.f32 %v16164_v0, %v10612_v41  ;;  %v14910_v6 = vpop.f32.mrb[28].mxu1 }
 0xa23   :  { %10741 = vst.msk [vmem:[%s21958_s7 + $0xd8] sm:$0xff] %vm92_vm1, %v10677_v42  ;;  %v10615_v13 = vadd.f32 %v14910_v6, %v21181_v10  ;;  %v10336_v26 = vpop.f32.mrb[29].mxu1  ;;  %v16179_v42 = vld [vmem:[%s21952_s0 + $0x158] sm:$0xff] }
 0xa24   :  { %10806 = vst.msk [vmem:[%s21958_s7 + $0xd8] sm:$0xff] %vm10778_vm9, %v10613_v44  ;;  %v10614_v40 = vadd.f32 %v21181_v10, %v10336_v26 }
 0xa25   :  { %10740 = vst.msk [vmem:[%s21958_s7 + $0xd0] sm:$0xff] %vm92_vm1, %v10676_v7  ;;  %v10679_v17 = vadd.f32 %v16165_v43, %v10615_v13  ;;  %v16180_v7 = vld [vmem:[%s21952_s0 + $0x150] sm:$0xff] }
 0xa26   :  { %10805 = vst.msk [vmem:[%s21958_s7 + $0xd0] sm:$0xff] %vm10778_vm9, %v10612_v41  ;;  %v10678_v1 = vadd.f32 %v16166_v50, %v10614_v40  ;;  %v14913_v24 = vpop.f32.mrb[30].mxu1 }
 0xa27   :  { %10743 = vst.msk [vmem:[%s21958_s7 + $0xe8] sm:$0xff] %vm92_vm1, %v10679_v17  ;;  %v10617_v5 = vadd.f32 %v14913_v24, %v21181_v10  ;;  %v10346_v32 = vpop.f32.mrb[31].mxu1  ;;  %v16181_v17 = vld [vmem:[%s21952_s0 + $0x168] sm:$0xff] }
 0xa28   :  { %10808 = vst.msk [vmem:[%s21958_s7 + $0xe8] sm:$0xff] %vm10778_vm9, %v10615_v13  ;;  %v10616_v58 = vadd.f32 %v21181_v10, %v10346_v32 }
 0xa29   :  { %10742 = vst.msk [vmem:[%s21958_s7 + $0xe0] sm:$0xff] %vm92_vm1, %v10678_v1  ;;  %v10681_v22 = vadd.f32 %v16167_v21, %v10617_v5  ;;  %v16182_v1 = vld [vmem:[%s21952_s0 + $0x160] sm:$0xff] }
 0xa2a   :  { %10807 = vst.msk [vmem:[%s21958_s7 + $0xe0] sm:$0xff] %vm10778_vm9, %v10614_v40  ;;  %v10680_v63 = vadd.f32 %v16168_v19, %v10616_v58  ;;  %v14916_v29 = vpop.f32.mrb[32].mxu1 }
 0xa2b   :  { %10745 = vst.msk [vmem:[%s21958_s7 + $0xf8] sm:$0xff] %vm92_vm1, %v10681_v22  ;;  %v10619_v57 = vadd.f32 %v14916_v29, %v21181_v10  ;;  %v10356_v37 = vpop.f32.mrb[33].mxu1  ;;  %v16183_v22 = vld [vmem:[%s21952_s0 + $0x178] sm:$0xff] }
 0xa2c   :  { %10810 = vst.msk [vmem:[%s21958_s7 + $0xf8] sm:$0xff] %vm10778_vm9, %v10617_v5  ;;  %v10618_v18 = vadd.f32 %v21181_v10, %v10356_v37 }
 0xa2d   :  { %10744 = vst.msk [vmem:[%s21958_s7 + $0xf0] sm:$0xff] %vm92_vm1, %v10680_v63  ;;  %v10683_v60 = vadd.f32 %v16169_v45, %v10619_v57  ;;  %v16184_v63 = vld [vmem:[%s21952_s0 + $0x170] sm:$0xff] }
 0xa2e   :  { %10809 = vst.msk [vmem:[%s21958_s7 + $0xf0] sm:$0xff] %vm10778_vm9, %v10616_v58  ;;  %v10682_v14 = vadd.f32 %v16170_v9, %v10618_v18  ;;  %v14919_v3 = vpop.f32.mrb[34].mxu1 }
 0xa2f   :  { %10747 = vst.msk [vmem:[%s21958_s7 + $0x108] sm:$0xff] %vm92_vm1, %v10683_v60  ;;  %v10621_v56 = vadd.f32 %v14919_v3, %v21181_v10  ;;  %v10366_v30 = vpop.f32.mrb[35].mxu1  ;;  %v16185_v60 = vld [vmem:[%s21952_s0 + $0x188] sm:$0xff] }
 0xa30   :  { %10812 = vst.msk [vmem:[%s21958_s7 + $0x108] sm:$0xff] %vm10778_vm9, %v10619_v57  ;;  %v10620_v38 = vadd.f32 %v21181_v10, %v10366_v30 }
 0xa31   :  { %10746 = vst.msk [vmem:[%s21958_s7 + $0x100] sm:$0xff] %vm92_vm1, %v10682_v14  ;;  %v10685_v48 = vadd.f32 %v16171_v54, %v10621_v56  ;;  %v16186_v14 = vld [vmem:[%s21952_s0 + $0x180] sm:$0xff] }
 0xa32   :  { %10811 = vst.msk [vmem:[%s21958_s7 + $0x100] sm:$0xff] %vm10778_vm9, %v10618_v18  ;;  %v10684_v8 = vadd.f32 %v16172_v25, %v10620_v38  ;;  %v14922_v23 = vpop.f32.mrb[36].mxu1 }
 0xa33   :  { %10749 = vst.msk [vmem:[%s21958_s7 + $0x118] sm:$0xff] %vm92_vm1, %v10685_v48  ;;  %v10623_v20 = vadd.f32 %v14922_v23, %v21181_v10  ;;  %v10376_v47 = vpop.f32.mrb[37].mxu1  ;;  %v16187_v48 = vld [vmem:[%s21952_s0 + $0x198] sm:$0xff] }
 0xa34   :  { %10814 = vst.msk [vmem:[%s21958_s7 + $0x118] sm:$0xff] %vm10778_vm9, %v10621_v56  ;;  %v10622_v55 = vadd.f32 %v21181_v10, %v10376_v47 }
 0xa35   :  { %10748 = vst.msk [vmem:[%s21958_s7 + $0x110] sm:$0xff] %vm92_vm1, %v10684_v8  ;;  %v10687_v62 = vadd.f32 %v16173_v11, %v10623_v20  ;;  %v16188_v8 = vld [vmem:[%s21952_s0 + $0x190] sm:$0xff] }
 0xa36   :  { %10813 = vst.msk [vmem:[%s21958_s7 + $0x110] sm:$0xff] %vm10778_vm9, %v10620_v38  ;;  %v10686_v16 = vadd.f32 %v16174_v39, %v10622_v55  ;;  %v14925_v53 = vpop.f32.mrb[38].mxu1 }
 0xa37   :  { %10751 = vst.msk [vmem:[%s21958_s7 + $0x128] sm:$0xff] %vm92_vm1, %v10687_v62  ;;  %v10625_v33 = vadd.f32 %v14925_v53, %v21181_v10  ;;  %v10386_v59 = vpop.f32.mrb[39].mxu1  ;;  %v16189_v62 = vld [vmem:[%s21952_s0 + $0x1a8] sm:$0xff] }
 0xa38   :  { %10816 = vst.msk [vmem:[%s21958_s7 + $0x128] sm:$0xff] %vm10778_vm9, %v10623_v20  ;;  %v10624_v51 = vadd.f32 %v21181_v10, %v10386_v59 }
 0xa39   :  { %10750 = vst.msk [vmem:[%s21958_s7 + $0x120] sm:$0xff] %vm92_vm1, %v10686_v16  ;;  %v10689_v52 = vadd.f32 %v16175_v15, %v10625_v33  ;;  %v16190_v16 = vld [vmem:[%s21952_s0 + $0x1a0] sm:$0xff] }
 0xa3a   :  { %10815 = vst.msk [vmem:[%s21958_s7 + $0x120] sm:$0xff] %vm10778_vm9, %v10622_v55  ;;  %v10688_v34 = vadd.f32 %v16176_v12, %v10624_v51  ;;  %v14928_v28 = vpop.f32.mrb[40].mxu1 }
 0xa3b   :  { %10753 = vst.msk [vmem:[%s21958_s7 + $0x138] sm:$0xff] %vm92_vm1, %v10689_v52  ;;  %v10627_v31 = vadd.f32 %v14928_v28, %v21181_v10  ;;  %v10396_v61 = vpop.f32.mrb[41].mxu1  ;;  %v16191_v52 = vld [vmem:[%s21952_s0 + $0x1b8] sm:$0xff] }
 0xa3c   :  { %10818 = vst.msk [vmem:[%s21958_s7 + $0x138] sm:$0xff] %vm10778_vm9, %v10625_v33  ;;  %v10626_v2 = vadd.f32 %v21181_v10, %v10396_v61 }
 0xa3d   :  { %10752 = vst.msk [vmem:[%s21958_s7 + $0x130] sm:$0xff] %vm92_vm1, %v10688_v34  ;;  %v10691_v4 = vadd.f32 %v16177_v49, %v10627_v31  ;;  %v16192_v34 = vld [vmem:[%s21952_s0 + $0x1b0] sm:$0xff] }
 0xa3e   :  { %10817 = vst.msk [vmem:[%s21958_s7 + $0x130] sm:$0xff] %vm10778_vm9, %v10624_v51  ;;  %v10690_v46 = vadd.f32 %v16178_v36, %v10626_v2  ;;  %v14931_v44 = vpop.f32.mrb[42].mxu1 }
 0xa3f   :  { %10755 = vst.msk [vmem:[%s21958_s7 + $0x148] sm:$0xff] %vm92_vm1, %v10691_v4  ;;  %v10629_v35 = vadd.f32 %v14931_v44, %v21181_v10  ;;  %v10406_v41 = vpop.f32.mrb[43].mxu1  ;;  %v16193_v4 = vld [vmem:[%s21952_s0 + $0x1c8] sm:$0xff] }
 0xa40   :  { %10820 = vst.msk [vmem:[%s21958_s7 + $0x148] sm:$0xff] %vm10778_vm9, %v10627_v31  ;;  %v10628_v27 = vadd.f32 %v21181_v10, %v10406_v41 }
 0xa41   :  { %10754 = vst.msk [vmem:[%s21958_s7 + $0x140] sm:$0xff] %vm92_vm1, %v10690_v46  ;;  %v10693_v0 = vadd.f32 %v16179_v42, %v10629_v35  ;;  %v16194_v46 = vld [vmem:[%s21952_s0 + $0x1c0] sm:$0xff] }
 0xa42   :  { %10819 = vst.msk [vmem:[%s21958_s7 + $0x140] sm:$0xff] %vm10778_vm9, %v10626_v2  ;;  %v10692_v6 = vadd.f32 %v16180_v7, %v10628_v27  ;;  %v14934_v13 = vpop.f32.mrb[44].mxu1 }
 0xa43   :  { %10757 = vst.msk [vmem:[%s21958_s7 + $0x158] sm:$0xff] %vm92_vm1, %v10693_v0  ;;  %v10631_v26 = vadd.f32 %v14934_v13, %v21181_v10  ;;  %v10416_v40 = vpop.f32.mrb[45].mxu1  ;;  %v16195_v0 = vld [vmem:[%s21952_s0 + $0x1d8] sm:$0xff] }
 0xa44   :  { %10822 = vst.msk [vmem:[%s21958_s7 + $0x158] sm:$0xff] %vm10778_vm9, %v10629_v35  ;;  %v10630_v43 = vadd.f32 %v21181_v10, %v10416_v40 }
 0xa45   :  { %10756 = vst.msk [vmem:[%s21958_s7 + $0x150] sm:$0xff] %vm92_vm1, %v10692_v6  ;;  %v10695_v50 = vadd.f32 %v16181_v17, %v10631_v26  ;;  %v16196_v6 = vld [vmem:[%s21952_s0 + $0x1d0] sm:$0xff] }
 0xa46   :  { %10821 = vst.msk [vmem:[%s21958_s7 + $0x150] sm:$0xff] %vm10778_vm9, %v10628_v27  ;;  %v10694_v24 = vadd.f32 %v16182_v1, %v10630_v43  ;;  %v14937_v5 = vpop.f32.mrb[46].mxu1 }
 0xa47   :  { %10759 = vst.msk [vmem:[%s21958_s7 + $0x168] sm:$0xff] %vm92_vm1, %v10695_v50  ;;  %v10633_v32 = vadd.f32 %v14937_v5, %v21181_v10  ;;  %v10426_v58 = vpop.f32.mrb[47].mxu1  ;;  %v16197_v50 = vld [vmem:[%s21952_s0 + $0x1e8] sm:$0xff] }
 0xa48   :  { %10824 = vst.msk [vmem:[%s21958_s7 + $0x168] sm:$0xff] %vm10778_vm9, %v10631_v26  ;;  %v10632_v21 = vadd.f32 %v21181_v10, %v10426_v58 }
 0xa49   :  { %10758 = vst.msk [vmem:[%s21958_s7 + $0x160] sm:$0xff] %vm92_vm1, %v10694_v24  ;;  %v10697_v19 = vadd.f32 %v16183_v22, %v10633_v32  ;;  %v16198_v24 = vld [vmem:[%s21952_s0 + $0x1e0] sm:$0xff] }
 0xa4a   :  { %10823 = vst.msk [vmem:[%s21958_s7 + $0x160] sm:$0xff] %vm10778_vm9, %v10630_v43  ;;  %v10696_v29 = vadd.f32 %v16184_v63, %v10632_v21  ;;  %v14940_v57 = vpop.f32.mrb[48].mxu1 }
 0xa4b   :  { %10761 = vst.msk [vmem:[%s21958_s7 + $0x178] sm:$0xff] %vm92_vm1, %v10697_v19  ;;  %v10635_v37 = vadd.f32 %v14940_v57, %v21181_v10  ;;  %v10436_v18 = vpop.f32.mrb[49].mxu1  ;;  %v16199_v19 = vld [vmem:[%s21952_s0 + $0x1f8] sm:$0xff] }
 0xa4c   :  { %10826 = vst.msk [vmem:[%s21958_s7 + $0x178] sm:$0xff] %vm10778_vm9, %v10633_v32  ;;  %v10634_v45 = vadd.f32 %v21181_v10, %v10436_v18 }
 0xa4d   :  { %10760 = vst.msk [vmem:[%s21958_s7 + $0x170] sm:$0xff] %vm92_vm1, %v10696_v29  ;;  %v10699_v9 = vadd.f32 %v16185_v60, %v10635_v37  ;;  %v16200_v29 = vld [vmem:[%s21952_s0 + $0x1f0] sm:$0xff] }
 0xa4e   :  { %10825 = vst.msk [vmem:[%s21958_s7 + $0x170] sm:$0xff] %vm10778_vm9, %v10632_v21  ;;  %v10698_v3 = vadd.f32 %v16186_v14, %v10634_v45  ;;  %v14943_v56 = vpop.f32.mrb[50].mxu1 }
 0xa4f   :  { %10763 = vst.msk [vmem:[%s21958_s7 + $0x188] sm:$0xff] %vm92_vm1, %v10699_v9  ;;  %v10637_v30 = vadd.f32 %v14943_v56, %v21181_v10  ;;  %v10446_v38 = vpop.f32.mrb[51].mxu1 }
 0xa50   :  { %10828 = vst.msk [vmem:[%s21958_s7 + $0x188] sm:$0xff] %vm10778_vm9, %v10635_v37  ;;  %v10636_v54 = vadd.f32 %v21181_v10, %v10446_v38 }
 0xa51   :  { %10762 = vst.msk [vmem:[%s21958_s7 + $0x180] sm:$0xff] %vm92_vm1, %v10698_v3  ;;  %v10701_v25 = vadd.f32 %v16187_v48, %v10637_v30 }
 0xa52   :  { %10827 = vst.msk [vmem:[%s21958_s7 + $0x180] sm:$0xff] %vm10778_vm9, %v10634_v45  ;;  %v10700_v23 = vadd.f32 %v16188_v8, %v10636_v54  ;;  %v14946_v20 = vpop.f32.mrb[52].mxu1 }
 0xa53   :  { %10765 = vst.msk [vmem:[%s21958_s7 + $0x198] sm:$0xff] %vm92_vm1, %v10701_v25  ;;  %v10639_v47 = vadd.f32 %v14946_v20, %v21181_v10  ;;  %v10456_v55 = vpop.f32.mrb[53].mxu1 }
 0xa54   :  { %10830 = vst.msk [vmem:[%s21958_s7 + $0x198] sm:$0xff] %vm10778_vm9, %v10637_v30  ;;  %v10638_v11 = vadd.f32 %v21181_v10, %v10456_v55 }
 0xa55   :  { %10764 = vst.msk [vmem:[%s21958_s7 + $0x190] sm:$0xff] %vm92_vm1, %v10700_v23  ;;  %v10703_v39 = vadd.f32 %v16189_v62, %v10639_v47 }
 0xa56   :  { %10829 = vst.msk [vmem:[%s21958_s7 + $0x190] sm:$0xff] %vm10778_vm9, %v10636_v54  ;;  %v10702_v53 = vadd.f32 %v16190_v16, %v10638_v11  ;;  %v14949_v33 = vpop.f32.mrb[54].mxu1 }
 0xa57   :  { %10767 = vst.msk [vmem:[%s21958_s7 + $0x1a8] sm:$0xff] %vm92_vm1, %v10703_v39  ;;  %v10641_v59 = vadd.f32 %v14949_v33, %v21181_v10  ;;  %v10466_v51 = vpop.f32.mrb[55].mxu1 }
 0xa58   :  { %10832 = vst.msk [vmem:[%s21958_s7 + $0x1a8] sm:$0xff] %vm10778_vm9, %v10639_v47  ;;  %v10640_v15 = vadd.f32 %v21181_v10, %v10466_v51 }
 0xa59   :  { %10766 = vst.msk [vmem:[%s21958_s7 + $0x1a0] sm:$0xff] %vm92_vm1, %v10702_v53  ;;  %v10705_v12 = vadd.f32 %v16191_v52, %v10641_v59 }
 0xa5a   :  { %10831 = vst.msk [vmem:[%s21958_s7 + $0x1a0] sm:$0xff] %vm10778_vm9, %v10638_v11  ;;  %v10704_v28 = vadd.f32 %v16192_v34, %v10640_v15  ;;  %v14952_v31 = vpop.f32.mrb[56].mxu1 }
 0xa5b   :  { %10769 = vst.msk [vmem:[%s21958_s7 + $0x1b8] sm:$0xff] %vm92_vm1, %v10705_v12  ;;  %v10643_v61 = vadd.f32 %v14952_v31, %v21181_v10  ;;  %v10476_v2 = vpop.f32.mrb[57].mxu1 }
 0xa5c   :  { %10834 = vst.msk [vmem:[%s21958_s7 + $0x1b8] sm:$0xff] %vm10778_vm9, %v10641_v59  ;;  %v10642_v49 = vadd.f32 %v21181_v10, %v10476_v2 }
 0xa5d   :  { %10768 = vst.msk [vmem:[%s21958_s7 + $0x1b0] sm:$0xff] %vm92_vm1, %v10704_v28  ;;  %v10707_v36 = vadd.f32 %v16193_v4, %v10643_v61 }
 0xa5e   :  { %10833 = vst.msk [vmem:[%s21958_s7 + $0x1b0] sm:$0xff] %vm10778_vm9, %v10640_v15  ;;  %v10706_v44 = vadd.f32 %v16194_v46, %v10642_v49  ;;  %v14955_v35 = vpop.f32.mrb[58].mxu1 }
 0xa5f   :  { %10771 = vst.msk [vmem:[%s21958_s7 + $0x1c8] sm:$0xff] %vm92_vm1, %v10707_v36  ;;  %v10645_v41 = vadd.f32 %v14955_v35, %v21181_v10  ;;  %v10486_v27 = vpop.f32.mrb[59].mxu1 }
 0xa60   :  { %10836 = vst.msk [vmem:[%s21958_s7 + $0x1c8] sm:$0xff] %vm10778_vm9, %v10643_v61  ;;  %v10644_v42 = vadd.f32 %v21181_v10, %v10486_v27 }
 0xa61   :  { %10770 = vst.msk [vmem:[%s21958_s7 + $0x1c0] sm:$0xff] %vm92_vm1, %v10706_v44  ;;  %v10709_v7 = vadd.f32 %v16195_v0, %v10645_v41 }
 0xa62   :  { %10835 = vst.msk [vmem:[%s21958_s7 + $0x1c0] sm:$0xff] %vm10778_vm9, %v10642_v49  ;;  %v10708_v13 = vadd.f32 %v16196_v6, %v10644_v42  ;;  %v14958_v26 = vpop.f32.mrb[60].mxu1 }
 0xa63   :  { %10773 = vst.msk [vmem:[%s21958_s7 + $0x1d8] sm:$0xff] %vm92_vm1, %v10709_v7  ;;  %v10647_v40 = vadd.f32 %v14958_v26, %v21181_v10  ;;  %v10496_v43 = vpop.f32.mrb[61].mxu1 }
 0xa64   :  { %10838 = vst.msk [vmem:[%s21958_s7 + $0x1d8] sm:$0xff] %vm10778_vm9, %v10645_v41  ;;  %v10646_v17 = vadd.f32 %v21181_v10, %v10496_v43 }
 0xa65   :  { %10772 = vst.msk [vmem:[%s21958_s7 + $0x1d0] sm:$0xff] %vm92_vm1, %v10708_v13  ;;  %v10711_v1 = vadd.f32 %v16197_v50, %v10647_v40 }
 0xa66   :  { %10837 = vst.msk [vmem:[%s21958_s7 + $0x1d0] sm:$0xff] %vm10778_vm9, %v10644_v42  ;;  %v10710_v5 = vadd.f32 %v16198_v24, %v10646_v17  ;;  %v14961_v32 = vpop.f32.mrb[62].mxu1 }
 0xa67   :  { %10775 = vst.msk [vmem:[%s21958_s7 + $0x1e8] sm:$0xff] %vm92_vm1, %v10711_v1  ;;  %v10649_v58 = vadd.f32 %v14961_v32, %v21181_v10  ;;  %v10506_v21 = vpop.f32.mrb[63].mxu1 }
 0xa68   :  { %10840 = vst.msk [vmem:[%s21958_s7 + $0x1e8] sm:$0xff] %vm10778_vm9, %v10647_v40  ;;  %v10648_v22 = vadd.f32 %v21181_v10, %v10506_v21 }
 0xa69   :  { %10774 = vst.msk [vmem:[%s21958_s7 + $0x1e0] sm:$0xff] %vm92_vm1, %v10710_v5  ;;  %v10713_v63 = vadd.f32 %v16199_v19, %v10649_v58 }
 0xa6a   :  { %10839 = vst.msk [vmem:[%s21958_s7 + $0x1e0] sm:$0xff] %vm10778_vm9, %v10646_v17  ;;  %v10712_v57 = vadd.f32 %v16200_v29, %v10648_v22 }
 0xa6b   :  { %10777 = vst.msk [vmem:[%s21958_s7 + $0x1f8] sm:$0xff] %vm92_vm1, %v10713_v63 }
 0xa6c   :  { %10842 = vst.msk [vmem:[%s21958_s7 + $0x1f8] sm:$0xff] %vm10778_vm9, %v10649_v58 }
 0xa6d   :  { %10776 = vst.msk [vmem:[%s21958_s7 + $0x1f0] sm:$0xff] %vm92_vm1, %v10712_v57 }
 0xa6e   :  { %10841 = vst.msk [vmem:[%s21958_s7 + $0x1f0] sm:$0xff] %vm10778_vm9, %v10648_v22 }

</bundles_post_ra>
